<compile_context>
chip_gen: v5e
topology: v5e:2x2
jax: 0.10.0
libtpu: 0.0.40
codegen_flags: <defaults>
</compile_context>

<pallas_src>
import functools

import jax
import jax.numpy as jnp
from jax.experimental import pallas as pl
from jax.experimental.pallas import tpu as pltpu

# Keep double-buffered working sets comfortably under v7x's 64 MiB physical
# VMEM while lifting the default scoped limit on v5e (16 MiB) / v6e (32 MiB).
_VMEM_LIMIT_BYTES = 48 * 1024 * 1024

# 256-wide tiles fill the 2x256x256 MXU on v6e/v7x and are fine multiples of
# v5e's 4x128x128 MXU; they keep bf16 weight tiles small enough for v7x VMEM.
_TILE_TARGET = 256


def _pick_tile(dim, target=_TILE_TARGET):
    """Largest 128-multiple tile <= target that divides `dim`."""
    for t in (512, 384, 256, 128):
        if t <= target and t <= dim and dim % t == 0:
            return t
    return dim  # small / odd dims: use full extent (single block)


# --------------------- Linear (+ fused BatchNorm1d/ReLU) --------------------

def _linear_kernel(x_ref, w_ref, *rest, bn_relu, view_rows, eps):
    """One (M, tn) output tile; K is reduced along the innermost grid axis."""
    if bn_relu:
        g_ref, b_ref, o_ref, acc_ref = rest
    else:
        o_ref, acc_ref = rest

    k = pl.program_id(1)

    @pl.when(k == 0)
    def _():
        acc_ref[...] = jnp.zeros_like(acc_ref)

    acc_ref[...] += jnp.dot(x_ref[...], w_ref[...],
                            preferred_element_type=jnp.float32)

    @pl.when(k == pl.num_programs(1) - 1)
    def _():
        y = acc_ref[...]
        if bn_relu:
            b = view_rows

            def _norm(v):
                mu = jnp.mean(v, axis=0, keepdims=True)
                # biased variance, matching torch BatchNorm1d training mode
                var = jnp.mean((v - mu) ** 2, axis=0, keepdims=True)
                return (v - mu) * jax.lax.rsqrt(var + eps)

            # Per-view batch statistics (views are stacked along the batch
            # axis to share weight streaming, but BN must not mix them).
            y = jnp.concatenate([_norm(y[:b]), _norm(y[b:])], axis=0)
            y = y * g_ref[...] + b_ref[...]
            y = jnp.maximum(y, 0.0)
        o_ref[...] = y.astype(o_ref.dtype)


def pallas_linear(x, w, gamma=None, beta=None, *, bn_relu, view_rows=None,
                  eps=1e-5):
    """y = x @ w  (w stored (in, out)), optionally fused per-view BN + ReLU."""
    m, k = x.shape
    k2, n = w.shape
    assert k == k2
    tk = _pick_tile(k)
    tn = _pick_tile(n)
    grid = (n // tn, k // tk)

    in_specs = [
        pl.BlockSpec((m, tk), lambda j, kk: (0, kk)),
        pl.BlockSpec((tk, tn), lambda j, kk: (kk, j)),
    ]
    args = [x.astype(jnp.bfloat16), w.astype(jnp.bfloat16)]
    if bn_relu:
        in_specs += [
            pl.BlockSpec((1, tn), lambda j, kk: (0, j)),
            pl.BlockSpec((1, tn), lambda j, kk: (0, j)),
        ]
        args += [gamma.reshape(1, n).astype(jnp.float32),
                 beta.reshape(1, n).astype(jnp.float32)]

    return pl.pallas_call(
        functools.partial(_linear_kernel, bn_relu=bn_relu,
                          view_rows=view_rows, eps=eps),
        out_shape=jax.ShapeDtypeStruct((m, n), jnp.float32),
        grid_spec=pltpu.PrefetchScalarGridSpec(
            num_scalar_prefetch=0,
            grid=grid,
            in_specs=in_specs,
            out_specs=pl.BlockSpec((m, tn), lambda j, kk: (0, j)),
            scratch_shapes=[pltpu.VMEM((m, tn), jnp.float32)],
        ),
        compiler_params=pltpu.CompilerParams(
            dimension_semantics=("parallel", "arbitrary"),
            vmem_limit_bytes=_VMEM_LIMIT_BYTES),
    )(*args)


# ------------------ Conv stem (in-kernel im2col) + avg pool -----------------

def _conv_pool_kernel(x_ref, w_ref, o_ref, *, ho, wo, hp2):
    # x_ref: (nb, 4*hp2, wp2, cin)  stride-2 phase split of the padded image
    # w_ref: (9, cin, F)            conv weight per tap
    # o_ref: (nb, F)                pooled features
    nb = x_ref.shape[0]
    cin = x_ref.shape[-1]
    f = w_ref.shape[-1]
    hw = ho * wo
    acc = jnp.zeros((nb * hw, f), jnp.float32)
    for di in range(3):
        for dj in range(3):
            phase = (di % 2) * 2 + (dj % 2)
            r0 = phase * hp2 + di // 2
            c0 = dj // 2
            patch = x_ref[:, r0:r0 + ho, c0:c0 + wo, :].reshape(nb * hw, cin)
            acc = acc + jnp.dot(patch, w_ref[di * 3 + dj],
                                preferred_element_type=jnp.float32)
    acc = jnp.maximum(acc, 0.0)                          # fused ReLU
    pooled = jnp.mean(acc.reshape(nb, hw, f), axis=1)    # fused global avg pool
    o_ref[...] = pooled.astype(o_ref.dtype)


def pallas_conv_stem_pool(phases, w9):
    n, rows, wp2, cin = phases.shape
    hp2 = rows // 4
    ho, wo = hp2 - 1, wp2 - 1
    f = w9.shape[-1]
    nb = 8 if n % 8 == 0 else n     # image block (sublane-aligned output tile)
    return pl.pallas_call(
        functools.partial(_conv_pool_kernel, ho=ho, wo=wo, hp2=hp2),
        out_shape=jax.ShapeDtypeStruct((n, f), jnp.float32),
        grid_spec=pltpu.PrefetchScalarGridSpec(
            num_scalar_prefetch=0,
            grid=(n // nb,),
            in_specs=[pl.BlockSpec((nb, rows, wp2, cin),
                                   lambda g: (g, 0, 0, 0)),
                      pl.BlockSpec((9, cin, f), lambda g: (0, 0, 0))],
            out_specs=pl.BlockSpec((nb, f), lambda g: (g, 0)),
        ),
        compiler_params=pltpu.CompilerParams(
            dimension_semantics=("parallel",),
            vmem_limit_bytes=_VMEM_LIMIT_BYTES),
    )(phases, w9)


# ----------------- Barlow loss (fused affine-free BN, tiled c) ---------------

def _barlow_kernel(z1_ref, z2_ref, o_ref, acc_ref, *, inv_bsz, lambd, td, eps):
    i = pl.program_id(0)
    j = pl.program_id(1)

    @pl.when((i == 0) & (j == 0))
    def _():
        acc_ref[...] = jnp.zeros_like(acc_ref)

    def _norm(v):   # affine-free BatchNorm1d (training-mode batch stats)
        mu = jnp.mean(v, axis=0, keepdims=True)
        var = jnp.mean((v - mu) ** 2, axis=0, keepdims=True)
        return (v - mu) * jax.lax.rsqrt(var + eps)

    a = _norm(z1_ref[...])
    b = _norm(z2_ref[...])
    # c tile = bn(z1)[:, i-cols].T @ bn(z2)[:, j-cols] / batch_size
    c = jax.lax.dot_general(a, b, (((0,), (0,)), ((), ())),
                            preferred_element_type=jnp.float32) * inv_bsz
    rows = jax.lax.broadcasted_iota(jnp.int32, (td, td), 0) + i * td
    cols = jax.lax.broadcasted_iota(jnp.int32, (td, td), 1) + j * td
    eye = rows == cols
    on_diag = jnp.sum(jnp.where(eye, c - 1.0, 0.0) ** 2, keepdims=True)
    off_diag = jnp.sum(jnp.where(eye, 0.0, c) ** 2, keepdims=True)
    acc_ref[...] += on_diag + lambd * off_diag

    @pl.when((i == pl.num_programs(0) - 1) & (j == pl.num_programs(1) - 1))
    def _():
        o_ref[...] = acc_ref[...]


def pallas_barlow_loss(z1, z2, *, batch_size, lambd, eps=1e-5):
    b, d = z1.shape
    td = _pick_tile(d)
    nd = d // td
    out = pl.pallas_call(
        functools.partial(_barlow_kernel, inv_bsz=1.0 / batch_size,
                          lambd=float(lambd), td=td, eps=eps),
        out_shape=jax.ShapeDtypeStruct((1, 1), jnp.float32),
        grid_spec=pltpu.PrefetchScalarGridSpec(
            num_scalar_prefetch=0,
            grid=(nd, nd),
            in_specs=[pl.BlockSpec((b, td), lambda i, j: (0, i)),
                      pl.BlockSpec((b, td), lambda i, j: (0, j))],
            out_specs=pl.BlockSpec((1, 1), lambda i, j: (0, 0)),
            scratch_shapes=[pltpu.VMEM((1, 1), jnp.float32)],
        ),
        compiler_params=pltpu.CompilerParams(
            dimension_semantics=("arbitrary", "arbitrary"),
            vmem_limit_bytes=_VMEM_LIMIT_BYTES),
    )(z1.astype(jnp.float32), z2.astype(jnp.float32))
    return out[0, 0]


# ------------------------------ Model wrapper -------------------------------

class BarlowTwinsPallas:
    def __init__(self, key, *, feat_dim, projector_sizes, batch_size, lambd):
        self.batch_size = batch_size
        self.lambd = lambd
        sizes = [feat_dim] + list(projector_sizes)   # analog of [2048]+projector
        self.sizes = sizes
        n_lin = len(sizes) - 1
        keys = jax.random.split(key, 1 + n_lin)

        # backbone stem conv weight, stored as (9, cin, feat_dim) for the
        # in-kernel im2col accumulation.
        conv_w = jax.random.normal(keys[0], (3, 3, 3, feat_dim),
                                   jnp.float32) * 0.1
        self.conv_w9 = conv_w.reshape(9, 3, feat_dim)

        # projector Linear weights (bias=False), PRE-TRANSPOSED to (in, out)
        # so no .T / transposed HBM copy is needed per forward.
        self.lin_ws = [
            jax.random.normal(keys[1 + i], (sizes[i], sizes[i + 1]),
                              jnp.float32) * (sizes[i] ** -0.5)
            for i in range(n_lin)
        ]
        # BatchNorm1d affine params (default init gamma=1, beta=0)
        self.bn_gammas = [jnp.ones((sizes[i + 1],), jnp.float32)
                          for i in range(n_lin - 1)]
        self.bn_betas = [jnp.zeros((sizes[i + 1],), jnp.float32)
                         for i in range(n_lin - 1)]

    def _backbone(self, y_nchw):
        # NCHW (PyTorch) -> NHWC, pad=1, split into the 4 stride-2 phases of the
        # padded image (pure re-arrangement, 1x data; the 9x im2col expansion
        # lives only in VMEM inside the kernel).
        x = jnp.transpose(y_nchw, (0, 2, 3, 1)).astype(jnp.float32)
        n, h, w, c = x.shape
        assert h % 2 == 0 and w % 2 == 0
        xp = jnp.pad(x, ((0, 0), (1, 1), (1, 1), (0, 0)))
        hp2, wp2 = (h + 2) // 2, (w + 2) // 2
        ph = xp.reshape(n, hp2, 2, wp2, 2, c)
        phases = jnp.transpose(ph, (0, 2, 4, 1, 3, 5))       # (n,2,2,hp2,wp2,c)
        phases = phases.reshape(n, 4 * hp2, wp2, c)
        return pallas_conv_stem_pool(phases, self.conv_w9)    # (n, feat_dim)

    def _projector(self, feats):
        # feats: (2B, feat_dim) -- the two views share weight streaming through
        # the matmuls; BN stats are computed per view inside the kernel.
        h = feats
        for i in range(len(self.lin_ws) - 1):
            h = pallas_linear(h, self.lin_ws[i],
                              self.bn_gammas[i], self.bn_betas[i],
                              bn_relu=True, view_rows=self.batch_size)
        return pallas_linear(h, self.lin_ws[-1], bn_relu=False)

    def forward(self, y1, y2):
        y = jnp.concatenate([y1, y2], axis=0)          # (2B, C, H, W)
        feats = self._backbone(y)                      # (2B, feat_dim)
        z = self._projector(feats)                     # (2B, D)
        b = self.batch_size
        z1, z2 = z[:b], z[b:]
        # final affine-free BatchNorm1d of z1/z2 is fused into the loss kernel
        return pallas_barlow_loss(z1, z2, batch_size=b, lambd=self.lambd)


# ---------------------------------- main ------------------------------------

if __name__ == "__main__":
    key = jax.random.PRNGKey(0)
    k_model, k1, k2 = jax.random.split(key, 3)

    batch, chan, hw = 8, 3, 16
    feat_dim = 256                       # stand-in for resnet50's 2048
    projector = "384-384-384"            # stand-in for "8192-8192-8192"
    lambd = 0.0051                       # args.lambd

    model = BarlowTwinsPallas(
        k_model,
        feat_dim=feat_dim,
        projector_sizes=[int(s) for s in projector.split("-")],
        batch_size=batch,
        lambd=lambd,
    )

    y1 = jax.random.normal(k1, (batch, chan, hw, hw), jnp.float32)
    y2 = jax.random.normal(k2, (batch, chan, hw, hw), jnp.float32)

    loss = jax.jit(model.forward)(y1, y2)
    jax.block_until_ready(loss)
    assert loss.shape == () and bool(jnp.isfinite(loss))
    print("KERNEL_OK")
</pallas_src>

<mosaic_0001>
module attributes {stable_mosaic.version = 11 : i64} {
  func.func @_conv_pool_kernel(%arg0: i32, %arg1: memref<8x36x9x3xf32, #tpu.memory_space<vmem>>, %arg2: memref<9x3x256xf32, #tpu.memory_space<vmem>>, %arg3: memref<8x256xf32, #tpu.memory_space<vmem>>) attributes {dimension_semantics = [#tpu.dimension_semantics<parallel>], iteration_bounds = array<i64: 2>, scalar_prefetch = 0 : i64, scratch_operands = 0 : i64, tpu.core_type = #tpu.core_type<tc>, window_params = [{transform_indices = @transform_0, window_bounds = array<i64: 8, 36, 9, 3>}, {pipeline_mode = #tpu.pipeline_mode<synchronous>, transform_indices = @transform_1, window_bounds = array<i64: 9, 3, 256>}, {transform_indices = @transform_2, window_bounds = array<i64: 8, 256>}]} {
    %cst = arith.constant 0.000000e+00 : f32
    %0 = vector.broadcast %cst : f32 to vector<512x256xf32>
    %c0 = arith.constant 0 : index
    %c0_0 = arith.constant 0 : index
    %c0_1 = arith.constant 0 : index
    %c0_2 = arith.constant 0 : index
    %1 = vector.load %arg1[%c0, %c0_0, %c0_1, %c0_2] : memref<8x36x9x3xf32, #tpu.memory_space<vmem>>, vector<8x8x8x3xf32>
    %2 = vector.shape_cast %1 : vector<8x8x8x3xf32> to vector<512x3xf32>
    %c0_3 = arith.constant 0 : index
    %c0_4 = arith.constant 0 : index
    %c0_5 = arith.constant 0 : index
    %3 = vector.load %arg2[%c0_3, %c0_4, %c0_5] : memref<9x3x256xf32, #tpu.memory_space<vmem>>, vector<1x3x256xf32>
    %4 = vector.shape_cast %3 : vector<1x3x256xf32> to vector<3x256xf32>
    %cst_6 = arith.constant dense<0.000000e+00> : vector<512x256xf32>
    %5 = tpu.matmul %2, %4, %cst_6 {dimension_numbers = #tpu.dot_dimension_numbers<[1], [0], [0], [1], [0, 0, 1, 1], [], []>} : vector<512x3xf32>, vector<3x256xf32>, vector<512x256xf32> -> vector<512x256xf32>
    %6 = arith.addf %0, %5 : vector<512x256xf32>
    %c0_7 = arith.constant 0 : index
    %c9 = arith.constant 9 : index
    %c0_8 = arith.constant 0 : index
    %c0_9 = arith.constant 0 : index
    %7 = vector.load %arg1[%c0_7, %c9, %c0_8, %c0_9] : memref<8x36x9x3xf32, #tpu.memory_space<vmem>>, vector<8x8x8x3xf32>
    %8 = vector.shape_cast %7 : vector<8x8x8x3xf32> to vector<512x3xf32>
    %c1 = arith.constant 1 : index
    %c0_10 = arith.constant 0 : index
    %c0_11 = arith.constant 0 : index
    %9 = vector.load %arg2[%c1, %c0_10, %c0_11] : memref<9x3x256xf32, #tpu.memory_space<vmem>>, vector<1x3x256xf32>
    %10 = vector.shape_cast %9 : vector<1x3x256xf32> to vector<3x256xf32>
    %cst_12 = arith.constant dense<0.000000e+00> : vector<512x256xf32>
    %11 = tpu.matmul %8, %10, %cst_12 {dimension_numbers = #tpu.dot_dimension_numbers<[1], [0], [0], [1], [0, 0, 1, 1], [], []>} : vector<512x3xf32>, vector<3x256xf32>, vector<512x256xf32> -> vector<512x256xf32>
    %12 = arith.addf %6, %11 : vector<512x256xf32>
    %c0_13 = arith.constant 0 : index
    %c0_14 = arith.constant 0 : index
    %c1_15 = arith.constant 1 : index
    %c0_16 = arith.constant 0 : index
    %13 = vector.load %arg1[%c0_13, %c0_14, %c1_15, %c0_16] : memref<8x36x9x3xf32, #tpu.memory_space<vmem>>, vector<8x8x8x3xf32>
    %14 = vector.shape_cast %13 : vector<8x8x8x3xf32> to vector<512x3xf32>
    %c2 = arith.constant 2 : index
    %c0_17 = arith.constant 0 : index
    %c0_18 = arith.constant 0 : index
    %15 = vector.load %arg2[%c2, %c0_17, %c0_18] : memref<9x3x256xf32, #tpu.memory_space<vmem>>, vector<1x3x256xf32>
    %16 = vector.shape_cast %15 : vector<1x3x256xf32> to vector<3x256xf32>
    %cst_19 = arith.constant dense<0.000000e+00> : vector<512x256xf32>
    %17 = tpu.matmul %14, %16, %cst_19 {dimension_numbers = #tpu.dot_dimension_numbers<[1], [0], [0], [1], [0, 0, 1, 1], [], []>} : vector<512x3xf32>, vector<3x256xf32>, vector<512x256xf32> -> vector<512x256xf32>
    %18 = arith.addf %12, %17 : vector<512x256xf32>
    %c0_20 = arith.constant 0 : index
    %c18 = arith.constant 18 : index
    %c0_21 = arith.constant 0 : index
    %c0_22 = arith.constant 0 : index
    %19 = vector.load %arg1[%c0_20, %c18, %c0_21, %c0_22] : memref<8x36x9x3xf32, #tpu.memory_space<vmem>>, vector<8x8x8x3xf32>
    %20 = vector.shape_cast %19 : vector<8x8x8x3xf32> to vector<512x3xf32>
    %c3 = arith.constant 3 : index
    %c0_23 = arith.constant 0 : index
    %c0_24 = arith.constant 0 : index
    %21 = vector.load %arg2[%c3, %c0_23, %c0_24] : memref<9x3x256xf32, #tpu.memory_space<vmem>>, vector<1x3x256xf32>
    %22 = vector.shape_cast %21 : vector<1x3x256xf32> to vector<3x256xf32>
    %cst_25 = arith.constant dense<0.000000e+00> : vector<512x256xf32>
    %23 = tpu.matmul %20, %22, %cst_25 {dimension_numbers = #tpu.dot_dimension_numbers<[1], [0], [0], [1], [0, 0, 1, 1], [], []>} : vector<512x3xf32>, vector<3x256xf32>, vector<512x256xf32> -> vector<512x256xf32>
    %24 = arith.addf %18, %23 : vector<512x256xf32>
    %c0_26 = arith.constant 0 : index
    %c27 = arith.constant 27 : index
    %c0_27 = arith.constant 0 : index
    %c0_28 = arith.constant 0 : index
    %25 = vector.load %arg1[%c0_26, %c27, %c0_27, %c0_28] : memref<8x36x9x3xf32, #tpu.memory_space<vmem>>, vector<8x8x8x3xf32>
    %26 = vector.shape_cast %25 : vector<8x8x8x3xf32> to vector<512x3xf32>
    %c4 = arith.constant 4 : index
    %c0_29 = arith.constant 0 : index
    %c0_30 = arith.constant 0 : index
    %27 = vector.load %arg2[%c4, %c0_29, %c0_30] : memref<9x3x256xf32, #tpu.memory_space<vmem>>, vector<1x3x256xf32>
    %28 = vector.shape_cast %27 : vector<1x3x256xf32> to vector<3x256xf32>
    %cst_31 = arith.constant dense<0.000000e+00> : vector<512x256xf32>
    %29 = tpu.matmul %26, %28, %cst_31 {dimension_numbers = #tpu.dot_dimension_numbers<[1], [0], [0], [1], [0, 0, 1, 1], [], []>} : vector<512x3xf32>, vector<3x256xf32>, vector<512x256xf32> -> vector<512x256xf32>
    %30 = arith.addf %24, %29 : vector<512x256xf32>
    %c0_32 = arith.constant 0 : index
    %c18_33 = arith.constant 18 : index
    %c1_34 = arith.constant 1 : index
    %c0_35 = arith.constant 0 : index
    %31 = vector.load %arg1[%c0_32, %c18_33, %c1_34, %c0_35] : memref<8x36x9x3xf32, #tpu.memory_space<vmem>>, vector<8x8x8x3xf32>
    %32 = vector.shape_cast %31 : vector<8x8x8x3xf32> to vector<512x3xf32>
    %c5 = arith.constant 5 : index
    %c0_36 = arith.constant 0 : index
    %c0_37 = arith.constant 0 : index
    %33 = vector.load %arg2[%c5, %c0_36, %c0_37] : memref<9x3x256xf32, #tpu.memory_space<vmem>>, vector<1x3x256xf32>
    %34 = vector.shape_cast %33 : vector<1x3x256xf32> to vector<3x256xf32>
    %cst_38 = arith.constant dense<0.000000e+00> : vector<512x256xf32>
    %35 = tpu.matmul %32, %34, %cst_38 {dimension_numbers = #tpu.dot_dimension_numbers<[1], [0], [0], [1], [0, 0, 1, 1], [], []>} : vector<512x3xf32>, vector<3x256xf32>, vector<512x256xf32> -> vector<512x256xf32>
    %36 = arith.addf %30, %35 : vector<512x256xf32>
    %c0_39 = arith.constant 0 : index
    %c1_40 = arith.constant 1 : index
    %c0_41 = arith.constant 0 : index
    %c0_42 = arith.constant 0 : index
    %37 = vector.load %arg1[%c0_39, %c1_40, %c0_41, %c0_42] : memref<8x36x9x3xf32, #tpu.memory_space<vmem>>, vector<8x8x8x3xf32>
    %38 = vector.shape_cast %37 : vector<8x8x8x3xf32> to vector<512x3xf32>
    %c6 = arith.constant 6 : index
    %c0_43 = arith.constant 0 : index
    %c0_44 = arith.constant 0 : index
    %39 = vector.load %arg2[%c6, %c0_43, %c0_44] : memref<9x3x256xf32, #tpu.memory_space<vmem>>, vector<1x3x256xf32>
    %40 = vector.shape_cast %39 : vector<1x3x256xf32> to vector<3x256xf32>
    %cst_45 = arith.constant dense<0.000000e+00> : vector<512x256xf32>
    %41 = tpu.matmul %38, %40, %cst_45 {dimension_numbers = #tpu.dot_dimension_numbers<[1], [0], [0], [1], [0, 0, 1, 1], [], []>} : vector<512x3xf32>, vector<3x256xf32>, vector<512x256xf32> -> vector<512x256xf32>
    %42 = arith.addf %36, %41 : vector<512x256xf32>
    %c0_46 = arith.constant 0 : index
    %c10 = arith.constant 10 : index
    %c0_47 = arith.constant 0 : index
    %c0_48 = arith.constant 0 : index
    %43 = vector.load %arg1[%c0_46, %c10, %c0_47, %c0_48] : memref<8x36x9x3xf32, #tpu.memory_space<vmem>>, vector<8x8x8x3xf32>
    %44 = vector.shape_cast %43 : vector<8x8x8x3xf32> to vector<512x3xf32>
    %c7 = arith.constant 7 : index
    %c0_49 = arith.constant 0 : index
    %c0_50 = arith.constant 0 : index
    %45 = vector.load %arg2[%c7, %c0_49, %c0_50] : memref<9x3x256xf32, #tpu.memory_space<vmem>>, vector<1x3x256xf32>
    %46 = vector.shape_cast %45 : vector<1x3x256xf32> to vector<3x256xf32>
    %cst_51 = arith.constant dense<0.000000e+00> : vector<512x256xf32>
    %47 = tpu.matmul %44, %46, %cst_51 {dimension_numbers = #tpu.dot_dimension_numbers<[1], [0], [0], [1], [0, 0, 1, 1], [], []>} : vector<512x3xf32>, vector<3x256xf32>, vector<512x256xf32> -> vector<512x256xf32>
    %48 = arith.addf %42, %47 : vector<512x256xf32>
    %c0_52 = arith.constant 0 : index
    %c1_53 = arith.constant 1 : index
    %c1_54 = arith.constant 1 : index
    %c0_55 = arith.constant 0 : index
    %49 = vector.load %arg1[%c0_52, %c1_53, %c1_54, %c0_55] : memref<8x36x9x3xf32, #tpu.memory_space<vmem>>, vector<8x8x8x3xf32>
    %50 = vector.shape_cast %49 : vector<8x8x8x3xf32> to vector<512x3xf32>
    %c8 = arith.constant 8 : index
    %c0_56 = arith.constant 0 : index
    %c0_57 = arith.constant 0 : index
    %51 = vector.load %arg2[%c8, %c0_56, %c0_57] : memref<9x3x256xf32, #tpu.memory_space<vmem>>, vector<1x3x256xf32>
    %52 = vector.shape_cast %51 : vector<1x3x256xf32> to vector<3x256xf32>
    %cst_58 = arith.constant dense<0.000000e+00> : vector<512x256xf32>
    %53 = tpu.matmul %50, %52, %cst_58 {dimension_numbers = #tpu.dot_dimension_numbers<[1], [0], [0], [1], [0, 0, 1, 1], [], []>} : vector<512x3xf32>, vector<3x256xf32>, vector<512x256xf32> -> vector<512x256xf32>
    %54 = arith.addf %48, %53 : vector<512x256xf32>
    %cst_59 = arith.constant 0.000000e+00 : f32
    %55 = vector.broadcast %cst_59 : f32 to vector<512x256xf32>
    %56 = arith.maximumf %54, %55 : vector<512x256xf32>
    %57 = vector.shape_cast %56 : vector<512x256xf32> to vector<8x64x256xf32>
    %cst_60 = arith.constant dense<0.000000e+00> : vector<8x256xf32>
    %58 = vector.multi_reduction <add>, %57, %cst_60 [1] : vector<8x64x256xf32> to vector<8x256xf32>
    %cst_61 = arith.constant 6.400000e+01 : f32
    %59 = vector.broadcast %cst_61 : f32 to vector<8x256xf32>
    %60 = arith.divf %58, %59 : vector<8x256xf32>
    %c0_62 = arith.constant 0 : index
    %c0_63 = arith.constant 0 : index
    %61 = vector.load %arg3[%c0_62, %c0_63] : memref<8x256xf32, #tpu.memory_space<vmem>>, vector<8x256xf32>
    tpu.vector_store %arg3[%c0_62, %c0_63], %60 {strides = array<i32>} : memref<8x256xf32, #tpu.memory_space<vmem>>, vector<8x256xf32>,
    return
  }
  func.func @transform_0(%arg0: i32) -> (i32, i32, i32, i32) {
    %c0_i32 = arith.constant 0 : i32
    %c0_i32_0 = arith.constant 0 : i32
    %c0_i32_1 = arith.constant 0 : i32
    %c0_i32_2 = arith.constant 0 : i32
    return %arg0, %c0_i32, %c0_i32_0, %c0_i32_1 : i32, i32, i32, i32
  }
  func.func @transform_1(%arg0: i32) -> (i32, i32, i32) {
    %c0_i32 = arith.constant 0 : i32
    %c0_i32_0 = arith.constant 0 : i32
    %c0_i32_1 = arith.constant 0 : i32
    %c0_i32_2 = arith.constant 0 : i32
    return %c0_i32, %c0_i32_0, %c0_i32_1 : i32, i32, i32
  }
  func.func @transform_2(%arg0: i32) -> (i32, i32) {
    %c0_i32 = arith.constant 0 : i32
    %c0_i32_0 = arith.constant 0 : i32
    return %arg0, %c0_i32 : i32, i32
  }
}

module attributes {stable_mosaic.version = 11 : i64} {
  func.func @_linear_kernel(%arg0: i32, %arg1: i32, %arg2: memref<16x256xbf16, #tpu.memory_space<vmem>>, %arg3: memref<256x128xbf16, #tpu.memory_space<vmem>>, %arg4: memref<1x128xf32, #tpu.memory_space<vmem>>, %arg5: memref<1x128xf32, #tpu.memory_space<vmem>>, %arg6: memref<16x128xf32, #tpu.memory_space<vmem>>, %arg7: memref<16x128xf32, #tpu.memory_space<vmem>>) attributes {dimension_semantics = [#tpu.dimension_semantics<parallel>, #tpu.dimension_semantics<arbitrary>], iteration_bounds = array<i64: 3, 1>, scalar_prefetch = 0 : i64, scratch_operands = 1 : i64, tpu.core_type = #tpu.core_type<tc>, window_params = [{transform_indices = @transform_0, window_bounds = array<i64: 16, 256>}, {transform_indices = @transform_1, window_bounds = array<i64: 256, 128>}, {transform_indices = @transform_2, window_bounds = array<i64: 1, 128>}, {transform_indices = @transform_3, window_bounds = array<i64: 1, 128>}, {transform_indices = @transform_4, window_bounds = array<i64: 16, 128>}]} {
    %c0_i32 = arith.constant 0 : i32
    %0 = arith.cmpi eq, %arg1, %c0_i32 : i32
    %1 = arith.extui %0 : i1 to i32
    %c0_i32_0 = arith.constant 0 : i32
    %2 = arith.cmpi ne, %1, %c0_i32_0 : i32
    scf.if %2 {
      %cst_10 = arith.constant 0.000000e+00 : f32
      %12 = vector.broadcast %cst_10 : f32 to vector<16x128xf32>
      %c0_11 = arith.constant 0 : index
      %c0_12 = arith.constant 0 : index
      %13 = vector.load %arg7[%c0_11, %c0_12] : memref<16x128xf32, #tpu.memory_space<vmem>>, vector<16x128xf32>
      tpu.vector_store %arg7[%c0_11, %c0_12], %12 {strides = array<i32>} : memref<16x128xf32, #tpu.memory_space<vmem>>, vector<16x128xf32>,
    } else {
    }
    %c0 = arith.constant 0 : index
    %c0_1 = arith.constant 0 : index
    %3 = vector.load %arg7[%c0, %c0_1] : memref<16x128xf32, #tpu.memory_space<vmem>>, vector<16x128xf32>
    %c0_2 = arith.constant 0 : index
    %c0_3 = arith.constant 0 : index
    %4 = vector.load %arg2[%c0_2, %c0_3] : memref<16x256xbf16, #tpu.memory_space<vmem>>, vector<16x256xbf16>
    %c0_4 = arith.constant 0 : index
    %c0_5 = arith.constant 0 : index
    %5 = vector.load %arg3[%c0_4, %c0_5] : memref<256x128xbf16, #tpu.memory_space<vmem>>, vector<256x128xbf16>
    %cst = arith.constant dense<0.000000e+00> : vector<16x128xf32>
    %6 = tpu.matmul %4, %5, %cst {dimension_numbers = #tpu.dot_dimension_numbers<[1], [0], [0], [1], [0, 0, 1, 1], [], []>} : vector<16x256xbf16>, vector<256x128xbf16>, vector<16x128xf32> -> vector<16x128xf32>
    %7 = arith.addf %3, %6 : vector<16x128xf32>
    %c0_6 = arith.constant 0 : index
    %c0_7 = arith.constant 0 : index
    %8 = vector.load %arg7[%c0_6, %c0_7] : memref<16x128xf32, #tpu.memory_space<vmem>>, vector<16x128xf32>
    tpu.vector_store %arg7[%c0_6, %c0_7], %7 {strides = array<i32>} : memref<16x128xf32, #tpu.memory_space<vmem>>, vector<16x128xf32>,
    %c0_i32_8 = arith.constant 0 : i32
    %9 = arith.cmpi eq, %arg1, %c0_i32_8 : i32
    %10 = arith.extui %9 : i1 to i32
    %c0_i32_9 = arith.constant 0 : i32
    %11 = arith.cmpi ne, %10, %c0_i32_9 : i32
    scf.if %11 {
      %c0_10 = arith.constant 0 : index
      %c0_11 = arith.constant 0 : index
      %12 = vector.load %arg7[%c0_10, %c0_11] : memref<16x128xf32, #tpu.memory_space<vmem>>, vector<16x128xf32>
      %13 = vector.extract_strided_slice %12 {offsets = [0, 0], sizes = [8, 128], strides = [1, 1]} : vector<16x128xf32> to vector<8x128xf32>
      %cst_12 = arith.constant dense<0.000000e+00> : vector<128xf32>
      %14 = vector.multi_reduction <add>, %13, %cst_12 [0] : vector<8x128xf32> to vector<128xf32>
      %15 = vector.shape_cast %14 : vector<128xf32> to vector<1x128xf32>
      %cst_13 = arith.constant 8.000000e+00 : f32
      %16 = vector.broadcast %cst_13 : f32 to vector<1x128xf32>
      %17 = arith.divf %15, %16 : vector<1x128xf32>
      %18 = vector.broadcast %17 : vector<1x128xf32> to vector<8x128xf32>
      %19 = arith.subf %13, %18 : vector<8x128xf32>
      %20 = arith.mulf %19, %19 : vector<8x128xf32>
      %cst_14 = arith.constant dense<0.000000e+00> : vector<128xf32>
      %21 = vector.multi_reduction <add>, %20, %cst_14 [0] : vector<8x128xf32> to vector<128xf32>
      %22 = vector.shape_cast %21 : vector<128xf32> to vector<1x128xf32>
      %cst_15 = arith.constant 8.000000e+00 : f32
      %23 = vector.broadcast %cst_15 : f32 to vector<1x128xf32>
      %24 = arith.divf %22, %23 : vector<1x128xf32>
      %25 = vector.broadcast %17 : vector<1x128xf32> to vector<8x128xf32>
      %26 = arith.subf %13, %25 : vector<8x128xf32>
      %cst_16 = arith.constant 9.99999974E-6 : f32
      %27 = vector.broadcast %cst_16 : f32 to vector<1x128xf32>
      %28 = arith.addf %24, %27 : vector<1x128xf32>
      %29 = math.rsqrt %28 : vector<1x128xf32>
      %30 = vector.broadcast %29 : vector<1x128xf32> to vector<8x128xf32>
      %31 = arith.mulf %26, %30 : vector<8x128xf32>
      %32 = vector.extract_strided_slice %12 {offsets = [8, 0], sizes = [8, 128], strides = [1, 1]} : vector<16x128xf32> to vector<8x128xf32>
      %cst_17 = arith.constant dense<0.000000e+00> : vector<128xf32>
      %33 = vector.multi_reduction <add>, %32, %cst_17 [0] : vector<8x128xf32> to vector<128xf32>
      %34 = vector.shape_cast %33 : vector<128xf32> to vector<1x128xf32>
      %cst_18 = arith.constant 8.000000e+00 : f32
      %35 = vector.broadcast %cst_18 : f32 to vector<1x128xf32>
      %36 = arith.divf %34, %35 : vector<1x128xf32>
      %37 = vector.broadcast %36 : vector<1x128xf32> to vector<8x128xf32>
      %38 = arith.subf %32, %37 : vector<8x128xf32>
      %39 = arith.mulf %38, %38 : vector<8x128xf32>
      %cst_19 = arith.constant dense<0.000000e+00> : vector<128xf32>
      %40 = vector.multi_reduction <add>, %39, %cst_19 [0] : vector<8x128xf32> to vector<128xf32>
      %41 = vector.shape_cast %40 : vector<128xf32> to vector<1x128xf32>
      %cst_20 = arith.constant 8.000000e+00 : f32
      %42 = vector.broadcast %cst_20 : f32 to vector<1x128xf32>
      %43 = arith.divf %41, %42 : vector<1x128xf32>
      %44 = vector.broadcast %36 : vector<1x128xf32> to vector<8x128xf32>
      %45 = arith.subf %32, %44 : vector<8x128xf32>
      %cst_21 = arith.constant 9.99999974E-6 : f32
      %46 = vector.broadcast %cst_21 : f32 to vector<1x128xf32>
      %47 = arith.addf %43, %46 : vector<1x128xf32>
      %48 = math.rsqrt %47 : vector<1x128xf32>
      %49 = vector.broadcast %48 : vector<1x128xf32> to vector<8x128xf32>
      %50 = arith.mulf %45, %49 : vector<8x128xf32>
      %51 = tpu.concatenate %31, %50 in 0 : vector<8x128xf32>, vector<8x128xf32> -> vector<16x128xf32>
      %c0_22 = arith.constant 0 : index
      %c0_23 = arith.constant 0 : index
      %52 = vector.load %arg4[%c0_22, %c0_23] : memref<1x128xf32, #tpu.memory_space<vmem>>, vector<1x128xf32>
      %53 = vector.broadcast %52 : vector<1x128xf32> to vector<16x128xf32>
      %54 = arith.mulf %51, %53 : vector<16x128xf32>
      %c0_24 = arith.constant 0 : index
      %c0_25 = arith.constant 0 : index
      %55 = vector.load %arg5[%c0_24, %c0_25] : memref<1x128xf32, #tpu.memory_space<vmem>>, vector<1x128xf32>
      %56 = vector.broadcast %55 : vector<1x128xf32> to vector<16x128xf32>
      %57 = arith.addf %54, %56 : vector<16x128xf32>
      %cst_26 = arith.constant 0.000000e+00 : f32
      %58 = vector.broadcast %cst_26 : f32 to vector<16x128xf32>
      %59 = arith.maximumf %57, %58 : vector<16x128xf32>
      %c0_27 = arith.constant 0 : index
      %c0_28 = arith.constant 0 : index
      %60 = vector.load %arg6[%c0_27, %c0_28] : memref<16x128xf32, #tpu.memory_space<vmem>>, vector<16x128xf32>
      tpu.vector_store %arg6[%c0_27, %c0_28], %59 {strides = array<i32>} : memref<16x128xf32, #tpu.memory_space<vmem>>, vector<16x128xf32>,
    } else {
    }
    return
  }
  func.func @transform_0(%arg0: i32, %arg1: i32) -> (i32, i32) {
    %c0_i32 = arith.constant 0 : i32
    %c0_i32_0 = arith.constant 0 : i32
    return %c0_i32, %arg1 : i32, i32
  }
  func.func @transform_1(%arg0: i32, %arg1: i32) -> (i32, i32) {
    %c0_i32 = arith.constant 0 : i32
    return %arg1, %arg0 : i32, i32
  }
  func.func @transform_2(%arg0: i32, %arg1: i32) -> (i32, i32) {
    %c0_i32 = arith.constant 0 : i32
    %c0_i32_0 = arith.constant 0 : i32
    return %c0_i32, %arg0 : i32, i32
  }
  func.func @transform_3(%arg0: i32, %arg1: i32) -> (i32, i32) {
    %c0_i32 = arith.constant 0 : i32
    %c0_i32_0 = arith.constant 0 : i32
    return %c0_i32, %arg0 : i32, i32
  }
  func.func @transform_4(%arg0: i32, %arg1: i32) -> (i32, i32) {
    %c0_i32 = arith.constant 0 : i32
    %c0_i32_0 = arith.constant 0 : i32
    return %c0_i32, %arg0 : i32, i32
  }
}

module attributes {stable_mosaic.version = 11 : i64} {
  func.func @_linear_kernel(%arg0: i32, %arg1: i32, %arg2: memref<16x128xbf16, #tpu.memory_space<vmem>>, %arg3: memref<128x128xbf16, #tpu.memory_space<vmem>>, %arg4: memref<1x128xf32, #tpu.memory_space<vmem>>, %arg5: memref<1x128xf32, #tpu.memory_space<vmem>>, %arg6: memref<16x128xf32, #tpu.memory_space<vmem>>, %arg7: memref<16x128xf32, #tpu.memory_space<vmem>>) attributes {dimension_semantics = [#tpu.dimension_semantics<parallel>, #tpu.dimension_semantics<arbitrary>], iteration_bounds = array<i64: 3, 3>, scalar_prefetch = 0 : i64, scratch_operands = 1 : i64, tpu.core_type = #tpu.core_type<tc>, window_params = [{transform_indices = @transform_0, window_bounds = array<i64: 16, 128>}, {transform_indices = @transform_1, window_bounds = array<i64: 128, 128>}, {transform_indices = @transform_2, window_bounds = array<i64: 1, 128>}, {transform_indices = @transform_3, window_bounds = array<i64: 1, 128>}, {transform_indices = @transform_4, window_bounds = array<i64: 16, 128>}]} {
    %c0_i32 = arith.constant 0 : i32
    %0 = arith.cmpi eq, %arg1, %c0_i32 : i32
    %1 = arith.extui %0 : i1 to i32
    %c0_i32_0 = arith.constant 0 : i32
    %2 = arith.cmpi ne, %1, %c0_i32_0 : i32
    scf.if %2 {
      %cst_9 = arith.constant 0.000000e+00 : f32
      %12 = vector.broadcast %cst_9 : f32 to vector<16x128xf32>
      %c0_10 = arith.constant 0 : index
      %c0_11 = arith.constant 0 : index
      %13 = vector.load %arg7[%c0_10, %c0_11] : memref<16x128xf32, #tpu.memory_space<vmem>>, vector<16x128xf32>
      tpu.vector_store %arg7[%c0_10, %c0_11], %12 {strides = array<i32>} : memref<16x128xf32, #tpu.memory_space<vmem>>, vector<16x128xf32>,
    } else {
    }
    %c0 = arith.constant 0 : index
    %c0_1 = arith.constant 0 : index
    %3 = vector.load %arg7[%c0, %c0_1] : memref<16x128xf32, #tpu.memory_space<vmem>>, vector<16x128xf32>
    %c0_2 = arith.constant 0 : index
    %c0_3 = arith.constant 0 : index
    %4 = vector.load %arg2[%c0_2, %c0_3] : memref<16x128xbf16, #tpu.memory_space<vmem>>, vector<16x128xbf16>
    %c0_4 = arith.constant 0 : index
    %c0_5 = arith.constant 0 : index
    %5 = vector.load %arg3[%c0_4, %c0_5] : memref<128x128xbf16, #tpu.memory_space<vmem>>, vector<128x128xbf16>
    %cst = arith.constant dense<0.000000e+00> : vector<16x128xf32>
    %6 = tpu.matmul %4, %5, %cst {dimension_numbers = #tpu.dot_dimension_numbers<[1], [0], [0], [1], [0, 0, 1, 1], [], []>} : vector<16x128xbf16>, vector<128x128xbf16>, vector<16x128xf32> -> vector<16x128xf32>
    %7 = arith.addf %3, %6 : vector<16x128xf32>
    %c0_6 = arith.constant 0 : index
    %c0_7 = arith.constant 0 : index
    %8 = vector.load %arg7[%c0_6, %c0_7] : memref<16x128xf32, #tpu.memory_space<vmem>>, vector<16x128xf32>
    tpu.vector_store %arg7[%c0_6, %c0_7], %7 {strides = array<i32>} : memref<16x128xf32, #tpu.memory_space<vmem>>, vector<16x128xf32>,
    %c2_i32 = arith.constant 2 : i32
    %9 = arith.cmpi eq, %arg1, %c2_i32 : i32
    %10 = arith.extui %9 : i1 to i32
    %c0_i32_8 = arith.constant 0 : i32
    %11 = arith.cmpi ne, %10, %c0_i32_8 : i32
    scf.if %11 {
      %c0_9 = arith.constant 0 : index
      %c0_10 = arith.constant 0 : index
      %12 = vector.load %arg7[%c0_9, %c0_10] : memref<16x128xf32, #tpu.memory_space<vmem>>, vector<16x128xf32>
      %13 = vector.extract_strided_slice %12 {offsets = [0, 0], sizes = [8, 128], strides = [1, 1]} : vector<16x128xf32> to vector<8x128xf32>
      %cst_11 = arith.constant dense<0.000000e+00> : vector<128xf32>
      %14 = vector.multi_reduction <add>, %13, %cst_11 [0] : vector<8x128xf32> to vector<128xf32>
      %15 = vector.shape_cast %14 : vector<128xf32> to vector<1x128xf32>
      %cst_12 = arith.constant 8.000000e+00 : f32
      %16 = vector.broadcast %cst_12 : f32 to vector<1x128xf32>
      %17 = arith.divf %15, %16 : vector<1x128xf32>
      %18 = vector.broadcast %17 : vector<1x128xf32> to vector<8x128xf32>
      %19 = arith.subf %13, %18 : vector<8x128xf32>
      %20 = arith.mulf %19, %19 : vector<8x128xf32>
      %cst_13 = arith.constant dense<0.000000e+00> : vector<128xf32>
      %21 = vector.multi_reduction <add>, %20, %cst_13 [0] : vector<8x128xf32> to vector<128xf32>
      %22 = vector.shape_cast %21 : vector<128xf32> to vector<1x128xf32>
      %cst_14 = arith.constant 8.000000e+00 : f32
      %23 = vector.broadcast %cst_14 : f32 to vector<1x128xf32>
      %24 = arith.divf %22, %23 : vector<1x128xf32>
      %25 = vector.broadcast %17 : vector<1x128xf32> to vector<8x128xf32>
      %26 = arith.subf %13, %25 : vector<8x128xf32>
      %cst_15 = arith.constant 9.99999974E-6 : f32
      %27 = vector.broadcast %cst_15 : f32 to vector<1x128xf32>
      %28 = arith.addf %24, %27 : vector<1x128xf32>
      %29 = math.rsqrt %28 : vector<1x128xf32>
      %30 = vector.broadcast %29 : vector<1x128xf32> to vector<8x128xf32>
      %31 = arith.mulf %26, %30 : vector<8x128xf32>
      %32 = vector.extract_strided_slice %12 {offsets = [8, 0], sizes = [8, 128], strides = [1, 1]} : vector<16x128xf32> to vector<8x128xf32>
      %cst_16 = arith.constant dense<0.000000e+00> : vector<128xf32>
      %33 = vector.multi_reduction <add>, %32, %cst_16 [0] : vector<8x128xf32> to vector<128xf32>
      %34 = vector.shape_cast %33 : vector<128xf32> to vector<1x128xf32>
      %cst_17 = arith.constant 8.000000e+00 : f32
      %35 = vector.broadcast %cst_17 : f32 to vector<1x128xf32>
      %36 = arith.divf %34, %35 : vector<1x128xf32>
      %37 = vector.broadcast %36 : vector<1x128xf32> to vector<8x128xf32>
      %38 = arith.subf %32, %37 : vector<8x128xf32>
      %39 = arith.mulf %38, %38 : vector<8x128xf32>
      %cst_18 = arith.constant dense<0.000000e+00> : vector<128xf32>
      %40 = vector.multi_reduction <add>, %39, %cst_18 [0] : vector<8x128xf32> to vector<128xf32>
      %41 = vector.shape_cast %40 : vector<128xf32> to vector<1x128xf32>
      %cst_19 = arith.constant 8.000000e+00 : f32
      %42 = vector.broadcast %cst_19 : f32 to vector<1x128xf32>
      %43 = arith.divf %41, %42 : vector<1x128xf32>
      %44 = vector.broadcast %36 : vector<1x128xf32> to vector<8x128xf32>
      %45 = arith.subf %32, %44 : vector<8x128xf32>
      %cst_20 = arith.constant 9.99999974E-6 : f32
      %46 = vector.broadcast %cst_20 : f32 to vector<1x128xf32>
      %47 = arith.addf %43, %46 : vector<1x128xf32>
      %48 = math.rsqrt %47 : vector<1x128xf32>
      %49 = vector.broadcast %48 : vector<1x128xf32> to vector<8x128xf32>
      %50 = arith.mulf %45, %49 : vector<8x128xf32>
      %51 = tpu.concatenate %31, %50 in 0 : vector<8x128xf32>, vector<8x128xf32> -> vector<16x128xf32>
      %c0_21 = arith.constant 0 : index
      %c0_22 = arith.constant 0 : index
      %52 = vector.load %arg4[%c0_21, %c0_22] : memref<1x128xf32, #tpu.memory_space<vmem>>, vector<1x128xf32>
      %53 = vector.broadcast %52 : vector<1x128xf32> to vector<16x128xf32>
      %54 = arith.mulf %51, %53 : vector<16x128xf32>
      %c0_23 = arith.constant 0 : index
      %c0_24 = arith.constant 0 : index
      %55 = vector.load %arg5[%c0_23, %c0_24] : memref<1x128xf32, #tpu.memory_space<vmem>>, vector<1x128xf32>
      %56 = vector.broadcast %55 : vector<1x128xf32> to vector<16x128xf32>
      %57 = arith.addf %54, %56 : vector<16x128xf32>
      %cst_25 = arith.constant 0.000000e+00 : f32
      %58 = vector.broadcast %cst_25 : f32 to vector<16x128xf32>
      %59 = arith.maximumf %57, %58 : vector<16x128xf32>
      %c0_26 = arith.constant 0 : index
      %c0_27 = arith.constant 0 : index
      %60 = vector.load %arg6[%c0_26, %c0_27] : memref<16x128xf32, #tpu.memory_space<vmem>>, vector<16x128xf32>
      tpu.vector_store %arg6[%c0_26, %c0_27], %59 {strides = array<i32>} : memref<16x128xf32, #tpu.memory_space<vmem>>, vector<16x128xf32>,
    } else {
    }
    return
  }
  func.func @transform_0(%arg0: i32, %arg1: i32) -> (i32, i32) {
    %c0_i32 = arith.constant 0 : i32
    %c0_i32_0 = arith.constant 0 : i32
    return %c0_i32, %arg1 : i32, i32
  }
  func.func @transform_1(%arg0: i32, %arg1: i32) -> (i32, i32) {
    %c0_i32 = arith.constant 0 : i32
    return %arg1, %arg0 : i32, i32
  }
  func.func @transform_2(%arg0: i32, %arg1: i32) -> (i32, i32) {
    %c0_i32 = arith.constant 0 : i32
    %c0_i32_0 = arith.constant 0 : i32
    return %c0_i32, %arg0 : i32, i32
  }
  func.func @transform_3(%arg0: i32, %arg1: i32) -> (i32, i32) {
    %c0_i32 = arith.constant 0 : i32
    %c0_i32_0 = arith.constant 0 : i32
    return %c0_i32, %arg0 : i32, i32
  }
  func.func @transform_4(%arg0: i32, %arg1: i32) -> (i32, i32) {
    %c0_i32 = arith.constant 0 : i32
    %c0_i32_0 = arith.constant 0 : i32
    return %c0_i32, %arg0 : i32, i32
  }
}

module attributes {stable_mosaic.version = 11 : i64} {
  func.func @_linear_kernel(%arg0: i32, %arg1: i32, %arg2: memref<16x128xbf16, #tpu.memory_space<vmem>>, %arg3: memref<128x128xbf16, #tpu.memory_space<vmem>>, %arg4: memref<16x128xf32, #tpu.memory_space<vmem>>, %arg5: memref<16x128xf32, #tpu.memory_space<vmem>>) attributes {dimension_semantics = [#tpu.dimension_semantics<parallel>, #tpu.dimension_semantics<arbitrary>], iteration_bounds = array<i64: 3, 3>, scalar_prefetch = 0 : i64, scratch_operands = 1 : i64, tpu.core_type = #tpu.core_type<tc>, window_params = [{transform_indices = @transform_0, window_bounds = array<i64: 16, 128>}, {transform_indices = @transform_1, window_bounds = array<i64: 128, 128>}, {transform_indices = @transform_2, window_bounds = array<i64: 16, 128>}]} {
    %c0_i32 = arith.constant 0 : i32
    %0 = arith.cmpi eq, %arg1, %c0_i32 : i32
    %1 = arith.extui %0 : i1 to i32
    %c0_i32_0 = arith.constant 0 : i32
    %2 = arith.cmpi ne, %1, %c0_i32_0 : i32
    scf.if %2 {
      %cst_9 = arith.constant 0.000000e+00 : f32
      %12 = vector.broadcast %cst_9 : f32 to vector<16x128xf32>
      %c0_10 = arith.constant 0 : index
      %c0_11 = arith.constant 0 : index
      %13 = vector.load %arg5[%c0_10, %c0_11] : memref<16x128xf32, #tpu.memory_space<vmem>>, vector<16x128xf32>
      tpu.vector_store %arg5[%c0_10, %c0_11], %12 {strides = array<i32>} : memref<16x128xf32, #tpu.memory_space<vmem>>, vector<16x128xf32>,
    } else {
    }
    %c0 = arith.constant 0 : index
    %c0_1 = arith.constant 0 : index
    %3 = vector.load %arg5[%c0, %c0_1] : memref<16x128xf32, #tpu.memory_space<vmem>>, vector<16x128xf32>
    %c0_2 = arith.constant 0 : index
    %c0_3 = arith.constant 0 : index
    %4 = vector.load %arg2[%c0_2, %c0_3] : memref<16x128xbf16, #tpu.memory_space<vmem>>, vector<16x128xbf16>
    %c0_4 = arith.constant 0 : index
    %c0_5 = arith.constant 0 : index
    %5 = vector.load %arg3[%c0_4, %c0_5] : memref<128x128xbf16, #tpu.memory_space<vmem>>, vector<128x128xbf16>
    %cst = arith.constant dense<0.000000e+00> : vector<16x128xf32>
    %6 = tpu.matmul %4, %5, %cst {dimension_numbers = #tpu.dot_dimension_numbers<[1], [0], [0], [1], [0, 0, 1, 1], [], []>} : vector<16x128xbf16>, vector<128x128xbf16>, vector<16x128xf32> -> vector<16x128xf32>
    %7 = arith.addf %3, %6 : vector<16x128xf32>
    %c0_6 = arith.constant 0 : index
    %c0_7 = arith.constant 0 : index
    %8 = vector.load %arg5[%c0_6, %c0_7] : memref<16x128xf32, #tpu.memory_space<vmem>>, vector<16x128xf32>
    tpu.vector_store %arg5[%c0_6, %c0_7], %7 {strides = array<i32>} : memref<16x128xf32, #tpu.memory_space<vmem>>, vector<16x128xf32>,
    %c2_i32 = arith.constant 2 : i32
    %9 = arith.cmpi eq, %arg1, %c2_i32 : i32
    %10 = arith.extui %9 : i1 to i32
    %c0_i32_8 = arith.constant 0 : i32
    %11 = arith.cmpi ne, %10, %c0_i32_8 : i32
    scf.if %11 {
      %c0_9 = arith.constant 0 : index
      %c0_10 = arith.constant 0 : index
      %12 = vector.load %arg5[%c0_9, %c0_10] : memref<16x128xf32, #tpu.memory_space<vmem>>, vector<16x128xf32>
      %c0_11 = arith.constant 0 : index
      %c0_12 = arith.constant 0 : index
      %13 = vector.load %arg4[%c0_11, %c0_12] : memref<16x128xf32, #tpu.memory_space<vmem>>, vector<16x128xf32>
      tpu.vector_store %arg4[%c0_11, %c0_12], %12 {strides = array<i32>} : memref<16x128xf32, #tpu.memory_space<vmem>>, vector<16x128xf32>,
    } else {
    }
    return
  }
  func.func @transform_0(%arg0: i32, %arg1: i32) -> (i32, i32) {
    %c0_i32 = arith.constant 0 : i32
    %c0_i32_0 = arith.constant 0 : i32
    return %c0_i32, %arg1 : i32, i32
  }
  func.func @transform_1(%arg0: i32, %arg1: i32) -> (i32, i32) {
    %c0_i32 = arith.constant 0 : i32
    return %arg1, %arg0 : i32, i32
  }
  func.func @transform_2(%arg0: i32, %arg1: i32) -> (i32, i32) {
    %c0_i32 = arith.constant 0 : i32
    %c0_i32_0 = arith.constant 0 : i32
    return %c0_i32, %arg0 : i32, i32
  }
}

module attributes {stable_mosaic.version = 11 : i64} {
  func.func @_barlow_kernel(%arg0: i32, %arg1: i32, %arg2: memref<8x128xf32, #tpu.memory_space<vmem>>, %arg3: memref<8x128xf32, #tpu.memory_space<vmem>>, %arg4: memref<1x1xf32, #tpu.memory_space<vmem>>, %arg5: memref<1x1xf32, #tpu.memory_space<vmem>>) attributes {dimension_semantics = [#tpu.dimension_semantics<arbitrary>, #tpu.dimension_semantics<arbitrary>], iteration_bounds = array<i64: 3, 3>, scalar_prefetch = 0 : i64, scratch_operands = 1 : i64, tpu.core_type = #tpu.core_type<tc>, window_params = [{transform_indices = @transform_0, window_bounds = array<i64: 8, 128>}, {transform_indices = @transform_1, window_bounds = array<i64: 8, 128>}, {pipeline_mode = #tpu.pipeline_mode<synchronous>, transform_indices = @transform_2, window_bounds = array<i64: 1, 1>}]} {
    %c0_i32 = arith.constant 0 : i32
    %0 = arith.cmpi eq, %arg0, %c0_i32 : i32
    %c0_i32_0 = arith.constant 0 : i32
    %1 = arith.cmpi eq, %arg1, %c0_i32_0 : i32
    %2 = arith.andi %0, %1 : i1
    %3 = arith.extui %2 : i1 to i32
    %c0_i32_1 = arith.constant 0 : i32
    %4 = arith.cmpi ne, %3, %c0_i32_1 : i32
    scf.if %4 {
      %cst_29 = arith.constant 0.000000e+00 : f32
      %84 = vector.broadcast %cst_29 : f32 to vector<1x1xf32>
      %c0_30 = arith.constant 0 : index
      %c0_31 = arith.constant 0 : index
      %85 = vector.load %arg5[%c0_30, %c0_31] : memref<1x1xf32, #tpu.memory_space<vmem>>, vector<1x1xf32>
      tpu.vector_store %arg5[%c0_30, %c0_31], %84 {strides = array<i32>} : memref<1x1xf32, #tpu.memory_space<vmem>>, vector<1x1xf32>,
    } else {
    }
    %c0 = arith.constant 0 : index
    %c0_2 = arith.constant 0 : index
    %5 = vector.load %arg2[%c0, %c0_2] : memref<8x128xf32, #tpu.memory_space<vmem>>, vector<8x128xf32>
    %cst = arith.constant dense<0.000000e+00> : vector<128xf32>
    %6 = vector.multi_reduction <add>, %5, %cst [0] : vector<8x128xf32> to vector<128xf32>
    %7 = vector.shape_cast %6 : vector<128xf32> to vector<1x128xf32>
    %cst_3 = arith.constant 8.000000e+00 : f32
    %8 = vector.broadcast %cst_3 : f32 to vector<1x128xf32>
    %9 = arith.divf %7, %8 : vector<1x128xf32>
    %10 = vector.broadcast %9 : vector<1x128xf32> to vector<8x128xf32>
    %11 = arith.subf %5, %10 : vector<8x128xf32>
    %12 = arith.mulf %11, %11 : vector<8x128xf32>
    %cst_4 = arith.constant dense<0.000000e+00> : vector<128xf32>
    %13 = vector.multi_reduction <add>, %12, %cst_4 [0] : vector<8x128xf32> to vector<128xf32>
    %14 = vector.shape_cast %13 : vector<128xf32> to vector<1x128xf32>
    %cst_5 = arith.constant 8.000000e+00 : f32
    %15 = vector.broadcast %cst_5 : f32 to vector<1x128xf32>
    %16 = arith.divf %14, %15 : vector<1x128xf32>
    %17 = vector.broadcast %9 : vector<1x128xf32> to vector<8x128xf32>
    %18 = arith.subf %5, %17 : vector<8x128xf32>
    %cst_6 = arith.constant 9.99999974E-6 : f32
    %19 = vector.broadcast %cst_6 : f32 to vector<1x128xf32>
    %20 = arith.addf %16, %19 : vector<1x128xf32>
    %21 = math.rsqrt %20 : vector<1x128xf32>
    %22 = vector.broadcast %21 : vector<1x128xf32> to vector<8x128xf32>
    %23 = arith.mulf %18, %22 : vector<8x128xf32>
    %c0_7 = arith.constant 0 : index
    %c0_8 = arith.constant 0 : index
    %24 = vector.load %arg3[%c0_7, %c0_8] : memref<8x128xf32, #tpu.memory_space<vmem>>, vector<8x128xf32>
    %cst_9 = arith.constant dense<0.000000e+00> : vector<128xf32>
    %25 = vector.multi_reduction <add>, %24, %cst_9 [0] : vector<8x128xf32> to vector<128xf32>
    %26 = vector.shape_cast %25 : vector<128xf32> to vector<1x128xf32>
    %cst_10 = arith.constant 8.000000e+00 : f32
    %27 = vector.broadcast %cst_10 : f32 to vector<1x128xf32>
    %28 = arith.divf %26, %27 : vector<1x128xf32>
    %29 = vector.broadcast %28 : vector<1x128xf32> to vector<8x128xf32>
    %30 = arith.subf %24, %29 : vector<8x128xf32>
    %31 = arith.mulf %30, %30 : vector<8x128xf32>
    %cst_11 = arith.constant dense<0.000000e+00> : vector<128xf32>
    %32 = vector.multi_reduction <add>, %31, %cst_11 [0] : vector<8x128xf32> to vector<128xf32>
    %33 = vector.shape_cast %32 : vector<128xf32> to vector<1x128xf32>
    %cst_12 = arith.constant 8.000000e+00 : f32
    %34 = vector.broadcast %cst_12 : f32 to vector<1x128xf32>
    %35 = arith.divf %33, %34 : vector<1x128xf32>
    %36 = vector.broadcast %28 : vector<1x128xf32> to vector<8x128xf32>
    %37 = arith.subf %24, %36 : vector<8x128xf32>
    %cst_13 = arith.constant 9.99999974E-6 : f32
    %38 = vector.broadcast %cst_13 : f32 to vector<1x128xf32>
    %39 = arith.addf %35, %38 : vector<1x128xf32>
    %40 = math.rsqrt %39 : vector<1x128xf32>
    %41 = vector.broadcast %40 : vector<1x128xf32> to vector<8x128xf32>
    %42 = arith.mulf %37, %41 : vector<8x128xf32>
    %cst_14 = arith.constant dense<0.000000e+00> : vector<128x128xf32>
    %43 = tpu.matmul %23, %42, %cst_14 {dimension_numbers = #tpu.dot_dimension_numbers<[0], [0], [1], [1], [0, 1, 1, 1], [], []>} : vector<8x128xf32>, vector<8x128xf32>, vector<128x128xf32> -> vector<128x128xf32>
    %cst_15 = arith.constant 1.250000e-01 : f32
    %44 = vector.broadcast %cst_15 : f32 to vector<128x128xf32>
    %45 = arith.mulf %43, %44 : vector<128x128xf32>
    %46 = tpu.iota {dimensions = array<i32: 0>} : vector<128x128xi32>
    %c128_i32 = arith.constant 128 : i32
    %47 = arith.muli %arg0, %c128_i32 : i32
    %48 = vector.broadcast %47 : i32 to vector<128x128xi32>
    %49 = arith.addi %46, %48 : vector<128x128xi32>
    %50 = tpu.iota {dimensions = array<i32: 1>} : vector<128x128xi32>
    %c128_i32_16 = arith.constant 128 : i32
    %51 = arith.muli %arg1, %c128_i32_16 : i32
    %52 = vector.broadcast %51 : i32 to vector<128x128xi32>
    %53 = arith.addi %50, %52 : vector<128x128xi32>
    %54 = arith.cmpi eq, %49, %53 : vector<128x128xi32>
    %cst_17 = arith.constant 1.000000e+00 : f32
    %55 = vector.broadcast %cst_17 : f32 to vector<128x128xf32>
    %56 = arith.subf %45, %55 : vector<128x128xf32>
    %cst_18 = arith.constant 0.000000e+00 : f32
    %57 = vector.broadcast %cst_18 : f32 to vector<128x128xf32>
    %58 = arith.select %54, %56, %57 : vector<128x128xi1>, vector<128x128xf32>
    %59 = arith.mulf %58, %58 : vector<128x128xf32>
    %60 = vector.shape_cast %59 : vector<128x128xf32> to vector<1x128x128xf32>
    %cst_19 = arith.constant dense<0.000000e+00> : vector<1xf32>
    %61 = vector.multi_reduction <add>, %60, %cst_19 [1, 2] : vector<1x128x128xf32> to vector<1xf32>
    %62 = vector.shape_cast %61 : vector<1xf32> to vector<1x1x1xf32>
    %63 = vector.extract %62[0, 0, 0] : f32 from vector<1x1x1xf32>
    %64 = vector.broadcast %63 : f32 to vector<1x1xf32>
    %cst_20 = arith.constant 0.000000e+00 : f32
    %65 = vector.broadcast %cst_20 : f32 to vector<128x128xf32>
    %66 = arith.select %54, %65, %45 : vector<128x128xi1>, vector<128x128xf32>
    %67 = arith.mulf %66, %66 : vector<128x128xf32>
    %68 = vector.shape_cast %67 : vector<128x128xf32> to vector<1x128x128xf32>
    %cst_21 = arith.constant dense<0.000000e+00> : vector<1xf32>
    %69 = vector.multi_reduction <add>, %68, %cst_21 [1, 2] : vector<1x128x128xf32> to vector<1xf32>
    %70 = vector.shape_cast %69 : vector<1xf32> to vector<1x1x1xf32>
    %71 = vector.extract %70[0, 0, 0] : f32 from vector<1x1x1xf32>
    %72 = vector.broadcast %71 : f32 to vector<1x1xf32>
    %c0_22 = arith.constant 0 : index
    %c0_23 = arith.constant 0 : index
    %73 = vector.load %arg5[%c0_22, %c0_23] : memref<1x1xf32, #tpu.memory_space<vmem>>, vector<1x1xf32>
    %cst_24 = arith.constant 5.100000e-03 : f32
    %74 = vector.broadcast %cst_24 : f32 to vector<1x1xf32>
    %75 = arith.mulf %74, %72 : vector<1x1xf32>
    %76 = arith.addf %64, %75 : vector<1x1xf32>
    %77 = arith.addf %73, %76 : vector<1x1xf32>
    %c0_25 = arith.constant 0 : index
    %c0_26 = arith.constant 0 : index
    %78 = vector.load %arg5[%c0_25, %c0_26] : memref<1x1xf32, #tpu.memory_space<vmem>>, vector<1x1xf32>
    tpu.vector_store %arg5[%c0_25, %c0_26], %77 {strides = array<i32>} : memref<1x1xf32, #tpu.memory_space<vmem>>, vector<1x1xf32>,
    %c2_i32 = arith.constant 2 : i32
    %79 = arith.cmpi eq, %arg0, %c2_i32 : i32
    %c2_i32_27 = arith.constant 2 : i32
    %80 = arith.cmpi eq, %arg1, %c2_i32_27 : i32
    %81 = arith.andi %79, %80 : i1
    %82 = arith.extui %81 : i1 to i32
    %c0_i32_28 = arith.constant 0 : i32
    %83 = arith.cmpi ne, %82, %c0_i32_28 : i32
    scf.if %83 {
      %c0_29 = arith.constant 0 : index
      %c0_30 = arith.constant 0 : index
      %84 = vector.load %arg5[%c0_29, %c0_30] : memref<1x1xf32, #tpu.memory_space<vmem>>, vector<1x1xf32>
      %c0_31 = arith.constant 0 : index
      %c0_32 = arith.constant 0 : index
      %85 = vector.load %arg4[%c0_31, %c0_32] : memref<1x1xf32, #tpu.memory_space<vmem>>, vector<1x1xf32>
      tpu.vector_store %arg4[%c0_31, %c0_32], %84 {strides = array<i32>} : memref<1x1xf32, #tpu.memory_space<vmem>>, vector<1x1xf32>,
    } else {
    }
    return
  }
  func.func @transform_0(%arg0: i32, %arg1: i32) -> (i32, i32) {
    %c0_i32 = arith.constant 0 : i32
    %c0_i32_0 = arith.constant 0 : i32
    return %c0_i32, %arg0 : i32, i32
  }
  func.func @transform_1(%arg0: i32, %arg1: i32) -> (i32, i32) {
    %c0_i32 = arith.constant 0 : i32
    %c0_i32_0 = arith.constant 0 : i32
    return %c0_i32, %arg1 : i32, i32
  }
  func.func @transform_2(%arg0: i32, %arg1: i32) -> (i32, i32) {
    %c0_i32 = arith.constant 0 : i32
    %c0_i32_0 = arith.constant 0 : i32
    %c0_i32_1 = arith.constant 0 : i32
    return %c0_i32, %c0_i32_0 : i32, i32
  }
}

</mosaic_0001>

<bundles_post_ra>
// kernel: forward.6
= control target key start
LH: loop header
LB: loop body
LE: loop exit
PB: predicated region body
PF: predicated region fallthrough
CT: control target
= control target key end

     0   :  { %s1056_s15 = smov 0   ;;  %s1058_s16 = smov 0   ;;  %s1252_s0 = inlined_call_operand.vmem [shape: bf16[16,256], index: 0, kind: input, shape index: {}]   ;;  %s1253_s1 = inlined_call_operand.vmem [shape: bf16[256,384], index: 1, kind: input, shape index: {}]   ;;  %s1254_s2 = inlined_call_operand.vmem [shape: f32[1,384], index: 2, kind: input, shape index: {}]   ;;  %s1255_s3 = inlined_call_operand.vmem [shape: f32[1,384], index: 3, kind: input, shape index: {}]   ;;  %s1256_s4 = inlined_call_operand.vmem [shape: f32[16,384], index: 4, kind: output, shape index: {}]  }
   0x1   :  { %s1060_s17 = smov 0   ;;  %s1062_s18 = smov 0  }
   0x2   :  { %s1064_s19 = smov 0  }
   0x3 LB: > { %s26_s20 = sadd.s32 1, %s1024_s18  ;;  %s837_s21 = sadd.s32 4294967295, %s1028_s19   ;;  %s1028_s19 = sphi %s1064_s19, %s14_s19   ;;  %s1024_s18 = sphi %s1062_s18, %s1261_s18   ;;  %s1020_s17 = sphi %s1060_s17, %s1260_s17   ;;  %s1016_s16 = sphi %s1058_s16, %s1259_s16   ;;  %s1012_s15 = sphi %s1056_s15, %s1258_s15  }
   0x4   : > { %p28_p0 = scmp.ge.s32.totalorder %s26_s20, 3  ;;  %p68_p1 = scmp.ne.s32.totalorder %s1016_s16, %s1012_s15 }
   0x5   : > { %p69_p2 = scmp.eq.s32.totalorder %s1028_s19, 0  ;;  %p150_p4 = scmp.eq.s32.totalorder %s837_s21, 2 }
   0x6   : > { %s1263_s20 = smov (%p28_p0, %s26_s20), 0  ;;  %s61_s23 = sadd.s32 1, %s1016_s16 }
   0x7   : > { %p70_p3 = por %p69_p2, %p68_p1  ;;  %s57_s22 = ssub.s32 %s1024_s18, %s1263_s20 }
   0x8   : > { %p59_p5 = scmp.eq.s32.totalorder %s57_s22, 0  ;;  %p1091_p6 = por %p150_p4, %p68_p1 }
   0x9   : > { %p841_p7 = scmp.ge.s32.totalorder %s1028_s19, 3 }
   0xa   : > { %s1096_s25 = scalar_select %p59_p5, %s1016_s16, %s61_s23  }
   0xb   : > { %181 = sbr.rel (%p841_p7) target bundleno = 52 (0x34), region = 20 }
  0x10   : > { %184 = sbr.rel (!%p70_p3) target bundleno = 52 (0x34), region = 24  ;;  %s186_s26 = sand.u32 (%p70_p3), 1, %s1016_s16  }
  0x11   : > { %s843_s27 = sshll.u32 (%p70_p3), %s1024_s18, 2  ;;  %s842_s28 = sshll.u32 (%p70_p3), %s186_s26, 7 }
  0x12   : > { %s1104_s5 = scalar_lea.vmem (%p70_p3), %s1253_s1, %s843_s27  ;;  %s1108_s6 = scalar_lea.vmem (%p70_p3), [#allocation3], %s842_s28 }
  0x13   : > { %v210_v0 = vld [vmem:[%s1104_s5] sm:$0xf] (%p70_p3)  ;;  %v212_v1 = vld [vmem:[%s1104_s5 + $0xc] sm:$0xf] (%p70_p3)  ;;  %v214_v2 = vld [vmem:[%s1104_s5 + $0x18] sm:$0xf] (%p70_p3) }
  0x14   : > { %211 = vst [vmem:[%s1108_s6] sm:$0xf] (%p70_p3), %v210_v0  ;;  %v216_v3 = vld [vmem:[%s1104_s5 + $0x24] sm:$0xf] (%p70_p3)  ;;  %v218_v4 = vld [vmem:[%s1104_s5 + $0x30] sm:$0xf] (%p70_p3) }
  0x15   : > { %213 = vst [vmem:[%s1108_s6 + $0x4] sm:$0xf] %v212_v1  ;;  %v220_v5 = vld [vmem:[%s1104_s5 + $0x3c] sm:$0xf]  ;;  %v222_v6 = vld [vmem:[%s1104_s5 + $0x48] sm:$0xf] }
  0x16   : > { %215 = vst [vmem:[%s1108_s6 + $0x8] sm:$0xf] %v214_v2  ;;  %v224_v7 = vld [vmem:[%s1104_s5 + $0x54] sm:$0xf]  ;;  %v226_v8 = vld [vmem:[%s1104_s5 + $0x60] sm:$0xf] }
  0x17   : > { %217 = vst [vmem:[%s1108_s6 + $0xc] sm:$0xf] %v216_v3  ;;  %v228_v9 = vld [vmem:[%s1104_s5 + $0x6c] sm:$0xf]  ;;  %v230_v10 = vld [vmem:[%s1104_s5 + $0x78] sm:$0xf] }
  0x18   : > { %219 = vst [vmem:[%s1108_s6 + $0x10] sm:$0xf] %v218_v4  ;;  %v232_v11 = vld [vmem:[%s1104_s5 + $0x84] sm:$0xf]  ;;  %v234_v12 = vld [vmem:[%s1104_s5 + $0x90] sm:$0xf] }
  0x19   : > { %221 = vst [vmem:[%s1108_s6 + $0x14] sm:$0xf] %v220_v5  ;;  %v236_v13 = vld [vmem:[%s1104_s5 + $0x9c] sm:$0xf]  ;;  %v238_v14 = vld [vmem:[%s1104_s5 + $0xa8] sm:$0xf] }
  0x1a   : > { %223 = vst [vmem:[%s1108_s6 + $0x18] sm:$0xf] %v222_v6  ;;  %v240_v15 = vld [vmem:[%s1104_s5 + $0xb4] sm:$0xf]  ;;  %v242_v16 = vld [vmem:[%s1104_s5 + $0xc0] sm:$0xf] }
  0x1b   : > { %225 = vst [vmem:[%s1108_s6 + $0x1c] sm:$0xf] %v224_v7  ;;  %v244_v17 = vld [vmem:[%s1104_s5 + $0xcc] sm:$0xf]  ;;  %v246_v18 = vld [vmem:[%s1104_s5 + $0xd8] sm:$0xf] }
  0x1c   : > { %227 = vst [vmem:[%s1108_s6 + $0x20] sm:$0xf] %v226_v8  ;;  %v248_v19 = vld [vmem:[%s1104_s5 + $0xe4] sm:$0xf]  ;;  %v250_v20 = vld [vmem:[%s1104_s5 + $0xf0] sm:$0xf] }
  0x1d   : > { %229 = vst [vmem:[%s1108_s6 + $0x24] sm:$0xf] %v228_v9  ;;  %v252_v21 = vld [vmem:[%s1104_s5 + $0xfc] sm:$0xf]  ;;  %v254_v22 = vld [vmem:[%s1104_s5 + $0x108] sm:$0xf] }
  0x1e   : > { %231 = vst [vmem:[%s1108_s6 + $0x28] sm:$0xf] %v230_v10  ;;  %v256_v23 = vld [vmem:[%s1104_s5 + $0x114] sm:$0xf]  ;;  %v258_v24 = vld [vmem:[%s1104_s5 + $0x120] sm:$0xf] }
  0x1f   : > { %233 = vst [vmem:[%s1108_s6 + $0x2c] sm:$0xf] %v232_v11  ;;  %v260_v25 = vld [vmem:[%s1104_s5 + $0x12c] sm:$0xf]  ;;  %v262_v26 = vld [vmem:[%s1104_s5 + $0x138] sm:$0xf] }
  0x20   : > { %235 = vst [vmem:[%s1108_s6 + $0x30] sm:$0xf] %v234_v12  ;;  %v264_v27 = vld [vmem:[%s1104_s5 + $0x144] sm:$0xf]  ;;  %v266_v28 = vld [vmem:[%s1104_s5 + $0x150] sm:$0xf] }
  0x21   : > { %237 = vst [vmem:[%s1108_s6 + $0x34] sm:$0xf] %v236_v13  ;;  %v268_v29 = vld [vmem:[%s1104_s5 + $0x15c] sm:$0xf]  ;;  %v270_v30 = vld [vmem:[%s1104_s5 + $0x168] sm:$0xf] }
  0x22   : > { %239 = vst [vmem:[%s1108_s6 + $0x38] sm:$0xf] %v238_v14  ;;  %v272_v31 = vld [vmem:[%s1104_s5 + $0x174] sm:$0xf] }
  0x23   : > { %241 = vst [vmem:[%s1108_s6 + $0x3c] sm:$0xf] %v240_v15 }
  0x24   : > { %243 = vst [vmem:[%s1108_s6 + $0x40] sm:$0xf] %v242_v16 }
  0x25   : > { %245 = vst [vmem:[%s1108_s6 + $0x44] sm:$0xf] %v244_v17 }
  0x26   : > { %247 = vst [vmem:[%s1108_s6 + $0x48] sm:$0xf] %v246_v18 }
  0x27   : > { %249 = vst [vmem:[%s1108_s6 + $0x4c] sm:$0xf] %v248_v19 }
  0x28   : > { %251 = vst [vmem:[%s1108_s6 + $0x50] sm:$0xf] %v250_v20 }
  0x29   : > { %253 = vst [vmem:[%s1108_s6 + $0x54] sm:$0xf] %v252_v21 }
  0x2a   : > { %255 = vst [vmem:[%s1108_s6 + $0x58] sm:$0xf] %v254_v22 }
  0x2b   : > { %257 = vst [vmem:[%s1108_s6 + $0x5c] sm:$0xf] %v256_v23 }
  0x2c   : > { %259 = vst [vmem:[%s1108_s6 + $0x60] sm:$0xf] %v258_v24 }
  0x2d   : > { %261 = vst [vmem:[%s1108_s6 + $0x64] sm:$0xf] %v260_v25 }
  0x2e   : > { %263 = vst [vmem:[%s1108_s6 + $0x68] sm:$0xf] %v262_v26 }
  0x2f   : > { %265 = vst [vmem:[%s1108_s6 + $0x6c] sm:$0xf] %v264_v27 }
  0x30   : > { %267 = vst [vmem:[%s1108_s6 + $0x70] sm:$0xf] %v266_v28 }
  0x31   : > { %269 = vst [vmem:[%s1108_s6 + $0x74] sm:$0xf] %v268_v29 }
  0x32   : > { %271 = vst [vmem:[%s1108_s6 + $0x78] sm:$0xf] %v270_v30 }
  0x33   : > { %273 = vst [vmem:[%s1108_s6 + $0x7c] sm:$0xf] %v272_v31 }
  0x34 PF: > { %p844_p8 = scmp.ge.s32.totalorder %s1028_s19, 1  ;;  %p372_p9 = scmp.lt.s32.totalorder %s1028_s19, 4 }
  0x36   : > { %p373_p10 = pnand %p844_p8, %p372_p9 }
  0x37   : > { %s379_s7 = sand.u32 (!%p373_p10), 1, %s1012_s15   ;;  %p421_p11 = scmp.lt.s32.totalorder (!%p373_p10), %s1020_s17, 2 }
  0x38   : > { %376 = sbr.rel (%p373_p10) target bundleno = 299 (0x12b), region = 73  ;;  %s845_s8 = sshll.u32 (!%p373_p10), %s379_s7, 7 }
  0x39   : > { %s1177_s9 = scalar_lea.vmem (!%p373_p10), [#allocation3], %s845_s8  ;;  %s846_s12 = sshll.u32 (!%p373_p10), %s379_s7, 4 }
  0x3a   : > { %s413_s13 = scalar_lea.vmem (!%p373_p10), [#allocation4], %s846_s12 }
  0x3d   : > { %v932_v32 = vld [vmem:[%s1177_s9 + $0x38] sm:$0xff]  ;;  %v931_v34 = vld [vmem:[%s1177_s9 + $0x30] sm:$0xff]  ;;  %v930_v36 = vld [vmem:[%s1177_s9 + $0x28] sm:$0xff]  ;;  %s1209_s26 = scalar_select %p421_p11, %s1020_s17, 2  ;;  %v1030_v54 = vmov 8.0  }
  0x3e   : > { %v940_v33 = vld [vmem:[%s1177_s9 + $0x78] sm:$0xff]  ;;  %575 = vmatpush.bf16.msra.mxu0 %v932_v32  ;;  %v939_v35 = vld [vmem:[%s1177_s9 + $0x70] sm:$0xff]  ;;  %v938_v37 = vld [vmem:[%s1177_s9 + $0x68] sm:$0xff]  ;;  %984 = vrcp.f32 %v1030_v54  ;;  %s920_s15 = sshll.u32 (%p1091_p6), %s1020_s17, 3 }
  0x3f   : > { %589 = vmatpush.bf16.msra.mxu1 %v940_v33  ;;  %v929_v38 = vld [vmem:[%s1177_s9 + $0x20] sm:$0xff]  ;;  %v928_v40 = vld [vmem:[%s1177_s9 + $0x18] sm:$0xff]  ;;  %v927_v42 = vld [vmem:[%s1177_s9 + $0x10] sm:$0xff]  ;;  %s423_s29 = scalar_lea.vmem %s1254_s2, %s1209_s26  ;;  %s426_s6 = scalar_lea.vmem %s1255_s3, %s1209_s26 }
  0x40   : > { %v937_v39 = vld [vmem:[%s1177_s9 + $0x60] sm:$0xff]  ;;  %v936_v41 = vld [vmem:[%s1177_s9 + $0x58] sm:$0xff]  ;;  %v935_v43 = vld [vmem:[%s1177_s9 + $0x50] sm:$0xff]  ;;  %s699_s21 = scalar_lea.vmem (%p1091_p6), %s1256_s4, %s920_s15 }
  0x41   : > { %v926_v44 = vld [vmem:[%s1177_s9 + $0x8] sm:$0xff]  ;;  %v849_v46 = vld [vmem:[%s1252_s0] sm:$0xf]  ;;  %v923_v48 = vld [vmem:[%s1252_s0 + $0x4] sm:$0xf] }
  0x42   : > { %576 = vmatpush.bf16.msra.mxu0 %v931_v34  ;;  %v934_v45 = vld [vmem:[%s1177_s9 + $0x48] sm:$0xff]  ;;  %v925_v49 = vld [vmem:[%s1177_s9] sm:$0xff] }
  0x43   : > { %590 = vmatpush.bf16.msra.mxu1 %v939_v35  ;;  %v924_v47 = vld [vmem:[%s1252_s0 + $0x4] sm:$0xf0]  ;;  %v933_v50 = vld [vmem:[%s1177_s9 + $0x40] sm:$0xff]  ;;  %v851_v51 = vld [vmem:[%s1252_s0 + $0x8] sm:$0xf0] }
  0x44   : > { %v850_v52 = vor.u32 %v924_v47, %v849_v46  ;;  %v854_v53 = vor.u32 %v923_v48, %v851_v51  ;;  %v985_v55 = vpop.eup %984 }
  0x45   : > { %v619_v56 = vmul.f32 8.0, %v985_v55  ;;  %vm623_vm0 = vweird.f32 %v985_v55 }
  0x46   : > { %577 = vmatpush.bf16.msra.mxu0 %v930_v36 }
  0x47   : > { %591 = vmatpush.bf16.msra.mxu1 %v938_v37  ;;  %v620_v59 = vsub.f32 1.0, %v619_v56 }
  0x49   : > { %v621_v62 = vmul.f32 %v985_v55, %v620_v59 }
  0x4a   : > { %578 = vmatpush.bf16.msra.mxu0 %v929_v38 }
  0x4b   : > { %592 = vmatpush.bf16.msra.mxu1 %v937_v39  ;;  %v622_v1 = vadd.f32 %v985_v55, %v621_v62 }
  0x4d   : > { %v624_v8 = vsel %vm623_vm0, %v985_v55, %v622_v1 }
  0x4e   : > { %579 = vmatpush.bf16.msra.mxu0 %v928_v40 }
  0x4f   : > { %593 = vmatpush.bf16.msra.mxu1 %v936_v41 }
  0x52   : > { %580 = vmatpush.bf16.msra.mxu0 %v927_v42 }
  0x53   : > { %594 = vmatpush.bf16.msra.mxu1 %v935_v43 }
  0x56   : > { %581 = vmatpush.bf16.msra.mxu0 %v926_v44 }
  0x57   : > { %595 = vmatpush.bf16.msra.mxu1 %v934_v45  ;;  %v982_v45 = vld [vmem:[%s423_s29] ss:$0 sm:$0xff] }
  0x5a   : > { %582 = vmatpush.bf16.msra.mxu0 %v925_v49  ;;  %v983_v49 = vld [vmem:[%s426_s6] ss:$0 sm:$0xff] }
  0x5b   : > { %596 = vmatpush.bf16.msra.mxu1 %v933_v50 }
  0x5d   : > { %583 = vmatmul.bf16.vlgmr.msra.gmra.mxu0 %v850_v52 }
  0x5e   : > { %597 = vmatmul.bf16.vlgmr.msra.gmra.mxu1 %v854_v53 }
  0xda   : > { %v584_v57 = vpop.f32.mrf.mxu0 }
  0xdb   : > { %v598_v58 = vpop.f32.mrf.mxu1 }
  0xdc   : > { %v599_v60 = vadd.f32 %v598_v58, %v584_v57 }
  0xde   : > { %v612_v61 = vrot.slane %v599_v60, 4 }
  0xe0   : > { %v613_v63 = vadd.f32 %v612_v61, %v599_v60 }
  0xe2   : > { %v614_v0 = vrot.slane %v613_v63, 2  ;;  %v586_v2 = vpop.f32.mrf.mxu0 }
  0xe3   : > { %v600_v3 = vpop.f32.mrf.mxu1 }
  0xe4   : > { %v615_v4 = vadd.f32 %v614_v0, %v613_v63  ;;  %v601_v5 = vadd.f32 %v600_v3, %v586_v2 }
  0xe6   : > { %v616_v6 = vrot.slane %v615_v4, 1  ;;  %v647_v7 = vrot.slane %v601_v5, 4 }
  0xe8   : > { %v617_v9 = vadd.f32 %v616_v6, %v615_v4  ;;  %v648_v10 = vadd.f32 %v647_v7, %v601_v5 }
  0xea   : > { %v625_v11 = vmul.f32 %v624_v8, %v617_v9  ;;  %v649_v12 = vrot.slane %v648_v10, 2 }
  0xec   : > { %v626_v13 = vsub.f32 %v599_v60, %v625_v11  ;;  %v650_v14 = vadd.f32 %v649_v12, %v648_v10 }
  0xee   : > { %v627_v15 = vmul.f32 %v626_v13, %v626_v13  ;;  %v651_v16 = vrot.slane %v650_v14, 1 }
  0xf0   : > { %v628_v17 = vrot.slane %v627_v15, 4  ;;  %v652_v18 = vadd.f32 %v651_v16, %v650_v14 }
  0xf2   : > { %v629_v19 = vadd.f32 %v628_v17, %v627_v15  ;;  %v653_v20 = vmul.f32 %v652_v18, %v624_v8 }
  0xf4   : > { %v630_v21 = vrot.slane %v629_v19, 2  ;;  %v654_v22 = vsub.f32 %v601_v5, %v653_v20 }
  0xf6   : > { %v631_v23 = vadd.f32 %v630_v21, %v629_v19  ;;  %v655_v24 = vmul.f32 %v654_v22, %v654_v22 }
  0xf8   : > { %v632_v25 = vrot.slane %v631_v23, 1  ;;  %v656_v26 = vrot.slane %v655_v24, 4 }
  0xfa   : > { %v633_v27 = vadd.f32 %v632_v25, %v631_v23  ;;  %v657_v28 = vadd.f32 %v656_v26, %v655_v24 }
  0xfc   : > { %v634_v29 = vmul.f32 %v633_v27, %v624_v8  ;;  %v658_v30 = vrot.slane %v657_v28, 2 }
  0xfe   : > { %v635_v31 = vadd.f32 1e-05, %v634_v29  ;;  %v659_v32 = vadd.f32 %v658_v30, %v657_v28 }
 0x100   : > { %986 = vrsqrt.f32 %v635_v31  ;;  %v660_v33 = vrot.slane %v659_v32, 1  ;;  %vm642_vm2 = vweird.f32 %v635_v31 }
 0x102   : > { %v661_v34 = vadd.f32 %v660_v33, %v659_v32 }
 0x104   : > { %v662_v35 = vmul.f32 %v661_v34, %v624_v8 }
 0x106   : > { %v987_v36 = vpop.eup %986  ;;  %v663_v37 = vadd.f32 1e-05, %v662_v35 }
 0x107   : > { %v637_v38 = vmul.f32 %v987_v36, %v635_v31  ;;  %vm643_vm1 = vweird.f32 %v987_v36 }
 0x108   : > { %988 = vrsqrt.f32 %v663_v37  ;;  %vm644_vm3 = vmor %vm642_vm2, %vm643_vm1  ;;  %vm670_vm5 = vweird.f32 %v663_v37 }
 0x109   : > { %v638_v39 = vmul.f32 %v987_v36, %v637_v38 }
 0x10b   : > { %v639_v40 = vmul.f32 0.5, %v638_v39 }
 0x10d   : > { %v640_v41 = vsub.f32 1.5, %v639_v40 }
 0x10e   : > { %v989_v42 = vpop.eup %988 }
 0x10f   : > { %v641_v43 = vmul.f32 %v987_v36, %v640_v41  ;;  %v665_v44 = vmul.f32 %v989_v42, %v663_v37  ;;  %vm671_vm4 = vweird.f32 %v989_v42 }
 0x110   : > { %vm672_vm6 = vmor %vm670_vm5, %vm671_vm4 }
 0x111   : > { %v645_v46 = vsel %vm644_vm3, %v987_v36, %v641_v43  ;;  %v666_v47 = vmul.f32 %v989_v42, %v665_v44 }
 0x112   : > { %v646_v48 = vmul.f32 %v645_v46, %v626_v13 }
 0x113   : > { %v667_v50 = vmul.f32 0.5, %v666_v47 }
 0x114   : > { %v679_v51 = vmul.f32 %v982_v45, %v646_v48 }
 0x115   : > { %v668_v52 = vsub.f32 1.5, %v667_v50 }
 0x116   : > { %v685_v53 = vadd.f32 %v983_v49, %v679_v51 }
 0x117   : > { %v669_v54 = vmul.f32 %v989_v42, %v668_v52 }
 0x118   : > { %v687_v55 = vmax.f32 %v685_v53, 0.0 }
 0x119   : > { %v673_v56 = vsel %vm672_vm6, %v989_v42, %v669_v54 }
 0x11a   : > { %689 = vst [vmem:[%s413_s13] sm:$0xff] %v687_v55  ;;  %v674_v57 = vmul.f32 %v673_v56, %v654_v22 }
 0x11c   : > { %v680_v58 = vmul.f32 %v982_v45, %v674_v57 }
 0x11e   : > { %v686_v59 = vadd.f32 %v983_v49, %v680_v58  ;;  %697 = sbr.rel (!%p1091_p6) target bundleno = 299 (0x12b), region = 89 }
 0x120   : > { %v688_v60 = vmax.f32 %v686_v59, 0.0 }
 0x121   : > { %v730_v61 = vld [vmem:[%s413_s13] sm:$0xff] (%p1091_p6) }
 0x122   : > { %690 = vst [vmem:[%s413_s13 + $0x8] sm:$0xff] %v688_v60 }
 0x123   : > { %731 = vst [vmem:[%s699_s21] sm:$0xff] %v730_v61 }
 0x129   : > { %v732_v62 = vld [vmem:[%s413_s13 + $0x8] sm:$0xff] }
 0x12a   : > { %733 = vst [vmem:[%s699_s21 + $0x18] sm:$0xff] %v732_v62 }
 0x12b PF: > { %s14_s19 = sadd.s32 1, %s1028_s19   ;;  %s1258_s15 = smov %s1016_s16 }
 0x12c   : > { %p11_p12 = scmp.ge.s32.totalorder %s14_s19, 5   ;;  %s1259_s16 = smov %s1096_s25 }
 0x12d   : > { %s1260_s17 = smov %s1024_s18  ;;  %s1261_s18 = smov %s1263_s20 }
 0x12e   :  { %13 = sbr.rel (!%p11_p12) target bundleno = 3 (0x3), region = 167 }

// kernel: forward.7
= control target key start
LH: loop header
LB: loop body
LE: loop exit
PB: predicated region body
PF: predicated region fallthrough
CT: control target
= control target key end

     0   :  { %s1022_s15 = smov 0   ;;  %s1024_s16 = smov 0   ;;  %s1231_s0 = inlined_call_operand.vmem [shape: bf16[16,384], index: 0, kind: input, shape index: {}]   ;;  %s1232_s1 = inlined_call_operand.vmem [shape: bf16[384,384], index: 1, kind: input, shape index: {}]   ;;  %s1233_s2 = inlined_call_operand.vmem [shape: f32[1,384], index: 2, kind: input, shape index: {}]   ;;  %s1234_s3 = inlined_call_operand.vmem [shape: f32[1,384], index: 3, kind: input, shape index: {}]   ;;  %s1235_s4 = inlined_call_operand.vmem [shape: f32[16,384], index: 4, kind: output, shape index: {}]  }
   0x1   :  { %s1026_s17 = smov 0   ;;  %s1028_s18 = smov 0  }
   0x2   :  { %s1030_s19 = smov 0   ;;  %s1032_s20 = smov 0  }
   0x3   :  { %s1034_s21 = smov 0   ;;  %s1036_s22 = smov 0  }
   0x4   :  { %s1038_s23 = smov 0   ;;  %s1040_s24 = smov 0  }
   0x5   :  { %s1042_s25 = smov 0  }
   0x6 LB: > { %1239 = sst [smem:[#allocation6_spill]] %s973_s20  ;;  %s743_s26 = sadd.s32 4294967295, %s993_s25   ;;  %s993_s25 = sphi %s1042_s25, %s14_s25   ;;  %s989_s24 = sphi %s1040_s24, %s1257_s24   ;;  %s985_s23 = sphi %s1038_s23, %s1256_s23   ;;  %s981_s22 = sphi %s1036_s22, %s1255_s22   ;;  %s977_s21 = sphi %s1034_s21, %s1254_s21   ;;  %s973_s20 = sphi %s1032_s20, %s1247_s20   ;;  %s969_s19 = sphi %s1030_s19, %s1246_s19   ;;  %s965_s18 = sphi %s1028_s18, %s1253_s18   ;;  %s961_s17 = sphi %s1026_s17, %s1252_s17   ;;  %s957_s16 = sphi %s1024_s16, %s1251_s16   ;;  %s953_s15 = sphi %s1022_s15, %s1250_s15  }
   0x7   : > { %s23_s27 = sadd.s32 1, %s985_s23  ;;  %s26_s28 = sadd.s32 1, %s989_s24 }
   0x8   : > { %p24_p0 = scmp.ge.s32.totalorder %s23_s27, 3  ;;  %s33_s29 = sadd.s32 1, %s973_s20 }
   0x9   : > { %p40_p1 = scmp.ne.s32.totalorder %s973_s20, %s969_s19  ;;  %p41_p2 = scmp.eq.s32.totalorder %s993_s25, 0 }
   0xa   : > { %s1259_s27 = smov (%p24_p0, %s23_s27), 0  ;;  %s1261_s28 = smov (!%p24_p0, %s26_s28), %s989_s24 }
   0xb   : > { %1240 = sst [smem:[#allocation7_spill]] %s1259_s27  ;;  %s30_s30 = ssub.s32 %s985_s23, %s1259_s27 }
   0xc   : > { %p28_p3 = scmp.ge.s32.totalorder %s1261_s28, 3  ;;  %p31_p4 = scmp.eq.s32.totalorder %s30_s30, 0 }
   0xd   : > { %p1089_p5 = por %p41_p2, %p40_p1  ;;  %s61_s6 = sadd.s32 1, %s965_s18 }
   0xe   : > { %s1263_s28 = smov (%p28_p3, %s1261_s28), 0  ;;  %p68_p6 = scmp.ne.s32.totalorder %s965_s18, %s961_s17 }
   0xf   : > { %1242 = sst [smem:[#allocation8_spill]] %s1263_s28  ;;  %s57_s8 = ssub.s32 %s989_s24, %s1263_s28 }
  0x10   : > { %s1097_s7 = scalar_select %p31_p4, %s973_s20, %s33_s29  }
  0x11   : > { %s58_s9 = sor.u32 %s57_s8, %s30_s30  ;;  %p137_p7 = scmp.eq.s32.totalorder %s57_s8, 0 }
  0x12   : > { %1243 = sst [smem:[#allocation9_spill]] %s1097_s7  ;;  %p59_p8 = scmp.eq.s32.totalorder %s58_s9, 0 }
  0x13   : > { %p1103_p9 = por %p68_p6, %p41_p2  ;;  %s139_s11 = sadd.s32 1, %s957_s16 }
  0x14   : > { %p149_p10 = scmp.ne.s32.totalorder %s957_s16, %s953_s15  ;;  %p150_p11 = scmp.eq.s32.totalorder %s743_s26, 8 }
  0x15   : > { %s1111_s12 = scalar_select %p59_p8, %s965_s18, %s61_s6  }
  0x16   : > { %s1114_s13 = scalar_select %p137_p7, %s957_s16, %s139_s11  }
  0x17   : > { %p1116_p12 = por %p150_p11, %p149_p10  ;;  %p746_p13 = scmp.ge.s32.totalorder %s993_s25, 9 }
  0x19   : > { %172 = sbr.rel (%p746_p13) target bundleno = 59 (0x3b), region = 16 }
  0x1e   : > { %175 = sbr.rel (!%p1089_p5) target bundleno = 36 (0x24), region = 20  ;;  %s177_s29 = sand.u32 (%p1089_p5), 1, %s973_s20  }
  0x1f   : > { %s748_s30 = sshll.u32 (%p1089_p5), %s985_s23, 2  ;;  %s747_s8 = sshll.u32 (%p1089_p5), %s177_s29, 3 }
  0x20   : > { %s181_s11 = scalar_lea.vmem (%p1089_p5), %s1231_s0, %s748_s30  ;;  %s179_s26 = scalar_lea.vmem (%p1089_p5), [#allocation3], %s747_s8 }
  0x21   : > { %v198_v0 = vld [vmem:[%s181_s11] sm:$0xf] (%p1089_p5)  ;;  %v200_v1 = vld [vmem:[%s181_s11 + $0xc] sm:$0xf] (%p1089_p5) }
  0x22   : > { %199 = vst [vmem:[%s179_s26] sm:$0xf] (%p1089_p5), %v198_v0 }
  0x23   : > { %201 = vst [vmem:[%s179_s26 + $0x4] sm:$0xf] %v200_v1 }
  0x24 PF: > { %229 = sbr.rel (!%p1103_p9) target bundleno = 59 (0x3b), region = 61  ;;  %s231_s5 = sand.u32 (%p1103_p9), 1, %s965_s18  }
  0x25   : > { %s808_s28 = smul.u32 (%p1103_p9), 48, %s985_s23  ;;  %s749_s27 = sshll.u32 (%p1103_p9), %s231_s5, 6 }
  0x27   : > { %s236_s29 = sadd.s32 (%p1103_p9), %s989_s24, %s808_s28  ;;  %s233_s28 = scalar_lea.vmem (%p1103_p9), [#allocation4], %s749_s27 }
  0x28   : > { %s752_s7 = sshll.u32 (%p1103_p9), %s236_s29, 2 }
  0x29   : > { %s1136_s30 = scalar_lea.vmem %s1232_s1, %s752_s7 }
  0x2a   : > { %v255_v2 = vld [vmem:[%s1136_s30] sm:$0xf]  ;;  %v257_v3 = vld [vmem:[%s1136_s30 + $0xc] sm:$0xf]  ;;  %v259_v4 = vld [vmem:[%s1136_s30 + $0x18] sm:$0xf] }
  0x2b   : > { %256 = vst [vmem:[%s233_s28] sm:$0xf] %v255_v2  ;;  %v261_v5 = vld [vmem:[%s1136_s30 + $0x24] sm:$0xf]  ;;  %v263_v6 = vld [vmem:[%s1136_s30 + $0x30] sm:$0xf] }
  0x2c   : > { %258 = vst [vmem:[%s233_s28 + $0x4] sm:$0xf] %v257_v3  ;;  %v265_v7 = vld [vmem:[%s1136_s30 + $0x3c] sm:$0xf]  ;;  %v267_v8 = vld [vmem:[%s1136_s30 + $0x48] sm:$0xf] }
  0x2d   : > { %260 = vst [vmem:[%s233_s28 + $0x8] sm:$0xf] %v259_v4  ;;  %v269_v9 = vld [vmem:[%s1136_s30 + $0x54] sm:$0xf]  ;;  %v271_v10 = vld [vmem:[%s1136_s30 + $0x60] sm:$0xf] }
  0x2e   : > { %262 = vst [vmem:[%s233_s28 + $0xc] sm:$0xf] %v261_v5  ;;  %v273_v11 = vld [vmem:[%s1136_s30 + $0x6c] sm:$0xf]  ;;  %v275_v12 = vld [vmem:[%s1136_s30 + $0x78] sm:$0xf] }
  0x2f   : > { %264 = vst [vmem:[%s233_s28 + $0x10] sm:$0xf] %v263_v6  ;;  %v277_v13 = vld [vmem:[%s1136_s30 + $0x84] sm:$0xf]  ;;  %v279_v14 = vld [vmem:[%s1136_s30 + $0x90] sm:$0xf] }
  0x30   : > { %266 = vst [vmem:[%s233_s28 + $0x14] sm:$0xf] %v265_v7  ;;  %v281_v15 = vld [vmem:[%s1136_s30 + $0x9c] sm:$0xf]  ;;  %v283_v16 = vld [vmem:[%s1136_s30 + $0xa8] sm:$0xf] }
  0x31   : > { %268 = vst [vmem:[%s233_s28 + $0x18] sm:$0xf] %v267_v8  ;;  %v285_v17 = vld [vmem:[%s1136_s30 + $0xb4] sm:$0xf] }
  0x32   : > { %270 = vst [vmem:[%s233_s28 + $0x1c] sm:$0xf] %v269_v9 }
  0x33   : > { %272 = vst [vmem:[%s233_s28 + $0x20] sm:$0xf] %v271_v10 }
  0x34   : > { %274 = vst [vmem:[%s233_s28 + $0x24] sm:$0xf] %v273_v11 }
  0x35   : > { %276 = vst [vmem:[%s233_s28 + $0x28] sm:$0xf] %v275_v12 }
  0x36   : > { %278 = vst [vmem:[%s233_s28 + $0x2c] sm:$0xf] %v277_v13 }
  0x37   : > { %280 = vst [vmem:[%s233_s28 + $0x30] sm:$0xf] %v279_v14 }
  0x38   : > { %282 = vst [vmem:[%s233_s28 + $0x34] sm:$0xf] %v281_v15 }
  0x39   : > { %284 = vst [vmem:[%s233_s28 + $0x38] sm:$0xf] %v283_v16 }
  0x3a   : > { %286 = vst [vmem:[%s233_s28 + $0x3c] sm:$0xf] %v285_v17 }
  0x3b PF: > { %p753_p0 = scmp.ge.s32.totalorder %s993_s25, 1  ;;  %p353_p1 = scmp.lt.s32.totalorder %s993_s25, 10 }
  0x3d   : > { %p354_p2 = pnand %p753_p0, %p353_p1 }
  0x3e   : > { %s360_s20 = sand.u32 (!%p354_p2), 1, %s969_s19   ;;  %s367_s27 = sand.u32 (!%p354_p2), 1, %s961_s17  }
  0x3f   : > { %357 = sbr.rel (%p354_p2) target bundleno = 322 (0x142), region = 110  ;;  %s1158_s7 = sshll.u32 (!%p354_p2), %s360_s20, 3 }
  0x40   : > { %s755_s10 = sshll.u32 (!%p354_p2), %s367_s27, 6  ;;  %s398_s8 = sand.u32 (!%p354_p2), 1, %s953_s15  }
  0x41   : > { %p402_p3 = scmp.lt.s32.totalorder (!%p354_p2), %s981_s22, 2  ;;  %s756_s9 = sshll.u32 (!%p354_p2), %s398_s8, 4 }
  0x42   : > { %s362_s17 = scalar_lea.vmem (!%p354_p2), [#allocation3], %s1158_s7  ;;  %s369_s28 = scalar_lea.vmem (!%p354_p2), [#allocation4], %s755_s10 }
  0x43   : > { %s1174_s20 = scalar_lea.vmem (!%p354_p2), [#allocation5], %s756_s9  ;;  %p757_p4 = scmp.ne.s32.totalorder (!%p354_p2), %s977_s21, 0 }
  0x44   : > { %s1163_s11 = scalar_select %p402_p3, %s981_s22, 2 }
  0x45   : > { %411 = sbr.rel (%p757_p4) target bundleno = 77 (0x4d), region = 122 }
  0x46   : > { %s404_s29 = scalar_lea.vmem %s1233_s2, %s1163_s11  ;;  %s407_s19 = scalar_lea.vmem %s1234_s3, %s1163_s11 }
  0x4a   : > { %v995_v18 = vmov 0.0  }
  0x4b   : > { %412 = vst [vmem:[#allocation2] sm:$0xff] %v995_v18 }
  0x4c   : > { %413 = vst [vmem:[#allocation2 + $0x8] sm:$0xff] %v995_v18 }
  0x4d PF: > { %v807_v19 = vld [vmem:[%s369_s28 + $0x38] sm:$0xff]  ;;  %v806_v20 = vld [vmem:[%s369_s28 + $0x30] sm:$0xff]  ;;  %v805_v21 = vld [vmem:[%s369_s28 + $0x28] sm:$0xff]  ;;  %p794_p5 = scmp.ne.s32.totalorder %s977_s21, 2 }
  0x4e   : > { %488 = vmatpush.bf16.msra.mxu0 %v807_v19  ;;  %v804_v22 = vld [vmem:[%s369_s28 + $0x20] sm:$0xff]  ;;  %v803_v23 = vld [vmem:[%s369_s28 + $0x18] sm:$0xff]  ;;  %v802_v24 = vld [vmem:[%s369_s28 + $0x10] sm:$0xff] }
  0x4f   : > { %v801_v25 = vld [vmem:[%s369_s28 + $0x8] sm:$0xff]  ;;  %v800_v26 = vld [vmem:[%s369_s28] sm:$0xff]  ;;  %v799_v27 = vld [vmem:[%s362_s17] sm:$0xff] }
  0x52   : > { %489 = vmatpush.bf16.msra.mxu0 %v806_v20  ;;  %v414_v28 = vld [vmem:[#allocation2] sm:$0xff] }
  0x53   : > { %v415_v31 = vld [vmem:[#allocation2 + $0x8] sm:$0xff] }
  0x56   : > { %490 = vmatpush.bf16.msra.mxu0 %v805_v21 }
  0x5a   : > { %491 = vmatpush.bf16.msra.mxu0 %v804_v22 }
  0x5e   : > { %492 = vmatpush.bf16.msra.mxu0 %v803_v23 }
  0x62   : > { %493 = vmatpush.bf16.msra.mxu0 %v802_v24 }
  0x66   : > { %494 = vmatpush.bf16.msra.mxu0 %v801_v25 }
  0x6a   : > { %495 = vmatpush.bf16.msra.mxu0 %v800_v26 }
  0x6d   : > { %496 = vmatmul.bf16.vlgmr.msra.gmra.mxu0 %v799_v27 }
  0xea   : > { %v497_v29 = vpop.f32.mrf.mxu0 }
  0xeb   : > { %v502_v30 = vadd.f32 %v497_v29, %v414_v28 }
  0xed   : > { %504 = vst [vmem:[#allocation2] sm:$0xff] %v502_v30 }
  0xf1   : > { %509 = sbr.rel (%p794_p5) target bundleno = 314 (0x13a), region = 126 }
  0xf2   : > { %v499_v32 = vpop.f32.mrf.mxu0 }
  0xf3   : > { %v503_v33 = vadd.f32 %v499_v32, %v415_v31 }
  0xf5   : > { %505 = vst [vmem:[#allocation2 + $0x8] sm:$0xff] %v503_v33 }
  0xf6   : > { %v510_v34 = vld [vmem:[#allocation2] sm:$0xff]  ;;  %v996_v36 = vmov 8.0  }
  0xf7   : > { %v512_v35 = vrot.slane %v510_v34, 4  ;;  %901 = vrcp.f32 %v996_v36  ;;  %v899_v24 = vld [vmem:[%s404_s29] ss:$0 sm:$0xff] }
  0xf8   : > { %v900_v28 = vld [vmem:[%s407_s19] ss:$0 sm:$0xff] }
  0xf9   : > { %v513_v39 = vadd.f32 %v512_v35, %v510_v34 }
  0xfb   : > { %v514_v41 = vrot.slane %v513_v39, 2 }
  0xfc   : > { %v511_v37 = vld [vmem:[#allocation2 + $0x8] sm:$0xff] }
  0xfd   : > { %v547_v38 = vrot.slane %v511_v37, 4  ;;  %v902_v43 = vpop.eup %901  ;;  %v515_v44 = vadd.f32 %v514_v41, %v513_v39 }
  0xfe   : > { %v519_v45 = vmul.f32 8.0, %v902_v43  ;;  %vm523_vm0 = vweird.f32 %v902_v43 }
  0xff   : > { %v548_v40 = vadd.f32 %v547_v38, %v511_v37  ;;  %v516_v47 = vrot.slane %v515_v44, 1 }
 0x100   : > { %v520_v48 = vsub.f32 1.0, %v519_v45 }
 0x101   : > { %v549_v42 = vrot.slane %v548_v40, 2  ;;  %v517_v51 = vadd.f32 %v516_v47, %v515_v44 }
 0x102   : > { %v521_v50 = vmul.f32 %v902_v43, %v520_v48 }
 0x103   : > { %v550_v46 = vadd.f32 %v549_v42, %v548_v40 }
 0x104   : > { %v522_v53 = vadd.f32 %v902_v43, %v521_v50 }
 0x105   : > { %v551_v49 = vrot.slane %v550_v46, 1 }
 0x106   : > { %v524_v54 = vsel %vm523_vm0, %v902_v43, %v522_v53 }
 0x107   : > { %v552_v52 = vadd.f32 %v551_v49, %v550_v46  ;;  %v525_v55 = vmul.f32 %v524_v54, %v517_v51 }
 0x109   : > { %v553_v56 = vmul.f32 %v552_v52, %v524_v54  ;;  %v526_v57 = vsub.f32 %v510_v34, %v525_v55 }
 0x10b   : > { %v554_v58 = vsub.f32 %v511_v37, %v553_v56  ;;  %v527_v59 = vmul.f32 %v526_v57, %v526_v57 }
 0x10d   : > { %v555_v60 = vmul.f32 %v554_v58, %v554_v58  ;;  %v528_v61 = vrot.slane %v527_v59, 4 }
 0x10f   : > { %v556_v62 = vrot.slane %v555_v60, 4  ;;  %v529_v63 = vadd.f32 %v528_v61, %v527_v59 }
 0x111   : > { %v557_v0 = vadd.f32 %v556_v62, %v555_v60  ;;  %v530_v1 = vrot.slane %v529_v63, 2 }
 0x113   : > { %v558_v2 = vrot.slane %v557_v0, 2  ;;  %v531_v3 = vadd.f32 %v530_v1, %v529_v63 }
 0x115   : > { %v559_v4 = vadd.f32 %v558_v2, %v557_v0  ;;  %v532_v5 = vrot.slane %v531_v3, 1 }
 0x117   : > { %v560_v6 = vrot.slane %v559_v4, 1  ;;  %v533_v7 = vadd.f32 %v532_v5, %v531_v3 }
 0x119   : > { %v561_v8 = vadd.f32 %v560_v6, %v559_v4  ;;  %v534_v9 = vmul.f32 %v533_v7, %v524_v54 }
 0x11b   : > { %v562_v10 = vmul.f32 %v561_v8, %v524_v54  ;;  %v535_v11 = vadd.f32 1e-05, %v534_v9 }
 0x11d   : > { %v563_v12 = vadd.f32 1e-05, %v562_v10  ;;  %903 = vrsqrt.f32 %v535_v11  ;;  %vm542_vm1 = vweird.f32 %v535_v11 }
 0x11f   : > { %905 = vrsqrt.f32 %v563_v12  ;;  %vm570_vm3 = vweird.f32 %v563_v12 }
 0x123   : > { %v904_v13 = vpop.eup %903 }
 0x124   : > { %v537_v15 = vmul.f32 %v904_v13, %v535_v11  ;;  %vm543_vm2 = vweird.f32 %v904_v13 }
 0x125   : > { %v906_v14 = vpop.eup %905  ;;  %vm544_vm5 = vmor %vm542_vm1, %vm543_vm2 }
 0x126   : > { %v565_v16 = vmul.f32 %v906_v14, %v563_v12  ;;  %v538_v17 = vmul.f32 %v904_v13, %v537_v15  ;;  %vm571_vm4 = vweird.f32 %v906_v14 }
 0x127   : > { %vm572_vm6 = vmor %vm570_vm3, %vm571_vm4 }
 0x128   : > { %v566_v18 = vmul.f32 %v906_v14, %v565_v16  ;;  %v539_v19 = vmul.f32 0.5, %v538_v17 }
 0x12a   : > { %v567_v20 = vmul.f32 0.5, %v566_v18  ;;  %v540_v21 = vsub.f32 1.5, %v539_v19 }
 0x12c   : > { %v568_v22 = vsub.f32 1.5, %v567_v20  ;;  %v541_v23 = vmul.f32 %v904_v13, %v540_v21 }
 0x12e   : > { %v569_v25 = vmul.f32 %v906_v14, %v568_v22  ;;  %v545_v26 = vsel %vm544_vm5, %v904_v13, %v541_v23 }
 0x12f   : > { %v546_v27 = vmul.f32 %v545_v26, %v526_v57 }
 0x130   : > { %v573_v29 = vsel %vm572_vm6, %v906_v14, %v569_v25 }
 0x131   : > { %v574_v30 = vmul.f32 %v573_v29, %v554_v58  ;;  %v579_v31 = vmul.f32 %v899_v24, %v546_v27 }
 0x133   : > { %v580_v32 = vmul.f32 %v899_v24, %v574_v30  ;;  %v585_v33 = vadd.f32 %v900_v28, %v579_v31 }
 0x135   : > { %v586_v34 = vadd.f32 %v900_v28, %v580_v32  ;;  %v587_v35 = vmax.f32 %v585_v33, 0.0 }
 0x137   : > { %v588_v36 = vmax.f32 %v586_v34, 0.0  ;;  %589 = vst [vmem:[%s1174_s20] sm:$0xff] %v587_v35 }
 0x139   : > { %590 = vst [vmem:[%s1174_s20 + $0x8] sm:$0xff] %v588_v36 }
 0x13a PF: > { %597 = sbr.rel (!%p1116_p12) target bundleno = 322 (0x142), region = 130  ;;  %s796_s10 = sshll.u32 (%p1116_p12), %s981_s22, 3 }
 0x13b   : > { %s599_s11 = scalar_lea.vmem (%p1116_p12), %s1235_s4, %s796_s10 }
 0x13e   : > { %v630_v37 = vld [vmem:[%s1174_s20] sm:$0xff] (%p1116_p12) }
 0x13f   : > { %631 = vst [vmem:[%s599_s11] sm:$0xff] %v630_v37 }
 0x140   : > { %v632_v38 = vld [vmem:[%s1174_s20 + $0x8] sm:$0xff] }
 0x141   : > { %633 = vst [vmem:[%s599_s11 + $0x18] sm:$0xff] %v632_v38 }
 0x142 PF: > { %s14_s25 = sadd.s32 1, %s993_s25   ;;  %s1246_s19 = sld [smem:[#allocation6_spill]] }
 0x143   : > { %p11_p6 = scmp.ge.s32.totalorder %s14_s25, 11   ;;  %s1247_s20 = sld [smem:[#allocation9_spill]] }
 0x144   : > { %s1248_s14 = sld [smem:[#allocation7_spill]]  ;;  %s1250_s15 = smov %s957_s16 }
 0x145   : > { %s1249_s26 = sld [smem:[#allocation8_spill]]  ;;  %s1251_s16 = smov %s1114_s13 }
 0x146   : > { %s1252_s17 = smov %s965_s18  ;;  %s1253_s18 = smov %s1111_s12 }
 0x147   : > { %s1254_s21 = smov %s985_s23  ;;  %s1255_s22 = smov %s989_s24 }
 0x148   :  { %13 = sbr.rel (!%p11_p6) target bundleno = 6 (0x6), region = 213 }
 0x14a   : > { %s1256_s23 = smov %s1248_s14 }
 0x14b   : > { %s1257_s24 = smov %s1249_s26 }

// kernel: forward.8
= control target key start
LH: loop header
LB: loop body
LE: loop exit
PB: predicated region body
PF: predicated region fallthrough
CT: control target
= control target key end

     0   :  { %s825_s9 = smov 0   ;;  %s827_s10 = smov 0   ;;  %s1009_s0 = inlined_call_operand.vmem [shape: bf16[16,384], index: 0, kind: input, shape index: {}]   ;;  %s1010_s1 = inlined_call_operand.vmem [shape: bf16[384,384], index: 1, kind: input, shape index: {}]   ;;  %s1011_s2 = inlined_call_operand.vmem [shape: f32[16,384], index: 2, kind: output, shape index: {}]  }
   0x1   :  { %s829_s11 = smov 0   ;;  %s831_s12 = smov 0  }
   0x2   :  { %s833_s13 = smov 0   ;;  %s835_s14 = smov 0  }
   0x3   :  { %s837_s15 = smov 0   ;;  %s839_s16 = smov 0  }
   0x4   :  { %s841_s17 = smov 0   ;;  %s843_s18 = smov 0  }
   0x5   :  { %s845_s19 = smov 0  }
   0x6 LB: > { %s566_s20 = sadd.s32 4294967295, %s807_s19   ;;  %s21_s21 = sadd.s32 1, %s799_s17  ;;  %s807_s19 = sphi %s845_s19, %s12_s19   ;;  %s803_s18 = sphi %s843_s18, %s1030_s18   ;;  %s799_s17 = sphi %s841_s17, %s1029_s17   ;;  %s795_s16 = sphi %s839_s16, %s1028_s16   ;;  %s791_s15 = sphi %s837_s15, %s1027_s15   ;;  %s787_s14 = sphi %s835_s14, %s1026_s14   ;;  %s783_s13 = sphi %s833_s13, %s1025_s13   ;;  %s779_s12 = sphi %s831_s12, %s1024_s12   ;;  %s775_s11 = sphi %s829_s11, %s1023_s11   ;;  %s771_s10 = sphi %s827_s10, %s1022_s10   ;;  %s767_s9 = sphi %s825_s9, %s1021_s9  }
   0x7   : > { %p22_p0 = scmp.ge.s32.totalorder %s21_s21, 3  ;;  %s24_s22 = sadd.s32 1, %s803_s18 }
   0x8   : > { %s31_s23 = sadd.s32 1, %s787_s14  ;;  %p38_p1 = scmp.ne.s32.totalorder %s787_s14, %s783_s13 }
   0x9   : > { %s1032_s21 = smov (%p22_p0, %s21_s21), 0  ;;  %s1034_s22 = smov (!%p22_p0, %s24_s22), %s803_s18 }
   0xa   : > { %1014 = sst [smem:[#allocation6_spill]] %s1032_s21  ;;  %s28_s24 = ssub.s32 %s799_s17, %s1032_s21 }
   0xb   : > { %p39_p2 = scmp.eq.s32.totalorder %s807_s19, 0  ;;  %p26_p3 = scmp.ge.s32.totalorder %s1034_s22, 3 }
   0xc   : > { %p29_p4 = scmp.eq.s32.totalorder %s28_s24, 0  ;;  %s59_s26 = sadd.s32 1, %s779_s12 }
   0xd   : > { %p892_p5 = por %p39_p2, %p38_p1  ;;  %s1036_s22 = smov (%p26_p3, %s1034_s22), 0 }
   0xe   : > { %1016 = sst [smem:[#allocation7_spill]] %s1036_s22  ;;  %s55_s28 = ssub.s32 %s803_s18, %s1036_s22 }
   0xf   : > { %s900_s27 = scalar_select %p29_p4, %s787_s14, %s31_s23  }
  0x10   : > { %p66_p6 = scmp.ne.s32.totalorder %s779_s12, %s775_s11  ;;  %s56_s29 = sor.u32 %s55_s28, %s28_s24 }
  0x11   : > { %p83_p7 = scmp.eq.s32.totalorder %s55_s28, 0  ;;  %p57_p8 = scmp.eq.s32.totalorder %s56_s29, 0 }
  0x12   : > { %p906_p9 = por %p66_p6, %p39_p2  ;;  %s85_s3 = sadd.s32 1, %s771_s10 }
  0x13   : > { %p95_p10 = scmp.ne.s32.totalorder %s771_s10, %s767_s9  ;;  %p96_p11 = scmp.eq.s32.totalorder %s566_s20, 8 }
  0x14   : > { %s914_s4 = scalar_select %p57_p8, %s779_s12, %s59_s26  }
  0x15   : > { %s917_s5 = scalar_select %p83_p7, %s771_s10, %s85_s3  }
  0x16   : > { %p919_p12 = por %p96_p11, %p95_p10  ;;  %p569_p13 = scmp.ge.s32.totalorder %s807_s19, 9 }
  0x18   : > { %118 = sbr.rel (%p569_p13) target bundleno = 58 (0x3a), region = 16 }
  0x1d   : > { %121 = sbr.rel (!%p892_p5) target bundleno = 35 (0x23), region = 20  ;;  %s123_s7 = sand.u32 (%p892_p5), 1, %s787_s14  }
  0x1e   : > { %s571_s8 = sshll.u32 (%p892_p5), %s799_s17, 2  ;;  %s570_s23 = sshll.u32 (%p892_p5), %s123_s7, 3 }
  0x1f   : > { %s127_s28 = scalar_lea.vmem (%p892_p5), %s1009_s0, %s571_s8  ;;  %s125_s20 = scalar_lea.vmem (%p892_p5), [#allocation3], %s570_s23 }
  0x20   : > { %v144_v0 = vld [vmem:[%s127_s28] sm:$0xf] (%p892_p5)  ;;  %v146_v1 = vld [vmem:[%s127_s28 + $0xc] sm:$0xf] (%p892_p5) }
  0x21   : > { %145 = vst [vmem:[%s125_s20] sm:$0xf] (%p892_p5), %v144_v0 }
  0x22   : > { %147 = vst [vmem:[%s125_s20 + $0x4] sm:$0xf] %v146_v1 }
  0x23 PF: > { %175 = sbr.rel (!%p906_p9) target bundleno = 58 (0x3a), region = 61  ;;  %s177_s25 = sand.u32 (%p906_p9), 1, %s779_s12  }
  0x24   : > { %s631_s29 = smul.u32 (%p906_p9), 48, %s799_s17  ;;  %s572_s3 = sshll.u32 (%p906_p9), %s177_s25, 6 }
  0x25   : > { %s179_s30 = scalar_lea.vmem (%p906_p9), [#allocation4], %s572_s3 }
  0x26   : > { %s182_s7 = sadd.s32 (%p906_p9), %s803_s18, %s631_s29 }
  0x27   : > { %s575_s22 = sshll.u32 (%p906_p9), %s182_s7, 2 }
  0x28   : > { %s939_s8 = scalar_lea.vmem %s1010_s1, %s575_s22 }
  0x29   : > { %v201_v2 = vld [vmem:[%s939_s8] sm:$0xf]  ;;  %v203_v3 = vld [vmem:[%s939_s8 + $0xc] sm:$0xf]  ;;  %v205_v4 = vld [vmem:[%s939_s8 + $0x18] sm:$0xf] }
  0x2a   : > { %202 = vst [vmem:[%s179_s30] sm:$0xf] %v201_v2  ;;  %v207_v5 = vld [vmem:[%s939_s8 + $0x24] sm:$0xf]  ;;  %v209_v6 = vld [vmem:[%s939_s8 + $0x30] sm:$0xf] }
  0x2b   : > { %204 = vst [vmem:[%s179_s30 + $0x4] sm:$0xf] %v203_v3  ;;  %v211_v7 = vld [vmem:[%s939_s8 + $0x3c] sm:$0xf]  ;;  %v213_v8 = vld [vmem:[%s939_s8 + $0x48] sm:$0xf] }
  0x2c   : > { %206 = vst [vmem:[%s179_s30 + $0x8] sm:$0xf] %v205_v4  ;;  %v215_v9 = vld [vmem:[%s939_s8 + $0x54] sm:$0xf]  ;;  %v217_v10 = vld [vmem:[%s939_s8 + $0x60] sm:$0xf] }
  0x2d   : > { %208 = vst [vmem:[%s179_s30 + $0xc] sm:$0xf] %v207_v5  ;;  %v219_v11 = vld [vmem:[%s939_s8 + $0x6c] sm:$0xf]  ;;  %v221_v12 = vld [vmem:[%s939_s8 + $0x78] sm:$0xf] }
  0x2e   : > { %210 = vst [vmem:[%s179_s30 + $0x10] sm:$0xf] %v209_v6  ;;  %v223_v13 = vld [vmem:[%s939_s8 + $0x84] sm:$0xf]  ;;  %v225_v14 = vld [vmem:[%s939_s8 + $0x90] sm:$0xf] }
  0x2f   : > { %212 = vst [vmem:[%s179_s30 + $0x14] sm:$0xf] %v211_v7  ;;  %v227_v15 = vld [vmem:[%s939_s8 + $0x9c] sm:$0xf]  ;;  %v229_v16 = vld [vmem:[%s939_s8 + $0xa8] sm:$0xf] }
  0x30   : > { %214 = vst [vmem:[%s179_s30 + $0x18] sm:$0xf] %v213_v8  ;;  %v231_v17 = vld [vmem:[%s939_s8 + $0xb4] sm:$0xf] }
  0x31   : > { %216 = vst [vmem:[%s179_s30 + $0x1c] sm:$0xf] %v215_v9 }
  0x32   : > { %218 = vst [vmem:[%s179_s30 + $0x20] sm:$0xf] %v217_v10 }
  0x33   : > { %220 = vst [vmem:[%s179_s30 + $0x24] sm:$0xf] %v219_v11 }
  0x34   : > { %222 = vst [vmem:[%s179_s30 + $0x28] sm:$0xf] %v221_v12 }
  0x35   : > { %224 = vst [vmem:[%s179_s30 + $0x2c] sm:$0xf] %v223_v13 }
  0x36   : > { %226 = vst [vmem:[%s179_s30 + $0x30] sm:$0xf] %v225_v14 }
  0x37   : > { %228 = vst [vmem:[%s179_s30 + $0x34] sm:$0xf] %v227_v15 }
  0x38   : > { %230 = vst [vmem:[%s179_s30 + $0x38] sm:$0xf] %v229_v16 }
  0x39   : > { %232 = vst [vmem:[%s179_s30 + $0x3c] sm:$0xf] %v231_v17 }
  0x3a PF: > { %p576_p0 = scmp.ge.s32.totalorder %s807_s19, 1  ;;  %p287_p1 = scmp.lt.s32.totalorder %s807_s19, 10 }
  0x3c   : > { %p288_p2 = pnand %p576_p0, %p287_p1 }
  0x3d   : > { %s294_s21 = sand.u32 (!%p288_p2), 1, %s783_s13   ;;  %s301_s22 = sand.u32 (!%p288_p2), 1, %s775_s11  }
  0x3e   : > { %291 = sbr.rel (%p288_p2) target bundleno = 261 (0x105), region = 102  ;;  %s577_s23 = sshll.u32 (!%p288_p2), %s294_s21, 3 }
  0x3f   : > { %s578_s26 = sshll.u32 (!%p288_p2), %s301_s22, 6  ;;  %s322_s28 = sand.u32 (!%p288_p2), 1, %s767_s9  }
  0x40   : > { %s579_s20 = sshll.u32 (!%p288_p2), %s322_s28, 4  ;;  %s296_s25 = scalar_lea.vmem (!%p288_p2), [#allocation3], %s577_s23 }
  0x41   : > { %s303_s29 = scalar_lea.vmem (!%p288_p2), [#allocation4], %s578_s26  ;;  %s962_s3 = scalar_lea.vmem (!%p288_p2), [#allocation5], %s579_s20 }
  0x42   : > { %p580_p3 = scmp.ne.s32.totalorder (!%p288_p2), %s791_s15, 0 }
  0x44   : > { %329 = sbr.rel (%p580_p3) target bundleno = 76 (0x4c), region = 114 }
  0x49   : > { %v809_v18 = vmov 0.0  }
  0x4a   : > { %330 = vst [vmem:[#allocation2] sm:$0xff] %v809_v18 }
  0x4b   : > { %331 = vst [vmem:[#allocation2 + $0x8] sm:$0xff] %v809_v18 }
  0x4c PF: > { %v630_v19 = vld [vmem:[%s303_s29 + $0x38] sm:$0xff]  ;;  %v629_v20 = vld [vmem:[%s303_s29 + $0x30] sm:$0xff]  ;;  %v628_v21 = vld [vmem:[%s303_s29 + $0x28] sm:$0xff]  ;;  %p617_p4 = scmp.ne.s32.totalorder %s791_s15, 2 }
  0x4d   : > { %406 = vmatpush.bf16.msra.mxu0 %v630_v19  ;;  %v627_v22 = vld [vmem:[%s303_s29 + $0x20] sm:$0xff]  ;;  %v626_v23 = vld [vmem:[%s303_s29 + $0x18] sm:$0xff]  ;;  %v625_v24 = vld [vmem:[%s303_s29 + $0x10] sm:$0xff] }
  0x4e   : > { %v624_v25 = vld [vmem:[%s303_s29 + $0x8] sm:$0xff]  ;;  %v623_v26 = vld [vmem:[%s303_s29] sm:$0xff]  ;;  %v622_v27 = vld [vmem:[%s296_s25] sm:$0xff] }
  0x51   : > { %407 = vmatpush.bf16.msra.mxu0 %v629_v20  ;;  %v332_v28 = vld [vmem:[#allocation2] sm:$0xff] }
  0x52   : > { %v333_v31 = vld [vmem:[#allocation2 + $0x8] sm:$0xff] }
  0x55   : > { %408 = vmatpush.bf16.msra.mxu0 %v628_v21 }
  0x59   : > { %409 = vmatpush.bf16.msra.mxu0 %v627_v22 }
  0x5d   : > { %410 = vmatpush.bf16.msra.mxu0 %v626_v23 }
  0x61   : > { %411 = vmatpush.bf16.msra.mxu0 %v625_v24 }
  0x65   : > { %412 = vmatpush.bf16.msra.mxu0 %v624_v25 }
  0x69   : > { %413 = vmatpush.bf16.msra.mxu0 %v623_v26 }
  0x6c   : > { %414 = vmatmul.bf16.vlgmr.msra.gmra.mxu0 %v622_v27 }
  0xe9   : > { %v415_v29 = vpop.f32.mrf.mxu0 }
  0xea   : > { %v420_v30 = vadd.f32 %v415_v29, %v332_v28 }
  0xec   : > { %422 = vst [vmem:[#allocation2] sm:$0xff] %v420_v30 }
  0xf0   : > { %427 = sbr.rel (%p617_p4) target bundleno = 253 (0xfd), region = 118 }
  0xf1   : > { %v417_v32 = vpop.f32.mrf.mxu0 }
  0xf2   : > { %v421_v33 = vadd.f32 %v417_v32, %v333_v31 }
  0xf4   : > { %423 = vst [vmem:[#allocation2 + $0x8] sm:$0xff] %v421_v33 }
  0xf5   : > { %v428_v34 = vld [vmem:[#allocation2] sm:$0xff] }
  0xf6   : > { %430 = vst [vmem:[%s962_s3] sm:$0xff] %v428_v34 }
  0xfb   : > { %v429_v35 = vld [vmem:[#allocation2 + $0x8] sm:$0xff] }
  0xfc   : > { %431 = vst [vmem:[%s962_s3 + $0x8] sm:$0xff] %v429_v35 }
  0xfd PF: > { %438 = sbr.rel (!%p919_p12) target bundleno = 261 (0x105), region = 122  ;;  %s619_s9 = sshll.u32 (%p919_p12), %s795_s16, 3  ;;  %v471_v36 = vld [vmem:[%s962_s3] sm:$0xff] (%p919_p12) }
  0xfe   : > { %s440_s15 = scalar_lea.vmem (%p919_p12), %s1011_s2, %s619_s9 }
  0xff   : > { %472 = vst [vmem:[%s440_s15] sm:$0xff] (%p919_p12), %v471_v36 }
 0x103   : > { %v473_v37 = vld [vmem:[%s962_s3 + $0x8] sm:$0xff] }
 0x104   : > { %474 = vst [vmem:[%s440_s15 + $0x18] sm:$0xff] %v473_v37 }
 0x105 PF: > { %s12_s19 = sadd.s32 1, %s807_s19   ;;  %s1019_s6 = sld [smem:[#allocation6_spill]] }
 0x106   : > { %p9_p5 = scmp.ge.s32.totalorder %s12_s19, 11   ;;  %s1020_s7 = sld [smem:[#allocation7_spill]] }
 0x107   : > { %s1021_s9 = smov %s771_s10  ;;  %s1022_s10 = smov %s917_s5 }
 0x108   : > { %s1023_s11 = smov %s779_s12  ;;  %s1024_s12 = smov %s914_s4 }
 0x109   : > { %s1025_s13 = smov %s787_s14  ;;  %s1026_s14 = smov %s900_s27 }
 0x10a   : > { %s1027_s15 = smov %s799_s17  ;;  %s1028_s16 = smov %s803_s18 }
 0x10b   : > { %s1029_s17 = smov %s1019_s6  ;;  %11 = sbr.rel (!%p9_p5) target bundleno = 6 (0x6), region = 199 }
 0x10c   : > { %s1030_s18 = smov %s1020_s7 }

// kernel: forward.9
= control target key start
LH: loop header
LB: loop body
LE: loop exit
PB: predicated region body
PF: predicated region fallthrough
CT: control target
= control target key end

     0   :  { %7 = vsyncpa [#allocation4], 0  ;;  %s860_s9 = smov 0   ;;  %s862_s10 = smov 0   ;;  %s1057_s0 = inlined_call_operand.vmem [shape: f32[8,384], index: 0, kind: input, shape index: {}]   ;;  %s1058_s1 = inlined_call_operand.vmem [shape: f32[8,384], index: 1, kind: input, shape index: {}]   ;;  %s1059_s2 = inlined_call_operand.hbm [shape: f32[1,1], index: 2, kind: output, shape index: {}]  }
   0x1   :  { %s864_s11 = smov 0   ;;  %s866_s12 = smov 0  }
   0x2   :  { %s868_s13 = smov 0  }
   0x3 LB: > { %s663_s14 = sadd.s32 4294967295, %s840_s13   ;;  %s22_s15 = sadd.s32 1, %s832_s11  ;;  %s840_s13 = sphi %s868_s13, %s13_s13   ;;  %s836_s12 = sphi %s866_s12, %s1064_s12   ;;  %s832_s11 = sphi %s864_s11, %s1063_s11   ;;  %s828_s10 = sphi %s862_s10, %s1062_s10   ;;  %s824_s9 = sphi %s860_s9, %s1061_s9  }
   0x4   : > { %p23_p0 = scmp.ge.s32.totalorder %s22_s15, 3  ;;  %s25_s16 = sadd.s32 1, %s836_s12 }
   0x5   : > { %p666_p1 = scmp.ge.s32.totalorder %s840_s13, 1  ;;  %p128_p2 = scmp.lt.s32.totalorder %s840_s13, 10 }
   0x6   : > { %s1066_s15 = smov (%p23_p0, %s22_s15), 0  ;;  %s1068_s16 = smov (!%p23_p0, %s25_s16), %s836_s12 }
   0x7   : > { %p129_p3 = pnand %p666_p1, %p128_p2  ;;  %p27_p4 = scmp.ge.s32.totalorder %s1068_s16, 3 }
   0x8   : > { %p148_p5 = scmp.lt.s32.totalorder (!%p129_p3), %s828_s10, 2  ;;  %p152_p6 = scmp.lt.s32.totalorder (!%p129_p3), %s824_s9, 2 }
   0x9   : > { %s1070_s16 = smov (%p27_p4, %s1068_s16), 0  ;;  %132 = sbr.rel (%p129_p3) target bundleno = 709 (0x2c5), region = 28 }
   0xa   : > { %p156_p7 = scmp.eq.s32.totalorder (!%p129_p3), %s828_s10, 0  ;;  %p157_p8 = scmp.eq.s32.totalorder (!%p129_p3), %s824_s9, 0 }
   0xc   : > { %p158_p9 = pnand (!%p129_p3), %p157_p8, %p156_p7 }
   0xe   : > { %s149_s17 = scalar_select %p148_p5, %s828_s10, 2 }
   0xf   : > { %s153_s18 = scalar_select %p152_p6, %s824_s9, 2 }
  0x10   : > { %s667_s19 = sshll.u32 %s149_s17, 3  ;;  %161 = sbr.rel (%p158_p9) target bundleno = 23 (0x17), region = 32 }
  0x11   : > { %s151_s22 = scalar_lea.vmem %s1057_s0, %s667_s19  ;;  %s668_s23 = sshll.u32 %s153_s18, 3 }
  0x12   : > { %s155_s26 = scalar_lea.vmem %s1058_s1, %s668_s23 }
  0x15   : > { %vm162_vm0 = vcmask 0   ;;  %v842_v0 = vmov 0.0  }
  0x16   : > { %163 = vst.msk [vmem:[#allocation2] sm:$0x1] %vm162_vm0, %v842_v0 }
  0x17 PF: > { %v164_v1 = vld [vmem:[%s151_s22] sm:$0xff]  ;;  %v843_v3 = vmov 8.0   ;;  %vm261_vm8 = vcmask 64512   ;;  %s685_s27 = sshll.u32 %s828_s10, 7  ;;  %s686_s28 = sshll.u32 %s824_s9, 7 }
  0x18   : > { %v165_v2 = vrot.slane %v164_v1, 4  ;;  %764 = vrcp.f32 %v843_v3  ;;  %v200_v21 = vld [vmem:[%s155_s26] sm:$0xff]  ;;  %p583_p10 = scmp.eq.s32.totalorder %s828_s10, 2  ;;  %p584_p11 = scmp.eq.s32.totalorder %s824_s9, 2 }
  0x19   : > { %v201_v22 = vrot.slane %v200_v21, 4 }
  0x1a   : > { %v166_v4 = vadd.f32 %v165_v2, %v164_v1  ;;  %p1031_p12 = pnand %p584_p11, %p583_p10 }
  0x1b   : > { %v202_v24 = vadd.f32 %v201_v22, %v200_v21  ;;  %v930_v22 = vstv %s685_s27 }
  0x1c   : > { %v167_v5 = vrot.slane %v166_v4, 2 }
  0x1d   : > { %v203_v26 = vrot.slane %v202_v24, 2 }
  0x1e   : > { %v765_v6 = vpop.eup %764  ;;  %v168_v7 = vadd.f32 %v167_v5, %v166_v4 }
  0x1f   : > { %v172_v8 = vmul.f32 8.0, %v765_v6  ;;  %vm176_vm1 = vweird.f32 %v765_v6  ;;  %v204_v28 = vadd.f32 %v203_v26, %v202_v24 }
  0x20   : > { %v169_v9 = vrot.slane %v168_v7, 1 }
  0x21   : > { %v173_v10 = vsub.f32 1.0, %v172_v8  ;;  %v205_v30 = vrot.slane %v204_v28, 1 }
  0x22   : > { %v170_v12 = vadd.f32 %v169_v9, %v168_v7 }
  0x23   : > { %v174_v11 = vmul.f32 %v765_v6, %v173_v10  ;;  %v206_v32 = vadd.f32 %v205_v30, %v204_v28 }
  0x25   : > { %v175_v13 = vadd.f32 %v765_v6, %v174_v11 }
  0x27   : > { %v177_v14 = vsel %vm176_vm1, %v765_v6, %v175_v13 }
  0x28   : > { %v178_v15 = vmul.f32 %v177_v14, %v170_v12  ;;  %v207_v33 = vmul.f32 %v206_v32, %v177_v14 }
  0x2a   : > { %v179_v16 = vsub.f32 %v164_v1, %v178_v15  ;;  %v208_v34 = vsub.f32 %v200_v21, %v207_v33  ;;  %v391_v15 = vlaneseq }
  0x2c   : > { %v180_v17 = vmul.f32 %v179_v16, %v179_v16  ;;  %v209_v35 = vmul.f32 %v208_v34, %v208_v34  ;;  %v427_v21 = vand.u32 127, %v391_v15 }
  0x2e   : > { %v181_v18 = vrot.slane %v180_v17, 4  ;;  %v210_v38 = vrot.slane %v209_v35, 4 }
  0x30   : > { %v182_v19 = vadd.f32 %v181_v18, %v180_v17  ;;  %v211_v40 = vadd.f32 %v210_v38, %v209_v35  ;;  %v923_v17 = vshrl.u32 %v391_v15, 7 }
  0x32   : > { %v183_v20 = vrot.slane %v182_v19, 2  ;;  %v212_v42 = vrot.slane %v211_v40, 2  ;;  %v394_v26 = vadd.s32 16, %v923_v17  ;;  %v410_v28 = vadd.s32 %v930_v22, %v923_v17 }
  0x33   : > { %v395_v30 = vadd.s32 24, %v923_v17  ;;  %v396_v35 = vadd.s32 32, %v923_v17 }
  0x34   : > { %v184_v23 = vadd.f32 %v183_v20, %v182_v19  ;;  %v213_v44 = vadd.f32 %v212_v42, %v211_v40  ;;  %v393_v19 = vadd.s32 8, %v923_v17 }
  0x35   : > { %v413_v40 = vadd.s32 %v930_v22, %v395_v30 }
  0x36   : > { %v185_v25 = vrot.slane %v184_v23, 1  ;;  %v214_v46 = vrot.slane %v213_v44, 1 }
  0x38   : > { %v186_v27 = vadd.f32 %v185_v25, %v184_v23  ;;  %v215_v48 = vadd.f32 %v214_v46, %v213_v44  ;;  %v429_v23 = vstv %s686_s28  ;;  %v411_v25 = vadd.s32 %v930_v22, %v393_v19 }
  0x39   : > { %v414_v46 = vadd.s32 %v930_v22, %v396_v35 }
  0x3a   : > { %v187_v29 = vmul.f32 %v186_v27, %v177_v14  ;;  %v216_v50 = vmul.f32 %v215_v48, %v177_v14 }
  0x3c   : > { %v188_v31 = vadd.f32 1e-05, %v187_v29  ;;  %v217_v51 = vadd.f32 1e-05, %v216_v50  ;;  %v936_v29 = vadd.s32 %v429_v23, %v427_v21 }
  0x3e   : > { %766 = vrsqrt.f32 %v188_v31  ;;  %vm195_vm2 = vweird.f32 %v188_v31  ;;  %vm224_vm5 = vweird.f32 %v217_v51  ;;  %vm432_vm9 = vcmp.eq.s32.totalorder %v411_v25, %v936_v29 }
  0x3f   : > { %768 = vrsqrt.f32 %v217_v51  ;;  %vm431_vm10 = vcmp.eq.s32.totalorder %v410_v28, %v936_v29  ;;  %vm434_vm12 = vcmp.eq.s32.totalorder %v413_v40, %v936_v29  ;;  %vm435_vm13 = vcmp.eq.s32.totalorder %v414_v46, %v936_v29 }
  0x40   : > { %v401_v25 = vadd.s32 72, %v923_v17 }
  0x42   : > { %v419_v40 = vadd.s32 %v930_v22, %v401_v25 }
  0x44   : > { %v767_v36 = vpop.eup %766 }
  0x45   : > { %v190_v37 = vmul.f32 %v767_v36, %v188_v31  ;;  %vm196_vm3 = vweird.f32 %v767_v36  ;;  %v769_v52 = vpop.eup %768 }
  0x46   : > { %vm197_vm4 = vmor %vm195_vm2, %vm196_vm3  ;;  %v219_v53 = vmul.f32 %v769_v52, %v217_v51  ;;  %vm225_vm6 = vweird.f32 %v769_v52  ;;  %vm440_vm2 = vcmp.eq.s32.totalorder %v419_v40, %v936_v29 }
  0x47   : > { %v191_v39 = vmul.f32 %v767_v36, %v190_v37  ;;  %vm226_vm7 = vmor %vm224_vm5, %vm225_vm6  ;;  %v397_v37 = vadd.s32 40, %v923_v17 }
  0x48   : > { %v220_v54 = vmul.f32 %v769_v52, %v219_v53 }
  0x49   : > { %v192_v41 = vmul.f32 0.5, %v191_v39  ;;  %v415_v48 = vadd.s32 %v930_v22, %v397_v37  ;;  %v402_v37 = vadd.s32 80, %v923_v17 }
  0x4a   : > { %v221_v55 = vmul.f32 0.5, %v220_v54 }
  0x4b   : > { %v193_v43 = vsub.f32 1.5, %v192_v41  ;;  %vm436_vm14 = vcmp.eq.s32.totalorder %v415_v48, %v936_v29 }
  0x4c   : > { %v222_v56 = vsub.f32 1.5, %v221_v55 }
  0x4d   : > { %v194_v45 = vmul.f32 %v767_v36, %v193_v43 }
  0x4e   : > { %v223_v57 = vmul.f32 %v769_v52, %v222_v56 }
  0x4f   : > { %v198_v47 = vsel %vm197_vm4, %v767_v36, %v194_v45 }
  0x50   : > { %v199_v49 = vmul.f32 %v198_v47, %v179_v16  ;;  %v227_v58 = vsel %vm226_vm7, %v769_v52, %v223_v57 }
  0x51   : > { %v228_v59 = vmul.f32 %v227_v58, %v208_v34  ;;  %v412_v34 = vadd.s32 %v930_v22, %v394_v26 }
  0x52   : > { %229 = vxpose.xlu0.b32.start.end [1/1] (short) %v199_v49, 128  ;;  %v398_v49 = vadd.s32 48, %v923_v17 }
  0x53   : > { %325 = vmatpush.msra.mxu0 %v228_v59  ;;  %707 = vmatpush.msra.mxu1 %v228_v59  ;;  %vm433_vm11 = vcmp.eq.s32.totalorder %v412_v34, %v936_v29 }
  0x54   : > { %708 = vmatpush.msra.mxu2 %v228_v59  ;;  %709 = vmatpush.msra.mxu3 %v228_v59  ;;  %v399_v59 = vadd.s32 56, %v923_v17 }
  0xf6   : > { %v245_v60 = vpop.trf.xlu0 }
  0xf7   : > { %669 = vmatmul.msk.f32.vlgmr.msra.gmra.mxu0 %vm261_vm8, %v245_v60 }
  0xfe   : > { %v246_v61 = vpop.trf.xlu0 }
  0xff   : > { %670 = vmatmul.msk.f32.gmra.mxu0 %vm261_vm8, %v246_v61 }
 0x106   : > { %v247_v62 = vpop.trf.xlu0 }
 0x107   : > { %671 = vmatmul.msk.f32.gmra.mxu0 %vm261_vm8, %v247_v62  ;;  %v416_v62 = vadd.s32 %v930_v22, %v398_v49 }
 0x109   : > { %vm437_vm15 = vcmp.eq.s32.totalorder %v416_v62, %v936_v29 }
 0x10e   : > { %v248_v63 = vpop.trf.xlu0 }
 0x10f   : > { %672 = vmatmul.msk.f32.gmra.mxu0 %vm261_vm8, %v248_v63 }
 0x116   : > { %v249_v0 = vpop.trf.xlu0 }
 0x117   : > { %673 = vmatmul.msk.f32.vlgmr.msra.gmra.mxu1 %vm261_vm8, %v249_v0 }
 0x11e   : > { %v250_v1 = vpop.trf.xlu0 }
 0x11f   : > { %674 = vmatmul.msk.f32.gmra.mxu1 %vm261_vm8, %v250_v1 }
 0x126   : > { %v251_v2 = vpop.trf.xlu0 }
 0x127   : > { %675 = vmatmul.msk.f32.gmra.mxu1 %vm261_vm8, %v251_v2 }
 0x12e   : > { %v252_v3 = vpop.trf.xlu0 }
 0x12f   : > { %676 = vmatmul.msk.f32.gmra.mxu1 %vm261_vm8, %v252_v3 }
 0x136   : > { %v253_v4 = vpop.trf.xlu0 }
 0x137   : > { %677 = vmatmul.msk.f32.vlgmr.msra.gmra.mxu2 %vm261_vm8, %v253_v4 }
 0x13e   : > { %v254_v5 = vpop.trf.xlu0 }
 0x13f   : > { %678 = vmatmul.msk.f32.gmra.mxu2 %vm261_vm8, %v254_v5 }
 0x146   : > { %v255_v6 = vpop.trf.xlu0 }
 0x147   : > { %679 = vmatmul.msk.f32.gmra.mxu2 %vm261_vm8, %v255_v6 }
 0x14e   : > { %v256_v7 = vpop.trf.xlu0 }
 0x14f   : > { %680 = vmatmul.msk.f32.gmra.mxu2 %vm261_vm8, %v256_v7 }
 0x156   : > { %v257_v8 = vpop.trf.xlu0 }
 0x157   : > { %681 = vmatmul.msk.f32.vlgmr.msra.gmra.mxu3 %vm261_vm8, %v257_v8 }
 0x15e   : > { %v258_v9 = vpop.trf.xlu0 }
 0x15f   : > { %682 = vmatmul.msk.f32.gmra.mxu3 %vm261_vm8, %v258_v9 }
 0x166   : > { %v259_v10 = vpop.trf.xlu0 }
 0x167   : > { %683 = vmatmul.msk.f32.gmra.mxu3 %vm261_vm8, %v259_v10  ;;  %v417_v10 = vadd.s32 %v930_v22, %v399_v59 }
 0x169   : > { %vm438_vm0 = vcmp.eq.s32.totalorder %v417_v10, %v936_v29 }
 0x16e   : > { %v260_v11 = vpop.trf.xlu0 }
 0x16f   : > { %684 = vmatmul.msk.f32.gmra.mxu3 %vm261_vm8, %v260_v11  ;;  %v400_v11 = vadd.s32 64, %v923_v17 }
 0x174   : > { %v327_v12 = vpop.f32.mrf.mxu0 }
 0x175   : > { %v375_v27 = vmul.f32 0.125, %v327_v12 }
 0x177   : > { %v687_v38 = vadd.f32 -1.0, %v375_v27  ;;  %v520_v47 = vsel %vm431_vm10, 0.0, %v375_v27  ;;  %v418_v27 = vadd.s32 %v930_v22, %v400_v11 }
 0x178   : > { %v536_v57 = vmul.f32 %v520_v47, %v520_v47 }
 0x179   : > { %v463_v50 = vsel %vm431_vm10, %v687_v38, 0.0  ;;  %vm439_vm1 = vcmp.eq.s32.totalorder %v418_v27, %v936_v29 }
 0x17a   : > { %v479_v60 = vmul.f32 %v463_v50, %v463_v50  ;;  %v420_v50 = vadd.s32 %v930_v22, %v402_v37 }
 0x17c   : > { %v330_v13 = vpop.f32.mrf.mxu0  ;;  %vm441_vm3 = vcmp.eq.s32.totalorder %v420_v50, %v936_v29 }
 0x17d   : > { %v376_v24 = vmul.f32 0.125, %v330_v13 }
 0x17f   : > { %v688_v33 = vadd.f32 -1.0, %v376_v24  ;;  %v521_v42 = vsel %vm432_vm9, 0.0, %v376_v24 }
 0x180   : > { %v537_v51 = vmul.f32 %v521_v42, %v521_v42 }
 0x181   : > { %v464_v44 = vsel %vm432_vm9, %v688_v33, 0.0  ;;  %vm581_vm9 = vcmask 0  }
 0x182   : > { %v480_v53 = vmul.f32 %v464_v44, %v464_v44  ;;  %v552_v5 = vadd.f32 %v537_v51, %v536_v57  ;;  %v403_v44 = vadd.s32 88, %v923_v17 }
 0x184   : > { %v333_v16 = vpop.f32.mrf.mxu0  ;;  %v495_v4 = vadd.f32 %v480_v53, %v479_v60 }
 0x185   : > { %v377_v31 = vmul.f32 0.125, %v333_v16 }
 0x187   : > { %v689_v43 = vadd.f32 -1.0, %v377_v31  ;;  %v522_v55 = vsel %vm433_vm11, 0.0, %v377_v31 }
 0x188   : > { %v538_v0 = vmul.f32 %v522_v55, %v522_v55 }
 0x189   : > { %v465_v54 = vsel %vm433_vm11, %v689_v43, 0.0 }
 0x18a   : > { %v481_v63 = vmul.f32 %v465_v54, %v465_v54  ;;  %v553_v16 = vadd.f32 %v552_v5, %v538_v0 }
 0x18c   : > { %v336_v32 = vpop.f32.mrf.mxu0  ;;  %v496_v15 = vadd.f32 %v495_v4, %v481_v63 }
 0x18d   : > { %v378_v39 = vmul.f32 0.125, %v336_v32 }
 0x18f   : > { %v690_v52 = vadd.f32 -1.0, %v378_v39  ;;  %v523_v61 = vsel %vm434_vm12, 0.0, %v378_v39 }
 0x190   : > { %v539_v8 = vmul.f32 %v523_v61, %v523_v61 }
 0x191   : > { %v466_v1 = vsel %vm434_vm12, %v690_v52, 0.0  ;;  %v404_v52 = vadd.s32 96, %v923_v17 }
 0x192   : > { %v482_v13 = vmul.f32 %v466_v1, %v466_v1  ;;  %v554_v26 = vadd.f32 %v553_v16, %v539_v8 }
 0x193   : > { %v422_v1 = vadd.s32 %v930_v22, %v404_v52 }
 0x194   : > { %v339_v14 = vpop.f32.mrf.mxu1  ;;  %v497_v30 = vadd.f32 %v496_v15, %v482_v13 }
 0x195   : > { %v379_v45 = vmul.f32 0.125, %v339_v14  ;;  %vm443_vm5 = vcmp.eq.s32.totalorder %v422_v1, %v936_v29 }
 0x197   : > { %v691_v58 = vadd.f32 -1.0, %v379_v45  ;;  %v524_v6 = vsel %vm435_vm13, 0.0, %v379_v45 }
 0x199   : > { %v467_v9 = vsel %vm435_vm13, %v691_v58, 0.0  ;;  %v421_v58 = vadd.s32 %v930_v22, %v403_v44 }
 0x19a   : > { %v483_v21 = vmul.f32 %v467_v9, %v467_v9 }
 0x19b   : > { %vm442_vm4 = vcmp.eq.s32.totalorder %v421_v58, %v936_v29 }
 0x19c   : > { %v342_v18 = vpop.f32.mrf.mxu1  ;;  %v498_v38 = vadd.f32 %v497_v30, %v483_v21 }
 0x19d   : > { %v380_v56 = vmul.f32 0.125, %v342_v18  ;;  %v540_v18 = vmul.f32 %v524_v6, %v524_v6 }
 0x19f   : > { %v692_v7 = vadd.f32 -1.0, %v380_v56  ;;  %v525_v24 = vsel %vm436_vm14, 0.0, %v380_v56  ;;  %v555_v39 = vadd.f32 %v554_v26, %v540_v18 }
 0x1a0   : > { %v541_v35 = vmul.f32 %v525_v24, %v525_v24 }
 0x1a1   : > { %v468_v23 = vsel %vm436_vm14, %v692_v7, 0.0 }
 0x1a2   : > { %v484_v34 = vmul.f32 %v468_v23, %v468_v23  ;;  %v556_v49 = vadd.f32 %v555_v39, %v541_v35  ;;  %v407_v23 = vadd.s32 120, %v923_v17 }
 0x1a4   : > { %v345_v36 = vpop.f32.mrf.mxu1  ;;  %v499_v48 = vadd.f32 %v498_v38, %v484_v34  ;;  %v425_v38 = vadd.s32 %v930_v22, %v407_v23 }
 0x1a5   : > { %v381_v2 = vmul.f32 0.125, %v345_v36 }
 0x1a6   : > { %vm446_vm8 = vcmp.eq.s32.totalorder %v425_v38, %v936_v29 }
 0x1a7   : > { %v693_v19 = vadd.f32 -1.0, %v381_v2  ;;  %v526_v31 = vsel %vm437_vm15, 0.0, %v381_v2  ;;  %v406_v2 = vadd.s32 112, %v923_v17 }
 0x1a8   : > { %v542_v42 = vmul.f32 %v526_v31, %v526_v31 }
 0x1a9   : > { %v469_v36 = vsel %vm437_vm15, %v693_v19, 0.0  ;;  %v424_v16 = vadd.s32 %v930_v22, %v406_v2 }
 0x1aa   : > { %v557_v56 = vadd.f32 %v556_v49, %v542_v42 }
 0x1ab   : > { %vm445_vm7 = vcmp.eq.s32.totalorder %v424_v16, %v936_v29 }
 0x1ac   : > { %v348_v3 = vpop.f32.mrf.mxu1 }
 0x1ad   : > { %v382_v14 = vmul.f32 0.125, %v348_v3 }
 0x1af   : > { %v694_v32 = vadd.f32 -1.0, %v382_v14  ;;  %v527_v43 = vsel %vm438_vm0, 0.0, %v382_v14 }
 0x1b0   : > { %v543_v53 = vmul.f32 %v527_v43, %v527_v43 }
 0x1b1   : > { %v470_v45 = vsel %vm438_vm0, %v694_v32, 0.0 }
 0x1b2   : > { %v486_v57 = vmul.f32 %v470_v45, %v470_v45  ;;  %v558_v3 = vadd.f32 %v557_v56, %v543_v53 }
 0x1ba   : > { %v928_v20 = vpop.f32.mrf.mxu2 }
 0x1bb   : > { %v383_v33 = vmul.f32 0.125, %v928_v20  ;;  %v485_v20 = vmul.f32 %v469_v36, %v469_v36 }
 0x1bd   : > { %v695_v46 = vadd.f32 -1.0, %v383_v33  ;;  %v528_v54 = vsel %vm439_vm1, 0.0, %v383_v33  ;;  %v500_v60 = vadd.f32 %v499_v48, %v485_v20 }
 0x1be   : > { %v544_v0 = vmul.f32 %v528_v54, %v528_v54 }
 0x1bf   : > { %v471_v61 = vsel %vm439_vm1, %v695_v46, 0.0  ;;  %v501_v7 = vadd.f32 %v500_v60, %v486_v57 }
 0x1c0   : > { %v487_v8 = vmul.f32 %v471_v61, %v471_v61  ;;  %v559_v14 = vadd.f32 %v558_v3, %v544_v0 }
 0x1c2   : > { %v945_v41 = vpop.f32.mrf.mxu2  ;;  %v502_v24 = vadd.f32 %v501_v7, %v487_v8 }
 0x1c3   : > { %v384_v47 = vmul.f32 0.125, %v945_v41  ;;  %v405_v41 = vadd.s32 104, %v923_v17 }
 0x1c5   : > { %v696_v62 = vadd.f32 -1.0, %v384_v47  ;;  %v529_v4 = vsel %vm440_vm2, 0.0, %v384_v47  ;;  %v423_v9 = vadd.s32 %v930_v22, %v405_v41 }
 0x1c6   : > { %v545_v15 = vmul.f32 %v529_v4, %v529_v4 }
 0x1c7   : > { %v472_v10 = vsel %vm440_vm2, %v696_v62, 0.0  ;;  %vm444_vm6 = vcmp.eq.s32.totalorder %v423_v9, %v936_v29 }
 0x1c8   : > { %v488_v25 = vmul.f32 %v472_v10, %v472_v10  ;;  %v560_v33 = vadd.f32 %v559_v14, %v545_v15 }
 0x1ca   : > { %v357_v12 = vpop.f32.mrf.mxu2  ;;  %v503_v39 = vadd.f32 %v502_v24, %v488_v25 }
 0x1cb   : > { %v385_v55 = vmul.f32 0.125, %v357_v12 }
 0x1cd   : > { %v697_v5 = vadd.f32 -1.0, %v385_v55  ;;  %v530_v11 = vsel %vm441_vm3, 0.0, %v385_v55 }
 0x1ce   : > { %v546_v26 = vmul.f32 %v530_v11, %v530_v11 }
 0x1cf   : > { %v473_v18 = vsel %vm441_vm3, %v697_v5, 0.0 }
 0x1d0   : > { %v489_v34 = vmul.f32 %v473_v18, %v473_v18  ;;  %v561_v40 = vadd.f32 %v560_v33, %v546_v26 }
 0x1d2   : > { %v360_v51 = vpop.f32.mrf.mxu2  ;;  %v504_v45 = vadd.f32 %v503_v39, %v489_v34 }
 0x1d3   : > { %v386_v63 = vmul.f32 0.125, %v360_v51 }
 0x1d5   : > { %v698_v12 = vadd.f32 -1.0, %v386_v63  ;;  %v531_v19 = vsel %vm442_vm4, 0.0, %v386_v63 }
 0x1d6   : > { %v547_v35 = vmul.f32 %v531_v19, %v531_v19 }
 0x1d8   : > { %v562_v46 = vadd.f32 %v561_v40, %v547_v35 }
 0x1da   : > { %v363_v28 = vpop.f32.mrf.mxu3 }
 0x1db   : > { %v387_v6 = vmul.f32 0.125, %v363_v28  ;;  %v474_v28 = vsel %vm442_vm4, %v698_v12, 0.0 }
 0x1dc   : > { %v490_v42 = vmul.f32 %v474_v28, %v474_v28 }
 0x1dd   : > { %v699_v21 = vadd.f32 -1.0, %v387_v6  ;;  %v532_v30 = vsel %vm443_vm5, 0.0, %v387_v6 }
 0x1de   : > { %v548_v43 = vmul.f32 %v532_v30, %v532_v30  ;;  %v505_v50 = vadd.f32 %v504_v45, %v490_v42 }
 0x1df   : > { %v475_v17 = vsel %vm443_vm5, %v699_v21, 0.0  ;;  %v577_v21 = vld [vmem:[#allocation2] sm:$0x1] }
 0x1e0   : > { %v491_v47 = vmul.f32 %v475_v17, %v475_v17  ;;  %v563_v51 = vadd.f32 %v562_v46, %v548_v43 }
 0x1e2   : > { %v366_v59 = vpop.f32.mrf.mxu3  ;;  %v506_v55 = vadd.f32 %v505_v50, %v491_v47 }
 0x1e3   : > { %v388_v13 = vmul.f32 0.125, %v366_v59 }
 0x1e5   : > { %v700_v31 = vadd.f32 -1.0, %v388_v13  ;;  %v533_v36 = vsel %vm444_vm6, 0.0, %v388_v13 }
 0x1e6   : > { %v549_v48 = vmul.f32 %v533_v36, %v533_v36 }
 0x1e7   : > { %v476_v44 = vsel %vm444_vm6, %v700_v31, 0.0 }
 0x1e8   : > { %v492_v52 = vmul.f32 %v476_v44, %v476_v44  ;;  %v564_v57 = vadd.f32 %v563_v51, %v549_v48 }
 0x1ea   : > { %v369_v27 = vpop.f32.mrf.mxu3  ;;  %v507_v61 = vadd.f32 %v506_v55, %v492_v52 }
 0x1eb   : > { %v389_v32 = vmul.f32 0.125, %v369_v27 }
 0x1ed   : > { %v701_v37 = vadd.f32 -1.0, %v389_v32  ;;  %v534_v20 = vsel %vm445_vm7, 0.0, %v389_v32 }
 0x1ee   : > { %v550_v53 = vmul.f32 %v534_v20, %v534_v20 }
 0x1ef   : > { %v477_v49 = vsel %vm445_vm7, %v701_v37, 0.0 }
 0x1f0   : > { %v493_v56 = vmul.f32 %v477_v49, %v477_v49  ;;  %v565_v60 = vadd.f32 %v564_v57, %v550_v53 }
 0x1f2   : > { %v372_v22 = vpop.f32.mrf.mxu3  ;;  %v508_v29 = vadd.f32 %v507_v61, %v493_v56 }
 0x1f3   : > { %v390_v54 = vmul.f32 0.125, %v372_v22 }
 0x1f5   : > { %v702_v58 = vadd.f32 -1.0, %v390_v54  ;;  %v535_v59 = vsel %vm446_vm8, 0.0, %v390_v54 }
 0x1f6   : > { %v551_v41 = vmul.f32 %v535_v59, %v535_v59 }
 0x1f7   : > { %v478_v62 = vsel %vm446_vm8, %v702_v58, 0.0 }
 0x1f8   : > { %v566_v63 = vadd.f32 %v565_v60, %v551_v41  ;;  %v494_v0 = vmul.f32 %v478_v62, %v478_v62 }
 0x1fa   : > { %567 = vadd.xlane.f32.xlu1 %v566_v63  ;;  %v509_v1 = vadd.f32 %v508_v29, %v494_v0 }
 0x1fc   : > { %510 = vadd.xlane.f32.xlu0 %v509_v1 }
 0x26d   : > { %v568_v2 = vpop.xlane.xlu1 %567 }
 0x26e   : > { %v569_v3 = vrot.slane %v568_v2, 4 }
 0x26f   : > { %v511_v4 = vpop.xlane.xlu0 %510 }
 0x270   : > { %v570_v5 = vadd.f32 %v569_v3, %v568_v2  ;;  %v512_v6 = vrot.slane %v511_v4, 4 }
 0x272   : > { %v571_v7 = vrot.slane %v570_v5, 2  ;;  %v513_v8 = vadd.f32 %v512_v6, %v511_v4 }
 0x274   : > { %v572_v9 = vadd.f32 %v571_v7, %v570_v5  ;;  %v514_v10 = vrot.slane %v513_v8, 2 }
 0x276   : > { %v515_v11 = vadd.f32 %v514_v10, %v513_v8  ;;  %v573_v12 = vrot.slane %v572_v9, 1 }
 0x278   : > { %v516_v13 = vrot.slane %v515_v11, 1  ;;  %v574_v15 = vadd.f32 %v573_v12, %v572_v9 }
 0x27a   : > { %v517_v14 = vadd.f32 %v516_v13, %v515_v11 }
 0x27c   : > { %710 = vpush %v517_v14 }
 0x27d   : > { %712 = vpush %v574_v15 }
 0x2ad   : > { %s711_s30 = spop %710 }
 0x2ae   : > { %s713_s3 = spop %712  ;;  %v519_v19 = vstv %s711_s30 }
 0x2af   : > { %v576_v16 = vstv %s713_s3 }
 0x2b0   : > { %v578_v18 = vmul.f32 0.0051, %v576_v16 }
 0x2b2   : > { %v579_v23 = vadd.f32 %v578_v18, %v519_v19  ;;  %588 = sbr.rel (%p1031_p12) target bundleno = 703 (0x2bf), region = 36 }
 0x2b4   : > { %v580_v24 = vadd.f32 %v579_v23, %v577_v21 }
 0x2b6   : > { %582 = vst.msk [vmem:[#allocation2] sm:$0x1] %vm581_vm9, %v580_v24 }
 0x2bd   : > { %v589_v25 = vld [vmem:[#allocation2] sm:$0x1] }
 0x2be   : > { %590 = vst.msk [vmem:[#allocation3] sm:$0x1] %vm581_vm9, %v589_v25 }
 0x2bf PF: > { %p718_p13 = scmp.eq.s32.totalorder %s663_s14, 8  ;;  %s599_s6 = sshll.u32 %s1059_s2, 4  ;;  %s600_s6 = int_to_ptr.hbm [resolvable:$true] %s599_s6 }
 0x2c0   : > { %s844_s7 = smov [#allocation3]  }
 0x2c1   : > { %s597_s8 = sshll.u32 %s844_s7, 4  ;;  %s598_s8 = int_to_ptr.vmem [resolvable:$true] %s597_s8 }
 0x2c2   : > { %715 = dma.vmem_to_hbm [thread:$0]  (%p718_p13), %s598_s8, 16, %s600_s6, [#allocation4]  }
 0x2c3   : > { %819 = dma.done.wait (%p718_p13), [#allocation4], 16  }
 0x2c4   : > { %821 = vsyncadd (%p718_p13), [#allocation4], 4294967280 }
 0x2c5 PF: > { %s13_s13 = sadd.s32 1, %s840_s13   ;;  %s1061_s9 = smov %s832_s11 }
 0x2c6   : > { %p10_p0 = scmp.ge.s32.totalorder %s13_s13, 11   ;;  %s1062_s10 = smov %s836_s12 }
 0x2c7   : > { %s1063_s11 = smov %s1066_s15  ;;  %s1064_s12 = smov %s1070_s16 }
 0x2c8   :  { %12 = sbr.rel (!%p10_p0) target bundleno = 3 (0x3), region = 66 }
 0x2cd   :  { %613 = vsyncpa [#allocation4], 1 }
 0x2ce   :  { %615 = vsyncpa [#allocation4 + $0x1], 1 }

// kernel: forward.5
= control target key start
LH: loop header
LB: loop body
LE: loop exit
PB: predicated region body
PF: predicated region fallthrough
CT: control target
= control target key end

     0   :  { %s9338_s9 = smov 0   ;;  %s12742_s0 = inlined_call_operand.vmem [shape: f32[16,36,9,3], index: 0, kind: input, shape index: {}]   ;;  %s12743_s1 = inlined_call_operand.vmem [shape: f32[9,3,256], index: 1, kind: input, shape index: {}]   ;;  %s12744_s2 = inlined_call_operand.vmem [shape: f32[16,256], index: 2, kind: output, shape index: {}]  }
   0x1 LB: > { %s9344_s10 = sadd.s32 4294967295, %s9320_s9   ;;  %p7666_p0 = scmp.ge.s32.totalorder %s9320_s9, 1  ;;  %s9320_s9 = sphi %s9338_s9, %s12_s9  }
   0x2   : > { %p114_p1 = scmp.lt.s32.totalorder %s9320_s9, 3 }
   0x4   : > { %p115_p2 = pnand %p7666_p0, %p114_p1 }
   0x6   : > { %118 = sbr.rel (%p115_p2) target bundleno = 2474 (0x9aa), region = 28 }
   0xb   : > { %v7735_v0 = vld [vmem:[%s12743_s1 + $0x8] sm:$0x77]  ;;  %s7667_s13 = sshll.u32 %s9344_s10, 3  ;;  %vm478_vm0 = vcmask 1042432   ;;  %v213_v1 = vld [vmem:[%s12743_s1] sm:$0x77] }
   0xc   : > { %282 = vst [vmem:[#allocation1] ss:$2 sm:$0xff] %v7735_v0  ;;  %p138_p3 = scmp.lt.s32.totalorder %s7667_s13, 15  ;;  %vm285_vm1 = vcmask 23552   ;;  %v7996_v6 = vld [vmem:[%s12743_s1 + $0x10] sm:$0x77] }
   0xd   : > { %v8191_v11 = vld [vmem:[%s12743_s1 + $0x18] sm:$0x77]  ;;  %vm7582_vm3 = vcmask 1041409   ;;  %vm7584_vm4 = vcmask 1042434   ;;  %vm7586_vm5 = vcmask 1043459   ;;  %vm7588_vm6 = vcmask 1044484  }
   0xe   : > { %s13370_s13 = smov (!%p138_p3, %s7667_s13), 15  ;;  %vm7590_vm7 = vcmask 1045509   ;;  %vm7592_vm8 = vcmask 1046534   ;;  %p144_p4 = scmp.lt.s32.totalorder %s9344_s10, 1  ;;  %vm7594_vm9 = vcmask 1047559  }
   0xf   : > { %s9302_s14 = smul.u32 576, %s13370_s13 }
  0x10   : > { %s13372_s10 = smov (!%p144_p4, %s9344_s10), 1 }
  0x11   : > { %s9358_s19 = scalar_lea.vmem %s12742_s0, %s9302_s14  ;;  %s9299_s6 = sshll.u32 %s13372_s10, 4 }
  0x12   : > { %v7703_v4 = vld [vmem:[%s9358_s19 + $0x990] sm:$0xff]  ;;  %v7704_v7 = vld [vmem:[%s9358_s19 + $0x9a0] sm:$0xff]  ;;  %s148_s11 = scalar_lea.vmem %s12744_s2, %s9299_s6 }
  0x13   : > { %v283_v2 = vld.sshfl [vmem:[#allocation1] sm:$0xff pattern:$0x75316420]  ;;  %v284_v3 = vld.sshfl [vmem:[#allocation1 + $0x8] sm:$0xff pattern:$0x75316420] }
  0x14   : > { %9300 = vmatpush.msk.msra.mxu2 %vm478_vm0, %v283_v2  ;;  %9301 = vmatpush.msk.msra.mxu3 %vm478_vm0, %v284_v3  ;;  %902 = vst [vmem:[#allocation1] ss:$2 sm:$0xff] %v213_v1  ;;  %v7671_v5 = vld [vmem:[%s9358_s19 + $0x90] sm:$0xff]  ;;  %v7672_v10 = vld [vmem:[%s9358_s19 + $0xa0] sm:$0xff] }
  0x15   : > { %7769 = vmatmul.msk.f32.vlgmr.msra.gmra.mxu2 %vm285_vm1, %v7703_v4  ;;  %7834 = vmatmul.msk.f32.vlgmr.msra.gmra.mxu3 %vm285_vm1, %v7703_v4  ;;  %v7705_v12 = vld [vmem:[%s9358_s19 + $0x9b0] sm:$0xff]  ;;  %v7706_v16 = vld [vmem:[%s9358_s19 + $0x9c0] sm:$0xff] }
  0x16   : > { %7736 = vmatpush.msk.msra.mxu0 %vm478_vm0, %v283_v2  ;;  %7801 = vmatpush.msk.msra.mxu1 %vm478_vm0, %v284_v3  ;;  %v7673_v15 = vld [vmem:[%s9358_s19 + $0xb0] sm:$0xff]  ;;  %v7674_v17 = vld [vmem:[%s9358_s19 + $0xc0] sm:$0xff] }
  0x17   : > { %7737 = vmatmul.msk.f32.vlgmr.msra.gmra.mxu0 %vm285_vm1, %v7671_v5  ;;  %7802 = vmatmul.msk.f32.vlgmr.msra.gmra.mxu1 %vm285_vm1, %v7671_v5  ;;  %v7707_v18 = vld [vmem:[%s9358_s19 + $0x9d0] sm:$0xff]  ;;  %v7708_v20 = vld [vmem:[%s9358_s19 + $0x9e0] sm:$0xff] }
  0x18   : > { %v7675_v19 = vld [vmem:[%s9358_s19 + $0xd0] sm:$0xff]  ;;  %v7676_v21 = vld [vmem:[%s9358_s19 + $0xe0] sm:$0xff] }
  0x19   : > { %v7709_v22 = vld [vmem:[%s9358_s19 + $0x9f0] sm:$0xff]  ;;  %v7710_v24 = vld [vmem:[%s9358_s19 + $0xa00] sm:$0xff] }
  0x1a   : > { %v7677_v23 = vld [vmem:[%s9358_s19 + $0xf0] sm:$0xff]  ;;  %v7678_v25 = vld [vmem:[%s9358_s19 + $0x100] sm:$0xff] }
  0x1b   : > { %v903_v8 = vld.sshfl [vmem:[#allocation1] sm:$0xff pattern:$0x75316420]  ;;  %v904_v9 = vld.sshfl [vmem:[#allocation1 + $0x8] sm:$0xff pattern:$0x75316420] }
  0x1c   : > { %7866 = vmatpush.msk.msrb.mxu2 %vm478_vm0, %v903_v8  ;;  %7931 = vmatpush.msk.msrb.mxu3 %vm478_vm0, %v904_v9  ;;  %1586 = vst [vmem:[#allocation1] ss:$2 sm:$0xff] %v7996_v6  ;;  %v7711_v26 = vld [vmem:[%s9358_s19 + $0xbd0] sm:$0xff]  ;;  %v7712_v28 = vld [vmem:[%s9358_s19 + $0xbe0] sm:$0xff] }
  0x1d   : > { %7770 = vmatmul.msk.f32.gmra.mxu2 %vm285_vm1, %v7704_v7  ;;  %7835 = vmatmul.msk.f32.gmra.mxu3 %vm285_vm1, %v7704_v7  ;;  %v7679_v27 = vld [vmem:[%s9358_s19 + $0x2d0] sm:$0xff]  ;;  %v7680_v29 = vld [vmem:[%s9358_s19 + $0x2e0] sm:$0xff] }
  0x1e   : > { %v7713_v30 = vld [vmem:[%s9358_s19 + $0xbf0] sm:$0xff]  ;;  %v7714_v32 = vld [vmem:[%s9358_s19 + $0xc00] sm:$0xff] }
  0x1f   : > { %7738 = vmatmul.msk.f32.gmra.mxu0 %vm285_vm1, %v7672_v10  ;;  %7803 = vmatmul.msk.f32.gmra.mxu1 %vm285_vm1, %v7672_v10  ;;  %v7681_v31 = vld [vmem:[%s9358_s19 + $0x2f0] sm:$0xff]  ;;  %v7682_v33 = vld [vmem:[%s9358_s19 + $0x300] sm:$0xff] }
  0x20   : > { %v7715_v34 = vld [vmem:[%s9358_s19 + $0xc10] sm:$0xff]  ;;  %v7716_v36 = vld [vmem:[%s9358_s19 + $0xc20] sm:$0xff] }
  0x21   : > { %v7683_v35 = vld [vmem:[%s9358_s19 + $0x310] sm:$0xff]  ;;  %v7684_v37 = vld [vmem:[%s9358_s19 + $0x320] sm:$0xff] }
  0x22   : > { %v7717_v38 = vld [vmem:[%s9358_s19 + $0xc30] sm:$0xff]  ;;  %v7718_v40 = vld [vmem:[%s9358_s19 + $0xc40] sm:$0xff] }
  0x23   : > { %v1587_v13 = vld.sshfl [vmem:[#allocation1] sm:$0xff pattern:$0x75316420]  ;;  %v1588_v14 = vld.sshfl [vmem:[#allocation1 + $0x8] sm:$0xff pattern:$0x75316420] }
  0x24   : > { %7997 = vmatpush.msk.msrb.mxu0 %vm478_vm0, %v1587_v13  ;;  %8062 = vmatpush.msk.msrb.mxu1 %vm478_vm0, %v1588_v14  ;;  %2399 = vst [vmem:[#allocation1] ss:$2 sm:$0xff] %v8191_v11  ;;  %v7685_v39 = vld [vmem:[%s9358_s19 + $0x330] sm:$0xff]  ;;  %v7686_v41 = vld [vmem:[%s9358_s19 + $0x340] sm:$0xff] }
  0x25   : > { %7771 = vmatmul.msk.f32.gmra.mxu2 %vm285_vm1, %v7705_v12  ;;  %7836 = vmatmul.msk.f32.gmra.mxu3 %vm285_vm1, %v7705_v12  ;;  %v7719_v42 = vld [vmem:[%s9358_s19 + $0xe10] sm:$0xff]  ;;  %v7720_v48 = vld [vmem:[%s9358_s19 + $0xe20] sm:$0xff] }
  0x26   : > { %v7687_v45 = vld [vmem:[%s9358_s19 + $0x510] sm:$0xff]  ;;  %v7688_v51 = vld [vmem:[%s9358_s19 + $0x520] sm:$0xff] }
  0x27   : > { %7739 = vmatmul.msk.f32.gmra.mxu0 %vm285_vm1, %v7673_v15  ;;  %7804 = vmatmul.msk.f32.gmra.mxu1 %vm285_vm1, %v7673_v15  ;;  %v7721_v54 = vld [vmem:[%s9358_s19 + $0xe30] sm:$0xff]  ;;  %v7722_v60 = vld [vmem:[%s9358_s19 + $0xe40] sm:$0xff] }
  0x28   : > { %v7689_v57 = vld [vmem:[%s9358_s19 + $0x530] sm:$0xff]  ;;  %v7690_v63 = vld [vmem:[%s9358_s19 + $0x540] sm:$0xff] }
  0x29   : > { %v7723_v2 = vld [vmem:[%s9358_s19 + $0xe50] sm:$0xff]  ;;  %v7724_v8 = vld [vmem:[%s9358_s19 + $0xe60] sm:$0xff] }
  0x2a   : > { %v7691_v5 = vld [vmem:[%s9358_s19 + $0x550] sm:$0xff]  ;;  %v7692_v11 = vld [vmem:[%s9358_s19 + $0x560] sm:$0xff] }
  0x2b   : > { %v7725_v14 = vld [vmem:[%s9358_s19 + $0xe70] sm:$0xff] }
  0x2d   : > { %7772 = vmatmul.msk.f32.gmra.mxu2 %vm285_vm1, %v7706_v16  ;;  %7837 = vmatmul.msk.f32.gmra.mxu3 %vm285_vm1, %v7706_v16 }
  0x2f   : > { %7740 = vmatmul.msk.f32.gmra.mxu0 %vm285_vm1, %v7674_v17  ;;  %7805 = vmatmul.msk.f32.gmra.mxu1 %vm285_vm1, %v7674_v17  ;;  %v7693_v17 = vld [vmem:[%s9358_s19 + $0x570] sm:$0xff] }
  0x35   : > { %7773 = vmatmul.msk.f32.gmra.mxu2 %vm285_vm1, %v7707_v18  ;;  %7838 = vmatmul.msk.f32.gmra.mxu3 %vm285_vm1, %v7707_v18 }
  0x37   : > { %7741 = vmatmul.msk.f32.gmra.mxu0 %vm285_vm1, %v7675_v19  ;;  %7806 = vmatmul.msk.f32.gmra.mxu1 %vm285_vm1, %v7675_v19 }
  0x3d   : > { %7774 = vmatmul.msk.f32.gmra.mxu2 %vm285_vm1, %v7708_v20  ;;  %7839 = vmatmul.msk.f32.gmra.mxu3 %vm285_vm1, %v7708_v20  ;;  %v7726_v20 = vld [vmem:[%s9358_s19 + $0xe80] sm:$0xff] }
  0x3f   : > { %7742 = vmatmul.msk.f32.gmra.mxu0 %vm285_vm1, %v7676_v21  ;;  %7807 = vmatmul.msk.f32.gmra.mxu1 %vm285_vm1, %v7676_v21 }
  0x45   : > { %7775 = vmatmul.msk.f32.gmra.mxu2 %vm285_vm1, %v7709_v22  ;;  %7840 = vmatmul.msk.f32.gmra.mxu3 %vm285_vm1, %v7709_v22 }
  0x47   : > { %7743 = vmatmul.msk.f32.gmra.mxu0 %vm285_vm1, %v7677_v23  ;;  %7808 = vmatmul.msk.f32.gmra.mxu1 %vm285_vm1, %v7677_v23  ;;  %v7694_v23 = vld [vmem:[%s9358_s19 + $0x580] sm:$0xff] }
  0x4d   : > { %7776 = vmatmul.msk.f32.gmra.mxu2 %vm285_vm1, %v7710_v24  ;;  %7841 = vmatmul.msk.f32.gmra.mxu3 %vm285_vm1, %v7710_v24 }
  0x4f   : > { %7744 = vmatmul.msk.f32.gmra.mxu0 %vm285_vm1, %v7678_v25  ;;  %7809 = vmatmul.msk.f32.gmra.mxu1 %vm285_vm1, %v7678_v25 }
  0x55   : > { %7777 = vmatmul.msk.f32.gmra.mxu2 %vm285_vm1, %v7711_v26  ;;  %7842 = vmatmul.msk.f32.gmra.mxu3 %vm285_vm1, %v7711_v26  ;;  %v7727_v26 = vld [vmem:[%s9358_s19 + $0x1050] sm:$0xff] }
  0x57   : > { %7745 = vmatmul.msk.f32.gmra.mxu0 %vm285_vm1, %v7679_v27  ;;  %7810 = vmatmul.msk.f32.gmra.mxu1 %vm285_vm1, %v7679_v27 }
  0x5d   : > { %7778 = vmatmul.msk.f32.gmra.mxu2 %vm285_vm1, %v7712_v28  ;;  %7843 = vmatmul.msk.f32.gmra.mxu3 %vm285_vm1, %v7712_v28 }
  0x5f   : > { %7746 = vmatmul.msk.f32.gmra.mxu0 %vm285_vm1, %v7680_v29  ;;  %7811 = vmatmul.msk.f32.gmra.mxu1 %vm285_vm1, %v7680_v29  ;;  %v7695_v29 = vld [vmem:[%s9358_s19 + $0x750] sm:$0xff] }
  0x65   : > { %7779 = vmatmul.msk.f32.gmra.mxu2 %vm285_vm1, %v7713_v30  ;;  %7844 = vmatmul.msk.f32.gmra.mxu3 %vm285_vm1, %v7713_v30 }
  0x67   : > { %7747 = vmatmul.msk.f32.gmra.mxu0 %vm285_vm1, %v7681_v31  ;;  %7812 = vmatmul.msk.f32.gmra.mxu1 %vm285_vm1, %v7681_v31 }
  0x6d   : > { %7780 = vmatmul.msk.f32.gmra.mxu2 %vm285_vm1, %v7714_v32  ;;  %7845 = vmatmul.msk.f32.gmra.mxu3 %vm285_vm1, %v7714_v32  ;;  %v7728_v32 = vld [vmem:[%s9358_s19 + $0x1060] sm:$0xff] }
  0x6f   : > { %7748 = vmatmul.msk.f32.gmra.mxu0 %vm285_vm1, %v7682_v33  ;;  %7813 = vmatmul.msk.f32.gmra.mxu1 %vm285_vm1, %v7682_v33 }
  0x75   : > { %7781 = vmatmul.msk.f32.gmra.mxu2 %vm285_vm1, %v7715_v34  ;;  %7846 = vmatmul.msk.f32.gmra.mxu3 %vm285_vm1, %v7715_v34 }
  0x77   : > { %7749 = vmatmul.msk.f32.gmra.mxu0 %vm285_vm1, %v7683_v35  ;;  %7814 = vmatmul.msk.f32.gmra.mxu1 %vm285_vm1, %v7683_v35  ;;  %v7696_v35 = vld [vmem:[%s9358_s19 + $0x760] sm:$0xff] }
  0x7d   : > { %7782 = vmatmul.msk.f32.gmra.mxu2 %vm285_vm1, %v7716_v36  ;;  %7847 = vmatmul.msk.f32.gmra.mxu3 %vm285_vm1, %v7716_v36 }
  0x7f   : > { %7750 = vmatmul.msk.f32.gmra.mxu0 %vm285_vm1, %v7684_v37  ;;  %7815 = vmatmul.msk.f32.gmra.mxu1 %vm285_vm1, %v7684_v37 }
  0x85   : > { %7783 = vmatmul.msk.f32.gmra.mxu2 %vm285_vm1, %v7717_v38  ;;  %7848 = vmatmul.msk.f32.gmra.mxu3 %vm285_vm1, %v7717_v38  ;;  %v7729_v38 = vld [vmem:[%s9358_s19 + $0x1070] sm:$0xff] }
  0x87   : > { %7751 = vmatmul.msk.f32.gmra.mxu0 %vm285_vm1, %v7685_v39  ;;  %7816 = vmatmul.msk.f32.gmra.mxu1 %vm285_vm1, %v7685_v39 }
  0x8d   : > { %7784 = vmatmul.msk.f32.gmra.mxu2 %vm285_vm1, %v7718_v40  ;;  %7849 = vmatmul.msk.f32.gmra.mxu3 %vm285_vm1, %v7718_v40 }
  0x8f   : > { %7752 = vmatmul.msk.f32.gmra.mxu0 %vm285_vm1, %v7686_v41  ;;  %7817 = vmatmul.msk.f32.gmra.mxu1 %vm285_vm1, %v7686_v41  ;;  %v7697_v41 = vld [vmem:[%s9358_s19 + $0x770] sm:$0xff] }
  0x94   : > { %v9471_v43 = vpop.f32.mrf.mxu0  ;;  %v9473_v44 = vpop.f32.mrf.mxu1 }
  0x95   : > { %7785 = vmatmul.msk.f32.gmra.mxu2 %vm285_vm1, %v7719_v42  ;;  %7850 = vmatmul.msk.f32.gmra.mxu3 %vm285_vm1, %v7719_v42 }
  0x97   : > { %7753 = vmatmul.msk.f32.gmra.mxu0 %vm285_vm1, %v7687_v45  ;;  %7818 = vmatmul.msk.f32.gmra.mxu1 %vm285_vm1, %v7687_v45 }
  0x98   : > { %v9480_v46 = vpop.f32.mrf.mxu2  ;;  %v9482_v47 = vpop.f32.mrf.mxu3 }
  0x99   : > { %12745 = vst [vmem:[#allocation2_spill] sm:$0xff] %v9480_v46  ;;  %v1531_v46 = vld [vmem:[%s9358_s19 + $0x281] sm:$0xff] }
  0x9a   : > { %12746 = vst [vmem:[#allocation3_spill] sm:$0xff] %v9482_v47 }
  0x9c   : > { %v9485_v49 = vpop.f32.mrf.mxu0  ;;  %v9487_v50 = vpop.f32.mrf.mxu1 }
  0x9d   : > { %7786 = vmatmul.msk.f32.gmra.mxu2 %vm285_vm1, %v7720_v48  ;;  %7851 = vmatmul.msk.f32.gmra.mxu3 %vm285_vm1, %v7720_v48  ;;  %v7730_v48 = vld [vmem:[%s9358_s19 + $0x1080] sm:$0xff] }
  0x9f   : > { %7754 = vmatmul.msk.f32.gmra.mxu0 %vm285_vm1, %v7688_v51  ;;  %7819 = vmatmul.msk.f32.gmra.mxu1 %vm285_vm1, %v7688_v51 }
  0xa0   : > { %v9494_v52 = vpop.f32.mrf.mxu2  ;;  %v9496_v53 = vpop.f32.mrf.mxu3 }
  0xa1   : > { %12747 = vst [vmem:[#allocation4_spill] sm:$0xff] %v9494_v52  ;;  %v1530_v52 = vld [vmem:[%s9358_s19 + $0x271] sm:$0xff] }
  0xa2   : > { %12748 = vst [vmem:[#allocation5_spill] sm:$0xff] %v9496_v53 }
  0xa4   : > { %v9499_v55 = vpop.f32.mrf.mxu0  ;;  %v9501_v56 = vpop.f32.mrf.mxu1 }
  0xa5   : > { %7787 = vmatmul.msk.f32.gmra.mxu2 %vm285_vm1, %v7721_v54  ;;  %7852 = vmatmul.msk.f32.gmra.mxu3 %vm285_vm1, %v7721_v54 }
  0xa7   : > { %7755 = vmatmul.msk.f32.gmra.mxu0 %vm285_vm1, %v7689_v57  ;;  %7820 = vmatmul.msk.f32.gmra.mxu1 %vm285_vm1, %v7689_v57  ;;  %v7698_v57 = vld [vmem:[%s9358_s19 + $0x780] sm:$0xff] }
  0xa8   : > { %v9508_v58 = vpop.f32.mrf.mxu2  ;;  %v9510_v59 = vpop.f32.mrf.mxu3 }
  0xa9   : > { %12749 = vst [vmem:[#allocation6_spill] sm:$0xff] %v9508_v58  ;;  %v1529_v58 = vld [vmem:[%s9358_s19 + $0x261] sm:$0xff] }
  0xaa   : > { %12750 = vst [vmem:[#allocation7_spill] sm:$0xff] %v9510_v59 }
  0xac   : > { %v9513_v61 = vpop.f32.mrf.mxu0  ;;  %v9515_v62 = vpop.f32.mrf.mxu1 }
  0xad   : > { %7788 = vmatmul.msk.f32.gmra.mxu2 %vm285_vm1, %v7722_v60  ;;  %7853 = vmatmul.msk.f32.gmra.mxu3 %vm285_vm1, %v7722_v60 }
  0xaf   : > { %7756 = vmatmul.msk.f32.gmra.mxu0 %vm285_vm1, %v7690_v63  ;;  %7821 = vmatmul.msk.f32.gmra.mxu1 %vm285_vm1, %v7690_v63 }
  0xb0   : > { %v9522_v0 = vpop.f32.mrf.mxu2  ;;  %v9524_v1 = vpop.f32.mrf.mxu3 }
  0xb1   : > { %12751 = vst [vmem:[#allocation8_spill] sm:$0xff] %v9522_v0  ;;  %v1528_v0 = vld [vmem:[%s9358_s19 + $0x251] sm:$0xff] }
  0xb2   : > { %12752 = vst [vmem:[#allocation9_spill] sm:$0xff] %v9524_v1 }
  0xb4   : > { %v9527_v3 = vpop.f32.mrf.mxu0  ;;  %v9529_v4 = vpop.f32.mrf.mxu1 }
  0xb5   : > { %7789 = vmatmul.msk.f32.gmra.mxu2 %vm285_vm1, %v7723_v2  ;;  %7854 = vmatmul.msk.f32.gmra.mxu3 %vm285_vm1, %v7723_v2  ;;  %v7731_v2 = vld [vmem:[%s9358_s19 + $0x1090] sm:$0xff] }
  0xb7   : > { %7757 = vmatmul.msk.f32.gmra.mxu0 %vm285_vm1, %v7691_v5  ;;  %7822 = vmatmul.msk.f32.gmra.mxu1 %vm285_vm1, %v7691_v5 }
  0xb8   : > { %v9536_v6 = vpop.f32.mrf.mxu2  ;;  %v9538_v7 = vpop.f32.mrf.mxu3 }
  0xb9   : > { %12753 = vst [vmem:[#allocation10_spill] sm:$0xff] %v9536_v6  ;;  %v1527_v6 = vld [vmem:[%s9358_s19 + $0x241] sm:$0xff] }
  0xba   : > { %12754 = vst [vmem:[#allocation11_spill] sm:$0xff] %v9538_v7 }
  0xbc   : > { %v9541_v9 = vpop.f32.mrf.mxu0  ;;  %v9543_v10 = vpop.f32.mrf.mxu1 }
  0xbd   : > { %7790 = vmatmul.msk.f32.gmra.mxu2 %vm285_vm1, %v7724_v8  ;;  %7855 = vmatmul.msk.f32.gmra.mxu3 %vm285_vm1, %v7724_v8 }
  0xbf   : > { %7758 = vmatmul.msk.f32.gmra.mxu0 %vm285_vm1, %v7692_v11  ;;  %7823 = vmatmul.msk.f32.gmra.mxu1 %vm285_vm1, %v7692_v11  ;;  %v7699_v11 = vld [vmem:[%s9358_s19 + $0x790] sm:$0xff] }
  0xc0   : > { %v9550_v12 = vpop.f32.mrf.mxu2  ;;  %v9552_v13 = vpop.f32.mrf.mxu3 }
  0xc1   : > { %12755 = vst [vmem:[#allocation12_spill] sm:$0xff] %v9550_v12  ;;  %v1526_v12 = vld [vmem:[%s9358_s19 + $0x71] sm:$0xff] }
  0xc2   : > { %12756 = vst [vmem:[#allocation13_spill] sm:$0xff] %v9552_v13 }
  0xc4   : > { %v9555_v15 = vpop.f32.mrf.mxu0  ;;  %v9557_v16 = vpop.f32.mrf.mxu1 }
  0xc5   : > { %7791 = vmatmul.msk.f32.gmra.mxu2 %vm285_vm1, %v7725_v14  ;;  %7856 = vmatmul.msk.f32.gmra.mxu3 %vm285_vm1, %v7725_v14 }
  0xc7   : > { %7759 = vmatmul.msk.f32.gmra.mxu0 %vm285_vm1, %v7693_v17  ;;  %7824 = vmatmul.msk.f32.gmra.mxu1 %vm285_vm1, %v7693_v17 }
  0xc8   : > { %v9564_v18 = vpop.f32.mrf.mxu2  ;;  %v9566_v19 = vpop.f32.mrf.mxu3 }
  0xc9   : > { %12757 = vst [vmem:[#allocation14_spill] sm:$0xff] %v9564_v18  ;;  %v1525_v18 = vld [vmem:[%s9358_s19 + $0x61] sm:$0xff] }
  0xca   : > { %12758 = vst [vmem:[#allocation15_spill] sm:$0xff] %v9566_v19 }
  0xcc   : > { %v9569_v21 = vpop.f32.mrf.mxu0  ;;  %v9571_v22 = vpop.f32.mrf.mxu1 }
  0xcd   : > { %7792 = vmatmul.msk.f32.gmra.mxu2 %vm285_vm1, %v7726_v20  ;;  %7857 = vmatmul.msk.f32.gmra.mxu3 %vm285_vm1, %v7726_v20  ;;  %v2400_v20 = vld.sshfl [vmem:[#allocation1] sm:$0xff pattern:$0x75316420] }
  0xce   : > { %8192 = vmatpush.msk.msra.mxu2 %vm478_vm0, %v2400_v20 }
  0xcf   : > { %7760 = vmatmul.msk.f32.gmra.mxu0 %vm285_vm1, %v7694_v23  ;;  %7825 = vmatmul.msk.f32.gmra.mxu1 %vm285_vm1, %v7694_v23  ;;  %v2401_v23 = vld.sshfl [vmem:[#allocation1 + $0x8] sm:$0xff pattern:$0x75316420] }
  0xd0   : > { %v9578_v24 = vpop.f32.mrf.mxu2  ;;  %v9580_v25 = vpop.f32.mrf.mxu3  ;;  %8257 = vmatpush.msk.msra.mxu3 %vm478_vm0, %v2401_v23 }
  0xd1   : > { %12759 = vst [vmem:[#allocation16_spill] sm:$0xff] %v9578_v24  ;;  %v1524_v24 = vld [vmem:[%s9358_s19 + $0x51] sm:$0xff] }
  0xd2   : > { %12760 = vst [vmem:[#allocation17_spill] sm:$0xff] %v9580_v25 }
  0xd4   : > { %v9583_v27 = vpop.f32.mrf.mxu0  ;;  %v9585_v28 = vpop.f32.mrf.mxu1 }
  0xd5   : > { %7793 = vmatmul.msk.f32.gmra.mxu2 %vm285_vm1, %v7727_v26  ;;  %7858 = vmatmul.msk.f32.gmra.mxu3 %vm285_vm1, %v7727_v26  ;;  %v8386_v26 = vld [vmem:[%s12743_s1 + $0x20] sm:$0x77] }
  0xd6   : > { %3212 = vst [vmem:[#allocation1] ss:$2 sm:$0xff] %v8386_v26  ;;  %v7701_v26 = vld [vmem:[%s9358_s19 + $0x7b0] sm:$0xff] }
  0xd7   : > { %7761 = vmatmul.msk.f32.gmra.mxu0 %vm285_vm1, %v7695_v29  ;;  %7826 = vmatmul.msk.f32.gmra.mxu1 %vm285_vm1, %v7695_v29  ;;  %v7732_v29 = vld [vmem:[%s9358_s19 + $0x10a0] sm:$0xff] }
  0xd8   : > { %v9592_v30 = vpop.f32.mrf.mxu2  ;;  %v9594_v31 = vpop.f32.mrf.mxu3 }
  0xd9   : > { %12761 = vst [vmem:[#allocation18_spill] sm:$0xff] %v9592_v30  ;;  %v1523_v30 = vld [vmem:[%s9358_s19 + $0x41] sm:$0xff] }
  0xda   : > { %12762 = vst [vmem:[#allocation19_spill] sm:$0xff] %v9594_v31 }
  0xdc   : > { %v9597_v33 = vpop.f32.mrf.mxu0  ;;  %v9599_v34 = vpop.f32.mrf.mxu1 }
  0xdd   : > { %7794 = vmatmul.msk.f32.gmra.mxu2 %vm285_vm1, %v7728_v32  ;;  %7859 = vmatmul.msk.f32.gmra.mxu3 %vm285_vm1, %v7728_v32 }
  0xdf   : > { %7762 = vmatmul.msk.f32.gmra.mxu0 %vm285_vm1, %v7696_v35  ;;  %7827 = vmatmul.msk.f32.gmra.mxu1 %vm285_vm1, %v7696_v35 }
  0xe0   : > { %v9606_v36 = vpop.f32.mrf.mxu2  ;;  %v9608_v37 = vpop.f32.mrf.mxu3 }
  0xe1   : > { %12763 = vst [vmem:[#allocation20_spill] sm:$0xff] %v9606_v36  ;;  %v1522_v36 = vld [vmem:[%s9358_s19 + $0x31] sm:$0xff] }
  0xe2   : > { %12764 = vst [vmem:[#allocation21_spill] sm:$0xff] %v9608_v37 }
  0xe4   : > { %v9611_v39 = vpop.f32.mrf.mxu0  ;;  %v9613_v40 = vpop.f32.mrf.mxu1 }
  0xe5   : > { %7795 = vmatmul.msk.f32.gmra.mxu2 %vm285_vm1, %v7729_v38  ;;  %7860 = vmatmul.msk.f32.gmra.mxu3 %vm285_vm1, %v7729_v38  ;;  %v7700_v38 = vld [vmem:[%s9358_s19 + $0x7a0] sm:$0xff] }
  0xe7   : > { %7763 = vmatmul.msk.f32.gmra.mxu0 %vm285_vm1, %v7697_v41  ;;  %7828 = vmatmul.msk.f32.gmra.mxu1 %vm285_vm1, %v7697_v41 }
  0xe8   : > { %v9620_v42 = vpop.f32.mrf.mxu2  ;;  %v9622_v45 = vpop.f32.mrf.mxu3 }
  0xe9   : > { %12765 = vst [vmem:[#allocation22_spill] sm:$0xff] %v9620_v42  ;;  %v1521_v42 = vld [vmem:[%s9358_s19 + $0x21] sm:$0xff] }
  0xea   : > { %12766 = vst [vmem:[#allocation23_spill] sm:$0xff] %v9622_v45 }
  0xec   : > { %v9625_v51 = vpop.f32.mrf.mxu0  ;;  %v9627_v54 = vpop.f32.mrf.mxu1 }
  0xed   : > { %7796 = vmatmul.msk.f32.gmra.mxu2 %vm285_vm1, %v7730_v48  ;;  %7861 = vmatmul.msk.f32.gmra.mxu3 %vm285_vm1, %v7730_v48 }
  0xef   : > { %7764 = vmatmul.msk.f32.gmra.mxu0 %vm285_vm1, %v7698_v57  ;;  %7829 = vmatmul.msk.f32.gmra.mxu1 %vm285_vm1, %v7698_v57  ;;  %v3213_v57 = vld.sshfl [vmem:[#allocation1] sm:$0xff pattern:$0x75316420] }
  0xf0   : > { %v9634_v60 = vpop.f32.mrf.mxu2  ;;  %v9636_v63 = vpop.f32.mrf.mxu3  ;;  %8387 = vmatpush.msk.msra.mxu0 %vm478_vm0, %v3213_v57  ;;  %v7734_v57 = vld [vmem:[%s9358_s19 + $0x10c0] sm:$0xff] }
  0xf1   : > { %12767 = vst [vmem:[#allocation24_spill] sm:$0xff] %v9634_v60  ;;  %v1520_v60 = vld [vmem:[%s9358_s19 + $0x11] sm:$0xff] }
  0xf2   : > { %12768 = vst [vmem:[#allocation25_spill] sm:$0xff] %v9636_v63 }
  0xf4   : > { %v9639_v5 = vpop.f32.mrf.mxu0  ;;  %v9641_v8 = vpop.f32.mrf.mxu1 }
  0xf5   : > { %7797 = vmatmul.msk.f32.gmra.mxu2 %vm285_vm1, %v7731_v2  ;;  %7862 = vmatmul.msk.f32.gmra.mxu3 %vm285_vm1, %v7731_v2  ;;  %v3214_v2 = vld.sshfl [vmem:[#allocation1 + $0x8] sm:$0xff pattern:$0x75316420] }
  0xf6   : > { %8452 = vmatpush.msk.msra.mxu1 %vm478_vm0, %v3214_v2 }
  0xf7   : > { %7765 = vmatmul.msk.f32.gmra.mxu0 %vm285_vm1, %v7699_v11  ;;  %7830 = vmatmul.msk.f32.gmra.mxu1 %vm285_vm1, %v7699_v11  ;;  %v7733_v11 = vld [vmem:[%s9358_s19 + $0x10b0] sm:$0xff] }
  0xf8   : > { %v9648_v14 = vpop.f32.mrf.mxu2  ;;  %v9650_v17 = vpop.f32.mrf.mxu3 }
  0xf9   : > { %12769 = vst [vmem:[#allocation26_spill] sm:$0xff] %v9648_v14  ;;  %v1519_v14 = vld [vmem:[%s9358_s19 + $0x1] sm:$0xff] }
  0xfa   : > { %12770 = vst [vmem:[#allocation27_spill] sm:$0xff] %v9650_v17 }
  0xfc   : > { %v9658_v32 = vpop.f32.mrf.mxu0  ;;  %v9660_v35 = vpop.f32.mrf.mxu1 }
  0xfd   : > { %7798 = vmatmul.msk.f32.gmra.mxu2 %vm285_vm1, %v7732_v29  ;;  %7863 = vmatmul.msk.f32.gmra.mxu3 %vm285_vm1, %v7732_v29 }
  0xff   : > { %7766 = vmatmul.msk.f32.gmra.mxu0 %vm285_vm1, %v7700_v38  ;;  %7831 = vmatmul.msk.f32.gmra.mxu1 %vm285_vm1, %v7700_v38 }
 0x100   : > { %v9667_v41 = vpop.f32.mrf.mxu2  ;;  %v9669_v48 = vpop.f32.mrf.mxu3 }
 0x101   : > { %12771 = vst [vmem:[#allocation28_spill] sm:$0xff] %v9667_v41  ;;  %v7702_v41 = vld [vmem:[%s9358_s19 + $0x7c0] sm:$0xff] }
 0x102   : > { %12772 = vst [vmem:[#allocation29_spill] sm:$0xff] %v9669_v48 }
 0x104   : > { %v9674_v20 = vpop.f32.mrf.mxu0  ;;  %v9676_v23 = vpop.f32.mrf.mxu1 }
 0x105   : > { %7799 = vmatmul.msk.f32.gmra.mxu2 %vm285_vm1, %v7733_v11  ;;  %7864 = vmatmul.msk.f32.gmra.mxu3 %vm285_vm1, %v7733_v11 }
 0x107   : > { %7767 = vmatmul.msk.f32.gmra.mxu0 %vm285_vm1, %v7701_v26  ;;  %7832 = vmatmul.msk.f32.gmra.mxu1 %vm285_vm1, %v7701_v26 }
 0x108   : > { %v9683_v29 = vpop.f32.mrf.mxu2  ;;  %v9685_v38 = vpop.f32.mrf.mxu3 }
 0x109   : > { %12773 = vst [vmem:[#allocation30_spill] sm:$0xff] %v9683_v29 }
 0x10a   : > { %12774 = vst [vmem:[#allocation31_spill] sm:$0xff] %v9685_v38  ;;  %v149_v38 = vld [vmem:[%s9358_s19] sm:$0xff] }
 0x10c   : > { %v9688_v2 = vpop.f32.mrf.mxu0  ;;  %v9690_v48 = vpop.f32.mrf.mxu1 }
 0x10d   : > { %7800 = vmatmul.msk.f32.gmra.mxu2 %vm285_vm1, %v7734_v57  ;;  %7865 = vmatmul.msk.f32.gmra.mxu3 %vm285_vm1, %v7734_v57 }
 0x10f   : > { %7768 = vmatmul.msk.f32.gmra.mxu0 %vm285_vm1, %v7702_v41  ;;  %7833 = vmatmul.msk.f32.gmra.mxu1 %vm285_vm1, %v7702_v41 }
 0x110   : > { %v9697_v11 = vpop.f32.mrf.mxu2  ;;  %v9699_v26 = vpop.f32.mrf.mxu3 }
 0x111   : > { %12775 = vst [vmem:[#allocation32_spill] sm:$0xff] %v9697_v11 }
 0x112   : > { %12776 = vst [vmem:[#allocation33_spill] sm:$0xff] %v9699_v26  ;;  %v150_v26 = vld [vmem:[%s9358_s19 + $0x10] sm:$0xff] }
 0x114   : > { %v9702_v29 = vpop.f32.mrf.mxu0  ;;  %v9704_v17 = vpop.f32.mrf.mxu1 }
 0x115   : > { %7867 = vmatmul.msk.f32.vlgmr.msrb.gmra.mxu2 %vm285_vm1, %v149_v38  ;;  %7932 = vmatmul.msk.f32.vlgmr.msrb.gmra.mxu3 %vm285_vm1, %v149_v38 }
 0x117   : > { %7998 = vmatmul.msk.f32.vlgmr.msrb.gmra.mxu0 %vm285_vm1, %v1519_v14  ;;  %8063 = vmatmul.msk.f32.vlgmr.msrb.gmra.mxu1 %vm285_vm1, %v1519_v14 }
 0x118   : > { %v9711_v41 = vpop.f32.mrf.mxu2  ;;  %v9713_v57 = vpop.f32.mrf.mxu3 }
 0x119   : > { %12777 = vst [vmem:[#allocation34_spill] sm:$0xff] %v9711_v41 }
 0x11a   : > { %12778 = vst [vmem:[#allocation35_spill] sm:$0xff] %v9713_v57  ;;  %v151_v57 = vld [vmem:[%s9358_s19 + $0x20] sm:$0xff] }
 0x11c   : > { %v9716_v11 = vpop.f32.mrf.mxu0  ;;  %v9718_v63 = vpop.f32.mrf.mxu1 }
 0x11d   : > { %7868 = vmatmul.msk.f32.gmra.mxu2 %vm285_vm1, %v150_v26  ;;  %7933 = vmatmul.msk.f32.gmra.mxu3 %vm285_vm1, %v150_v26 }
 0x11f   : > { %7999 = vmatmul.msk.f32.gmra.mxu0 %vm285_vm1, %v1520_v60  ;;  %8064 = vmatmul.msk.f32.gmra.mxu1 %vm285_vm1, %v1520_v60 }
 0x120   : > { %v9725_v14 = vpop.f32.mrf.mxu2  ;;  %v9727_v38 = vpop.f32.mrf.mxu3 }
 0x121   : > { %12779 = vst [vmem:[#allocation36_spill] sm:$0xff] %v9725_v14 }
 0x122   : > { %12780 = vst [vmem:[#allocation37_spill] sm:$0xff] %v9727_v38  ;;  %v152_v38 = vld [vmem:[%s9358_s19 + $0x30] sm:$0xff] }
 0x124   : > { %v9730_v41 = vpop.f32.mrf.mxu0  ;;  %v9732_v45 = vpop.f32.mrf.mxu1 }
 0x125   : > { %7869 = vmatmul.msk.f32.gmra.mxu2 %vm285_vm1, %v151_v57  ;;  %7934 = vmatmul.msk.f32.gmra.mxu3 %vm285_vm1, %v151_v57 }
 0x127   : > { %8000 = vmatmul.msk.f32.gmra.mxu0 %vm285_vm1, %v1521_v42  ;;  %8065 = vmatmul.msk.f32.gmra.mxu1 %vm285_vm1, %v1521_v42 }
 0x128   : > { %v9739_v60 = vpop.f32.mrf.mxu2  ;;  %v9741_v26 = vpop.f32.mrf.mxu3 }
 0x129   : > { %12781 = vst [vmem:[#allocation38_spill] sm:$0xff] %v9739_v60 }
 0x12a   : > { %12782 = vst [vmem:[#allocation39_spill] sm:$0xff] %v9741_v26  ;;  %v153_v26 = vld [vmem:[%s9358_s19 + $0x40] sm:$0xff] }
 0x12c   : > { %v9744_v14 = vpop.f32.mrf.mxu0  ;;  %v9746_v37 = vpop.f32.mrf.mxu1 }
 0x12d   : > { %7870 = vmatmul.msk.f32.gmra.mxu2 %vm285_vm1, %v152_v38  ;;  %7935 = vmatmul.msk.f32.gmra.mxu3 %vm285_vm1, %v152_v38 }
 0x12f   : > { %8001 = vmatmul.msk.f32.gmra.mxu0 %vm285_vm1, %v1522_v36  ;;  %8066 = vmatmul.msk.f32.gmra.mxu1 %vm285_vm1, %v1522_v36 }
 0x130   : > { %v9753_v42 = vpop.f32.mrf.mxu2  ;;  %v9755_v57 = vpop.f32.mrf.mxu3 }
 0x131   : > { %12783 = vst [vmem:[#allocation40_spill] sm:$0xff] %v9753_v42 }
 0x132   : > { %12784 = vst [vmem:[#allocation41_spill] sm:$0xff] %v9755_v57  ;;  %v154_v57 = vld [vmem:[%s9358_s19 + $0x50] sm:$0xff] }
 0x134   : > { %v9758_v60 = vpop.f32.mrf.mxu0  ;;  %v9760_v31 = vpop.f32.mrf.mxu1 }
 0x135   : > { %7871 = vmatmul.msk.f32.gmra.mxu2 %vm285_vm1, %v153_v26  ;;  %7936 = vmatmul.msk.f32.gmra.mxu3 %vm285_vm1, %v153_v26 }
 0x137   : > { %8002 = vmatmul.msk.f32.gmra.mxu0 %vm285_vm1, %v1523_v30  ;;  %8067 = vmatmul.msk.f32.gmra.mxu1 %vm285_vm1, %v1523_v30 }
 0x138   : > { %v9767_v36 = vpop.f32.mrf.mxu2  ;;  %v9769_v38 = vpop.f32.mrf.mxu3 }
 0x139   : > { %12785 = vst [vmem:[#allocation42_spill] sm:$0xff] %v9767_v36 }
 0x13a   : > { %12786 = vst [vmem:[#allocation43_spill] sm:$0xff] %v9769_v38  ;;  %v155_v38 = vld [vmem:[%s9358_s19 + $0x60] sm:$0xff] }
 0x13c   : > { %v9772_v42 = vpop.f32.mrf.mxu0  ;;  %v9774_v25 = vpop.f32.mrf.mxu1 }
 0x13d   : > { %7872 = vmatmul.msk.f32.gmra.mxu2 %vm285_vm1, %v154_v57  ;;  %7937 = vmatmul.msk.f32.gmra.mxu3 %vm285_vm1, %v154_v57 }
 0x13f   : > { %8003 = vmatmul.msk.f32.gmra.mxu0 %vm285_vm1, %v1524_v24  ;;  %8068 = vmatmul.msk.f32.gmra.mxu1 %vm285_vm1, %v1524_v24 }
 0x140   : > { %v9781_v30 = vpop.f32.mrf.mxu2  ;;  %v9783_v26 = vpop.f32.mrf.mxu3 }
 0x141   : > { %12787 = vst [vmem:[#allocation44_spill] sm:$0xff] %v9781_v30 }
 0x142   : > { %12788 = vst [vmem:[#allocation45_spill] sm:$0xff] %v9783_v26  ;;  %v156_v26 = vld [vmem:[%s9358_s19 + $0x70] sm:$0xff] }
 0x144   : > { %v9786_v36 = vpop.f32.mrf.mxu0  ;;  %v9788_v19 = vpop.f32.mrf.mxu1 }
 0x145   : > { %7873 = vmatmul.msk.f32.gmra.mxu2 %vm285_vm1, %v155_v38  ;;  %7938 = vmatmul.msk.f32.gmra.mxu3 %vm285_vm1, %v155_v38 }
 0x147   : > { %8004 = vmatmul.msk.f32.gmra.mxu0 %vm285_vm1, %v1525_v18  ;;  %8069 = vmatmul.msk.f32.gmra.mxu1 %vm285_vm1, %v1525_v18 }
 0x148   : > { %v9795_v24 = vpop.f32.mrf.mxu2  ;;  %v9797_v57 = vpop.f32.mrf.mxu3 }
 0x149   : > { %12789 = vst [vmem:[#allocation46_spill] sm:$0xff] %v9795_v24 }
 0x14a   : > { %12790 = vst [vmem:[#allocation47_spill] sm:$0xff] %v9797_v57  ;;  %v157_v57 = vld [vmem:[%s9358_s19 + $0x240] sm:$0xff] }
 0x14c   : > { %v9800_v30 = vpop.f32.mrf.mxu0  ;;  %v9802_v13 = vpop.f32.mrf.mxu1 }
 0x14d   : > { %7874 = vmatmul.msk.f32.gmra.mxu2 %vm285_vm1, %v156_v26  ;;  %7939 = vmatmul.msk.f32.gmra.mxu3 %vm285_vm1, %v156_v26 }
 0x14f   : > { %8005 = vmatmul.msk.f32.gmra.mxu0 %vm285_vm1, %v1526_v12  ;;  %8070 = vmatmul.msk.f32.gmra.mxu1 %vm285_vm1, %v1526_v12 }
 0x150   : > { %v9809_v18 = vpop.f32.mrf.mxu2  ;;  %v9811_v38 = vpop.f32.mrf.mxu3 }
 0x151   : > { %12791 = vst [vmem:[#allocation48_spill] sm:$0xff] %v9809_v18 }
 0x152   : > { %12792 = vst [vmem:[#allocation49_spill] sm:$0xff] %v9811_v38  ;;  %v158_v38 = vld [vmem:[%s9358_s19 + $0x250] sm:$0xff] }
 0x154   : > { %v9814_v24 = vpop.f32.mrf.mxu0  ;;  %v9816_v7 = vpop.f32.mrf.mxu1 }
 0x155   : > { %7875 = vmatmul.msk.f32.gmra.mxu2 %vm285_vm1, %v157_v57  ;;  %7940 = vmatmul.msk.f32.gmra.mxu3 %vm285_vm1, %v157_v57 }
 0x157   : > { %8006 = vmatmul.msk.f32.gmra.mxu0 %vm285_vm1, %v1527_v6  ;;  %8071 = vmatmul.msk.f32.gmra.mxu1 %vm285_vm1, %v1527_v6 }
 0x158   : > { %v9823_v12 = vpop.f32.mrf.mxu2  ;;  %v9825_v26 = vpop.f32.mrf.mxu3 }
 0x159   : > { %12793 = vst [vmem:[#allocation50_spill] sm:$0xff] %v9823_v12 }
 0x15a   : > { %12794 = vst [vmem:[#allocation51_spill] sm:$0xff] %v9825_v26  ;;  %v159_v26 = vld [vmem:[%s9358_s19 + $0x260] sm:$0xff] }
 0x15c   : > { %v9828_v18 = vpop.f32.mrf.mxu0  ;;  %v9830_v1 = vpop.f32.mrf.mxu1 }
 0x15d   : > { %12795 = vst [vmem:[#allocation52_spill] sm:$0xff] %v9830_v1  ;;  %7876 = vmatmul.msk.f32.gmra.mxu2 %vm285_vm1, %v158_v38  ;;  %7941 = vmatmul.msk.f32.gmra.mxu3 %vm285_vm1, %v158_v38 }
 0x15f   : > { %8007 = vmatmul.msk.f32.gmra.mxu0 %vm285_vm1, %v1528_v0  ;;  %8072 = vmatmul.msk.f32.gmra.mxu1 %vm285_vm1, %v1528_v0 }
 0x160   : > { %v9837_v6 = vpop.f32.mrf.mxu2  ;;  %v9839_v57 = vpop.f32.mrf.mxu3 }
 0x161   : > { %12796 = vst [vmem:[#allocation53_spill] sm:$0xff] %v9837_v6 }
 0x162   : > { %12797 = vst [vmem:[#allocation54_spill] sm:$0xff] %v9839_v57  ;;  %v160_v57 = vld [vmem:[%s9358_s19 + $0x270] sm:$0xff] }
 0x164   : > { %v9842_v12 = vpop.f32.mrf.mxu0  ;;  %v9844_v59 = vpop.f32.mrf.mxu1 }
 0x165   : > { %12798 = vst [vmem:[#allocation55_spill] sm:$0xff] %v9842_v12  ;;  %7877 = vmatmul.msk.f32.gmra.mxu2 %vm285_vm1, %v159_v26  ;;  %7942 = vmatmul.msk.f32.gmra.mxu3 %vm285_vm1, %v159_v26 }
 0x166   : > { %12799 = vst [vmem:[#allocation56_spill] sm:$0xff] %v9844_v59 }
 0x167   : > { %8008 = vmatmul.msk.f32.gmra.mxu0 %vm285_vm1, %v1529_v58  ;;  %8073 = vmatmul.msk.f32.gmra.mxu1 %vm285_vm1, %v1529_v58 }
 0x168   : > { %v9851_v0 = vpop.f32.mrf.mxu2  ;;  %v9853_v38 = vpop.f32.mrf.mxu3 }
 0x169   : > { %12800 = vst [vmem:[#allocation57_spill] sm:$0xff] %v9851_v0 }
 0x16a   : > { %12801 = vst [vmem:[#allocation58_spill] sm:$0xff] %v9853_v38  ;;  %v161_v38 = vld [vmem:[%s9358_s19 + $0x280] sm:$0xff] }
 0x16c   : > { %v9856_v6 = vpop.f32.mrf.mxu0  ;;  %v9858_v53 = vpop.f32.mrf.mxu1 }
 0x16d   : > { %12802 = vst [vmem:[#allocation59_spill] sm:$0xff] %v9856_v6  ;;  %7878 = vmatmul.msk.f32.gmra.mxu2 %vm285_vm1, %v160_v57  ;;  %7943 = vmatmul.msk.f32.gmra.mxu3 %vm285_vm1, %v160_v57 }
 0x16e   : > { %12803 = vst [vmem:[#allocation60_spill] sm:$0xff] %v9858_v53  ;;  %v1535_v53 = vld [vmem:[%s9358_s19 + $0x481] sm:$0xff] }
 0x16f   : > { %8009 = vmatmul.msk.f32.gmra.mxu0 %vm285_vm1, %v1530_v52  ;;  %8074 = vmatmul.msk.f32.gmra.mxu1 %vm285_vm1, %v1530_v52 }
 0x170   : > { %v9865_v58 = vpop.f32.mrf.mxu2  ;;  %v9867_v26 = vpop.f32.mrf.mxu3 }
 0x171   : > { %12804 = vst [vmem:[#allocation61_spill] sm:$0xff] %v9865_v58 }
 0x172   : > { %12805 = vst [vmem:[#allocation62_spill] sm:$0xff] %v9867_v26  ;;  %v162_v26 = vld [vmem:[%s9358_s19 + $0x290] sm:$0xff] }
 0x174   : > { %v9870_v0 = vpop.f32.mrf.mxu0  ;;  %v9872_v47 = vpop.f32.mrf.mxu1 }
 0x175   : > { %12806 = vst [vmem:[#allocation63_spill] sm:$0xff] %v9870_v0  ;;  %7879 = vmatmul.msk.f32.gmra.mxu2 %vm285_vm1, %v161_v38  ;;  %7944 = vmatmul.msk.f32.gmra.mxu3 %vm285_vm1, %v161_v38 }
 0x176   : > { %12807 = vst [vmem:[#allocation64_spill] sm:$0xff] %v9872_v47  ;;  %v1532_v47 = vld [vmem:[%s9358_s19 + $0x291] sm:$0xff] }
 0x177   : > { %8010 = vmatmul.msk.f32.gmra.mxu0 %vm285_vm1, %v1531_v46  ;;  %8075 = vmatmul.msk.f32.gmra.mxu1 %vm285_vm1, %v1531_v46 }
 0x178   : > { %v9879_v52 = vpop.f32.mrf.mxu2  ;;  %v9881_v57 = vpop.f32.mrf.mxu3 }
 0x179   : > { %12808 = vst [vmem:[#allocation65_spill] sm:$0xff] %v9879_v52 }
 0x17a   : > { %12809 = vst [vmem:[#allocation66_spill] sm:$0xff] %v9881_v57  ;;  %v163_v57 = vld [vmem:[%s9358_s19 + $0x2a0] sm:$0xff] }
 0x17c   : > { %v9884_v58 = vpop.f32.mrf.mxu0  ;;  %v9886_v0 = vpop.f32.mrf.mxu1 }
 0x17d   : > { %12810 = vst [vmem:[#allocation67_spill] sm:$0xff] %v9884_v58  ;;  %7880 = vmatmul.msk.f32.gmra.mxu2 %vm285_vm1, %v162_v26  ;;  %7945 = vmatmul.msk.f32.gmra.mxu3 %vm285_vm1, %v162_v26 }
 0x17e   : > { %12811 = vst [vmem:[#allocation68_spill] sm:$0xff] %v9886_v0  ;;  %v1533_v0 = vld [vmem:[%s9358_s19 + $0x2a1] sm:$0xff] }
 0x17f   : > { %8011 = vmatmul.msk.f32.gmra.mxu0 %vm285_vm1, %v1532_v47  ;;  %8076 = vmatmul.msk.f32.gmra.mxu1 %vm285_vm1, %v1532_v47 }
 0x180   : > { %v9893_v46 = vpop.f32.mrf.mxu2  ;;  %v9895_v38 = vpop.f32.mrf.mxu3 }
 0x181   : > { %12812 = vst [vmem:[#allocation69_spill] sm:$0xff] %v9893_v46 }
 0x182   : > { %12813 = vst [vmem:[#allocation70_spill] sm:$0xff] %v9895_v38  ;;  %v164_v38 = vld [vmem:[%s9358_s19 + $0x2b0] sm:$0xff] }
 0x184   : > { %v9898_v52 = vpop.f32.mrf.mxu0  ;;  %v9900_v58 = vpop.f32.mrf.mxu1 }
 0x185   : > { %12814 = vst [vmem:[#allocation71_spill] sm:$0xff] %v9898_v52  ;;  %7881 = vmatmul.msk.f32.gmra.mxu2 %vm285_vm1, %v163_v57  ;;  %7946 = vmatmul.msk.f32.gmra.mxu3 %vm285_vm1, %v163_v57 }
 0x186   : > { %12815 = vst [vmem:[#allocation72_spill] sm:$0xff] %v9900_v58  ;;  %v1534_v58 = vld [vmem:[%s9358_s19 + $0x2b1] sm:$0xff] }
 0x187   : > { %8012 = vmatmul.msk.f32.gmra.mxu0 %vm285_vm1, %v1533_v0  ;;  %8077 = vmatmul.msk.f32.gmra.mxu1 %vm285_vm1, %v1533_v0 }
 0x188   : > { %v9907_v47 = vpop.f32.mrf.mxu2  ;;  %v9909_v26 = vpop.f32.mrf.mxu3 }
 0x189   : > { %12816 = vst [vmem:[#allocation73_spill] sm:$0xff] %v9907_v47 }
 0x18a   : > { %12817 = vst [vmem:[#allocation74_spill] sm:$0xff] %v9909_v26  ;;  %v165_v26 = vld [vmem:[%s9358_s19 + $0x480] sm:$0xff] }
 0x18c   : > { %v9912_v46 = vpop.f32.mrf.mxu0  ;;  %v9914_v52 = vpop.f32.mrf.mxu1 }
 0x18d   : > { %12818 = vst [vmem:[#allocation75_spill] sm:$0xff] %v9912_v46  ;;  %7882 = vmatmul.msk.f32.gmra.mxu2 %vm285_vm1, %v164_v38  ;;  %7947 = vmatmul.msk.f32.gmra.mxu3 %vm285_vm1, %v164_v38 }
 0x18e   : > { %12819 = vst [vmem:[#allocation76_spill] sm:$0xff] %v9914_v52 }
 0x18f   : > { %8013 = vmatmul.msk.f32.gmra.mxu0 %vm285_vm1, %v1534_v58  ;;  %8078 = vmatmul.msk.f32.gmra.mxu1 %vm285_vm1, %v1534_v58 }
 0x190   : > { %v9921_v0 = vpop.f32.mrf.mxu2  ;;  %v9923_v57 = vpop.f32.mrf.mxu3 }
 0x191   : > { %12820 = vst [vmem:[#allocation77_spill] sm:$0xff] %v9921_v0  ;;  %v166_v0 = vld [vmem:[%s9358_s19 + $0x490] sm:$0xff] }
 0x192   : > { %12821 = vst [vmem:[#allocation78_spill] sm:$0xff] %v9923_v57 }
 0x194   : > { %v1802_v47 = vpop.f32.mrf.mxu0  ;;  %v2011_v46 = vpop.f32.mrf.mxu1 }
 0x195   : > { %7883 = vmatmul.msk.f32.gmra.mxu2 %vm285_vm1, %v165_v26  ;;  %7948 = vmatmul.msk.f32.gmra.mxu3 %vm285_vm1, %v165_v26  ;;  %v1536_v26 = vld [vmem:[%s9358_s19 + $0x491] sm:$0xff] }
 0x197   : > { %8014 = vmatmul.msk.f32.gmra.mxu0 %vm285_vm1, %v1535_v53  ;;  %8079 = vmatmul.msk.f32.gmra.mxu1 %vm285_vm1, %v1535_v53 }
 0x198   : > { %v1118_v38 = vpop.f32.mrf.mxu2  ;;  %v1327_v52 = vpop.f32.mrf.mxu3 }
 0x199   : > { %v1119_v58 = vadd.f32 %v1118_v38, %v9471_v43  ;;  %v1328_v57 = vadd.f32 %v1327_v52, %v9473_v44 }
 0x19b   : > { %v9934_v6 = vadd.f32 %v1802_v47, %v1119_v58  ;;  %v9936_v59 = vadd.f32 %v2011_v46, %v1328_v57  ;;  %v167_v46 = vld [vmem:[%s9358_s19 + $0x4a0] sm:$0xff] }
 0x19c   : > { %v1805_v12 = vpop.f32.mrf.mxu0  ;;  %v2014_v1 = vpop.f32.mrf.mxu1 }
 0x19d   : > { %7884 = vmatmul.msk.f32.gmra.mxu2 %vm285_vm1, %v166_v0  ;;  %7949 = vmatmul.msk.f32.gmra.mxu3 %vm285_vm1, %v166_v0  ;;  %v1537_v0 = vld [vmem:[%s9358_s19 + $0x4a1] sm:$0xff] }
 0x19f   : > { %8015 = vmatmul.msk.f32.gmra.mxu0 %vm285_vm1, %v1536_v26  ;;  %8080 = vmatmul.msk.f32.gmra.mxu1 %vm285_vm1, %v1536_v26 }
 0x1a0   : > { %v1121_v43 = vpop.f32.mrf.mxu2  ;;  %v1330_v53 = vpop.f32.mrf.mxu3 }
 0x1a1   : > { %v1122_v44 = vadd.f32 %v1121_v43, %v9485_v49  ;;  %v1331_v52 = vadd.f32 %v1330_v53, %v9487_v50 }
 0x1a3   : > { %v9946_v47 = vadd.f32 %v1805_v12, %v1122_v44  ;;  %v9948_v57 = vadd.f32 %v2014_v1, %v1331_v52  ;;  %v168_v12 = vld [vmem:[%s9358_s19 + $0x4b0] sm:$0xff] }
 0x1a4   : > { %v1808_v38 = vpop.f32.mrf.mxu0  ;;  %v2017_v58 = vpop.f32.mrf.mxu1 }
 0x1a5   : > { %7885 = vmatmul.msk.f32.gmra.mxu2 %vm285_vm1, %v167_v46  ;;  %7950 = vmatmul.msk.f32.gmra.mxu3 %vm285_vm1, %v167_v46  ;;  %v1538_v46 = vld [vmem:[%s9358_s19 + $0x4b1] sm:$0xff] }
 0x1a7   : > { %8016 = vmatmul.msk.f32.gmra.mxu0 %vm285_vm1, %v1537_v0  ;;  %8081 = vmatmul.msk.f32.gmra.mxu1 %vm285_vm1, %v1537_v0 }
 0x1a8   : > { %v1124_v49 = vpop.f32.mrf.mxu2  ;;  %v1333_v26 = vpop.f32.mrf.mxu3 }
 0x1a9   : > { %v1125_v50 = vadd.f32 %v1124_v49, %v9499_v55  ;;  %v1334_v1 = vadd.f32 %v1333_v26, %v9501_v56 }
 0x1ab   : > { %v9958_v43 = vadd.f32 %v1808_v38, %v1125_v50  ;;  %v9960_v53 = vadd.f32 %v2017_v58, %v1334_v1  ;;  %v169_v58 = vld [vmem:[%s9358_s19 + $0x4c0] sm:$0xff] }
 0x1ac   : > { %v1811_v44 = vpop.f32.mrf.mxu0  ;;  %v2020_v52 = vpop.f32.mrf.mxu1 }
 0x1ad   : > { %7886 = vmatmul.msk.f32.gmra.mxu2 %vm285_vm1, %v168_v12  ;;  %7951 = vmatmul.msk.f32.gmra.mxu3 %vm285_vm1, %v168_v12  ;;  %v1539_v12 = vld [vmem:[%s9358_s19 + $0x4c1] sm:$0xff] }
 0x1af   : > { %8017 = vmatmul.msk.f32.gmra.mxu0 %vm285_vm1, %v1538_v46  ;;  %8082 = vmatmul.msk.f32.gmra.mxu1 %vm285_vm1, %v1538_v46 }
 0x1b0   : > { %v1127_v55 = vpop.f32.mrf.mxu2  ;;  %v1336_v0 = vpop.f32.mrf.mxu3 }
 0x1b1   : > { %v1128_v56 = vadd.f32 %v1127_v55, %v9513_v61  ;;  %v1337_v38 = vadd.f32 %v1336_v0, %v9515_v62 }
 0x1b3   : > { %v9970_v49 = vadd.f32 %v1811_v44, %v1128_v56  ;;  %v9972_v26 = vadd.f32 %v2020_v52, %v1337_v38  ;;  %v170_v52 = vld [vmem:[%s9358_s19 + $0x4d0] sm:$0xff] }
 0x1b4   : > { %v1814_v50 = vpop.f32.mrf.mxu0  ;;  %v2023_v1 = vpop.f32.mrf.mxu1 }
 0x1b5   : > { %7887 = vmatmul.msk.f32.gmra.mxu2 %vm285_vm1, %v169_v58  ;;  %7952 = vmatmul.msk.f32.gmra.mxu3 %vm285_vm1, %v169_v58  ;;  %v1540_v58 = vld [vmem:[%s9358_s19 + $0x4d1] sm:$0xff] }
 0x1b7   : > { %8018 = vmatmul.msk.f32.gmra.mxu0 %vm285_vm1, %v1539_v12  ;;  %8083 = vmatmul.msk.f32.gmra.mxu1 %vm285_vm1, %v1539_v12 }
 0x1b8   : > { %v1130_v61 = vpop.f32.mrf.mxu2  ;;  %v1339_v46 = vpop.f32.mrf.mxu3 }
 0x1b9   : > { %v1131_v62 = vadd.f32 %v1130_v61, %v9527_v3  ;;  %v1340_v44 = vadd.f32 %v1339_v46, %v9529_v4 }
 0x1bb   : > { %v9982_v55 = vadd.f32 %v1814_v50, %v1131_v62  ;;  %v9984_v0 = vadd.f32 %v2023_v1, %v1340_v44  ;;  %v171_v1 = vld [vmem:[%s9358_s19 + $0x4e0] sm:$0xff] }
 0x1bc   : > { %v1817_v56 = vpop.f32.mrf.mxu0  ;;  %v2026_v38 = vpop.f32.mrf.mxu1 }
 0x1bd   : > { %7888 = vmatmul.msk.f32.gmra.mxu2 %vm285_vm1, %v170_v52  ;;  %7953 = vmatmul.msk.f32.gmra.mxu3 %vm285_vm1, %v170_v52  ;;  %v1541_v52 = vld [vmem:[%s9358_s19 + $0x4e1] sm:$0xff] }
 0x1bf   : > { %8019 = vmatmul.msk.f32.gmra.mxu0 %vm285_vm1, %v1540_v58  ;;  %8084 = vmatmul.msk.f32.gmra.mxu1 %vm285_vm1, %v1540_v58 }
 0x1c0   : > { %v1133_v3 = vpop.f32.mrf.mxu2  ;;  %v1342_v12 = vpop.f32.mrf.mxu3 }
 0x1c1   : > { %v1134_v4 = vadd.f32 %v1133_v3, %v9541_v9  ;;  %v1343_v50 = vadd.f32 %v1342_v12, %v9543_v10 }
 0x1c3   : > { %v9994_v61 = vadd.f32 %v1817_v56, %v1134_v4  ;;  %v9996_v46 = vadd.f32 %v2026_v38, %v1343_v50  ;;  %v172_v38 = vld [vmem:[%s9358_s19 + $0x4f0] sm:$0xff] }
 0x1c4   : > { %v1820_v62 = vpop.f32.mrf.mxu0  ;;  %v2029_v44 = vpop.f32.mrf.mxu1 }
 0x1c5   : > { %7889 = vmatmul.msk.f32.gmra.mxu2 %vm285_vm1, %v171_v1  ;;  %7954 = vmatmul.msk.f32.gmra.mxu3 %vm285_vm1, %v171_v1  ;;  %v1542_v1 = vld [vmem:[%s9358_s19 + $0x4f1] sm:$0xff] }
 0x1c7   : > { %8020 = vmatmul.msk.f32.gmra.mxu0 %vm285_vm1, %v1541_v52  ;;  %8085 = vmatmul.msk.f32.gmra.mxu1 %vm285_vm1, %v1541_v52 }
 0x1c8   : > { %v1136_v9 = vpop.f32.mrf.mxu2  ;;  %v1345_v58 = vpop.f32.mrf.mxu3 }
 0x1c9   : > { %v1137_v10 = vadd.f32 %v1136_v9, %v9555_v15  ;;  %v1346_v56 = vadd.f32 %v1345_v58, %v9557_v16 }
 0x1cb   : > { %v10006_v3 = vadd.f32 %v1820_v62, %v1137_v10  ;;  %v10008_v12 = vadd.f32 %v2029_v44, %v1346_v56  ;;  %v173_v44 = vld [vmem:[%s9358_s19 + $0x6c0] sm:$0xff] }
 0x1cc   : > { %v1823_v4 = vpop.f32.mrf.mxu0  ;;  %v2032_v50 = vpop.f32.mrf.mxu1 }
 0x1cd   : > { %7890 = vmatmul.msk.f32.gmra.mxu2 %vm285_vm1, %v172_v38  ;;  %7955 = vmatmul.msk.f32.gmra.mxu3 %vm285_vm1, %v172_v38  ;;  %v1543_v38 = vld [vmem:[%s9358_s19 + $0x6c1] sm:$0xff] }
 0x1cf   : > { %8021 = vmatmul.msk.f32.gmra.mxu0 %vm285_vm1, %v1542_v1  ;;  %8086 = vmatmul.msk.f32.gmra.mxu1 %vm285_vm1, %v1542_v1 }
 0x1d0   : > { %v1139_v15 = vpop.f32.mrf.mxu2  ;;  %v1348_v52 = vpop.f32.mrf.mxu3 }
 0x1d1   : > { %v1140_v16 = vadd.f32 %v1139_v15, %v9569_v21  ;;  %v1349_v62 = vadd.f32 %v1348_v52, %v9571_v22 }
 0x1d3   : > { %v10018_v9 = vadd.f32 %v1823_v4, %v1140_v16  ;;  %v10020_v58 = vadd.f32 %v2032_v50, %v1349_v62  ;;  %v174_v50 = vld [vmem:[%s9358_s19 + $0x6d0] sm:$0xff] }
 0x1d4   : > { %v1826_v10 = vpop.f32.mrf.mxu0  ;;  %v2035_v56 = vpop.f32.mrf.mxu1 }
 0x1d5   : > { %7891 = vmatmul.msk.f32.gmra.mxu2 %vm285_vm1, %v173_v44  ;;  %7956 = vmatmul.msk.f32.gmra.mxu3 %vm285_vm1, %v173_v44  ;;  %v1544_v44 = vld [vmem:[%s9358_s19 + $0x6d1] sm:$0xff] }
 0x1d7   : > { %8022 = vmatmul.msk.f32.gmra.mxu0 %vm285_vm1, %v1543_v38  ;;  %8087 = vmatmul.msk.f32.gmra.mxu1 %vm285_vm1, %v1543_v38 }
 0x1d8   : > { %v1142_v21 = vpop.f32.mrf.mxu2  ;;  %v1351_v1 = vpop.f32.mrf.mxu3 }
 0x1d9   : > { %v1143_v22 = vadd.f32 %v1142_v21, %v9583_v27  ;;  %v1352_v4 = vadd.f32 %v1351_v1, %v9585_v28 }
 0x1db   : > { %v10030_v15 = vadd.f32 %v1826_v10, %v1143_v22  ;;  %v10032_v52 = vadd.f32 %v2035_v56, %v1352_v4  ;;  %v175_v56 = vld [vmem:[%s9358_s19 + $0x6e0] sm:$0xff] }
 0x1dc   : > { %v1829_v16 = vpop.f32.mrf.mxu0  ;;  %v2038_v62 = vpop.f32.mrf.mxu1 }
 0x1dd   : > { %7892 = vmatmul.msk.f32.gmra.mxu2 %vm285_vm1, %v174_v50  ;;  %7957 = vmatmul.msk.f32.gmra.mxu3 %vm285_vm1, %v174_v50  ;;  %v1545_v50 = vld [vmem:[%s9358_s19 + $0x6e1] sm:$0xff] }
 0x1df   : > { %8023 = vmatmul.msk.f32.gmra.mxu0 %vm285_vm1, %v1544_v44  ;;  %8088 = vmatmul.msk.f32.gmra.mxu1 %vm285_vm1, %v1544_v44 }
 0x1e0   : > { %v1145_v27 = vpop.f32.mrf.mxu2  ;;  %v1354_v38 = vpop.f32.mrf.mxu3 }
 0x1e1   : > { %v1146_v28 = vadd.f32 %v1145_v27, %v9597_v33  ;;  %v1355_v10 = vadd.f32 %v1354_v38, %v9599_v34 }
 0x1e3   : > { %v10042_v21 = vadd.f32 %v1829_v16, %v1146_v28  ;;  %v10044_v1 = vadd.f32 %v2038_v62, %v1355_v10  ;;  %v176_v62 = vld [vmem:[%s9358_s19 + $0x6f0] sm:$0xff] }
 0x1e4   : > { %v1832_v22 = vpop.f32.mrf.mxu0  ;;  %v2041_v4 = vpop.f32.mrf.mxu1 }
 0x1e5   : > { %7893 = vmatmul.msk.f32.gmra.mxu2 %vm285_vm1, %v175_v56  ;;  %7958 = vmatmul.msk.f32.gmra.mxu3 %vm285_vm1, %v175_v56  ;;  %v1546_v56 = vld [vmem:[%s9358_s19 + $0x6f1] sm:$0xff] }
 0x1e7   : > { %8024 = vmatmul.msk.f32.gmra.mxu0 %vm285_vm1, %v1545_v50  ;;  %8089 = vmatmul.msk.f32.gmra.mxu1 %vm285_vm1, %v1545_v50 }
 0x1e8   : > { %v1148_v33 = vpop.f32.mrf.mxu2  ;;  %v1357_v44 = vpop.f32.mrf.mxu3 }
 0x1e9   : > { %v1149_v34 = vadd.f32 %v1148_v33, %v9611_v39  ;;  %v1358_v16 = vadd.f32 %v1357_v44, %v9613_v40 }
 0x1eb   : > { %v10054_v27 = vadd.f32 %v1832_v22, %v1149_v34  ;;  %v10056_v38 = vadd.f32 %v2041_v4, %v1358_v16  ;;  %v177_v4 = vld [vmem:[%s9358_s19 + $0x700] sm:$0xff] }
 0x1ec   : > { %v1835_v28 = vpop.f32.mrf.mxu0  ;;  %v2044_v10 = vpop.f32.mrf.mxu1 }
 0x1ed   : > { %7894 = vmatmul.msk.f32.gmra.mxu2 %vm285_vm1, %v176_v62  ;;  %7959 = vmatmul.msk.f32.gmra.mxu3 %vm285_vm1, %v176_v62  ;;  %v1547_v62 = vld [vmem:[%s9358_s19 + $0x701] sm:$0xff] }
 0x1ef   : > { %8025 = vmatmul.msk.f32.gmra.mxu0 %vm285_vm1, %v1546_v56  ;;  %8090 = vmatmul.msk.f32.gmra.mxu1 %vm285_vm1, %v1546_v56 }
 0x1f0   : > { %v1151_v39 = vpop.f32.mrf.mxu2  ;;  %v1360_v50 = vpop.f32.mrf.mxu3 }
 0x1f1   : > { %v1152_v40 = vadd.f32 %v1151_v39, %v9625_v51  ;;  %v1361_v22 = vadd.f32 %v1360_v50, %v9627_v54 }
 0x1f3   : > { %v10066_v33 = vadd.f32 %v1835_v28, %v1152_v40  ;;  %v10068_v44 = vadd.f32 %v2044_v10, %v1361_v22  ;;  %v178_v10 = vld [vmem:[%s9358_s19 + $0x710] sm:$0xff] }
 0x1f4   : > { %v1838_v34 = vpop.f32.mrf.mxu0  ;;  %v2047_v16 = vpop.f32.mrf.mxu1 }
 0x1f5   : > { %7895 = vmatmul.msk.f32.gmra.mxu2 %vm285_vm1, %v177_v4  ;;  %7960 = vmatmul.msk.f32.gmra.mxu3 %vm285_vm1, %v177_v4  ;;  %v1548_v4 = vld [vmem:[%s9358_s19 + $0x711] sm:$0xff] }
 0x1f7   : > { %8026 = vmatmul.msk.f32.gmra.mxu0 %vm285_vm1, %v1547_v62  ;;  %8091 = vmatmul.msk.f32.gmra.mxu1 %vm285_vm1, %v1547_v62 }
 0x1f8   : > { %v1154_v51 = vpop.f32.mrf.mxu2  ;;  %v1363_v56 = vpop.f32.mrf.mxu3 }
 0x1f9   : > { %v1155_v54 = vadd.f32 %v1154_v51, %v9639_v5  ;;  %v1364_v28 = vadd.f32 %v1363_v56, %v9641_v8 }
 0x1fb   : > { %v10078_v39 = vadd.f32 %v1838_v34, %v1155_v54  ;;  %v10080_v50 = vadd.f32 %v2047_v16, %v1364_v28  ;;  %v179_v16 = vld [vmem:[%s9358_s19 + $0x720] sm:$0xff] }
 0x1fc   : > { %v1841_v40 = vpop.f32.mrf.mxu0  ;;  %v2050_v22 = vpop.f32.mrf.mxu1 }
 0x1fd   : > { %7896 = vmatmul.msk.f32.gmra.mxu2 %vm285_vm1, %v178_v10  ;;  %7961 = vmatmul.msk.f32.gmra.mxu3 %vm285_vm1, %v178_v10  ;;  %v1549_v10 = vld [vmem:[%s9358_s19 + $0x721] sm:$0xff] }
 0x1ff   : > { %8027 = vmatmul.msk.f32.gmra.mxu0 %vm285_vm1, %v1548_v4  ;;  %8092 = vmatmul.msk.f32.gmra.mxu1 %vm285_vm1, %v1548_v4 }
 0x200   : > { %v1157_v5 = vpop.f32.mrf.mxu2  ;;  %v1366_v62 = vpop.f32.mrf.mxu3 }
 0x201   : > { %v1158_v8 = vadd.f32 %v1157_v5, %v9658_v32  ;;  %v1367_v34 = vadd.f32 %v1366_v62, %v9660_v35 }
 0x203   : > { %v10090_v51 = vadd.f32 %v1841_v40, %v1158_v8  ;;  %v10092_v56 = vadd.f32 %v2050_v22, %v1367_v34  ;;  %v180_v22 = vld [vmem:[%s9358_s19 + $0x730] sm:$0xff] }
 0x204   : > { %v1844_v54 = vpop.f32.mrf.mxu0  ;;  %v2053_v28 = vpop.f32.mrf.mxu1 }
 0x205   : > { %7897 = vmatmul.msk.f32.gmra.mxu2 %vm285_vm1, %v179_v16  ;;  %7962 = vmatmul.msk.f32.gmra.mxu3 %vm285_vm1, %v179_v16  ;;  %v1550_v16 = vld [vmem:[%s9358_s19 + $0x731] sm:$0xff] }
 0x207   : > { %8028 = vmatmul.msk.f32.gmra.mxu0 %vm285_vm1, %v1549_v10  ;;  %8093 = vmatmul.msk.f32.gmra.mxu1 %vm285_vm1, %v1549_v10 }
 0x208   : > { %v1160_v32 = vpop.f32.mrf.mxu2  ;;  %v1369_v4 = vpop.f32.mrf.mxu3 }
 0x209   : > { %v1161_v35 = vadd.f32 %v1160_v32, %v9674_v20  ;;  %v1370_v40 = vadd.f32 %v1369_v4, %v9676_v23 }
 0x20b   : > { %v10102_v5 = vadd.f32 %v1844_v54, %v1161_v35  ;;  %v10104_v62 = vadd.f32 %v2053_v28, %v1370_v40  ;;  %v181_v28 = vld [vmem:[%s9358_s19 + $0x900] sm:$0xff] }
 0x20c   : > { %v1847_v8 = vpop.f32.mrf.mxu0  ;;  %v2056_v34 = vpop.f32.mrf.mxu1 }
 0x20d   : > { %7898 = vmatmul.msk.f32.gmra.mxu2 %vm285_vm1, %v180_v22  ;;  %7963 = vmatmul.msk.f32.gmra.mxu3 %vm285_vm1, %v180_v22  ;;  %v1551_v22 = vld [vmem:[%s9358_s19 + $0x901] sm:$0xff] }
 0x20f   : > { %8029 = vmatmul.msk.f32.gmra.mxu0 %vm285_vm1, %v1550_v16  ;;  %8094 = vmatmul.msk.f32.gmra.mxu1 %vm285_vm1, %v1550_v16 }
 0x210   : > { %v1163_v20 = vpop.f32.mrf.mxu2  ;;  %v1372_v10 = vpop.f32.mrf.mxu3 }
 0x211   : > { %v1164_v23 = vadd.f32 %v1163_v20, %v9688_v2  ;;  %v1373_v54 = vadd.f32 %v1372_v10, %v9690_v48 }
 0x213   : > { %v10114_v32 = vadd.f32 %v1847_v8, %v1164_v23  ;;  %v10116_v4 = vadd.f32 %v2056_v34, %v1373_v54  ;;  %v182_v34 = vld [vmem:[%s9358_s19 + $0x910] sm:$0xff] }
 0x214   : > { %v1850_v35 = vpop.f32.mrf.mxu0  ;;  %v2059_v40 = vpop.f32.mrf.mxu1 }
 0x215   : > { %7899 = vmatmul.msk.f32.gmra.mxu2 %vm285_vm1, %v181_v28  ;;  %7964 = vmatmul.msk.f32.gmra.mxu3 %vm285_vm1, %v181_v28  ;;  %v1552_v28 = vld [vmem:[%s9358_s19 + $0x911] sm:$0xff] }
 0x217   : > { %8030 = vmatmul.msk.f32.gmra.mxu0 %vm285_vm1, %v1551_v22  ;;  %8095 = vmatmul.msk.f32.gmra.mxu1 %vm285_vm1, %v1551_v22 }
 0x218   : > { %v1166_v2 = vpop.f32.mrf.mxu2  ;;  %v1375_v16 = vpop.f32.mrf.mxu3 }
 0x219   : > { %v1167_v48 = vadd.f32 %v1166_v2, %v9702_v29  ;;  %v1376_v8 = vadd.f32 %v1375_v16, %v9704_v17 }
 0x21b   : > { %v10126_v20 = vadd.f32 %v1850_v35, %v1167_v48  ;;  %v10128_v10 = vadd.f32 %v2059_v40, %v1376_v8  ;;  %v183_v40 = vld [vmem:[%s9358_s19 + $0x920] sm:$0xff] }
 0x21c   : > { %v1853_v23 = vpop.f32.mrf.mxu0  ;;  %v2062_v54 = vpop.f32.mrf.mxu1 }
 0x21d   : > { %7900 = vmatmul.msk.f32.gmra.mxu2 %vm285_vm1, %v182_v34  ;;  %7965 = vmatmul.msk.f32.gmra.mxu3 %vm285_vm1, %v182_v34  ;;  %v1553_v34 = vld [vmem:[%s9358_s19 + $0x921] sm:$0xff] }
 0x21f   : > { %8031 = vmatmul.msk.f32.gmra.mxu0 %vm285_vm1, %v1552_v28  ;;  %8096 = vmatmul.msk.f32.gmra.mxu1 %vm285_vm1, %v1552_v28 }
 0x220   : > { %v1169_v29 = vpop.f32.mrf.mxu2  ;;  %v1378_v22 = vpop.f32.mrf.mxu3 }
 0x221   : > { %v1170_v17 = vadd.f32 %v1169_v29, %v9716_v11  ;;  %v1379_v35 = vadd.f32 %v1378_v22, %v9718_v63 }
 0x223   : > { %v10138_v2 = vadd.f32 %v1853_v23, %v1170_v17  ;;  %v10140_v16 = vadd.f32 %v2062_v54, %v1379_v35  ;;  %v184_v54 = vld [vmem:[%s9358_s19 + $0x930] sm:$0xff] }
 0x224   : > { %v1856_v48 = vpop.f32.mrf.mxu0  ;;  %v2065_v8 = vpop.f32.mrf.mxu1 }
 0x225   : > { %7901 = vmatmul.msk.f32.gmra.mxu2 %vm285_vm1, %v183_v40  ;;  %7966 = vmatmul.msk.f32.gmra.mxu3 %vm285_vm1, %v183_v40  ;;  %v1554_v40 = vld [vmem:[%s9358_s19 + $0x931] sm:$0xff] }
 0x227   : > { %8032 = vmatmul.msk.f32.gmra.mxu0 %vm285_vm1, %v1553_v34  ;;  %8097 = vmatmul.msk.f32.gmra.mxu1 %vm285_vm1, %v1553_v34 }
 0x228   : > { %v1172_v11 = vpop.f32.mrf.mxu2  ;;  %v1381_v28 = vpop.f32.mrf.mxu3 }
 0x229   : > { %v1173_v63 = vadd.f32 %v1172_v11, %v9730_v41  ;;  %v1382_v23 = vadd.f32 %v1381_v28, %v9732_v45 }
 0x22b   : > { %v10150_v29 = vadd.f32 %v1856_v48, %v1173_v63  ;;  %v10152_v22 = vadd.f32 %v2065_v8, %v1382_v23  ;;  %v185_v8 = vld [vmem:[%s9358_s19 + $0x940] sm:$0xff] }
 0x22c   : > { %v1859_v17 = vpop.f32.mrf.mxu0  ;;  %v2068_v35 = vpop.f32.mrf.mxu1 }
 0x22d   : > { %7902 = vmatmul.msk.f32.gmra.mxu2 %vm285_vm1, %v184_v54  ;;  %7967 = vmatmul.msk.f32.gmra.mxu3 %vm285_vm1, %v184_v54  ;;  %v1555_v54 = vld [vmem:[%s9358_s19 + $0x941] sm:$0xff] }
 0x22f   : > { %8033 = vmatmul.msk.f32.gmra.mxu0 %vm285_vm1, %v1554_v40  ;;  %8098 = vmatmul.msk.f32.gmra.mxu1 %vm285_vm1, %v1554_v40 }
 0x230   : > { %v1175_v41 = vpop.f32.mrf.mxu2  ;;  %v1384_v34 = vpop.f32.mrf.mxu3 }
 0x231   : > { %v1176_v45 = vadd.f32 %v1175_v41, %v9744_v14  ;;  %v1385_v48 = vadd.f32 %v1384_v34, %v9746_v37 }
 0x233   : > { %v10162_v11 = vadd.f32 %v1859_v17, %v1176_v45  ;;  %v10164_v28 = vadd.f32 %v2068_v35, %v1385_v48  ;;  %v186_v35 = vld [vmem:[%s9358_s19 + $0x950] sm:$0xff] }
 0x234   : > { %v1862_v63 = vpop.f32.mrf.mxu0  ;;  %v2071_v23 = vpop.f32.mrf.mxu1 }
 0x235   : > { %7903 = vmatmul.msk.f32.gmra.mxu2 %vm285_vm1, %v185_v8  ;;  %7968 = vmatmul.msk.f32.gmra.mxu3 %vm285_vm1, %v185_v8  ;;  %v1556_v8 = vld [vmem:[%s9358_s19 + $0x951] sm:$0xff] }
 0x237   : > { %8034 = vmatmul.msk.f32.gmra.mxu0 %vm285_vm1, %v1555_v54  ;;  %8099 = vmatmul.msk.f32.gmra.mxu1 %vm285_vm1, %v1555_v54 }
 0x238   : > { %v1178_v14 = vpop.f32.mrf.mxu2  ;;  %v1387_v40 = vpop.f32.mrf.mxu3 }
 0x239   : > { %v1179_v37 = vadd.f32 %v1178_v14, %v9758_v60  ;;  %v1388_v17 = vadd.f32 %v1387_v40, %v9760_v31 }
 0x23b   : > { %v10174_v41 = vadd.f32 %v1862_v63, %v1179_v37  ;;  %v10176_v34 = vadd.f32 %v2071_v23, %v1388_v17  ;;  %v187_v23 = vld [vmem:[%s9358_s19 + $0x960] sm:$0xff] }
 0x23c   : > { %v1865_v45 = vpop.f32.mrf.mxu0  ;;  %v2074_v48 = vpop.f32.mrf.mxu1 }
 0x23d   : > { %7904 = vmatmul.msk.f32.gmra.mxu2 %vm285_vm1, %v186_v35  ;;  %7969 = vmatmul.msk.f32.gmra.mxu3 %vm285_vm1, %v186_v35  ;;  %v1557_v35 = vld [vmem:[%s9358_s19 + $0x961] sm:$0xff] }
 0x23f   : > { %8035 = vmatmul.msk.f32.gmra.mxu0 %vm285_vm1, %v1556_v8  ;;  %8100 = vmatmul.msk.f32.gmra.mxu1 %vm285_vm1, %v1556_v8 }
 0x240   : > { %v1181_v60 = vpop.f32.mrf.mxu2  ;;  %v1390_v54 = vpop.f32.mrf.mxu3 }
 0x241   : > { %v1182_v31 = vadd.f32 %v1181_v60, %v9772_v42  ;;  %v1391_v63 = vadd.f32 %v1390_v54, %v9774_v25 }
 0x243   : > { %v10186_v14 = vadd.f32 %v1865_v45, %v1182_v31  ;;  %v10188_v40 = vadd.f32 %v2074_v48, %v1391_v63  ;;  %v188_v48 = vld [vmem:[%s9358_s19 + $0x970] sm:$0xff] }
 0x244   : > { %v1868_v37 = vpop.f32.mrf.mxu0  ;;  %v2077_v17 = vpop.f32.mrf.mxu1 }
 0x245   : > { %7905 = vmatmul.msk.f32.gmra.mxu2 %vm285_vm1, %v187_v23  ;;  %7970 = vmatmul.msk.f32.gmra.mxu3 %vm285_vm1, %v187_v23  ;;  %v1558_v23 = vld [vmem:[%s9358_s19 + $0x971] sm:$0xff] }
 0x247   : > { %8036 = vmatmul.msk.f32.gmra.mxu0 %vm285_vm1, %v1557_v35  ;;  %8101 = vmatmul.msk.f32.gmra.mxu1 %vm285_vm1, %v1557_v35 }
 0x248   : > { %v1184_v42 = vpop.f32.mrf.mxu2  ;;  %v1393_v8 = vpop.f32.mrf.mxu3 }
 0x249   : > { %v1185_v25 = vadd.f32 %v1184_v42, %v9786_v36  ;;  %v1394_v45 = vadd.f32 %v1393_v8, %v9788_v19 }
 0x24b   : > { %v10198_v60 = vadd.f32 %v1868_v37, %v1185_v25  ;;  %v10200_v54 = vadd.f32 %v2077_v17, %v1394_v45  ;;  %v189_v17 = vld [vmem:[%s9358_s19 + $0xb40] sm:$0xff] }
 0x24c   : > { %v1871_v31 = vpop.f32.mrf.mxu0  ;;  %v2080_v63 = vpop.f32.mrf.mxu1 }
 0x24d   : > { %7906 = vmatmul.msk.f32.gmra.mxu2 %vm285_vm1, %v188_v48  ;;  %7971 = vmatmul.msk.f32.gmra.mxu3 %vm285_vm1, %v188_v48  ;;  %v1559_v48 = vld [vmem:[%s9358_s19 + $0xb41] sm:$0xff] }
 0x24f   : > { %8037 = vmatmul.msk.f32.gmra.mxu0 %vm285_vm1, %v1558_v23  ;;  %8102 = vmatmul.msk.f32.gmra.mxu1 %vm285_vm1, %v1558_v23 }
 0x250   : > { %v1187_v36 = vpop.f32.mrf.mxu2  ;;  %v1396_v35 = vpop.f32.mrf.mxu3 }
 0x251   : > { %v1188_v19 = vadd.f32 %v1187_v36, %v9800_v30  ;;  %v1397_v37 = vadd.f32 %v1396_v35, %v9802_v13 }
 0x253   : > { %v10210_v42 = vadd.f32 %v1871_v31, %v1188_v19  ;;  %v10212_v8 = vadd.f32 %v2080_v63, %v1397_v37  ;;  %v190_v63 = vld [vmem:[%s9358_s19 + $0xb50] sm:$0xff] }
 0x254   : > { %v1874_v25 = vpop.f32.mrf.mxu0  ;;  %v2083_v45 = vpop.f32.mrf.mxu1 }
 0x255   : > { %12822 = vst [vmem:[#allocation79_spill] sm:$0xff] %v10212_v8  ;;  %7907 = vmatmul.msk.f32.gmra.mxu2 %vm285_vm1, %v189_v17  ;;  %7972 = vmatmul.msk.f32.gmra.mxu3 %vm285_vm1, %v189_v17  ;;  %v1560_v17 = vld [vmem:[%s9358_s19 + $0xb51] sm:$0xff]  ;;  %v1581_v8 = vld [vmem:[%s9358_s19 + $0x1021] sm:$0xff] }
 0x257   : > { %8038 = vmatmul.msk.f32.gmra.mxu0 %vm285_vm1, %v1559_v48  ;;  %8103 = vmatmul.msk.f32.gmra.mxu1 %vm285_vm1, %v1559_v48 }
 0x258   : > { %v1190_v30 = vpop.f32.mrf.mxu2  ;;  %v1399_v23 = vpop.f32.mrf.mxu3 }
 0x259   : > { %v1191_v13 = vadd.f32 %v1190_v30, %v9814_v24  ;;  %v1400_v31 = vadd.f32 %v1399_v23, %v9816_v7  ;;  %v191_v30 = vld [vmem:[%s9358_s19 + $0xb60] sm:$0xff] }
 0x25b   : > { %v10222_v36 = vadd.f32 %v1874_v25, %v1191_v13  ;;  %v10224_v35 = vadd.f32 %v2083_v45, %v1400_v31  ;;  %v12825_v25 = vld [vmem:[#allocation52_spill] sm:$0xff] }
 0x25c   : > { %v1877_v19 = vpop.f32.mrf.mxu0  ;;  %v2086_v37 = vpop.f32.mrf.mxu1 }
 0x25d   : > { %12823 = vst [vmem:[#allocation80_spill] sm:$0xff] %v10222_v36  ;;  %7908 = vmatmul.msk.f32.gmra.mxu2 %vm285_vm1, %v190_v63  ;;  %7973 = vmatmul.msk.f32.gmra.mxu3 %vm285_vm1, %v190_v63  ;;  %v1561_v63 = vld [vmem:[%s9358_s19 + $0xb61] sm:$0xff]  ;;  %v1580_v36 = vld [vmem:[%s9358_s19 + $0x1011] sm:$0xff] }
 0x25e   : > { %12824 = vst [vmem:[#allocation81_spill] sm:$0xff] %v10224_v35 }
 0x25f   : > { %8039 = vmatmul.msk.f32.gmra.mxu0 %vm285_vm1, %v1560_v17  ;;  %8104 = vmatmul.msk.f32.gmra.mxu1 %vm285_vm1, %v1560_v17 }
 0x260   : > { %v1193_v24 = vpop.f32.mrf.mxu2  ;;  %v1402_v48 = vpop.f32.mrf.mxu3 }
 0x261   : > { %v1194_v7 = vadd.f32 %v1193_v24, %v9828_v18  ;;  %v1403_v45 = vadd.f32 %v1402_v48, %v12825_v25  ;;  %v12828_v24 = vld [vmem:[#allocation55_spill] sm:$0xff] }
 0x263   : > { %v10234_v23 = vadd.f32 %v1877_v19, %v1194_v7  ;;  %v10236_v13 = vadd.f32 %v2086_v37, %v1403_v45  ;;  %v12829_v19 = vld [vmem:[#allocation56_spill] sm:$0xff]  ;;  %v192_v7 = vld [vmem:[%s9358_s19 + $0xb70] sm:$0xff] }
 0x264   : > { %v1880_v31 = vpop.f32.mrf.mxu0  ;;  %v2089_v35 = vpop.f32.mrf.mxu1 }
 0x265   : > { %12826 = vst [vmem:[#allocation52_spill] sm:$0xff] %v10234_v23  ;;  %7909 = vmatmul.msk.f32.gmra.mxu2 %vm285_vm1, %v191_v30  ;;  %7974 = vmatmul.msk.f32.gmra.mxu3 %vm285_vm1, %v191_v30  ;;  %v1562_v30 = vld [vmem:[%s9358_s19 + $0xb71] sm:$0xff] }
 0x266   : > { %12827 = vst [vmem:[#allocation82_spill] sm:$0xff] %v10236_v13 }
 0x267   : > { %8040 = vmatmul.msk.f32.gmra.mxu0 %vm285_vm1, %v1561_v63  ;;  %8105 = vmatmul.msk.f32.gmra.mxu1 %vm285_vm1, %v1561_v63 }
 0x268   : > { %v1196_v18 = vpop.f32.mrf.mxu2  ;;  %v1405_v17 = vpop.f32.mrf.mxu3 }
 0x269   : > { %v1197_v48 = vadd.f32 %v1196_v18, %v12828_v24  ;;  %v1406_v37 = vadd.f32 %v1405_v17, %v12829_v19  ;;  %v12832_v17 = vld [vmem:[#allocation59_spill] sm:$0xff] }
 0x26b   : > { %v10246_v25 = vadd.f32 %v1880_v31, %v1197_v48  ;;  %v10248_v45 = vadd.f32 %v2089_v35, %v1406_v37  ;;  %v12833_v31 = vld [vmem:[#allocation60_spill] sm:$0xff]  ;;  %v193_v48 = vld [vmem:[%s9358_s19 + $0xb80] sm:$0xff] }
 0x26c   : > { %v1883_v13 = vpop.f32.mrf.mxu0  ;;  %v2092_v23 = vpop.f32.mrf.mxu1 }
 0x26d   : > { %12830 = vst [vmem:[#allocation55_spill] sm:$0xff] %v10246_v25  ;;  %7910 = vmatmul.msk.f32.gmra.mxu2 %vm285_vm1, %v192_v7  ;;  %7975 = vmatmul.msk.f32.gmra.mxu3 %vm285_vm1, %v192_v7  ;;  %v1563_v7 = vld [vmem:[%s9358_s19 + $0xb81] sm:$0xff] }
 0x26e   : > { %12831 = vst [vmem:[#allocation56_spill] sm:$0xff] %v10248_v45 }
 0x26f   : > { %8041 = vmatmul.msk.f32.gmra.mxu0 %vm285_vm1, %v1562_v30  ;;  %8106 = vmatmul.msk.f32.gmra.mxu1 %vm285_vm1, %v1562_v30 }
 0x270   : > { %v1199_v63 = vpop.f32.mrf.mxu2  ;;  %v1408_v18 = vpop.f32.mrf.mxu3 }
 0x271   : > { %v1200_v24 = vadd.f32 %v1199_v63, %v12832_v17  ;;  %v1409_v35 = vadd.f32 %v1408_v18, %v12833_v31  ;;  %v12836_v18 = vld [vmem:[#allocation63_spill] sm:$0xff] }
 0x273   : > { %v10258_v19 = vadd.f32 %v1883_v13, %v1200_v24  ;;  %v10260_v37 = vadd.f32 %v2092_v23, %v1409_v35  ;;  %v12837_v13 = vld [vmem:[#allocation64_spill] sm:$0xff]  ;;  %v194_v24 = vld [vmem:[%s9358_s19 + $0xb90] sm:$0xff] }
 0x274   : > { %v1886_v45 = vpop.f32.mrf.mxu0  ;;  %v2095_v25 = vpop.f32.mrf.mxu1 }
 0x275   : > { %12834 = vst [vmem:[#allocation59_spill] sm:$0xff] %v10258_v19  ;;  %7911 = vmatmul.msk.f32.gmra.mxu2 %vm285_vm1, %v193_v48  ;;  %7976 = vmatmul.msk.f32.gmra.mxu3 %vm285_vm1, %v193_v48  ;;  %v1564_v48 = vld [vmem:[%s9358_s19 + $0xb91] sm:$0xff] }
 0x276   : > { %12835 = vst [vmem:[#allocation60_spill] sm:$0xff] %v10260_v37 }
 0x277   : > { %8042 = vmatmul.msk.f32.gmra.mxu0 %vm285_vm1, %v1563_v7  ;;  %8107 = vmatmul.msk.f32.gmra.mxu1 %vm285_vm1, %v1563_v7 }
 0x278   : > { %v1202_v30 = vpop.f32.mrf.mxu2  ;;  %v1411_v63 = vpop.f32.mrf.mxu3 }
 0x279   : > { %v1203_v17 = vadd.f32 %v1202_v30, %v12836_v18  ;;  %v1412_v23 = vadd.f32 %v1411_v63, %v12837_v13  ;;  %v12840_v63 = vld [vmem:[#allocation67_spill] sm:$0xff] }
 0x27b   : > { %v10270_v31 = vadd.f32 %v1886_v45, %v1203_v17  ;;  %v10272_v35 = vadd.f32 %v2095_v25, %v1412_v23  ;;  %v12841_v45 = vld [vmem:[#allocation68_spill] sm:$0xff]  ;;  %v195_v17 = vld [vmem:[%s9358_s19 + $0xba0] sm:$0xff] }
 0x27c   : > { %v1889_v37 = vpop.f32.mrf.mxu0  ;;  %v2098_v19 = vpop.f32.mrf.mxu1 }
 0x27d   : > { %12838 = vst [vmem:[#allocation63_spill] sm:$0xff] %v10270_v31  ;;  %7912 = vmatmul.msk.f32.gmra.mxu2 %vm285_vm1, %v194_v24  ;;  %7977 = vmatmul.msk.f32.gmra.mxu3 %vm285_vm1, %v194_v24  ;;  %v1565_v24 = vld [vmem:[%s9358_s19 + $0xba1] sm:$0xff] }
 0x27e   : > { %12839 = vst [vmem:[#allocation64_spill] sm:$0xff] %v10272_v35 }
 0x27f   : > { %8043 = vmatmul.msk.f32.gmra.mxu0 %vm285_vm1, %v1564_v48  ;;  %8108 = vmatmul.msk.f32.gmra.mxu1 %vm285_vm1, %v1564_v48 }
 0x280   : > { %v1205_v7 = vpop.f32.mrf.mxu2  ;;  %v1414_v30 = vpop.f32.mrf.mxu3 }
 0x281   : > { %v1206_v18 = vadd.f32 %v1205_v7, %v12840_v63  ;;  %v1415_v25 = vadd.f32 %v1414_v30, %v12841_v45  ;;  %v12844_v30 = vld [vmem:[#allocation71_spill] sm:$0xff] }
 0x283   : > { %v10282_v13 = vadd.f32 %v1889_v37, %v1206_v18  ;;  %v10284_v23 = vadd.f32 %v2098_v19, %v1415_v25  ;;  %v12845_v37 = vld [vmem:[#allocation72_spill] sm:$0xff]  ;;  %v196_v18 = vld [vmem:[%s9358_s19 + $0xbb0] sm:$0xff] }
 0x284   : > { %v1892_v35 = vpop.f32.mrf.mxu0  ;;  %v2101_v31 = vpop.f32.mrf.mxu1 }
 0x285   : > { %12842 = vst [vmem:[#allocation67_spill] sm:$0xff] %v10282_v13  ;;  %7913 = vmatmul.msk.f32.gmra.mxu2 %vm285_vm1, %v195_v17  ;;  %7978 = vmatmul.msk.f32.gmra.mxu3 %vm285_vm1, %v195_v17  ;;  %v1566_v17 = vld [vmem:[%s9358_s19 + $0xbb1] sm:$0xff] }
 0x286   : > { %12843 = vst [vmem:[#allocation68_spill] sm:$0xff] %v10284_v23 }
 0x287   : > { %8044 = vmatmul.msk.f32.gmra.mxu0 %vm285_vm1, %v1565_v24  ;;  %8109 = vmatmul.msk.f32.gmra.mxu1 %vm285_vm1, %v1565_v24 }
 0x288   : > { %v1208_v48 = vpop.f32.mrf.mxu2  ;;  %v1417_v7 = vpop.f32.mrf.mxu3 }
 0x289   : > { %v1209_v63 = vadd.f32 %v1208_v48, %v12844_v30  ;;  %v1418_v19 = vadd.f32 %v1417_v7, %v12845_v37  ;;  %v12848_v7 = vld [vmem:[#allocation75_spill] sm:$0xff] }
 0x28b   : > { %v10294_v45 = vadd.f32 %v1892_v35, %v1209_v63  ;;  %v10296_v25 = vadd.f32 %v2101_v31, %v1418_v19  ;;  %v12849_v35 = vld [vmem:[#allocation76_spill] sm:$0xff]  ;;  %v197_v63 = vld [vmem:[%s9358_s19 + $0xd80] sm:$0xff] }
 0x28c   : > { %v1895_v23 = vpop.f32.mrf.mxu0  ;;  %v2104_v13 = vpop.f32.mrf.mxu1 }
 0x28d   : > { %12846 = vst [vmem:[#allocation71_spill] sm:$0xff] %v10294_v45  ;;  %7914 = vmatmul.msk.f32.gmra.mxu2 %vm285_vm1, %v196_v18  ;;  %7979 = vmatmul.msk.f32.gmra.mxu3 %vm285_vm1, %v196_v18  ;;  %v1567_v18 = vld [vmem:[%s9358_s19 + $0xd81] sm:$0xff] }
 0x28e   : > { %12847 = vst [vmem:[#allocation72_spill] sm:$0xff] %v10296_v25 }
 0x28f   : > { %8045 = vmatmul.msk.f32.gmra.mxu0 %vm285_vm1, %v1566_v17  ;;  %8110 = vmatmul.msk.f32.gmra.mxu1 %vm285_vm1, %v1566_v17 }
 0x290   : > { %v1211_v24 = vpop.f32.mrf.mxu2  ;;  %v1420_v48 = vpop.f32.mrf.mxu3 }
 0x291   : > { %v1212_v30 = vadd.f32 %v1211_v24, %v12848_v7  ;;  %v1421_v31 = vadd.f32 %v1420_v48, %v12849_v35  ;;  %v12852_v48 = vld [vmem:[#allocation2_spill] sm:$0xff] }
 0x293   : > { %v10306_v37 = vadd.f32 %v1895_v23, %v1212_v30  ;;  %v10308_v19 = vadd.f32 %v2104_v13, %v1421_v31  ;;  %v12853_v23 = vld [vmem:[#allocation3_spill] sm:$0xff] }
 0x294   : > { %v1898_v25 = vpop.f32.mrf.mxu0  ;;  %v2107_v45 = vpop.f32.mrf.mxu1  ;;  %v198_v30 = vld [vmem:[%s9358_s19 + $0xd90] sm:$0xff] }
 0x295   : > { %12850 = vst [vmem:[#allocation75_spill] sm:$0xff] %v10306_v37  ;;  %7915 = vmatmul.msk.f32.gmra.mxu2 %vm285_vm1, %v197_v63  ;;  %7980 = vmatmul.msk.f32.gmra.mxu3 %vm285_vm1, %v197_v63  ;;  %v1568_v63 = vld [vmem:[%s9358_s19 + $0xd91] sm:$0xff] }
 0x296   : > { %12851 = vst [vmem:[#allocation76_spill] sm:$0xff] %v10308_v19 }
 0x297   : > { %8046 = vmatmul.msk.f32.gmra.mxu0 %vm285_vm1, %v1567_v18  ;;  %8111 = vmatmul.msk.f32.gmra.mxu1 %vm285_vm1, %v1567_v18 }
 0x298   : > { %v1214_v17 = vpop.f32.mrf.mxu2  ;;  %v1423_v24 = vpop.f32.mrf.mxu3 }
 0x299   : > { %v1215_v7 = vadd.f32 %v1214_v17, %v12852_v48  ;;  %v1424_v13 = vadd.f32 %v1423_v24, %v12853_v23  ;;  %v12856_v24 = vld [vmem:[#allocation4_spill] sm:$0xff] }
 0x29b   : > { %v10318_v35 = vadd.f32 %v1898_v25, %v1215_v7  ;;  %v10320_v31 = vadd.f32 %v2107_v45, %v1424_v13  ;;  %v12857_v25 = vld [vmem:[#allocation5_spill] sm:$0xff] }
 0x29c   : > { %v1901_v19 = vpop.f32.mrf.mxu0  ;;  %v2110_v37 = vpop.f32.mrf.mxu1  ;;  %v199_v7 = vld [vmem:[%s9358_s19 + $0xda0] sm:$0xff] }
 0x29d   : > { %12854 = vst [vmem:[#allocation2_spill] sm:$0xff] %v10318_v35  ;;  %7916 = vmatmul.msk.f32.gmra.mxu2 %vm285_vm1, %v198_v30  ;;  %7981 = vmatmul.msk.f32.gmra.mxu3 %vm285_vm1, %v198_v30  ;;  %v1569_v30 = vld [vmem:[%s9358_s19 + $0xda1] sm:$0xff] }
 0x29e   : > { %12855 = vst [vmem:[#allocation3_spill] sm:$0xff] %v10320_v31 }
 0x29f   : > { %8047 = vmatmul.msk.f32.gmra.mxu0 %vm285_vm1, %v1568_v63  ;;  %8112 = vmatmul.msk.f32.gmra.mxu1 %vm285_vm1, %v1568_v63 }
 0x2a0   : > { %v1217_v18 = vpop.f32.mrf.mxu2  ;;  %v1426_v17 = vpop.f32.mrf.mxu3 }
 0x2a1   : > { %v1218_v48 = vadd.f32 %v1217_v18, %v12856_v24  ;;  %v1427_v45 = vadd.f32 %v1426_v17, %v12857_v25  ;;  %v12860_v17 = vld [vmem:[#allocation6_spill] sm:$0xff] }
 0x2a3   : > { %v10330_v23 = vadd.f32 %v1901_v19, %v1218_v48  ;;  %v10332_v13 = vadd.f32 %v2110_v37, %v1427_v45  ;;  %v12861_v19 = vld [vmem:[#allocation7_spill] sm:$0xff] }
 0x2a4   : > { %v1904_v31 = vpop.f32.mrf.mxu0  ;;  %v2113_v35 = vpop.f32.mrf.mxu1  ;;  %v200_v48 = vld [vmem:[%s9358_s19 + $0xdb0] sm:$0xff] }
 0x2a5   : > { %12858 = vst [vmem:[#allocation4_spill] sm:$0xff] %v10330_v23  ;;  %7917 = vmatmul.msk.f32.gmra.mxu2 %vm285_vm1, %v199_v7  ;;  %7982 = vmatmul.msk.f32.gmra.mxu3 %vm285_vm1, %v199_v7  ;;  %v1570_v7 = vld [vmem:[%s9358_s19 + $0xdb1] sm:$0xff] }
 0x2a6   : > { %12859 = vst [vmem:[#allocation5_spill] sm:$0xff] %v10332_v13 }
 0x2a7   : > { %8048 = vmatmul.msk.f32.gmra.mxu0 %vm285_vm1, %v1569_v30  ;;  %8113 = vmatmul.msk.f32.gmra.mxu1 %vm285_vm1, %v1569_v30 }
 0x2a8   : > { %v1220_v63 = vpop.f32.mrf.mxu2  ;;  %v1429_v18 = vpop.f32.mrf.mxu3 }
 0x2a9   : > { %v1221_v24 = vadd.f32 %v1220_v63, %v12860_v17  ;;  %v1430_v37 = vadd.f32 %v1429_v18, %v12861_v19  ;;  %v12864_v18 = vld [vmem:[#allocation8_spill] sm:$0xff] }
 0x2ab   : > { %v10342_v25 = vadd.f32 %v1904_v31, %v1221_v24  ;;  %v10344_v45 = vadd.f32 %v2113_v35, %v1430_v37  ;;  %v12865_v31 = vld [vmem:[#allocation9_spill] sm:$0xff] }
 0x2ac   : > { %v1907_v13 = vpop.f32.mrf.mxu0  ;;  %v2116_v23 = vpop.f32.mrf.mxu1  ;;  %v201_v24 = vld [vmem:[%s9358_s19 + $0xdc0] sm:$0xff] }
 0x2ad   : > { %12862 = vst [vmem:[#allocation6_spill] sm:$0xff] %v10342_v25  ;;  %7918 = vmatmul.msk.f32.gmra.mxu2 %vm285_vm1, %v200_v48  ;;  %7983 = vmatmul.msk.f32.gmra.mxu3 %vm285_vm1, %v200_v48  ;;  %v1571_v48 = vld [vmem:[%s9358_s19 + $0xdc1] sm:$0xff] }
 0x2ae   : > { %12863 = vst [vmem:[#allocation7_spill] sm:$0xff] %v10344_v45 }
 0x2af   : > { %8049 = vmatmul.msk.f32.gmra.mxu0 %vm285_vm1, %v1570_v7  ;;  %8114 = vmatmul.msk.f32.gmra.mxu1 %vm285_vm1, %v1570_v7 }
 0x2b0   : > { %v1223_v30 = vpop.f32.mrf.mxu2  ;;  %v1432_v63 = vpop.f32.mrf.mxu3 }
 0x2b1   : > { %v1224_v17 = vadd.f32 %v1223_v30, %v12864_v18  ;;  %v1433_v35 = vadd.f32 %v1432_v63, %v12865_v31  ;;  %v12868_v63 = vld [vmem:[#allocation10_spill] sm:$0xff] }
 0x2b3   : > { %v10354_v19 = vadd.f32 %v1907_v13, %v1224_v17  ;;  %v10356_v37 = vadd.f32 %v2116_v23, %v1433_v35  ;;  %v12869_v13 = vld [vmem:[#allocation11_spill] sm:$0xff] }
 0x2b4   : > { %v1910_v45 = vpop.f32.mrf.mxu0  ;;  %v2119_v25 = vpop.f32.mrf.mxu1  ;;  %v202_v17 = vld [vmem:[%s9358_s19 + $0xdd0] sm:$0xff] }
 0x2b5   : > { %12866 = vst [vmem:[#allocation8_spill] sm:$0xff] %v10354_v19  ;;  %7919 = vmatmul.msk.f32.gmra.mxu2 %vm285_vm1, %v201_v24  ;;  %7984 = vmatmul.msk.f32.gmra.mxu3 %vm285_vm1, %v201_v24  ;;  %v1572_v24 = vld [vmem:[%s9358_s19 + $0xdd1] sm:$0xff] }
 0x2b6   : > { %12867 = vst [vmem:[#allocation9_spill] sm:$0xff] %v10356_v37 }
 0x2b7   : > { %8050 = vmatmul.msk.f32.gmra.mxu0 %vm285_vm1, %v1571_v48  ;;  %8115 = vmatmul.msk.f32.gmra.mxu1 %vm285_vm1, %v1571_v48 }
 0x2b8   : > { %v1226_v7 = vpop.f32.mrf.mxu2  ;;  %v1435_v30 = vpop.f32.mrf.mxu3 }
 0x2b9   : > { %v1227_v18 = vadd.f32 %v1226_v7, %v12868_v63  ;;  %v1436_v23 = vadd.f32 %v1435_v30, %v12869_v13  ;;  %v12872_v30 = vld [vmem:[#allocation12_spill] sm:$0xff] }
 0x2bb   : > { %v10366_v31 = vadd.f32 %v1910_v45, %v1227_v18  ;;  %v10368_v35 = vadd.f32 %v2119_v25, %v1436_v23  ;;  %v12873_v45 = vld [vmem:[#allocation13_spill] sm:$0xff] }
 0x2bc   : > { %v1913_v37 = vpop.f32.mrf.mxu0  ;;  %v2122_v19 = vpop.f32.mrf.mxu1  ;;  %v203_v18 = vld [vmem:[%s9358_s19 + $0xde0] sm:$0xff] }
 0x2bd   : > { %12870 = vst [vmem:[#allocation10_spill] sm:$0xff] %v10366_v31  ;;  %7920 = vmatmul.msk.f32.gmra.mxu2 %vm285_vm1, %v202_v17  ;;  %7985 = vmatmul.msk.f32.gmra.mxu3 %vm285_vm1, %v202_v17  ;;  %v1573_v17 = vld [vmem:[%s9358_s19 + $0xde1] sm:$0xff] }
 0x2be   : > { %12871 = vst [vmem:[#allocation11_spill] sm:$0xff] %v10368_v35 }
 0x2bf   : > { %8051 = vmatmul.msk.f32.gmra.mxu0 %vm285_vm1, %v1572_v24  ;;  %8116 = vmatmul.msk.f32.gmra.mxu1 %vm285_vm1, %v1572_v24 }
 0x2c0   : > { %v1229_v48 = vpop.f32.mrf.mxu2  ;;  %v1438_v7 = vpop.f32.mrf.mxu3 }
 0x2c1   : > { %v1230_v63 = vadd.f32 %v1229_v48, %v12872_v30  ;;  %v1439_v25 = vadd.f32 %v1438_v7, %v12873_v45  ;;  %v12876_v7 = vld [vmem:[#allocation14_spill] sm:$0xff] }
 0x2c3   : > { %v10378_v13 = vadd.f32 %v1913_v37, %v1230_v63  ;;  %v10380_v23 = vadd.f32 %v2122_v19, %v1439_v25  ;;  %v12877_v37 = vld [vmem:[#allocation15_spill] sm:$0xff] }
 0x2c4   : > { %v1916_v35 = vpop.f32.mrf.mxu0  ;;  %v2125_v31 = vpop.f32.mrf.mxu1  ;;  %v204_v63 = vld [vmem:[%s9358_s19 + $0xdf0] sm:$0xff] }
 0x2c5   : > { %12874 = vst [vmem:[#allocation12_spill] sm:$0xff] %v10378_v13  ;;  %7921 = vmatmul.msk.f32.gmra.mxu2 %vm285_vm1, %v203_v18  ;;  %7986 = vmatmul.msk.f32.gmra.mxu3 %vm285_vm1, %v203_v18  ;;  %v1574_v18 = vld [vmem:[%s9358_s19 + $0xdf1] sm:$0xff] }
 0x2c6   : > { %12875 = vst [vmem:[#allocation13_spill] sm:$0xff] %v10380_v23 }
 0x2c7   : > { %8052 = vmatmul.msk.f32.gmra.mxu0 %vm285_vm1, %v1573_v17  ;;  %8117 = vmatmul.msk.f32.gmra.mxu1 %vm285_vm1, %v1573_v17 }
 0x2c8   : > { %v1232_v24 = vpop.f32.mrf.mxu2  ;;  %v1441_v48 = vpop.f32.mrf.mxu3 }
 0x2c9   : > { %v1233_v30 = vadd.f32 %v1232_v24, %v12876_v7  ;;  %v1442_v19 = vadd.f32 %v1441_v48, %v12877_v37  ;;  %v12880_v48 = vld [vmem:[#allocation16_spill] sm:$0xff] }
 0x2cb   : > { %v10390_v45 = vadd.f32 %v1916_v35, %v1233_v30  ;;  %v10392_v25 = vadd.f32 %v2125_v31, %v1442_v19  ;;  %v12881_v35 = vld [vmem:[#allocation17_spill] sm:$0xff] }
 0x2cc   : > { %v1919_v23 = vpop.f32.mrf.mxu0  ;;  %v2128_v13 = vpop.f32.mrf.mxu1  ;;  %v205_v30 = vld [vmem:[%s9358_s19 + $0xfc0] sm:$0xff] }
 0x2cd   : > { %12878 = vst [vmem:[#allocation14_spill] sm:$0xff] %v10390_v45  ;;  %7922 = vmatmul.msk.f32.gmra.mxu2 %vm285_vm1, %v204_v63  ;;  %7987 = vmatmul.msk.f32.gmra.mxu3 %vm285_vm1, %v204_v63  ;;  %v1575_v63 = vld [vmem:[%s9358_s19 + $0xfc1] sm:$0xff] }
 0x2ce   : > { %12879 = vst [vmem:[#allocation15_spill] sm:$0xff] %v10392_v25 }
 0x2cf   : > { %8053 = vmatmul.msk.f32.gmra.mxu0 %vm285_vm1, %v1574_v18  ;;  %8118 = vmatmul.msk.f32.gmra.mxu1 %vm285_vm1, %v1574_v18 }
 0x2d0   : > { %v1235_v17 = vpop.f32.mrf.mxu2  ;;  %v1444_v24 = vpop.f32.mrf.mxu3 }
 0x2d1   : > { %v1236_v7 = vadd.f32 %v1235_v17, %v12880_v48  ;;  %v1445_v31 = vadd.f32 %v1444_v24, %v12881_v35  ;;  %v12884_v24 = vld [vmem:[#allocation18_spill] sm:$0xff] }
 0x2d3   : > { %v10402_v37 = vadd.f32 %v1919_v23, %v1236_v7  ;;  %v10404_v19 = vadd.f32 %v2128_v13, %v1445_v31  ;;  %v12885_v23 = vld [vmem:[#allocation19_spill] sm:$0xff] }
 0x2d4   : > { %v1922_v25 = vpop.f32.mrf.mxu0  ;;  %v2131_v45 = vpop.f32.mrf.mxu1  ;;  %v206_v7 = vld [vmem:[%s9358_s19 + $0xfd0] sm:$0xff] }
 0x2d5   : > { %12882 = vst [vmem:[#allocation16_spill] sm:$0xff] %v10402_v37  ;;  %7923 = vmatmul.msk.f32.gmra.mxu2 %vm285_vm1, %v205_v30  ;;  %7988 = vmatmul.msk.f32.gmra.mxu3 %vm285_vm1, %v205_v30  ;;  %v1576_v30 = vld [vmem:[%s9358_s19 + $0xfd1] sm:$0xff] }
 0x2d6   : > { %12883 = vst [vmem:[#allocation17_spill] sm:$0xff] %v10404_v19 }
 0x2d7   : > { %8054 = vmatmul.msk.f32.gmra.mxu0 %vm285_vm1, %v1575_v63  ;;  %8119 = vmatmul.msk.f32.gmra.mxu1 %vm285_vm1, %v1575_v63 }
 0x2d8   : > { %v1238_v18 = vpop.f32.mrf.mxu2  ;;  %v1447_v17 = vpop.f32.mrf.mxu3 }
 0x2d9   : > { %v1239_v48 = vadd.f32 %v1238_v18, %v12884_v24  ;;  %v1448_v13 = vadd.f32 %v1447_v17, %v12885_v23  ;;  %v12888_v17 = vld [vmem:[#allocation20_spill] sm:$0xff] }
 0x2db   : > { %v10414_v35 = vadd.f32 %v1922_v25, %v1239_v48  ;;  %v10416_v31 = vadd.f32 %v2131_v45, %v1448_v13  ;;  %v12889_v25 = vld [vmem:[#allocation21_spill] sm:$0xff] }
 0x2dc   : > { %v1925_v19 = vpop.f32.mrf.mxu0  ;;  %v2134_v37 = vpop.f32.mrf.mxu1  ;;  %v207_v48 = vld [vmem:[%s9358_s19 + $0xfe0] sm:$0xff] }
 0x2dd   : > { %12886 = vst [vmem:[#allocation18_spill] sm:$0xff] %v10414_v35  ;;  %7924 = vmatmul.msk.f32.gmra.mxu2 %vm285_vm1, %v206_v7  ;;  %7989 = vmatmul.msk.f32.gmra.mxu3 %vm285_vm1, %v206_v7  ;;  %v1577_v7 = vld [vmem:[%s9358_s19 + $0xfe1] sm:$0xff] }
 0x2de   : > { %12887 = vst [vmem:[#allocation19_spill] sm:$0xff] %v10416_v31 }
 0x2df   : > { %8055 = vmatmul.msk.f32.gmra.mxu0 %vm285_vm1, %v1576_v30  ;;  %8120 = vmatmul.msk.f32.gmra.mxu1 %vm285_vm1, %v1576_v30 }
 0x2e0   : > { %v1241_v63 = vpop.f32.mrf.mxu2  ;;  %v1450_v18 = vpop.f32.mrf.mxu3 }
 0x2e1   : > { %v1242_v24 = vadd.f32 %v1241_v63, %v12888_v17  ;;  %v1451_v45 = vadd.f32 %v1450_v18, %v12889_v25  ;;  %v12892_v18 = vld [vmem:[#allocation22_spill] sm:$0xff] }
 0x2e3   : > { %v10426_v23 = vadd.f32 %v1925_v19, %v1242_v24  ;;  %v10428_v13 = vadd.f32 %v2134_v37, %v1451_v45  ;;  %v12893_v19 = vld [vmem:[#allocation23_spill] sm:$0xff] }
 0x2e4   : > { %v1928_v31 = vpop.f32.mrf.mxu0  ;;  %v2137_v35 = vpop.f32.mrf.mxu1  ;;  %v208_v24 = vld [vmem:[%s9358_s19 + $0xff0] sm:$0xff] }
 0x2e5   : > { %12890 = vst [vmem:[#allocation20_spill] sm:$0xff] %v10426_v23  ;;  %7925 = vmatmul.msk.f32.gmra.mxu2 %vm285_vm1, %v207_v48  ;;  %7990 = vmatmul.msk.f32.gmra.mxu3 %vm285_vm1, %v207_v48  ;;  %v1578_v48 = vld [vmem:[%s9358_s19 + $0xff1] sm:$0xff] }
 0x2e6   : > { %12891 = vst [vmem:[#allocation21_spill] sm:$0xff] %v10428_v13 }
 0x2e7   : > { %8056 = vmatmul.msk.f32.gmra.mxu0 %vm285_vm1, %v1577_v7  ;;  %8121 = vmatmul.msk.f32.gmra.mxu1 %vm285_vm1, %v1577_v7 }
 0x2e8   : > { %v1244_v30 = vpop.f32.mrf.mxu2  ;;  %v1453_v63 = vpop.f32.mrf.mxu3 }
 0x2e9   : > { %v1245_v17 = vadd.f32 %v1244_v30, %v12892_v18  ;;  %v1454_v37 = vadd.f32 %v1453_v63, %v12893_v19  ;;  %v12896_v63 = vld [vmem:[#allocation24_spill] sm:$0xff] }
 0x2eb   : > { %v10438_v25 = vadd.f32 %v1928_v31, %v1245_v17  ;;  %v10440_v45 = vadd.f32 %v2137_v35, %v1454_v37  ;;  %v12897_v31 = vld [vmem:[#allocation25_spill] sm:$0xff] }
 0x2ec   : > { %v1931_v13 = vpop.f32.mrf.mxu0  ;;  %v2140_v23 = vpop.f32.mrf.mxu1  ;;  %v209_v17 = vld [vmem:[%s9358_s19 + $0x1000] sm:$0xff] }
 0x2ed   : > { %12894 = vst [vmem:[#allocation22_spill] sm:$0xff] %v10438_v25  ;;  %7926 = vmatmul.msk.f32.gmra.mxu2 %vm285_vm1, %v208_v24  ;;  %7991 = vmatmul.msk.f32.gmra.mxu3 %vm285_vm1, %v208_v24  ;;  %v1579_v24 = vld [vmem:[%s9358_s19 + $0x1001] sm:$0xff] }
 0x2ee   : > { %12895 = vst [vmem:[#allocation23_spill] sm:$0xff] %v10440_v45 }
 0x2ef   : > { %8057 = vmatmul.msk.f32.gmra.mxu0 %vm285_vm1, %v1578_v48  ;;  %8122 = vmatmul.msk.f32.gmra.mxu1 %vm285_vm1, %v1578_v48 }
 0x2f0   : > { %v1247_v7 = vpop.f32.mrf.mxu2  ;;  %v1456_v30 = vpop.f32.mrf.mxu3 }
 0x2f1   : > { %v1248_v18 = vadd.f32 %v1247_v7, %v12896_v63  ;;  %v1457_v35 = vadd.f32 %v1456_v30, %v12897_v31  ;;  %v12900_v30 = vld [vmem:[#allocation26_spill] sm:$0xff] }
 0x2f3   : > { %v10450_v19 = vadd.f32 %v1931_v13, %v1248_v18  ;;  %v10452_v37 = vadd.f32 %v2140_v23, %v1457_v35  ;;  %v12901_v13 = vld [vmem:[#allocation27_spill] sm:$0xff] }
 0x2f4   : > { %v1934_v45 = vpop.f32.mrf.mxu0  ;;  %v2143_v25 = vpop.f32.mrf.mxu1  ;;  %v210_v23 = vld [vmem:[%s9358_s19 + $0x1010] sm:$0xff] }
 0x2f5   : > { %12898 = vst [vmem:[#allocation24_spill] sm:$0xff] %v10450_v19  ;;  %7927 = vmatmul.msk.f32.gmra.mxu2 %vm285_vm1, %v209_v17  ;;  %7992 = vmatmul.msk.f32.gmra.mxu3 %vm285_vm1, %v209_v17  ;;  %v8581_v17 = vld [vmem:[%s12743_s1 + $0x28] sm:$0x77] }
 0x2f6   : > { %12899 = vst [vmem:[#allocation25_spill] sm:$0xff] %v10452_v37 }
 0x2f7   : > { %8058 = vmatmul.msk.f32.gmra.mxu0 %vm285_vm1, %v1579_v24  ;;  %8123 = vmatmul.msk.f32.gmra.mxu1 %vm285_vm1, %v1579_v24  ;;  %4024 = vst [vmem:[#allocation1] ss:$2 sm:$0xff] %v8581_v17  ;;  %v12904_v24 = vld [vmem:[#allocation28_spill] sm:$0xff] }
 0x2f8   : > { %v1250_v48 = vpop.f32.mrf.mxu2  ;;  %v1459_v7 = vpop.f32.mrf.mxu3 }
 0x2f9   : > { %v1251_v63 = vadd.f32 %v1250_v48, %v12900_v30  ;;  %v1460_v18 = vadd.f32 %v1459_v7, %v12901_v13  ;;  %v12905_v7 = vld [vmem:[#allocation29_spill] sm:$0xff] }
 0x2fb   : > { %v10462_v31 = vadd.f32 %v1934_v45, %v1251_v63  ;;  %v10464_v35 = vadd.f32 %v2143_v25, %v1460_v18  ;;  %v211_v63 = vld [vmem:[%s9358_s19 + $0x1020] sm:$0xff] }
 0x2fc   : > { %v1937_v37 = vpop.f32.mrf.mxu0  ;;  %v2146_v19 = vpop.f32.mrf.mxu1 }
 0x2fd   : > { %12902 = vst [vmem:[#allocation26_spill] sm:$0xff] %v10462_v31  ;;  %7928 = vmatmul.msk.f32.gmra.mxu2 %vm285_vm1, %v210_v23  ;;  %7993 = vmatmul.msk.f32.gmra.mxu3 %vm285_vm1, %v210_v23 }
 0x2fe   : > { %12903 = vst [vmem:[#allocation27_spill] sm:$0xff] %v10464_v35  ;;  %v4025_v17 = vld.sshfl [vmem:[#allocation1] sm:$0xff pattern:$0x75316420] }
 0x2ff   : > { %8059 = vmatmul.msk.f32.gmra.mxu0 %vm285_vm1, %v1580_v36  ;;  %8124 = vmatmul.msk.f32.gmra.mxu1 %vm285_vm1, %v1580_v36  ;;  %v4026_v35 = vld.sshfl [vmem:[#allocation1 + $0x8] sm:$0xff pattern:$0x75316420]  ;;  %v8776_v36 = vld [vmem:[%s12743_s1 + $0x30] sm:$0x77] }
 0x300   : > { %v1253_v45 = vpop.f32.mrf.mxu2  ;;  %v1462_v25 = vpop.f32.mrf.mxu3  ;;  %8582 = vmatpush.msk.msrb.mxu2 %vm478_vm0, %v4025_v17  ;;  %8647 = vmatpush.msk.msrb.mxu3 %vm478_vm0, %v4026_v35  ;;  %4837 = vst [vmem:[#allocation1] ss:$2 sm:$0xff] %v8776_v36  ;;  %v212_v35 = vld [vmem:[%s9358_s19 + $0x1030] sm:$0xff] }
 0x301   : > { %v1254_v48 = vadd.f32 %v1253_v45, %v12904_v24  ;;  %v1463_v30 = vadd.f32 %v1462_v25, %v12905_v7  ;;  %v12908_v45 = vld [vmem:[#allocation30_spill] sm:$0xff]  ;;  %v12909_v24 = vld [vmem:[#allocation31_spill] sm:$0xff] }
 0x302   : > { %v1582_v17 = vld [vmem:[%s9358_s19 + $0x1031] sm:$0xff] }
 0x303   : > { %v10477_v13 = vadd.f32 %v1937_v37, %v1254_v48  ;;  %v10479_v18 = vadd.f32 %v2146_v19, %v1463_v30 }
 0x304   : > { %v1940_v31 = vpop.f32.mrf.mxu0  ;;  %v2149_v23 = vpop.f32.mrf.mxu1 }
 0x305   : > { %12906 = vst [vmem:[#allocation28_spill] sm:$0xff] %v10477_v13  ;;  %7929 = vmatmul.msk.f32.gmra.mxu2 %vm285_vm1, %v211_v63  ;;  %7994 = vmatmul.msk.f32.gmra.mxu3 %vm285_vm1, %v211_v63 }
 0x306   : > { %12907 = vst [vmem:[#allocation29_spill] sm:$0xff] %v10479_v18 }
 0x307   : > { %8060 = vmatmul.msk.f32.gmra.mxu0 %vm285_vm1, %v1581_v8  ;;  %8125 = vmatmul.msk.f32.gmra.mxu1 %vm285_vm1, %v1581_v8  ;;  %v4838_v36 = vld.sshfl [vmem:[#allocation1] sm:$0xff pattern:$0x75316420]  ;;  %v4839_v13 = vld.sshfl [vmem:[#allocation1 + $0x8] sm:$0xff pattern:$0x75316420] }
 0x308   : > { %v1256_v19 = vpop.f32.mrf.mxu2  ;;  %v1465_v37 = vpop.f32.mrf.mxu3  ;;  %8777 = vmatpush.msk.msrb.mxu0 %vm478_vm0, %v4838_v36  ;;  %8842 = vmatpush.msk.msrb.mxu1 %vm478_vm0, %v4839_v13  ;;  %v8322_v13 = vld [vmem:[%s9358_s19 + $0x1b0] sm:$0xff] }
 0x309   : > { %v1257_v25 = vadd.f32 %v1256_v19, %v12908_v45  ;;  %v1466_v48 = vadd.f32 %v1465_v37, %v12909_v24  ;;  %v12911_v37 = vld [vmem:[#allocation33_spill] sm:$0xff] }
 0x30b   : > { %v10494_v7 = vadd.f32 %v1940_v31, %v1257_v25  ;;  %v10496_v30 = vadd.f32 %v2149_v23, %v1466_v48  ;;  %v12910_v23 = vld [vmem:[#allocation32_spill] sm:$0xff]  ;;  %v8127_v25 = vld [vmem:[%s9358_s19 + $0x120] sm:$0xff] }
 0x30c   : > { %v1943_v18 = vpop.f32.mrf.mxu0  ;;  %v2152_v63 = vpop.f32.mrf.mxu1 }
 0x30d   : > { %7930 = vmatmul.msk.f32.gmra.mxu2 %vm285_vm1, %v212_v35  ;;  %7995 = vmatmul.msk.f32.gmra.mxu3 %vm285_vm1, %v212_v35 }
 0x30f   : > { %8061 = vmatmul.msk.f32.gmra.mxu0 %vm285_vm1, %v1582_v17  ;;  %8126 = vmatmul.msk.f32.gmra.mxu1 %vm285_vm1, %v1582_v17 }
 0x310   : > { %v1259_v8 = vpop.f32.mrf.mxu2  ;;  %v1468_v31 = vpop.f32.mrf.mxu3 }
 0x311   : > { %v1260_v19 = vadd.f32 %v1259_v8, %v12910_v23  ;;  %v1469_v45 = vadd.f32 %v1468_v31, %v12911_v37  ;;  %v12914_v31 = vld [vmem:[#allocation34_spill] sm:$0xff] }
 0x313   : > { %v10508_v24 = vadd.f32 %v1943_v18, %v1260_v19  ;;  %v10510_v48 = vadd.f32 %v2152_v63, %v1469_v45  ;;  %v12915_v18 = vld [vmem:[#allocation35_spill] sm:$0xff] }
 0x314   : > { %v1946_v35 = vpop.f32.mrf.mxu0  ;;  %v2155_v36 = vpop.f32.mrf.mxu1  ;;  %v8128_v19 = vld [vmem:[%s9358_s19 + $0x130] sm:$0xff] }
 0x315   : > { %12912 = vst [vmem:[#allocation30_spill] sm:$0xff] %v10508_v24  ;;  %8193 = vmatmul.msk.f32.vlgmr.msra.gmra.mxu2 %vm285_vm1, %v8127_v25  ;;  %8258 = vmatmul.msk.f32.vlgmr.msra.gmra.mxu3 %vm285_vm1, %v8127_v25  ;;  %v8323_v25 = vld [vmem:[%s9358_s19 + $0x1c0] sm:$0xff] }
 0x316   : > { %12913 = vst [vmem:[#allocation31_spill] sm:$0xff] %v10510_v48 }
 0x317   : > { %8388 = vmatmul.msk.f32.vlgmr.msra.gmra.mxu0 %vm285_vm1, %v8322_v13  ;;  %8453 = vmatmul.msk.f32.vlgmr.msra.gmra.mxu1 %vm285_vm1, %v8322_v13 }
 0x318   : > { %v1262_v17 = vpop.f32.mrf.mxu2  ;;  %v1471_v8 = vpop.f32.mrf.mxu3 }
 0x319   : > { %v1263_v23 = vadd.f32 %v1262_v17, %v12914_v31  ;;  %v1472_v63 = vadd.f32 %v1471_v8, %v12915_v18  ;;  %v12918_v8 = vld [vmem:[#allocation36_spill] sm:$0xff] }
 0x31b   : > { %v10520_v37 = vadd.f32 %v1946_v35, %v1263_v23  ;;  %v10522_v45 = vadd.f32 %v2155_v36, %v1472_v63  ;;  %v12919_v35 = vld [vmem:[#allocation37_spill] sm:$0xff] }
 0x31c   : > { %v1949_v48 = vpop.f32.mrf.mxu0  ;;  %v2158_v24 = vpop.f32.mrf.mxu1  ;;  %v8129_v23 = vld [vmem:[%s9358_s19 + $0x140] sm:$0xff] }
 0x31d   : > { %12916 = vst [vmem:[#allocation32_spill] sm:$0xff] %v10520_v37  ;;  %8194 = vmatmul.msk.f32.gmra.mxu2 %vm285_vm1, %v8128_v19  ;;  %8259 = vmatmul.msk.f32.gmra.mxu3 %vm285_vm1, %v8128_v19  ;;  %v8324_v19 = vld [vmem:[%s9358_s19 + $0x1d0] sm:$0xff] }
 0x31e   : > { %12917 = vst [vmem:[#allocation33_spill] sm:$0xff] %v10522_v45 }
 0x31f   : > { %8389 = vmatmul.msk.f32.gmra.mxu0 %vm285_vm1, %v8323_v25  ;;  %8454 = vmatmul.msk.f32.gmra.mxu1 %vm285_vm1, %v8323_v25 }
 0x320   : > { %v1265_v13 = vpop.f32.mrf.mxu2  ;;  %v1474_v17 = vpop.f32.mrf.mxu3 }
 0x321   : > { %v1266_v31 = vadd.f32 %v1265_v13, %v12918_v8  ;;  %v1475_v36 = vadd.f32 %v1474_v17, %v12919_v35  ;;  %v12922_v17 = vld [vmem:[#allocation38_spill] sm:$0xff] }
 0x323   : > { %v10532_v18 = vadd.f32 %v1949_v48, %v1266_v31  ;;  %v10534_v63 = vadd.f32 %v2158_v24, %v1475_v36  ;;  %v12923_v48 = vld [vmem:[#allocation39_spill] sm:$0xff] }
 0x324   : > { %v1952_v45 = vpop.f32.mrf.mxu0  ;;  %v2161_v37 = vpop.f32.mrf.mxu1  ;;  %v8130_v31 = vld [vmem:[%s9358_s19 + $0x150] sm:$0xff] }
 0x325   : > { %12920 = vst [vmem:[#allocation34_spill] sm:$0xff] %v10532_v18  ;;  %8195 = vmatmul.msk.f32.gmra.mxu2 %vm285_vm1, %v8129_v23  ;;  %8260 = vmatmul.msk.f32.gmra.mxu3 %vm285_vm1, %v8129_v23  ;;  %v8325_v23 = vld [vmem:[%s9358_s19 + $0x1e0] sm:$0xff] }
 0x326   : > { %12921 = vst [vmem:[#allocation35_spill] sm:$0xff] %v10534_v63 }
 0x327   : > { %8390 = vmatmul.msk.f32.gmra.mxu0 %vm285_vm1, %v8324_v19  ;;  %8455 = vmatmul.msk.f32.gmra.mxu1 %vm285_vm1, %v8324_v19 }
 0x328   : > { %v1268_v25 = vpop.f32.mrf.mxu2  ;;  %v1477_v13 = vpop.f32.mrf.mxu3 }
 0x329   : > { %v1269_v8 = vadd.f32 %v1268_v25, %v12922_v17  ;;  %v1478_v24 = vadd.f32 %v1477_v13, %v12923_v48  ;;  %v12926_v13 = vld [vmem:[#allocation40_spill] sm:$0xff] }
 0x32b   : > { %v10544_v35 = vadd.f32 %v1952_v45, %v1269_v8  ;;  %v10546_v36 = vadd.f32 %v2161_v37, %v1478_v24  ;;  %v12927_v45 = vld [vmem:[#allocation41_spill] sm:$0xff] }
 0x32c   : > { %v1955_v63 = vpop.f32.mrf.mxu0  ;;  %v2164_v18 = vpop.f32.mrf.mxu1  ;;  %v8131_v8 = vld [vmem:[%s9358_s19 + $0x160] sm:$0xff] }
 0x32d   : > { %12924 = vst [vmem:[#allocation36_spill] sm:$0xff] %v10544_v35  ;;  %8196 = vmatmul.msk.f32.gmra.mxu2 %vm285_vm1, %v8130_v31  ;;  %8261 = vmatmul.msk.f32.gmra.mxu3 %vm285_vm1, %v8130_v31  ;;  %v8326_v31 = vld [vmem:[%s9358_s19 + $0x1f0] sm:$0xff] }
 0x32e   : > { %12925 = vst [vmem:[#allocation37_spill] sm:$0xff] %v10546_v36 }
 0x32f   : > { %8391 = vmatmul.msk.f32.gmra.mxu0 %vm285_vm1, %v8325_v23  ;;  %8456 = vmatmul.msk.f32.gmra.mxu1 %vm285_vm1, %v8325_v23 }
 0x330   : > { %v1271_v19 = vpop.f32.mrf.mxu2  ;;  %v1480_v25 = vpop.f32.mrf.mxu3 }
 0x331   : > { %v1272_v17 = vadd.f32 %v1271_v19, %v12926_v13  ;;  %v1481_v37 = vadd.f32 %v1480_v25, %v12927_v45  ;;  %v12930_v25 = vld [vmem:[#allocation42_spill] sm:$0xff] }
 0x333   : > { %v10556_v48 = vadd.f32 %v1955_v63, %v1272_v17  ;;  %v10558_v24 = vadd.f32 %v2164_v18, %v1481_v37  ;;  %v12931_v63 = vld [vmem:[#allocation43_spill] sm:$0xff] }
 0x334   : > { %v1958_v36 = vpop.f32.mrf.mxu0  ;;  %v2167_v35 = vpop.f32.mrf.mxu1  ;;  %v8132_v17 = vld [vmem:[%s9358_s19 + $0x170] sm:$0xff] }
 0x335   : > { %12928 = vst [vmem:[#allocation38_spill] sm:$0xff] %v10556_v48  ;;  %8197 = vmatmul.msk.f32.gmra.mxu2 %vm285_vm1, %v8131_v8  ;;  %8262 = vmatmul.msk.f32.gmra.mxu3 %vm285_vm1, %v8131_v8  ;;  %v8327_v8 = vld [vmem:[%s9358_s19 + $0x200] sm:$0xff] }
 0x336   : > { %12929 = vst [vmem:[#allocation39_spill] sm:$0xff] %v10558_v24 }
 0x337   : > { %8392 = vmatmul.msk.f32.gmra.mxu0 %vm285_vm1, %v8326_v31  ;;  %8457 = vmatmul.msk.f32.gmra.mxu1 %vm285_vm1, %v8326_v31 }
 0x338   : > { %v1274_v23 = vpop.f32.mrf.mxu2  ;;  %v1483_v19 = vpop.f32.mrf.mxu3 }
 0x339   : > { %v1275_v13 = vadd.f32 %v1274_v23, %v12930_v25  ;;  %v1484_v18 = vadd.f32 %v1483_v19, %v12931_v63  ;;  %v12934_v19 = vld [vmem:[#allocation44_spill] sm:$0xff] }
 0x33b   : > { %v10568_v45 = vadd.f32 %v1958_v36, %v1275_v13  ;;  %v10570_v37 = vadd.f32 %v2167_v35, %v1484_v18  ;;  %v12935_v36 = vld [vmem:[#allocation45_spill] sm:$0xff] }
 0x33c   : > { %v1961_v24 = vpop.f32.mrf.mxu0  ;;  %v2170_v48 = vpop.f32.mrf.mxu1  ;;  %v8133_v13 = vld [vmem:[%s9358_s19 + $0x180] sm:$0xff] }
 0x33d   : > { %12932 = vst [vmem:[#allocation40_spill] sm:$0xff] %v10568_v45  ;;  %8198 = vmatmul.msk.f32.gmra.mxu2 %vm285_vm1, %v8132_v17  ;;  %8263 = vmatmul.msk.f32.gmra.mxu3 %vm285_vm1, %v8132_v17  ;;  %v8328_v17 = vld [vmem:[%s9358_s19 + $0x210] sm:$0xff] }
 0x33e   : > { %12933 = vst [vmem:[#allocation41_spill] sm:$0xff] %v10570_v37 }
 0x33f   : > { %8393 = vmatmul.msk.f32.gmra.mxu0 %vm285_vm1, %v8327_v8  ;;  %8458 = vmatmul.msk.f32.gmra.mxu1 %vm285_vm1, %v8327_v8 }
 0x340   : > { %v1277_v31 = vpop.f32.mrf.mxu2  ;;  %v1486_v23 = vpop.f32.mrf.mxu3 }
 0x341   : > { %v1278_v25 = vadd.f32 %v1277_v31, %v12934_v19  ;;  %v1487_v35 = vadd.f32 %v1486_v23, %v12935_v36  ;;  %v12938_v23 = vld [vmem:[#allocation46_spill] sm:$0xff] }
 0x343   : > { %v10580_v63 = vadd.f32 %v1961_v24, %v1278_v25  ;;  %v10582_v18 = vadd.f32 %v2170_v48, %v1487_v35  ;;  %v12939_v24 = vld [vmem:[#allocation47_spill] sm:$0xff] }
 0x344   : > { %v1964_v37 = vpop.f32.mrf.mxu0  ;;  %v2173_v45 = vpop.f32.mrf.mxu1  ;;  %v8134_v25 = vld [vmem:[%s9358_s19 + $0x190] sm:$0xff] }
 0x345   : > { %12936 = vst [vmem:[#allocation42_spill] sm:$0xff] %v10580_v63  ;;  %8199 = vmatmul.msk.f32.gmra.mxu2 %vm285_vm1, %v8133_v13  ;;  %8264 = vmatmul.msk.f32.gmra.mxu3 %vm285_vm1, %v8133_v13  ;;  %v8329_v13 = vld [vmem:[%s9358_s19 + $0x220] sm:$0xff] }
 0x346   : > { %12937 = vst [vmem:[#allocation43_spill] sm:$0xff] %v10582_v18 }
 0x347   : > { %8394 = vmatmul.msk.f32.gmra.mxu0 %vm285_vm1, %v8328_v17  ;;  %8459 = vmatmul.msk.f32.gmra.mxu1 %vm285_vm1, %v8328_v17 }
 0x348   : > { %v1280_v8 = vpop.f32.mrf.mxu2  ;;  %v1489_v31 = vpop.f32.mrf.mxu3 }
 0x349   : > { %v1281_v19 = vadd.f32 %v1280_v8, %v12938_v23  ;;  %v1490_v48 = vadd.f32 %v1489_v31, %v12939_v24  ;;  %v12942_v31 = vld [vmem:[#allocation48_spill] sm:$0xff] }
 0x34b   : > { %v10592_v36 = vadd.f32 %v1964_v37, %v1281_v19  ;;  %v10594_v35 = vadd.f32 %v2173_v45, %v1490_v48  ;;  %v12943_v37 = vld [vmem:[#allocation49_spill] sm:$0xff] }
 0x34c   : > { %v1967_v18 = vpop.f32.mrf.mxu0  ;;  %v2176_v63 = vpop.f32.mrf.mxu1  ;;  %v8135_v19 = vld [vmem:[%s9358_s19 + $0x360] sm:$0xff] }
 0x34d   : > { %12940 = vst [vmem:[#allocation44_spill] sm:$0xff] %v10592_v36  ;;  %8200 = vmatmul.msk.f32.gmra.mxu2 %vm285_vm1, %v8134_v25  ;;  %8265 = vmatmul.msk.f32.gmra.mxu3 %vm285_vm1, %v8134_v25  ;;  %v8330_v25 = vld [vmem:[%s9358_s19 + $0x3f0] sm:$0xff] }
 0x34e   : > { %12941 = vst [vmem:[#allocation45_spill] sm:$0xff] %v10594_v35 }
 0x34f   : > { %8395 = vmatmul.msk.f32.gmra.mxu0 %vm285_vm1, %v8329_v13  ;;  %8460 = vmatmul.msk.f32.gmra.mxu1 %vm285_vm1, %v8329_v13 }
 0x350   : > { %v1283_v17 = vpop.f32.mrf.mxu2  ;;  %v1492_v8 = vpop.f32.mrf.mxu3 }
 0x351   : > { %v1284_v23 = vadd.f32 %v1283_v17, %v12942_v31  ;;  %v1493_v45 = vadd.f32 %v1492_v8, %v12943_v37  ;;  %v12946_v8 = vld [vmem:[#allocation50_spill] sm:$0xff] }
 0x353   : > { %v10604_v24 = vadd.f32 %v1967_v18, %v1284_v23  ;;  %v10606_v48 = vadd.f32 %v2176_v63, %v1493_v45  ;;  %v12947_v18 = vld [vmem:[#allocation51_spill] sm:$0xff] }
 0x354   : > { %v1970_v35 = vpop.f32.mrf.mxu0  ;;  %v2179_v36 = vpop.f32.mrf.mxu1  ;;  %v8136_v23 = vld [vmem:[%s9358_s19 + $0x370] sm:$0xff] }
 0x355   : > { %12944 = vst [vmem:[#allocation46_spill] sm:$0xff] %v10604_v24  ;;  %8201 = vmatmul.msk.f32.gmra.mxu2 %vm285_vm1, %v8135_v19  ;;  %8266 = vmatmul.msk.f32.gmra.mxu3 %vm285_vm1, %v8135_v19  ;;  %v8331_v19 = vld [vmem:[%s9358_s19 + $0x400] sm:$0xff] }
 0x356   : > { %12945 = vst [vmem:[#allocation47_spill] sm:$0xff] %v10606_v48 }
 0x357   : > { %8396 = vmatmul.msk.f32.gmra.mxu0 %vm285_vm1, %v8330_v25  ;;  %8461 = vmatmul.msk.f32.gmra.mxu1 %vm285_vm1, %v8330_v25 }
 0x358   : > { %v1286_v13 = vpop.f32.mrf.mxu2  ;;  %v1495_v17 = vpop.f32.mrf.mxu3 }
 0x359   : > { %v1287_v31 = vadd.f32 %v1286_v13, %v12946_v8  ;;  %v1496_v63 = vadd.f32 %v1495_v17, %v12947_v18  ;;  %v12950_v17 = vld [vmem:[#allocation53_spill] sm:$0xff] }
 0x35b   : > { %v10616_v37 = vadd.f32 %v1970_v35, %v1287_v31  ;;  %v10618_v45 = vadd.f32 %v2179_v36, %v1496_v63  ;;  %v12951_v35 = vld [vmem:[#allocation54_spill] sm:$0xff]  ;;  %v8137_v31 = vld [vmem:[%s9358_s19 + $0x380] sm:$0xff] }
 0x35c   : > { %v1973_v48 = vpop.f32.mrf.mxu0  ;;  %v2182_v24 = vpop.f32.mrf.mxu1 }
 0x35d   : > { %12948 = vst [vmem:[#allocation48_spill] sm:$0xff] %v10616_v37  ;;  %8202 = vmatmul.msk.f32.gmra.mxu2 %vm285_vm1, %v8136_v23  ;;  %8267 = vmatmul.msk.f32.gmra.mxu3 %vm285_vm1, %v8136_v23  ;;  %v8332_v23 = vld [vmem:[%s9358_s19 + $0x410] sm:$0xff] }
 0x35e   : > { %12949 = vst [vmem:[#allocation49_spill] sm:$0xff] %v10618_v45 }
 0x35f   : > { %8397 = vmatmul.msk.f32.gmra.mxu0 %vm285_vm1, %v8331_v19  ;;  %8462 = vmatmul.msk.f32.gmra.mxu1 %vm285_vm1, %v8331_v19 }
 0x360   : > { %v1289_v25 = vpop.f32.mrf.mxu2  ;;  %v1498_v13 = vpop.f32.mrf.mxu3 }
 0x361   : > { %v1290_v8 = vadd.f32 %v1289_v25, %v12950_v17  ;;  %v1499_v36 = vadd.f32 %v1498_v13, %v12951_v35  ;;  %v12954_v13 = vld [vmem:[#allocation57_spill] sm:$0xff] }
 0x363   : > { %v10628_v18 = vadd.f32 %v1973_v48, %v1290_v8  ;;  %v10630_v63 = vadd.f32 %v2182_v24, %v1499_v36  ;;  %v12955_v48 = vld [vmem:[#allocation58_spill] sm:$0xff]  ;;  %v8138_v8 = vld [vmem:[%s9358_s19 + $0x390] sm:$0xff] }
 0x364   : > { %v1976_v45 = vpop.f32.mrf.mxu0  ;;  %v2185_v37 = vpop.f32.mrf.mxu1 }
 0x365   : > { %12952 = vst [vmem:[#allocation50_spill] sm:$0xff] %v10628_v18  ;;  %8203 = vmatmul.msk.f32.gmra.mxu2 %vm285_vm1, %v8137_v31  ;;  %8268 = vmatmul.msk.f32.gmra.mxu3 %vm285_vm1, %v8137_v31  ;;  %v8333_v31 = vld [vmem:[%s9358_s19 + $0x420] sm:$0xff] }
 0x366   : > { %12953 = vst [vmem:[#allocation51_spill] sm:$0xff] %v10630_v63 }
 0x367   : > { %8398 = vmatmul.msk.f32.gmra.mxu0 %vm285_vm1, %v8332_v23  ;;  %8463 = vmatmul.msk.f32.gmra.mxu1 %vm285_vm1, %v8332_v23 }
 0x368   : > { %v1292_v19 = vpop.f32.mrf.mxu2  ;;  %v1501_v25 = vpop.f32.mrf.mxu3 }
 0x369   : > { %v1293_v17 = vadd.f32 %v1292_v19, %v12954_v13  ;;  %v1502_v24 = vadd.f32 %v1501_v25, %v12955_v48  ;;  %v12958_v25 = vld [vmem:[#allocation61_spill] sm:$0xff] }
 0x36b   : > { %v10640_v35 = vadd.f32 %v1976_v45, %v1293_v17  ;;  %v10642_v36 = vadd.f32 %v2185_v37, %v1502_v24  ;;  %v12959_v45 = vld [vmem:[#allocation62_spill] sm:$0xff]  ;;  %v8139_v17 = vld [vmem:[%s9358_s19 + $0x3a0] sm:$0xff] }
 0x36c   : > { %v1979_v63 = vpop.f32.mrf.mxu0  ;;  %v2188_v18 = vpop.f32.mrf.mxu1 }
 0x36d   : > { %12956 = vst [vmem:[#allocation53_spill] sm:$0xff] %v10640_v35  ;;  %8204 = vmatmul.msk.f32.gmra.mxu2 %vm285_vm1, %v8138_v8  ;;  %8269 = vmatmul.msk.f32.gmra.mxu3 %vm285_vm1, %v8138_v8  ;;  %v8334_v8 = vld [vmem:[%s9358_s19 + $0x430] sm:$0xff] }
 0x36e   : > { %12957 = vst [vmem:[#allocation54_spill] sm:$0xff] %v10642_v36 }
 0x36f   : > { %8399 = vmatmul.msk.f32.gmra.mxu0 %vm285_vm1, %v8333_v31  ;;  %8464 = vmatmul.msk.f32.gmra.mxu1 %vm285_vm1, %v8333_v31 }
 0x370   : > { %v1295_v23 = vpop.f32.mrf.mxu2  ;;  %v1504_v19 = vpop.f32.mrf.mxu3 }
 0x371   : > { %v1296_v13 = vadd.f32 %v1295_v23, %v12958_v25  ;;  %v1505_v37 = vadd.f32 %v1504_v19, %v12959_v45  ;;  %v12962_v19 = vld [vmem:[#allocation65_spill] sm:$0xff] }
 0x373   : > { %v10652_v48 = vadd.f32 %v1979_v63, %v1296_v13  ;;  %v10654_v24 = vadd.f32 %v2188_v18, %v1505_v37  ;;  %v12963_v63 = vld [vmem:[#allocation66_spill] sm:$0xff]  ;;  %v8140_v13 = vld [vmem:[%s9358_s19 + $0x3b0] sm:$0xff] }
 0x374   : > { %v1982_v36 = vpop.f32.mrf.mxu0  ;;  %v2191_v35 = vpop.f32.mrf.mxu1 }
 0x375   : > { %12960 = vst [vmem:[#allocation57_spill] sm:$0xff] %v10652_v48  ;;  %8205 = vmatmul.msk.f32.gmra.mxu2 %vm285_vm1, %v8139_v17  ;;  %8270 = vmatmul.msk.f32.gmra.mxu3 %vm285_vm1, %v8139_v17  ;;  %v8335_v17 = vld [vmem:[%s9358_s19 + $0x440] sm:$0xff] }
 0x376   : > { %12961 = vst [vmem:[#allocation58_spill] sm:$0xff] %v10654_v24 }
 0x377   : > { %8400 = vmatmul.msk.f32.gmra.mxu0 %vm285_vm1, %v8334_v8  ;;  %8465 = vmatmul.msk.f32.gmra.mxu1 %vm285_vm1, %v8334_v8 }
 0x378   : > { %v1298_v31 = vpop.f32.mrf.mxu2  ;;  %v1507_v23 = vpop.f32.mrf.mxu3 }
 0x379   : > { %v1299_v25 = vadd.f32 %v1298_v31, %v12962_v19  ;;  %v1508_v18 = vadd.f32 %v1507_v23, %v12963_v63  ;;  %v12966_v23 = vld [vmem:[#allocation69_spill] sm:$0xff] }
 0x37b   : > { %v10664_v45 = vadd.f32 %v1982_v36, %v1299_v25  ;;  %v10666_v37 = vadd.f32 %v2191_v35, %v1508_v18  ;;  %v12967_v36 = vld [vmem:[#allocation70_spill] sm:$0xff]  ;;  %v8141_v25 = vld [vmem:[%s9358_s19 + $0x3c0] sm:$0xff] }
 0x37c   : > { %v1985_v24 = vpop.f32.mrf.mxu0  ;;  %v2194_v48 = vpop.f32.mrf.mxu1 }
 0x37d   : > { %12964 = vst [vmem:[#allocation61_spill] sm:$0xff] %v10664_v45  ;;  %8206 = vmatmul.msk.f32.gmra.mxu2 %vm285_vm1, %v8140_v13  ;;  %8271 = vmatmul.msk.f32.gmra.mxu3 %vm285_vm1, %v8140_v13  ;;  %v8336_v13 = vld [vmem:[%s9358_s19 + $0x450] sm:$0xff] }
 0x37e   : > { %12965 = vst [vmem:[#allocation62_spill] sm:$0xff] %v10666_v37 }
 0x37f   : > { %8401 = vmatmul.msk.f32.gmra.mxu0 %vm285_vm1, %v8335_v17  ;;  %8466 = vmatmul.msk.f32.gmra.mxu1 %vm285_vm1, %v8335_v17 }
 0x380   : > { %v1301_v8 = vpop.f32.mrf.mxu2  ;;  %v1510_v31 = vpop.f32.mrf.mxu3 }
 0x381   : > { %v1302_v19 = vadd.f32 %v1301_v8, %v12966_v23  ;;  %v1511_v35 = vadd.f32 %v1510_v31, %v12967_v36  ;;  %v12970_v31 = vld [vmem:[#allocation73_spill] sm:$0xff] }
 0x383   : > { %v10676_v63 = vadd.f32 %v1985_v24, %v1302_v19  ;;  %v10678_v18 = vadd.f32 %v2194_v48, %v1511_v35  ;;  %v12971_v24 = vld [vmem:[#allocation74_spill] sm:$0xff]  ;;  %v8142_v19 = vld [vmem:[%s9358_s19 + $0x3d0] sm:$0xff] }
 0x384   : > { %v1988_v37 = vpop.f32.mrf.mxu0  ;;  %v2197_v45 = vpop.f32.mrf.mxu1 }
 0x385   : > { %12968 = vst [vmem:[#allocation65_spill] sm:$0xff] %v10676_v63  ;;  %8207 = vmatmul.msk.f32.gmra.mxu2 %vm285_vm1, %v8141_v25  ;;  %8272 = vmatmul.msk.f32.gmra.mxu3 %vm285_vm1, %v8141_v25  ;;  %v8337_v25 = vld [vmem:[%s9358_s19 + $0x460] sm:$0xff] }
 0x386   : > { %12969 = vst [vmem:[#allocation66_spill] sm:$0xff] %v10678_v18 }
 0x387   : > { %8402 = vmatmul.msk.f32.gmra.mxu0 %vm285_vm1, %v8336_v13  ;;  %8467 = vmatmul.msk.f32.gmra.mxu1 %vm285_vm1, %v8336_v13 }
 0x388   : > { %v1304_v17 = vpop.f32.mrf.mxu2  ;;  %v1513_v8 = vpop.f32.mrf.mxu3 }
 0x389   : > { %v1305_v23 = vadd.f32 %v1304_v17, %v12970_v31  ;;  %v1514_v48 = vadd.f32 %v1513_v8, %v12971_v24  ;;  %v12974_v8 = vld [vmem:[#allocation77_spill] sm:$0xff] }
 0x38b   : > { %v10688_v36 = vadd.f32 %v1988_v37, %v1305_v23  ;;  %v10690_v35 = vadd.f32 %v2197_v45, %v1514_v48  ;;  %v12975_v37 = vld [vmem:[#allocation78_spill] sm:$0xff]  ;;  %v8143_v23 = vld [vmem:[%s9358_s19 + $0x5a0] sm:$0xff] }
 0x38c   : > { %v1991_v18 = vpop.f32.mrf.mxu0  ;;  %v2200_v63 = vpop.f32.mrf.mxu1 }
 0x38d   : > { %12972 = vst [vmem:[#allocation69_spill] sm:$0xff] %v10688_v36  ;;  %8208 = vmatmul.msk.f32.gmra.mxu2 %vm285_vm1, %v8142_v19  ;;  %8273 = vmatmul.msk.f32.gmra.mxu3 %vm285_vm1, %v8142_v19  ;;  %v8338_v19 = vld [vmem:[%s9358_s19 + $0x630] sm:$0xff] }
 0x38e   : > { %12973 = vst [vmem:[#allocation70_spill] sm:$0xff] %v10690_v35 }
 0x38f   : > { %8403 = vmatmul.msk.f32.gmra.mxu0 %vm285_vm1, %v8337_v25  ;;  %8468 = vmatmul.msk.f32.gmra.mxu1 %vm285_vm1, %v8337_v25 }
 0x390   : > { %v1307_v13 = vpop.f32.mrf.mxu2  ;;  %v1516_v17 = vpop.f32.mrf.mxu3 }
 0x391   : > { %v1308_v31 = vadd.f32 %v1307_v13, %v12974_v8  ;;  %v1517_v45 = vadd.f32 %v1516_v17, %v12975_v37 }
 0x393   : > { %v10700_v24 = vadd.f32 %v1991_v18, %v1308_v31  ;;  %v10702_v48 = vadd.f32 %v2200_v63, %v1517_v45  ;;  %v8144_v18 = vld [vmem:[%s9358_s19 + $0x5b0] sm:$0xff] }
 0x394   : > { %v3428_v35 = vpop.f32.mrf.mxu0  ;;  %v3637_v36 = vpop.f32.mrf.mxu1 }
 0x395   : > { %8209 = vmatmul.msk.f32.gmra.mxu2 %vm285_vm1, %v8143_v23  ;;  %8274 = vmatmul.msk.f32.gmra.mxu3 %vm285_vm1, %v8143_v23  ;;  %v8339_v23 = vld [vmem:[%s9358_s19 + $0x640] sm:$0xff] }
 0x397   : > { %8404 = vmatmul.msk.f32.gmra.mxu0 %vm285_vm1, %v8338_v19  ;;  %8469 = vmatmul.msk.f32.gmra.mxu1 %vm285_vm1, %v8338_v19 }
 0x398   : > { %v2615_v25 = vpop.f32.mrf.mxu2  ;;  %v2824_v13 = vpop.f32.mrf.mxu3 }
 0x399   : > { %v3016_v17 = vadd.f32 %v2615_v25, %v9934_v6  ;;  %v3017_v63 = vadd.f32 %v2824_v13, %v9936_v59 }
 0x39b   : > { %v10712_v8 = vadd.f32 %v3428_v35, %v3016_v17  ;;  %v10714_v31 = vadd.f32 %v3637_v36, %v3017_v63  ;;  %v8145_v35 = vld [vmem:[%s9358_s19 + $0x5c0] sm:$0xff] }
 0x39c   : > { %v3431_v37 = vpop.f32.mrf.mxu0  ;;  %v3640_v45 = vpop.f32.mrf.mxu1 }
 0x39d   : > { %8210 = vmatmul.msk.f32.gmra.mxu2 %vm285_vm1, %v8144_v18  ;;  %8275 = vmatmul.msk.f32.gmra.mxu3 %vm285_vm1, %v8144_v18  ;;  %v8340_v18 = vld [vmem:[%s9358_s19 + $0x650] sm:$0xff] }
 0x39f   : > { %8405 = vmatmul.msk.f32.gmra.mxu0 %vm285_vm1, %v8339_v23  ;;  %8470 = vmatmul.msk.f32.gmra.mxu1 %vm285_vm1, %v8339_v23 }
 0x3a0   : > { %v2618_v6 = vpop.f32.mrf.mxu2  ;;  %v2827_v19 = vpop.f32.mrf.mxu3 }
 0x3a1   : > { %v3018_v59 = vadd.f32 %v2618_v6, %v9946_v47  ;;  %v3019_v36 = vadd.f32 %v2827_v19, %v9948_v57 }
 0x3a3   : > { %v10724_v25 = vadd.f32 %v3431_v37, %v3018_v59  ;;  %v10726_v13 = vadd.f32 %v3640_v45, %v3019_v36  ;;  %v8146_v45 = vld [vmem:[%s9358_s19 + $0x5d0] sm:$0xff] }
 0x3a4   : > { %v3434_v17 = vpop.f32.mrf.mxu0  ;;  %v3643_v63 = vpop.f32.mrf.mxu1 }
 0x3a5   : > { %8211 = vmatmul.msk.f32.gmra.mxu2 %vm285_vm1, %v8145_v35  ;;  %8276 = vmatmul.msk.f32.gmra.mxu3 %vm285_vm1, %v8145_v35  ;;  %v8341_v35 = vld [vmem:[%s9358_s19 + $0x660] sm:$0xff] }
 0x3a7   : > { %8406 = vmatmul.msk.f32.gmra.mxu0 %vm285_vm1, %v8340_v18  ;;  %8471 = vmatmul.msk.f32.gmra.mxu1 %vm285_vm1, %v8340_v18 }
 0x3a8   : > { %v2621_v47 = vpop.f32.mrf.mxu2  ;;  %v2830_v23 = vpop.f32.mrf.mxu3 }
 0x3a9   : > { %v3020_v57 = vadd.f32 %v2621_v47, %v9958_v43  ;;  %v3021_v37 = vadd.f32 %v2830_v23, %v9960_v53 }
 0x3ab   : > { %v10736_v6 = vadd.f32 %v3434_v17, %v3020_v57  ;;  %v10738_v19 = vadd.f32 %v3643_v63, %v3021_v37  ;;  %v8147_v63 = vld [vmem:[%s9358_s19 + $0x5e0] sm:$0xff] }
 0x3ac   : > { %v3437_v59 = vpop.f32.mrf.mxu0  ;;  %v3646_v36 = vpop.f32.mrf.mxu1 }
 0x3ad   : > { %8212 = vmatmul.msk.f32.gmra.mxu2 %vm285_vm1, %v8146_v45  ;;  %8277 = vmatmul.msk.f32.gmra.mxu3 %vm285_vm1, %v8146_v45  ;;  %v8342_v45 = vld [vmem:[%s9358_s19 + $0x670] sm:$0xff] }
 0x3af   : > { %8407 = vmatmul.msk.f32.gmra.mxu0 %vm285_vm1, %v8341_v35  ;;  %8472 = vmatmul.msk.f32.gmra.mxu1 %vm285_vm1, %v8341_v35 }
 0x3b0   : > { %v2624_v43 = vpop.f32.mrf.mxu2  ;;  %v2833_v18 = vpop.f32.mrf.mxu3 }
 0x3b1   : > { %v3022_v53 = vadd.f32 %v2624_v43, %v9970_v49  ;;  %v3023_v17 = vadd.f32 %v2833_v18, %v9972_v26 }
 0x3b3   : > { %v10748_v47 = vadd.f32 %v3437_v59, %v3022_v53  ;;  %v10750_v23 = vadd.f32 %v3646_v36, %v3023_v17  ;;  %v8148_v36 = vld [vmem:[%s9358_s19 + $0x5f0] sm:$0xff] }
 0x3b4   : > { %v3440_v57 = vpop.f32.mrf.mxu0  ;;  %v3649_v37 = vpop.f32.mrf.mxu1 }
 0x3b5   : > { %8213 = vmatmul.msk.f32.gmra.mxu2 %vm285_vm1, %v8147_v63  ;;  %8278 = vmatmul.msk.f32.gmra.mxu3 %vm285_vm1, %v8147_v63  ;;  %v8343_v63 = vld [vmem:[%s9358_s19 + $0x680] sm:$0xff] }
 0x3b7   : > { %8408 = vmatmul.msk.f32.gmra.mxu0 %vm285_vm1, %v8342_v45  ;;  %8473 = vmatmul.msk.f32.gmra.mxu1 %vm285_vm1, %v8342_v45 }
 0x3b8   : > { %v2627_v49 = vpop.f32.mrf.mxu2  ;;  %v2836_v35 = vpop.f32.mrf.mxu3 }
 0x3b9   : > { %v3024_v26 = vadd.f32 %v2627_v49, %v9982_v55  ;;  %v3025_v59 = vadd.f32 %v2836_v35, %v9984_v0 }
 0x3bb   : > { %v10760_v43 = vadd.f32 %v3440_v57, %v3024_v26  ;;  %v10762_v18 = vadd.f32 %v3649_v37, %v3025_v59  ;;  %v8149_v37 = vld [vmem:[%s9358_s19 + $0x600] sm:$0xff] }
 0x3bc   : > { %v3443_v53 = vpop.f32.mrf.mxu0  ;;  %v3652_v17 = vpop.f32.mrf.mxu1 }
 0x3bd   : > { %8214 = vmatmul.msk.f32.gmra.mxu2 %vm285_vm1, %v8148_v36  ;;  %8279 = vmatmul.msk.f32.gmra.mxu3 %vm285_vm1, %v8148_v36  ;;  %v8344_v36 = vld [vmem:[%s9358_s19 + $0x690] sm:$0xff] }
 0x3bf   : > { %8409 = vmatmul.msk.f32.gmra.mxu0 %vm285_vm1, %v8343_v63  ;;  %8474 = vmatmul.msk.f32.gmra.mxu1 %vm285_vm1, %v8343_v63 }
 0x3c0   : > { %v2630_v55 = vpop.f32.mrf.mxu2  ;;  %v2839_v45 = vpop.f32.mrf.mxu3 }
 0x3c1   : > { %v3026_v0 = vadd.f32 %v2630_v55, %v9994_v61  ;;  %v3027_v57 = vadd.f32 %v2839_v45, %v9996_v46 }
 0x3c3   : > { %v10772_v49 = vadd.f32 %v3443_v53, %v3026_v0  ;;  %v10774_v35 = vadd.f32 %v3652_v17, %v3027_v57  ;;  %v8150_v17 = vld [vmem:[%s9358_s19 + $0x610] sm:$0xff] }
 0x3c4   : > { %v3446_v26 = vpop.f32.mrf.mxu0  ;;  %v3655_v59 = vpop.f32.mrf.mxu1 }
 0x3c5   : > { %8215 = vmatmul.msk.f32.gmra.mxu2 %vm285_vm1, %v8149_v37  ;;  %8280 = vmatmul.msk.f32.gmra.mxu3 %vm285_vm1, %v8149_v37  ;;  %v8345_v37 = vld [vmem:[%s9358_s19 + $0x6a0] sm:$0xff] }
 0x3c7   : > { %8410 = vmatmul.msk.f32.gmra.mxu0 %vm285_vm1, %v8344_v36  ;;  %8475 = vmatmul.msk.f32.gmra.mxu1 %vm285_vm1, %v8344_v36 }
 0x3c8   : > { %v2633_v61 = vpop.f32.mrf.mxu2  ;;  %v2842_v63 = vpop.f32.mrf.mxu3 }
 0x3c9   : > { %v3028_v46 = vadd.f32 %v2633_v61, %v10006_v3  ;;  %v3029_v53 = vadd.f32 %v2842_v63, %v10008_v12 }
 0x3cb   : > { %v10784_v55 = vadd.f32 %v3446_v26, %v3028_v46  ;;  %v10786_v45 = vadd.f32 %v3655_v59, %v3029_v53  ;;  %v8151_v59 = vld [vmem:[%s9358_s19 + $0x7e0] sm:$0xff] }
 0x3cc   : > { %v3449_v0 = vpop.f32.mrf.mxu0  ;;  %v3658_v57 = vpop.f32.mrf.mxu1 }
 0x3cd   : > { %8216 = vmatmul.msk.f32.gmra.mxu2 %vm285_vm1, %v8150_v17  ;;  %8281 = vmatmul.msk.f32.gmra.mxu3 %vm285_vm1, %v8150_v17  ;;  %v8346_v17 = vld [vmem:[%s9358_s19 + $0x870] sm:$0xff] }
 0x3cf   : > { %8411 = vmatmul.msk.f32.gmra.mxu0 %vm285_vm1, %v8345_v37  ;;  %8476 = vmatmul.msk.f32.gmra.mxu1 %vm285_vm1, %v8345_v37 }
 0x3d0   : > { %v2636_v3 = vpop.f32.mrf.mxu2  ;;  %v2845_v36 = vpop.f32.mrf.mxu3 }
 0x3d1   : > { %v3030_v12 = vadd.f32 %v2636_v3, %v10018_v9  ;;  %v3031_v26 = vadd.f32 %v2845_v36, %v10020_v58 }
 0x3d3   : > { %v10796_v61 = vadd.f32 %v3449_v0, %v3030_v12  ;;  %v10798_v63 = vadd.f32 %v3658_v57, %v3031_v26  ;;  %v8152_v57 = vld [vmem:[%s9358_s19 + $0x7f0] sm:$0xff] }
 0x3d4   : > { %v3452_v46 = vpop.f32.mrf.mxu0  ;;  %v3661_v53 = vpop.f32.mrf.mxu1 }
 0x3d5   : > { %8217 = vmatmul.msk.f32.gmra.mxu2 %vm285_vm1, %v8151_v59  ;;  %8282 = vmatmul.msk.f32.gmra.mxu3 %vm285_vm1, %v8151_v59  ;;  %v8347_v59 = vld [vmem:[%s9358_s19 + $0x880] sm:$0xff] }
 0x3d7   : > { %8412 = vmatmul.msk.f32.gmra.mxu0 %vm285_vm1, %v8346_v17  ;;  %8477 = vmatmul.msk.f32.gmra.mxu1 %vm285_vm1, %v8346_v17 }
 0x3d8   : > { %v2639_v9 = vpop.f32.mrf.mxu2  ;;  %v2848_v37 = vpop.f32.mrf.mxu3 }
 0x3d9   : > { %v3032_v58 = vadd.f32 %v2639_v9, %v10030_v15  ;;  %v3033_v0 = vadd.f32 %v2848_v37, %v10032_v52 }
 0x3db   : > { %v10808_v3 = vadd.f32 %v3452_v46, %v3032_v58  ;;  %v10810_v36 = vadd.f32 %v3661_v53, %v3033_v0  ;;  %v8153_v53 = vld [vmem:[%s9358_s19 + $0x800] sm:$0xff] }
 0x3dc   : > { %v3455_v12 = vpop.f32.mrf.mxu0  ;;  %v3664_v26 = vpop.f32.mrf.mxu1 }
 0x3dd   : > { %8218 = vmatmul.msk.f32.gmra.mxu2 %vm285_vm1, %v8152_v57  ;;  %8283 = vmatmul.msk.f32.gmra.mxu3 %vm285_vm1, %v8152_v57  ;;  %v8348_v57 = vld [vmem:[%s9358_s19 + $0x890] sm:$0xff] }
 0x3df   : > { %8413 = vmatmul.msk.f32.gmra.mxu0 %vm285_vm1, %v8347_v59  ;;  %8478 = vmatmul.msk.f32.gmra.mxu1 %vm285_vm1, %v8347_v59 }
 0x3e0   : > { %v2642_v15 = vpop.f32.mrf.mxu2  ;;  %v2851_v17 = vpop.f32.mrf.mxu3 }
 0x3e1   : > { %v3034_v52 = vadd.f32 %v2642_v15, %v10042_v21  ;;  %v3035_v46 = vadd.f32 %v2851_v17, %v10044_v1 }
 0x3e3   : > { %v10820_v9 = vadd.f32 %v3455_v12, %v3034_v52  ;;  %v10822_v37 = vadd.f32 %v3664_v26, %v3035_v46  ;;  %v8154_v26 = vld [vmem:[%s9358_s19 + $0x810] sm:$0xff] }
 0x3e4   : > { %v3458_v58 = vpop.f32.mrf.mxu0  ;;  %v3667_v0 = vpop.f32.mrf.mxu1 }
 0x3e5   : > { %8219 = vmatmul.msk.f32.gmra.mxu2 %vm285_vm1, %v8153_v53  ;;  %8284 = vmatmul.msk.f32.gmra.mxu3 %vm285_vm1, %v8153_v53  ;;  %v8349_v53 = vld [vmem:[%s9358_s19 + $0x8a0] sm:$0xff] }
 0x3e7   : > { %8414 = vmatmul.msk.f32.gmra.mxu0 %vm285_vm1, %v8348_v57  ;;  %8479 = vmatmul.msk.f32.gmra.mxu1 %vm285_vm1, %v8348_v57 }
 0x3e8   : > { %v2645_v21 = vpop.f32.mrf.mxu2  ;;  %v2854_v59 = vpop.f32.mrf.mxu3 }
 0x3e9   : > { %v3036_v1 = vadd.f32 %v2645_v21, %v10054_v27  ;;  %v3037_v12 = vadd.f32 %v2854_v59, %v10056_v38 }
 0x3eb   : > { %v10832_v15 = vadd.f32 %v3458_v58, %v3036_v1  ;;  %v10834_v17 = vadd.f32 %v3667_v0, %v3037_v12  ;;  %v8155_v0 = vld [vmem:[%s9358_s19 + $0x820] sm:$0xff] }
 0x3ec   : > { %v3461_v52 = vpop.f32.mrf.mxu0  ;;  %v3670_v46 = vpop.f32.mrf.mxu1 }
 0x3ed   : > { %8220 = vmatmul.msk.f32.gmra.mxu2 %vm285_vm1, %v8154_v26  ;;  %8285 = vmatmul.msk.f32.gmra.mxu3 %vm285_vm1, %v8154_v26  ;;  %v8350_v26 = vld [vmem:[%s9358_s19 + $0x8b0] sm:$0xff] }
 0x3ef   : > { %8415 = vmatmul.msk.f32.gmra.mxu0 %vm285_vm1, %v8349_v53  ;;  %8480 = vmatmul.msk.f32.gmra.mxu1 %vm285_vm1, %v8349_v53 }
 0x3f0   : > { %v2648_v27 = vpop.f32.mrf.mxu2  ;;  %v2857_v57 = vpop.f32.mrf.mxu3 }
 0x3f1   : > { %v3038_v38 = vadd.f32 %v2648_v27, %v10066_v33  ;;  %v3039_v58 = vadd.f32 %v2857_v57, %v10068_v44 }
 0x3f3   : > { %v10844_v21 = vadd.f32 %v3461_v52, %v3038_v38  ;;  %v10846_v59 = vadd.f32 %v3670_v46, %v3039_v58  ;;  %v8156_v46 = vld [vmem:[%s9358_s19 + $0x830] sm:$0xff] }
 0x3f4   : > { %v3464_v1 = vpop.f32.mrf.mxu0  ;;  %v3673_v12 = vpop.f32.mrf.mxu1 }
 0x3f5   : > { %8221 = vmatmul.msk.f32.gmra.mxu2 %vm285_vm1, %v8155_v0  ;;  %8286 = vmatmul.msk.f32.gmra.mxu3 %vm285_vm1, %v8155_v0  ;;  %v8351_v0 = vld [vmem:[%s9358_s19 + $0x8c0] sm:$0xff] }
 0x3f7   : > { %8416 = vmatmul.msk.f32.gmra.mxu0 %vm285_vm1, %v8350_v26  ;;  %8481 = vmatmul.msk.f32.gmra.mxu1 %vm285_vm1, %v8350_v26 }
 0x3f8   : > { %v2651_v33 = vpop.f32.mrf.mxu2  ;;  %v2860_v53 = vpop.f32.mrf.mxu3 }
 0x3f9   : > { %v3040_v44 = vadd.f32 %v2651_v33, %v10078_v39  ;;  %v3041_v52 = vadd.f32 %v2860_v53, %v10080_v50 }
 0x3fb   : > { %v10856_v27 = vadd.f32 %v3464_v1, %v3040_v44  ;;  %v10858_v57 = vadd.f32 %v3673_v12, %v3041_v52  ;;  %v8157_v12 = vld [vmem:[%s9358_s19 + $0x840] sm:$0xff] }
 0x3fc   : > { %v3467_v38 = vpop.f32.mrf.mxu0  ;;  %v3676_v58 = vpop.f32.mrf.mxu1 }
 0x3fd   : > { %8222 = vmatmul.msk.f32.gmra.mxu2 %vm285_vm1, %v8156_v46  ;;  %8287 = vmatmul.msk.f32.gmra.mxu3 %vm285_vm1, %v8156_v46  ;;  %v8352_v46 = vld [vmem:[%s9358_s19 + $0x8d0] sm:$0xff] }
 0x3ff   : > { %8417 = vmatmul.msk.f32.gmra.mxu0 %vm285_vm1, %v8351_v0  ;;  %8482 = vmatmul.msk.f32.gmra.mxu1 %vm285_vm1, %v8351_v0 }
 0x400   : > { %v2654_v39 = vpop.f32.mrf.mxu2  ;;  %v2863_v26 = vpop.f32.mrf.mxu3 }
 0x401   : > { %v3042_v50 = vadd.f32 %v2654_v39, %v10090_v51  ;;  %v3043_v1 = vadd.f32 %v2863_v26, %v10092_v56 }
 0x403   : > { %v10868_v33 = vadd.f32 %v3467_v38, %v3042_v50  ;;  %v10870_v53 = vadd.f32 %v3676_v58, %v3043_v1  ;;  %v8158_v58 = vld [vmem:[%s9358_s19 + $0x850] sm:$0xff] }
 0x404   : > { %v3470_v44 = vpop.f32.mrf.mxu0  ;;  %v3679_v52 = vpop.f32.mrf.mxu1 }
 0x405   : > { %8223 = vmatmul.msk.f32.gmra.mxu2 %vm285_vm1, %v8157_v12  ;;  %8288 = vmatmul.msk.f32.gmra.mxu3 %vm285_vm1, %v8157_v12  ;;  %v8353_v12 = vld [vmem:[%s9358_s19 + $0x8e0] sm:$0xff] }
 0x407   : > { %8418 = vmatmul.msk.f32.gmra.mxu0 %vm285_vm1, %v8352_v46  ;;  %8483 = vmatmul.msk.f32.gmra.mxu1 %vm285_vm1, %v8352_v46 }
 0x408   : > { %v2657_v51 = vpop.f32.mrf.mxu2  ;;  %v2866_v0 = vpop.f32.mrf.mxu3 }
 0x409   : > { %v3044_v56 = vadd.f32 %v2657_v51, %v10102_v5  ;;  %v3045_v38 = vadd.f32 %v2866_v0, %v10104_v62 }
 0x40b   : > { %v10880_v39 = vadd.f32 %v3470_v44, %v3044_v56  ;;  %v10882_v26 = vadd.f32 %v3679_v52, %v3045_v38  ;;  %v8159_v52 = vld [vmem:[%s9358_s19 + $0xa20] sm:$0xff] }
 0x40c   : > { %v3473_v50 = vpop.f32.mrf.mxu0  ;;  %v3682_v1 = vpop.f32.mrf.mxu1 }
 0x40d   : > { %8224 = vmatmul.msk.f32.gmra.mxu2 %vm285_vm1, %v8158_v58  ;;  %8289 = vmatmul.msk.f32.gmra.mxu3 %vm285_vm1, %v8158_v58  ;;  %v8354_v58 = vld [vmem:[%s9358_s19 + $0xab0] sm:$0xff] }
 0x40f   : > { %8419 = vmatmul.msk.f32.gmra.mxu0 %vm285_vm1, %v8353_v12  ;;  %8484 = vmatmul.msk.f32.gmra.mxu1 %vm285_vm1, %v8353_v12 }
 0x410   : > { %v2660_v5 = vpop.f32.mrf.mxu2  ;;  %v2869_v46 = vpop.f32.mrf.mxu3 }
 0x411   : > { %v3046_v62 = vadd.f32 %v2660_v5, %v10114_v32  ;;  %v3047_v44 = vadd.f32 %v2869_v46, %v10116_v4 }
 0x413   : > { %v10892_v51 = vadd.f32 %v3473_v50, %v3046_v62  ;;  %v10894_v0 = vadd.f32 %v3682_v1, %v3047_v44  ;;  %v8160_v1 = vld [vmem:[%s9358_s19 + $0xa30] sm:$0xff] }
 0x414   : > { %v3476_v56 = vpop.f32.mrf.mxu0  ;;  %v3685_v38 = vpop.f32.mrf.mxu1 }
 0x415   : > { %8225 = vmatmul.msk.f32.gmra.mxu2 %vm285_vm1, %v8159_v52  ;;  %8290 = vmatmul.msk.f32.gmra.mxu3 %vm285_vm1, %v8159_v52  ;;  %v8355_v52 = vld [vmem:[%s9358_s19 + $0xac0] sm:$0xff] }
 0x417   : > { %8420 = vmatmul.msk.f32.gmra.mxu0 %vm285_vm1, %v8354_v58  ;;  %8485 = vmatmul.msk.f32.gmra.mxu1 %vm285_vm1, %v8354_v58 }
 0x418   : > { %v2663_v32 = vpop.f32.mrf.mxu2  ;;  %v2872_v12 = vpop.f32.mrf.mxu3 }
 0x419   : > { %v3048_v4 = vadd.f32 %v2663_v32, %v10126_v20  ;;  %v3049_v50 = vadd.f32 %v2872_v12, %v10128_v10 }
 0x41b   : > { %v10904_v5 = vadd.f32 %v3476_v56, %v3048_v4  ;;  %v10906_v46 = vadd.f32 %v3685_v38, %v3049_v50  ;;  %v8161_v38 = vld [vmem:[%s9358_s19 + $0xa40] sm:$0xff] }
 0x41c   : > { %v3479_v62 = vpop.f32.mrf.mxu0  ;;  %v3688_v44 = vpop.f32.mrf.mxu1 }
 0x41d   : > { %8226 = vmatmul.msk.f32.gmra.mxu2 %vm285_vm1, %v8160_v1  ;;  %8291 = vmatmul.msk.f32.gmra.mxu3 %vm285_vm1, %v8160_v1  ;;  %v8356_v1 = vld [vmem:[%s9358_s19 + $0xad0] sm:$0xff] }
 0x41f   : > { %8421 = vmatmul.msk.f32.gmra.mxu0 %vm285_vm1, %v8355_v52  ;;  %8486 = vmatmul.msk.f32.gmra.mxu1 %vm285_vm1, %v8355_v52 }
 0x420   : > { %v2666_v20 = vpop.f32.mrf.mxu2  ;;  %v2875_v58 = vpop.f32.mrf.mxu3 }
 0x421   : > { %v3050_v10 = vadd.f32 %v2666_v20, %v10138_v2  ;;  %v3051_v56 = vadd.f32 %v2875_v58, %v10140_v16 }
 0x423   : > { %v10916_v32 = vadd.f32 %v3479_v62, %v3050_v10  ;;  %v10918_v12 = vadd.f32 %v3688_v44, %v3051_v56  ;;  %v8162_v44 = vld [vmem:[%s9358_s19 + $0xa50] sm:$0xff] }
 0x424   : > { %v3482_v4 = vpop.f32.mrf.mxu0  ;;  %v3691_v50 = vpop.f32.mrf.mxu1 }
 0x425   : > { %8227 = vmatmul.msk.f32.gmra.mxu2 %vm285_vm1, %v8161_v38  ;;  %8292 = vmatmul.msk.f32.gmra.mxu3 %vm285_vm1, %v8161_v38  ;;  %v8357_v38 = vld [vmem:[%s9358_s19 + $0xae0] sm:$0xff] }
 0x427   : > { %8422 = vmatmul.msk.f32.gmra.mxu0 %vm285_vm1, %v8356_v1  ;;  %8487 = vmatmul.msk.f32.gmra.mxu1 %vm285_vm1, %v8356_v1 }
 0x428   : > { %v2669_v2 = vpop.f32.mrf.mxu2  ;;  %v2878_v52 = vpop.f32.mrf.mxu3 }
 0x429   : > { %v3052_v16 = vadd.f32 %v2669_v2, %v10150_v29  ;;  %v3053_v62 = vadd.f32 %v2878_v52, %v10152_v22 }
 0x42b   : > { %v10928_v20 = vadd.f32 %v3482_v4, %v3052_v16  ;;  %v10930_v58 = vadd.f32 %v3691_v50, %v3053_v62  ;;  %v8163_v50 = vld [vmem:[%s9358_s19 + $0xa60] sm:$0xff] }
 0x42c   : > { %v3485_v10 = vpop.f32.mrf.mxu0  ;;  %v3694_v56 = vpop.f32.mrf.mxu1 }
 0x42d   : > { %8228 = vmatmul.msk.f32.gmra.mxu2 %vm285_vm1, %v8162_v44  ;;  %8293 = vmatmul.msk.f32.gmra.mxu3 %vm285_vm1, %v8162_v44  ;;  %v8358_v44 = vld [vmem:[%s9358_s19 + $0xaf0] sm:$0xff] }
 0x42f   : > { %8423 = vmatmul.msk.f32.gmra.mxu0 %vm285_vm1, %v8357_v38  ;;  %8488 = vmatmul.msk.f32.gmra.mxu1 %vm285_vm1, %v8357_v38 }
 0x430   : > { %v2672_v29 = vpop.f32.mrf.mxu2  ;;  %v2881_v1 = vpop.f32.mrf.mxu3 }
 0x431   : > { %v3054_v22 = vadd.f32 %v2672_v29, %v10162_v11  ;;  %v3055_v4 = vadd.f32 %v2881_v1, %v10164_v28 }
 0x433   : > { %v10940_v2 = vadd.f32 %v3485_v10, %v3054_v22  ;;  %v10942_v52 = vadd.f32 %v3694_v56, %v3055_v4  ;;  %v8164_v56 = vld [vmem:[%s9358_s19 + $0xa70] sm:$0xff] }
 0x434   : > { %v3488_v16 = vpop.f32.mrf.mxu0  ;;  %v3697_v62 = vpop.f32.mrf.mxu1 }
 0x435   : > { %8229 = vmatmul.msk.f32.gmra.mxu2 %vm285_vm1, %v8163_v50  ;;  %8294 = vmatmul.msk.f32.gmra.mxu3 %vm285_vm1, %v8163_v50  ;;  %v8359_v50 = vld [vmem:[%s9358_s19 + $0xb00] sm:$0xff] }
 0x437   : > { %8424 = vmatmul.msk.f32.gmra.mxu0 %vm285_vm1, %v8358_v44  ;;  %8489 = vmatmul.msk.f32.gmra.mxu1 %vm285_vm1, %v8358_v44 }
 0x438   : > { %v2675_v11 = vpop.f32.mrf.mxu2  ;;  %v2884_v38 = vpop.f32.mrf.mxu3 }
 0x439   : > { %v3056_v28 = vadd.f32 %v2675_v11, %v10174_v41  ;;  %v3057_v10 = vadd.f32 %v2884_v38, %v10176_v34 }
 0x43b   : > { %v10952_v29 = vadd.f32 %v3488_v16, %v3056_v28  ;;  %v10954_v1 = vadd.f32 %v3697_v62, %v3057_v10  ;;  %v8165_v62 = vld [vmem:[%s9358_s19 + $0xa80] sm:$0xff] }
 0x43c   : > { %v3491_v22 = vpop.f32.mrf.mxu0  ;;  %v3700_v4 = vpop.f32.mrf.mxu1 }
 0x43d   : > { %8230 = vmatmul.msk.f32.gmra.mxu2 %vm285_vm1, %v8164_v56  ;;  %8295 = vmatmul.msk.f32.gmra.mxu3 %vm285_vm1, %v8164_v56  ;;  %v8360_v56 = vld [vmem:[%s9358_s19 + $0xb10] sm:$0xff] }
 0x43f   : > { %8425 = vmatmul.msk.f32.gmra.mxu0 %vm285_vm1, %v8359_v50  ;;  %8490 = vmatmul.msk.f32.gmra.mxu1 %vm285_vm1, %v8359_v50 }
 0x440   : > { %v2678_v41 = vpop.f32.mrf.mxu2  ;;  %v2887_v44 = vpop.f32.mrf.mxu3 }
 0x441   : > { %v3058_v34 = vadd.f32 %v2678_v41, %v10186_v14  ;;  %v3059_v16 = vadd.f32 %v2887_v44, %v10188_v40 }
 0x443   : > { %v10964_v11 = vadd.f32 %v3491_v22, %v3058_v34  ;;  %v10966_v38 = vadd.f32 %v3700_v4, %v3059_v16  ;;  %v8166_v4 = vld [vmem:[%s9358_s19 + $0xa90] sm:$0xff] }
 0x444   : > { %v3494_v28 = vpop.f32.mrf.mxu0  ;;  %v3703_v10 = vpop.f32.mrf.mxu1 }
 0x445   : > { %12976 = vst [vmem:[#allocation73_spill] sm:$0xff] %v10966_v38  ;;  %8231 = vmatmul.msk.f32.gmra.mxu2 %vm285_vm1, %v8165_v62  ;;  %8296 = vmatmul.msk.f32.gmra.mxu3 %vm285_vm1, %v8165_v62  ;;  %v8361_v62 = vld [vmem:[%s9358_s19 + $0xb20] sm:$0xff]  ;;  %v8384_v38 = vld [vmem:[%s9358_s19 + $0x11d0] sm:$0xff] }
 0x447   : > { %8426 = vmatmul.msk.f32.gmra.mxu0 %vm285_vm1, %v8360_v56  ;;  %8491 = vmatmul.msk.f32.gmra.mxu1 %vm285_vm1, %v8360_v56 }
 0x448   : > { %v2681_v14 = vpop.f32.mrf.mxu2  ;;  %v2890_v50 = vpop.f32.mrf.mxu3 }
 0x449   : > { %v3060_v40 = vadd.f32 %v2681_v14, %v10198_v60  ;;  %v3061_v22 = vadd.f32 %v2890_v50, %v10200_v54  ;;  %v8167_v14 = vld [vmem:[%s9358_s19 + $0xc60] sm:$0xff] }
 0x44b   : > { %v10976_v41 = vadd.f32 %v3494_v28, %v3060_v40  ;;  %v10978_v44 = vadd.f32 %v3703_v10, %v3061_v22  ;;  %v12979_v28 = vld [vmem:[#allocation79_spill] sm:$0xff] }
 0x44c   : > { %v3497_v34 = vpop.f32.mrf.mxu0  ;;  %v3706_v16 = vpop.f32.mrf.mxu1 }
 0x44d   : > { %12977 = vst [vmem:[#allocation74_spill] sm:$0xff] %v10976_v41  ;;  %8232 = vmatmul.msk.f32.gmra.mxu2 %vm285_vm1, %v8166_v4  ;;  %8297 = vmatmul.msk.f32.gmra.mxu3 %vm285_vm1, %v8166_v4  ;;  %v8362_v4 = vld [vmem:[%s9358_s19 + $0xcf0] sm:$0xff]  ;;  %v8383_v41 = vld [vmem:[%s9358_s19 + $0x11c0] sm:$0xff] }
 0x44e   : > { %12978 = vst [vmem:[#allocation77_spill] sm:$0xff] %v10978_v44 }
 0x44f   : > { %8427 = vmatmul.msk.f32.gmra.mxu0 %vm285_vm1, %v8361_v62  ;;  %8492 = vmatmul.msk.f32.gmra.mxu1 %vm285_vm1, %v8361_v62 }
 0x450   : > { %v2684_v60 = vpop.f32.mrf.mxu2  ;;  %v2893_v56 = vpop.f32.mrf.mxu3 }
 0x451   : > { %v3062_v54 = vadd.f32 %v2684_v60, %v10210_v42  ;;  %v3063_v10 = vadd.f32 %v2893_v56, %v12979_v28  ;;  %v12982_v60 = vld [vmem:[#allocation80_spill] sm:$0xff] }
 0x453   : > { %v10988_v50 = vadd.f32 %v3497_v34, %v3062_v54  ;;  %v10990_v40 = vadd.f32 %v3706_v16, %v3063_v10  ;;  %v12983_v34 = vld [vmem:[#allocation81_spill] sm:$0xff]  ;;  %v8168_v54 = vld [vmem:[%s9358_s19 + $0xc70] sm:$0xff] }
 0x454   : > { %v3500_v22 = vpop.f32.mrf.mxu0  ;;  %v3709_v44 = vpop.f32.mrf.mxu1 }
 0x455   : > { %12980 = vst [vmem:[#allocation78_spill] sm:$0xff] %v10988_v50  ;;  %8233 = vmatmul.msk.f32.gmra.mxu2 %vm285_vm1, %v8167_v14  ;;  %8298 = vmatmul.msk.f32.gmra.mxu3 %vm285_vm1, %v8167_v14  ;;  %v8363_v14 = vld [vmem:[%s9358_s19 + $0xd00] sm:$0xff] }
 0x456   : > { %12981 = vst [vmem:[#allocation79_spill] sm:$0xff] %v10990_v40 }
 0x457   : > { %8428 = vmatmul.msk.f32.gmra.mxu0 %vm285_vm1, %v8362_v4  ;;  %8493 = vmatmul.msk.f32.gmra.mxu1 %vm285_vm1, %v8362_v4 }
 0x458   : > { %v2687_v42 = vpop.f32.mrf.mxu2  ;;  %v2896_v62 = vpop.f32.mrf.mxu3 }
 0x459   : > { %v3064_v56 = vadd.f32 %v2687_v42, %v12982_v60  ;;  %v3065_v16 = vadd.f32 %v2896_v62, %v12983_v34  ;;  %v12986_v62 = vld [vmem:[#allocation52_spill] sm:$0xff] }
 0x45b   : > { %v11000_v28 = vadd.f32 %v3500_v22, %v3064_v56  ;;  %v11002_v10 = vadd.f32 %v3709_v44, %v3065_v16  ;;  %v12987_v22 = vld [vmem:[#allocation82_spill] sm:$0xff]  ;;  %v8169_v56 = vld [vmem:[%s9358_s19 + $0xc80] sm:$0xff] }
 0x45c   : > { %v3503_v40 = vpop.f32.mrf.mxu0  ;;  %v3712_v50 = vpop.f32.mrf.mxu1 }
 0x45d   : > { %12984 = vst [vmem:[#allocation80_spill] sm:$0xff] %v11000_v28  ;;  %8234 = vmatmul.msk.f32.gmra.mxu2 %vm285_vm1, %v8168_v54  ;;  %8299 = vmatmul.msk.f32.gmra.mxu3 %vm285_vm1, %v8168_v54  ;;  %v8364_v54 = vld [vmem:[%s9358_s19 + $0xd10] sm:$0xff] }
 0x45e   : > { %12985 = vst [vmem:[#allocation81_spill] sm:$0xff] %v11002_v10 }
 0x45f   : > { %8429 = vmatmul.msk.f32.gmra.mxu0 %vm285_vm1, %v8363_v14  ;;  %8494 = vmatmul.msk.f32.gmra.mxu1 %vm285_vm1, %v8363_v14 }
 0x460   : > { %v2690_v4 = vpop.f32.mrf.mxu2  ;;  %v2899_v42 = vpop.f32.mrf.mxu3 }
 0x461   : > { %v3066_v60 = vadd.f32 %v2690_v4, %v12986_v62  ;;  %v3067_v44 = vadd.f32 %v2899_v42, %v12987_v22  ;;  %v12990_v42 = vld [vmem:[#allocation55_spill] sm:$0xff] }
 0x463   : > { %v11012_v34 = vadd.f32 %v3503_v40, %v3066_v60  ;;  %v11014_v16 = vadd.f32 %v3712_v50, %v3067_v44  ;;  %v12991_v40 = vld [vmem:[#allocation56_spill] sm:$0xff]  ;;  %v8170_v60 = vld [vmem:[%s9358_s19 + $0xc90] sm:$0xff] }
 0x464   : > { %v3506_v10 = vpop.f32.mrf.mxu0  ;;  %v3715_v28 = vpop.f32.mrf.mxu1 }
 0x465   : > { %12988 = vst [vmem:[#allocation52_spill] sm:$0xff] %v11012_v34  ;;  %8235 = vmatmul.msk.f32.gmra.mxu2 %vm285_vm1, %v8169_v56  ;;  %8300 = vmatmul.msk.f32.gmra.mxu3 %vm285_vm1, %v8169_v56  ;;  %v8365_v56 = vld [vmem:[%s9358_s19 + $0xd20] sm:$0xff] }
 0x466   : > { %12989 = vst [vmem:[#allocation82_spill] sm:$0xff] %v11014_v16 }
 0x467   : > { %8430 = vmatmul.msk.f32.gmra.mxu0 %vm285_vm1, %v8364_v54  ;;  %8495 = vmatmul.msk.f32.gmra.mxu1 %vm285_vm1, %v8364_v54 }
 0x468   : > { %v2693_v14 = vpop.f32.mrf.mxu2  ;;  %v2902_v4 = vpop.f32.mrf.mxu3 }
 0x469   : > { %v3068_v62 = vadd.f32 %v2693_v14, %v12990_v42  ;;  %v3069_v50 = vadd.f32 %v2902_v4, %v12991_v40  ;;  %v12994_v4 = vld [vmem:[#allocation59_spill] sm:$0xff] }
 0x46b   : > { %v11024_v22 = vadd.f32 %v3506_v10, %v3068_v62  ;;  %v11026_v44 = vadd.f32 %v3715_v28, %v3069_v50  ;;  %v12995_v10 = vld [vmem:[#allocation60_spill] sm:$0xff]  ;;  %v8171_v62 = vld [vmem:[%s9358_s19 + $0xca0] sm:$0xff] }
 0x46c   : > { %v3509_v16 = vpop.f32.mrf.mxu0  ;;  %v3718_v34 = vpop.f32.mrf.mxu1 }
 0x46d   : > { %12992 = vst [vmem:[#allocation55_spill] sm:$0xff] %v11024_v22  ;;  %8236 = vmatmul.msk.f32.gmra.mxu2 %vm285_vm1, %v8170_v60  ;;  %8301 = vmatmul.msk.f32.gmra.mxu3 %vm285_vm1, %v8170_v60  ;;  %v8366_v60 = vld [vmem:[%s9358_s19 + $0xd30] sm:$0xff] }
 0x46e   : > { %12993 = vst [vmem:[#allocation56_spill] sm:$0xff] %v11026_v44 }
 0x46f   : > { %8431 = vmatmul.msk.f32.gmra.mxu0 %vm285_vm1, %v8365_v56  ;;  %8496 = vmatmul.msk.f32.gmra.mxu1 %vm285_vm1, %v8365_v56 }
 0x470   : > { %v2696_v54 = vpop.f32.mrf.mxu2  ;;  %v2905_v14 = vpop.f32.mrf.mxu3 }
 0x471   : > { %v3070_v42 = vadd.f32 %v2696_v54, %v12994_v4  ;;  %v3071_v28 = vadd.f32 %v2905_v14, %v12995_v10  ;;  %v12998_v14 = vld [vmem:[#allocation63_spill] sm:$0xff] }
 0x473   : > { %v11036_v40 = vadd.f32 %v3509_v16, %v3070_v42  ;;  %v11038_v50 = vadd.f32 %v3718_v34, %v3071_v28  ;;  %v12999_v16 = vld [vmem:[#allocation64_spill] sm:$0xff]  ;;  %v8172_v42 = vld [vmem:[%s9358_s19 + $0xcb0] sm:$0xff] }
 0x474   : > { %v3512_v44 = vpop.f32.mrf.mxu0  ;;  %v3721_v22 = vpop.f32.mrf.mxu1 }
 0x475   : > { %12996 = vst [vmem:[#allocation59_spill] sm:$0xff] %v11036_v40  ;;  %8237 = vmatmul.msk.f32.gmra.mxu2 %vm285_vm1, %v8171_v62  ;;  %8302 = vmatmul.msk.f32.gmra.mxu3 %vm285_vm1, %v8171_v62  ;;  %v8367_v62 = vld [vmem:[%s9358_s19 + $0xd40] sm:$0xff] }
 0x476   : > { %12997 = vst [vmem:[#allocation60_spill] sm:$0xff] %v11038_v50 }
 0x477   : > { %8432 = vmatmul.msk.f32.gmra.mxu0 %vm285_vm1, %v8366_v60  ;;  %8497 = vmatmul.msk.f32.gmra.mxu1 %vm285_vm1, %v8366_v60 }
 0x478   : > { %v2699_v56 = vpop.f32.mrf.mxu2  ;;  %v2908_v54 = vpop.f32.mrf.mxu3 }
 0x479   : > { %v3072_v4 = vadd.f32 %v2699_v56, %v12998_v14  ;;  %v3073_v34 = vadd.f32 %v2908_v54, %v12999_v16  ;;  %v13002_v54 = vld [vmem:[#allocation67_spill] sm:$0xff] }
 0x47b   : > { %v11048_v10 = vadd.f32 %v3512_v44, %v3072_v4  ;;  %v11050_v28 = vadd.f32 %v3721_v22, %v3073_v34  ;;  %v13003_v44 = vld [vmem:[#allocation68_spill] sm:$0xff]  ;;  %v8173_v4 = vld [vmem:[%s9358_s19 + $0xcc0] sm:$0xff] }
 0x47c   : > { %v3515_v50 = vpop.f32.mrf.mxu0  ;;  %v3724_v40 = vpop.f32.mrf.mxu1 }
 0x47d   : > { %13000 = vst [vmem:[#allocation63_spill] sm:$0xff] %v11048_v10  ;;  %8238 = vmatmul.msk.f32.gmra.mxu2 %vm285_vm1, %v8172_v42  ;;  %8303 = vmatmul.msk.f32.gmra.mxu3 %vm285_vm1, %v8172_v42  ;;  %v8368_v42 = vld [vmem:[%s9358_s19 + $0xd50] sm:$0xff] }
 0x47e   : > { %13001 = vst [vmem:[#allocation64_spill] sm:$0xff] %v11050_v28 }
 0x47f   : > { %8433 = vmatmul.msk.f32.gmra.mxu0 %vm285_vm1, %v8367_v62  ;;  %8498 = vmatmul.msk.f32.gmra.mxu1 %vm285_vm1, %v8367_v62 }
 0x480   : > { %v2702_v60 = vpop.f32.mrf.mxu2  ;;  %v2911_v56 = vpop.f32.mrf.mxu3 }
 0x481   : > { %v3074_v14 = vadd.f32 %v2702_v60, %v13002_v54  ;;  %v3075_v22 = vadd.f32 %v2911_v56, %v13003_v44  ;;  %v13006_v56 = vld [vmem:[#allocation71_spill] sm:$0xff] }
 0x483   : > { %v11060_v16 = vadd.f32 %v3515_v50, %v3074_v14  ;;  %v11062_v34 = vadd.f32 %v3724_v40, %v3075_v22  ;;  %v13007_v50 = vld [vmem:[#allocation72_spill] sm:$0xff]  ;;  %v8174_v14 = vld [vmem:[%s9358_s19 + $0xcd0] sm:$0xff] }
 0x484   : > { %v3518_v28 = vpop.f32.mrf.mxu0  ;;  %v3727_v10 = vpop.f32.mrf.mxu1 }
 0x485   : > { %13004 = vst [vmem:[#allocation67_spill] sm:$0xff] %v11060_v16  ;;  %8239 = vmatmul.msk.f32.gmra.mxu2 %vm285_vm1, %v8173_v4  ;;  %8304 = vmatmul.msk.f32.gmra.mxu3 %vm285_vm1, %v8173_v4  ;;  %v8369_v4 = vld [vmem:[%s9358_s19 + $0xd60] sm:$0xff] }
 0x486   : > { %13005 = vst [vmem:[#allocation68_spill] sm:$0xff] %v11062_v34 }
 0x487   : > { %8434 = vmatmul.msk.f32.gmra.mxu0 %vm285_vm1, %v8368_v42  ;;  %8499 = vmatmul.msk.f32.gmra.mxu1 %vm285_vm1, %v8368_v42 }
 0x488   : > { %v2705_v62 = vpop.f32.mrf.mxu2  ;;  %v2914_v60 = vpop.f32.mrf.mxu3 }
 0x489   : > { %v3076_v54 = vadd.f32 %v2705_v62, %v13006_v56  ;;  %v3077_v40 = vadd.f32 %v2914_v60, %v13007_v50  ;;  %v13010_v60 = vld [vmem:[#allocation75_spill] sm:$0xff] }
 0x48b   : > { %v11072_v44 = vadd.f32 %v3518_v28, %v3076_v54  ;;  %v11074_v22 = vadd.f32 %v3727_v10, %v3077_v40  ;;  %v13011_v28 = vld [vmem:[#allocation76_spill] sm:$0xff]  ;;  %v8175_v54 = vld [vmem:[%s9358_s19 + $0xea0] sm:$0xff] }
 0x48c   : > { %v3521_v34 = vpop.f32.mrf.mxu0  ;;  %v3730_v16 = vpop.f32.mrf.mxu1 }
 0x48d   : > { %13008 = vst [vmem:[#allocation71_spill] sm:$0xff] %v11072_v44  ;;  %8240 = vmatmul.msk.f32.gmra.mxu2 %vm285_vm1, %v8174_v14  ;;  %8305 = vmatmul.msk.f32.gmra.mxu3 %vm285_vm1, %v8174_v14  ;;  %v8370_v14 = vld [vmem:[%s9358_s19 + $0xf30] sm:$0xff] }
 0x48e   : > { %13009 = vst [vmem:[#allocation72_spill] sm:$0xff] %v11074_v22 }
 0x48f   : > { %8435 = vmatmul.msk.f32.gmra.mxu0 %vm285_vm1, %v8369_v4  ;;  %8500 = vmatmul.msk.f32.gmra.mxu1 %vm285_vm1, %v8369_v4 }
 0x490   : > { %v2708_v42 = vpop.f32.mrf.mxu2  ;;  %v2917_v62 = vpop.f32.mrf.mxu3 }
 0x491   : > { %v3078_v56 = vadd.f32 %v2708_v42, %v13010_v60  ;;  %v3079_v10 = vadd.f32 %v2917_v62, %v13011_v28  ;;  %v13014_v62 = vld [vmem:[#allocation2_spill] sm:$0xff] }
 0x493   : > { %v11084_v50 = vadd.f32 %v3521_v34, %v3078_v56  ;;  %v11086_v40 = vadd.f32 %v3730_v16, %v3079_v10  ;;  %v13015_v34 = vld [vmem:[#allocation3_spill] sm:$0xff] }
 0x494   : > { %v3524_v22 = vpop.f32.mrf.mxu0  ;;  %v3733_v44 = vpop.f32.mrf.mxu1  ;;  %v8176_v56 = vld [vmem:[%s9358_s19 + $0xeb0] sm:$0xff] }
 0x495   : > { %13012 = vst [vmem:[#allocation75_spill] sm:$0xff] %v11084_v50  ;;  %8241 = vmatmul.msk.f32.gmra.mxu2 %vm285_vm1, %v8175_v54  ;;  %8306 = vmatmul.msk.f32.gmra.mxu3 %vm285_vm1, %v8175_v54  ;;  %v8371_v54 = vld [vmem:[%s9358_s19 + $0xf40] sm:$0xff] }
 0x496   : > { %13013 = vst [vmem:[#allocation76_spill] sm:$0xff] %v11086_v40 }
 0x497   : > { %8436 = vmatmul.msk.f32.gmra.mxu0 %vm285_vm1, %v8370_v14  ;;  %8501 = vmatmul.msk.f32.gmra.mxu1 %vm285_vm1, %v8370_v14 }
 0x498   : > { %v2711_v4 = vpop.f32.mrf.mxu2  ;;  %v2920_v42 = vpop.f32.mrf.mxu3 }
 0x499   : > { %v3080_v60 = vadd.f32 %v2711_v4, %v13014_v62  ;;  %v3081_v16 = vadd.f32 %v2920_v42, %v13015_v34  ;;  %v13018_v42 = vld [vmem:[#allocation4_spill] sm:$0xff] }
 0x49b   : > { %v11096_v28 = vadd.f32 %v3524_v22, %v3080_v60  ;;  %v11098_v10 = vadd.f32 %v3733_v44, %v3081_v16  ;;  %v13019_v22 = vld [vmem:[#allocation5_spill] sm:$0xff] }
 0x49c   : > { %v3527_v40 = vpop.f32.mrf.mxu0  ;;  %v3736_v50 = vpop.f32.mrf.mxu1  ;;  %v8177_v60 = vld [vmem:[%s9358_s19 + $0xec0] sm:$0xff] }
 0x49d   : > { %13016 = vst [vmem:[#allocation2_spill] sm:$0xff] %v11096_v28  ;;  %8242 = vmatmul.msk.f32.gmra.mxu2 %vm285_vm1, %v8176_v56  ;;  %8307 = vmatmul.msk.f32.gmra.mxu3 %vm285_vm1, %v8176_v56  ;;  %v8372_v56 = vld [vmem:[%s9358_s19 + $0xf50] sm:$0xff] }
 0x49e   : > { %13017 = vst [vmem:[#allocation3_spill] sm:$0xff] %v11098_v10 }
 0x49f   : > { %8437 = vmatmul.msk.f32.gmra.mxu0 %vm285_vm1, %v8371_v54  ;;  %8502 = vmatmul.msk.f32.gmra.mxu1 %vm285_vm1, %v8371_v54 }
 0x4a0   : > { %v2714_v14 = vpop.f32.mrf.mxu2  ;;  %v2923_v4 = vpop.f32.mrf.mxu3 }
 0x4a1   : > { %v3082_v62 = vadd.f32 %v2714_v14, %v13018_v42  ;;  %v3083_v44 = vadd.f32 %v2923_v4, %v13019_v22  ;;  %v13022_v4 = vld [vmem:[#allocation6_spill] sm:$0xff] }
 0x4a3   : > { %v11108_v34 = vadd.f32 %v3527_v40, %v3082_v62  ;;  %v11110_v16 = vadd.f32 %v3736_v50, %v3083_v44  ;;  %v13023_v40 = vld [vmem:[#allocation7_spill] sm:$0xff] }
 0x4a4   : > { %v3530_v10 = vpop.f32.mrf.mxu0  ;;  %v3739_v28 = vpop.f32.mrf.mxu1  ;;  %v8178_v62 = vld [vmem:[%s9358_s19 + $0xed0] sm:$0xff] }
 0x4a5   : > { %13020 = vst [vmem:[#allocation4_spill] sm:$0xff] %v11108_v34  ;;  %8243 = vmatmul.msk.f32.gmra.mxu2 %vm285_vm1, %v8177_v60  ;;  %8308 = vmatmul.msk.f32.gmra.mxu3 %vm285_vm1, %v8177_v60  ;;  %v8373_v60 = vld [vmem:[%s9358_s19 + $0xf60] sm:$0xff] }
 0x4a6   : > { %13021 = vst [vmem:[#allocation5_spill] sm:$0xff] %v11110_v16 }
 0x4a7   : > { %8438 = vmatmul.msk.f32.gmra.mxu0 %vm285_vm1, %v8372_v56  ;;  %8503 = vmatmul.msk.f32.gmra.mxu1 %vm285_vm1, %v8372_v56 }
 0x4a8   : > { %v2717_v54 = vpop.f32.mrf.mxu2  ;;  %v2926_v14 = vpop.f32.mrf.mxu3 }
 0x4a9   : > { %v3084_v42 = vadd.f32 %v2717_v54, %v13022_v4  ;;  %v3085_v50 = vadd.f32 %v2926_v14, %v13023_v40  ;;  %v13026_v14 = vld [vmem:[#allocation8_spill] sm:$0xff] }
 0x4ab   : > { %v11120_v22 = vadd.f32 %v3530_v10, %v3084_v42  ;;  %v11122_v44 = vadd.f32 %v3739_v28, %v3085_v50  ;;  %v13027_v10 = vld [vmem:[#allocation9_spill] sm:$0xff] }
 0x4ac   : > { %v3533_v16 = vpop.f32.mrf.mxu0  ;;  %v3742_v34 = vpop.f32.mrf.mxu1  ;;  %v8179_v42 = vld [vmem:[%s9358_s19 + $0xee0] sm:$0xff] }
 0x4ad   : > { %13024 = vst [vmem:[#allocation6_spill] sm:$0xff] %v11120_v22  ;;  %8244 = vmatmul.msk.f32.gmra.mxu2 %vm285_vm1, %v8178_v62  ;;  %8309 = vmatmul.msk.f32.gmra.mxu3 %vm285_vm1, %v8178_v62  ;;  %v8374_v62 = vld [vmem:[%s9358_s19 + $0xf70] sm:$0xff] }
 0x4ae   : > { %13025 = vst [vmem:[#allocation7_spill] sm:$0xff] %v11122_v44 }
 0x4af   : > { %8439 = vmatmul.msk.f32.gmra.mxu0 %vm285_vm1, %v8373_v60  ;;  %8504 = vmatmul.msk.f32.gmra.mxu1 %vm285_vm1, %v8373_v60 }
 0x4b0   : > { %v2720_v56 = vpop.f32.mrf.mxu2  ;;  %v2929_v54 = vpop.f32.mrf.mxu3 }
 0x4b1   : > { %v3086_v4 = vadd.f32 %v2720_v56, %v13026_v14  ;;  %v3087_v28 = vadd.f32 %v2929_v54, %v13027_v10  ;;  %v13030_v54 = vld [vmem:[#allocation10_spill] sm:$0xff] }
 0x4b3   : > { %v11132_v40 = vadd.f32 %v3533_v16, %v3086_v4  ;;  %v11134_v50 = vadd.f32 %v3742_v34, %v3087_v28  ;;  %v13031_v16 = vld [vmem:[#allocation11_spill] sm:$0xff] }
 0x4b4   : > { %v3536_v44 = vpop.f32.mrf.mxu0  ;;  %v3745_v22 = vpop.f32.mrf.mxu1  ;;  %v8180_v4 = vld [vmem:[%s9358_s19 + $0xef0] sm:$0xff] }
 0x4b5   : > { %13028 = vst [vmem:[#allocation8_spill] sm:$0xff] %v11132_v40  ;;  %8245 = vmatmul.msk.f32.gmra.mxu2 %vm285_vm1, %v8179_v42  ;;  %8310 = vmatmul.msk.f32.gmra.mxu3 %vm285_vm1, %v8179_v42  ;;  %v8375_v42 = vld [vmem:[%s9358_s19 + $0xf80] sm:$0xff] }
 0x4b6   : > { %13029 = vst [vmem:[#allocation9_spill] sm:$0xff] %v11134_v50 }
 0x4b7   : > { %8440 = vmatmul.msk.f32.gmra.mxu0 %vm285_vm1, %v8374_v62  ;;  %8505 = vmatmul.msk.f32.gmra.mxu1 %vm285_vm1, %v8374_v62 }
 0x4b8   : > { %v2723_v60 = vpop.f32.mrf.mxu2  ;;  %v2932_v56 = vpop.f32.mrf.mxu3 }
 0x4b9   : > { %v3088_v14 = vadd.f32 %v2723_v60, %v13030_v54  ;;  %v3089_v34 = vadd.f32 %v2932_v56, %v13031_v16  ;;  %v13034_v56 = vld [vmem:[#allocation12_spill] sm:$0xff] }
 0x4bb   : > { %v11144_v10 = vadd.f32 %v3536_v44, %v3088_v14  ;;  %v11146_v28 = vadd.f32 %v3745_v22, %v3089_v34  ;;  %v13035_v44 = vld [vmem:[#allocation13_spill] sm:$0xff] }
 0x4bc   : > { %v3539_v50 = vpop.f32.mrf.mxu0  ;;  %v3748_v40 = vpop.f32.mrf.mxu1  ;;  %v8181_v14 = vld [vmem:[%s9358_s19 + $0xf00] sm:$0xff] }
 0x4bd   : > { %13032 = vst [vmem:[#allocation10_spill] sm:$0xff] %v11144_v10  ;;  %8246 = vmatmul.msk.f32.gmra.mxu2 %vm285_vm1, %v8180_v4  ;;  %8311 = vmatmul.msk.f32.gmra.mxu3 %vm285_vm1, %v8180_v4  ;;  %v8376_v4 = vld [vmem:[%s9358_s19 + $0xf90] sm:$0xff] }
 0x4be   : > { %13033 = vst [vmem:[#allocation11_spill] sm:$0xff] %v11146_v28 }
 0x4bf   : > { %8441 = vmatmul.msk.f32.gmra.mxu0 %vm285_vm1, %v8375_v42  ;;  %8506 = vmatmul.msk.f32.gmra.mxu1 %vm285_vm1, %v8375_v42 }
 0x4c0   : > { %v2726_v62 = vpop.f32.mrf.mxu2  ;;  %v2935_v60 = vpop.f32.mrf.mxu3 }
 0x4c1   : > { %v3090_v54 = vadd.f32 %v2726_v62, %v13034_v56  ;;  %v3091_v22 = vadd.f32 %v2935_v60, %v13035_v44  ;;  %v13038_v60 = vld [vmem:[#allocation14_spill] sm:$0xff] }
 0x4c3   : > { %v11156_v16 = vadd.f32 %v3539_v50, %v3090_v54  ;;  %v11158_v34 = vadd.f32 %v3748_v40, %v3091_v22  ;;  %v13039_v50 = vld [vmem:[#allocation15_spill] sm:$0xff] }
 0x4c4   : > { %v3542_v28 = vpop.f32.mrf.mxu0  ;;  %v3751_v10 = vpop.f32.mrf.mxu1  ;;  %v8182_v54 = vld [vmem:[%s9358_s19 + $0xf10] sm:$0xff] }
 0x4c5   : > { %13036 = vst [vmem:[#allocation12_spill] sm:$0xff] %v11156_v16  ;;  %8247 = vmatmul.msk.f32.gmra.mxu2 %vm285_vm1, %v8181_v14  ;;  %8312 = vmatmul.msk.f32.gmra.mxu3 %vm285_vm1, %v8181_v14  ;;  %v8377_v14 = vld [vmem:[%s9358_s19 + $0xfa0] sm:$0xff] }
 0x4c6   : > { %13037 = vst [vmem:[#allocation13_spill] sm:$0xff] %v11158_v34 }
 0x4c7   : > { %8442 = vmatmul.msk.f32.gmra.mxu0 %vm285_vm1, %v8376_v4  ;;  %8507 = vmatmul.msk.f32.gmra.mxu1 %vm285_vm1, %v8376_v4 }
 0x4c8   : > { %v2729_v42 = vpop.f32.mrf.mxu2  ;;  %v2938_v62 = vpop.f32.mrf.mxu3 }
 0x4c9   : > { %v3092_v56 = vadd.f32 %v2729_v42, %v13038_v60  ;;  %v3093_v40 = vadd.f32 %v2938_v62, %v13039_v50  ;;  %v13042_v62 = vld [vmem:[#allocation16_spill] sm:$0xff] }
 0x4cb   : > { %v11168_v44 = vadd.f32 %v3542_v28, %v3092_v56  ;;  %v11170_v22 = vadd.f32 %v3751_v10, %v3093_v40  ;;  %v13043_v28 = vld [vmem:[#allocation17_spill] sm:$0xff] }
 0x4cc   : > { %v3545_v34 = vpop.f32.mrf.mxu0  ;;  %v3754_v16 = vpop.f32.mrf.mxu1  ;;  %v8183_v56 = vld [vmem:[%s9358_s19 + $0x10e0] sm:$0xff] }
 0x4cd   : > { %13040 = vst [vmem:[#allocation14_spill] sm:$0xff] %v11168_v44  ;;  %8248 = vmatmul.msk.f32.gmra.mxu2 %vm285_vm1, %v8182_v54  ;;  %8313 = vmatmul.msk.f32.gmra.mxu3 %vm285_vm1, %v8182_v54  ;;  %v8378_v54 = vld [vmem:[%s9358_s19 + $0x1170] sm:$0xff] }
 0x4ce   : > { %13041 = vst [vmem:[#allocation15_spill] sm:$0xff] %v11170_v22 }
 0x4cf   : > { %8443 = vmatmul.msk.f32.gmra.mxu0 %vm285_vm1, %v8377_v14  ;;  %8508 = vmatmul.msk.f32.gmra.mxu1 %vm285_vm1, %v8377_v14 }
 0x4d0   : > { %v2732_v4 = vpop.f32.mrf.mxu2  ;;  %v2941_v42 = vpop.f32.mrf.mxu3 }
 0x4d1   : > { %v3094_v60 = vadd.f32 %v2732_v4, %v13042_v62  ;;  %v3095_v10 = vadd.f32 %v2941_v42, %v13043_v28  ;;  %v13046_v42 = vld [vmem:[#allocation18_spill] sm:$0xff] }
 0x4d3   : > { %v11180_v50 = vadd.f32 %v3545_v34, %v3094_v60  ;;  %v11182_v40 = vadd.f32 %v3754_v16, %v3095_v10  ;;  %v13047_v34 = vld [vmem:[#allocation19_spill] sm:$0xff] }
 0x4d4   : > { %v3548_v22 = vpop.f32.mrf.mxu0  ;;  %v3757_v44 = vpop.f32.mrf.mxu1  ;;  %v8184_v60 = vld [vmem:[%s9358_s19 + $0x10f0] sm:$0xff] }
 0x4d5   : > { %13044 = vst [vmem:[#allocation16_spill] sm:$0xff] %v11180_v50  ;;  %8249 = vmatmul.msk.f32.gmra.mxu2 %vm285_vm1, %v8183_v56  ;;  %8314 = vmatmul.msk.f32.gmra.mxu3 %vm285_vm1, %v8183_v56  ;;  %v8379_v56 = vld [vmem:[%s9358_s19 + $0x1180] sm:$0xff] }
 0x4d6   : > { %13045 = vst [vmem:[#allocation17_spill] sm:$0xff] %v11182_v40 }
 0x4d7   : > { %8444 = vmatmul.msk.f32.gmra.mxu0 %vm285_vm1, %v8378_v54  ;;  %8509 = vmatmul.msk.f32.gmra.mxu1 %vm285_vm1, %v8378_v54 }
 0x4d8   : > { %v2735_v14 = vpop.f32.mrf.mxu2  ;;  %v2944_v4 = vpop.f32.mrf.mxu3 }
 0x4d9   : > { %v3096_v62 = vadd.f32 %v2735_v14, %v13046_v42  ;;  %v3097_v16 = vadd.f32 %v2944_v4, %v13047_v34  ;;  %v13050_v4 = vld [vmem:[#allocation20_spill] sm:$0xff] }
 0x4db   : > { %v11192_v28 = vadd.f32 %v3548_v22, %v3096_v62  ;;  %v11194_v10 = vadd.f32 %v3757_v44, %v3097_v16  ;;  %v13051_v22 = vld [vmem:[#allocation21_spill] sm:$0xff] }
 0x4dc   : > { %v3551_v40 = vpop.f32.mrf.mxu0  ;;  %v3760_v50 = vpop.f32.mrf.mxu1  ;;  %v8185_v62 = vld [vmem:[%s9358_s19 + $0x1100] sm:$0xff] }
 0x4dd   : > { %13048 = vst [vmem:[#allocation18_spill] sm:$0xff] %v11192_v28  ;;  %8250 = vmatmul.msk.f32.gmra.mxu2 %vm285_vm1, %v8184_v60  ;;  %8315 = vmatmul.msk.f32.gmra.mxu3 %vm285_vm1, %v8184_v60  ;;  %v8380_v60 = vld [vmem:[%s9358_s19 + $0x1190] sm:$0xff] }
 0x4de   : > { %13049 = vst [vmem:[#allocation19_spill] sm:$0xff] %v11194_v10 }
 0x4df   : > { %8445 = vmatmul.msk.f32.gmra.mxu0 %vm285_vm1, %v8379_v56  ;;  %8510 = vmatmul.msk.f32.gmra.mxu1 %vm285_vm1, %v8379_v56 }
 0x4e0   : > { %v2738_v54 = vpop.f32.mrf.mxu2  ;;  %v2947_v14 = vpop.f32.mrf.mxu3 }
 0x4e1   : > { %v3098_v42 = vadd.f32 %v2738_v54, %v13050_v4  ;;  %v3099_v44 = vadd.f32 %v2947_v14, %v13051_v22  ;;  %v13054_v14 = vld [vmem:[#allocation22_spill] sm:$0xff] }
 0x4e3   : > { %v11204_v34 = vadd.f32 %v3551_v40, %v3098_v42  ;;  %v11206_v16 = vadd.f32 %v3760_v50, %v3099_v44  ;;  %v13055_v40 = vld [vmem:[#allocation23_spill] sm:$0xff] }
 0x4e4   : > { %v3554_v10 = vpop.f32.mrf.mxu0  ;;  %v3763_v28 = vpop.f32.mrf.mxu1  ;;  %v8186_v42 = vld [vmem:[%s9358_s19 + $0x1110] sm:$0xff] }
 0x4e5   : > { %13052 = vst [vmem:[#allocation20_spill] sm:$0xff] %v11204_v34  ;;  %8251 = vmatmul.msk.f32.gmra.mxu2 %vm285_vm1, %v8185_v62  ;;  %8316 = vmatmul.msk.f32.gmra.mxu3 %vm285_vm1, %v8185_v62  ;;  %v8381_v62 = vld [vmem:[%s9358_s19 + $0x11a0] sm:$0xff] }
 0x4e6   : > { %13053 = vst [vmem:[#allocation21_spill] sm:$0xff] %v11206_v16 }
 0x4e7   : > { %8446 = vmatmul.msk.f32.gmra.mxu0 %vm285_vm1, %v8380_v60  ;;  %8511 = vmatmul.msk.f32.gmra.mxu1 %vm285_vm1, %v8380_v60 }
 0x4e8   : > { %v2741_v56 = vpop.f32.mrf.mxu2  ;;  %v2950_v54 = vpop.f32.mrf.mxu3 }
 0x4e9   : > { %v3100_v4 = vadd.f32 %v2741_v56, %v13054_v14  ;;  %v3101_v50 = vadd.f32 %v2950_v54, %v13055_v40  ;;  %v13058_v54 = vld [vmem:[#allocation24_spill] sm:$0xff] }
 0x4eb   : > { %v11216_v22 = vadd.f32 %v3554_v10, %v3100_v4  ;;  %v11218_v44 = vadd.f32 %v3763_v28, %v3101_v50  ;;  %v13059_v10 = vld [vmem:[#allocation25_spill] sm:$0xff] }
 0x4ec   : > { %v3557_v16 = vpop.f32.mrf.mxu0  ;;  %v3766_v34 = vpop.f32.mrf.mxu1  ;;  %v8187_v4 = vld [vmem:[%s9358_s19 + $0x1120] sm:$0xff] }
 0x4ed   : > { %13056 = vst [vmem:[#allocation22_spill] sm:$0xff] %v11216_v22  ;;  %8252 = vmatmul.msk.f32.gmra.mxu2 %vm285_vm1, %v8186_v42  ;;  %8317 = vmatmul.msk.f32.gmra.mxu3 %vm285_vm1, %v8186_v42  ;;  %v8382_v42 = vld [vmem:[%s9358_s19 + $0x11b0] sm:$0xff] }
 0x4ee   : > { %13057 = vst [vmem:[#allocation23_spill] sm:$0xff] %v11218_v44 }
 0x4ef   : > { %8447 = vmatmul.msk.f32.gmra.mxu0 %vm285_vm1, %v8381_v62  ;;  %8512 = vmatmul.msk.f32.gmra.mxu1 %vm285_vm1, %v8381_v62 }
 0x4f0   : > { %v2744_v60 = vpop.f32.mrf.mxu2  ;;  %v2953_v56 = vpop.f32.mrf.mxu3 }
 0x4f1   : > { %v3102_v14 = vadd.f32 %v2744_v60, %v13058_v54  ;;  %v3103_v28 = vadd.f32 %v2953_v56, %v13059_v10  ;;  %v13062_v56 = vld [vmem:[#allocation26_spill] sm:$0xff] }
 0x4f3   : > { %v11228_v40 = vadd.f32 %v3557_v16, %v3102_v14  ;;  %v11230_v50 = vadd.f32 %v3766_v34, %v3103_v28  ;;  %v13063_v16 = vld [vmem:[#allocation27_spill] sm:$0xff] }
 0x4f4   : > { %v3560_v44 = vpop.f32.mrf.mxu0  ;;  %v3769_v22 = vpop.f32.mrf.mxu1  ;;  %v8188_v34 = vld [vmem:[%s9358_s19 + $0x1130] sm:$0xff] }
 0x4f5   : > { %13060 = vst [vmem:[#allocation24_spill] sm:$0xff] %v11228_v40  ;;  %8253 = vmatmul.msk.f32.gmra.mxu2 %vm285_vm1, %v8187_v4  ;;  %8318 = vmatmul.msk.f32.gmra.mxu3 %vm285_vm1, %v8187_v4  ;;  %v8971_v4 = vld [vmem:[%s12743_s1 + $0x38] sm:$0x77] }
 0x4f6   : > { %13061 = vst [vmem:[#allocation25_spill] sm:$0xff] %v11230_v50 }
 0x4f7   : > { %8448 = vmatmul.msk.f32.gmra.mxu0 %vm285_vm1, %v8382_v42  ;;  %8513 = vmatmul.msk.f32.gmra.mxu1 %vm285_vm1, %v8382_v42  ;;  %5650 = vst [vmem:[#allocation1] ss:$2 sm:$0xff] %v8971_v4  ;;  %v13066_v42 = vld [vmem:[#allocation28_spill] sm:$0xff] }
 0x4f8   : > { %v2747_v62 = vpop.f32.mrf.mxu2  ;;  %v2956_v60 = vpop.f32.mrf.mxu3 }
 0x4f9   : > { %v3104_v54 = vadd.f32 %v2747_v62, %v13062_v56  ;;  %v3105_v14 = vadd.f32 %v2956_v60, %v13063_v16  ;;  %v13067_v60 = vld [vmem:[#allocation29_spill] sm:$0xff] }
 0x4fb   : > { %v11240_v10 = vadd.f32 %v3560_v44, %v3104_v54  ;;  %v11242_v28 = vadd.f32 %v3769_v22, %v3105_v14  ;;  %v8189_v54 = vld [vmem:[%s9358_s19 + $0x1140] sm:$0xff] }
 0x4fc   : > { %v3563_v50 = vpop.f32.mrf.mxu0  ;;  %v3772_v40 = vpop.f32.mrf.mxu1 }
 0x4fd   : > { %13064 = vst [vmem:[#allocation26_spill] sm:$0xff] %v11240_v10  ;;  %8254 = vmatmul.msk.f32.gmra.mxu2 %vm285_vm1, %v8188_v34  ;;  %8319 = vmatmul.msk.f32.gmra.mxu3 %vm285_vm1, %v8188_v34 }
 0x4fe   : > { %13065 = vst [vmem:[#allocation27_spill] sm:$0xff] %v11242_v28  ;;  %v5651_v4 = vld.sshfl [vmem:[#allocation1] sm:$0xff pattern:$0x75316420] }
 0x4ff   : > { %8449 = vmatmul.msk.f32.gmra.mxu0 %vm285_vm1, %v8383_v41  ;;  %8514 = vmatmul.msk.f32.gmra.mxu1 %vm285_vm1, %v8383_v41  ;;  %v5652_v28 = vld.sshfl [vmem:[#allocation1 + $0x8] sm:$0xff pattern:$0x75316420]  ;;  %v9166_v41 = vld [vmem:[%s12743_s1 + $0x40] sm:$0x77] }
 0x500   : > { %v2750_v44 = vpop.f32.mrf.mxu2  ;;  %v2959_v22 = vpop.f32.mrf.mxu3  ;;  %8972 = vmatpush.msk.msra.mxu2 %vm478_vm0, %v5651_v4  ;;  %9037 = vmatpush.msk.msra.mxu3 %vm478_vm0, %v5652_v28  ;;  %6462 = vst [vmem:[#allocation1] ss:$2 sm:$0xff] %v9166_v41  ;;  %v8190_v28 = vld [vmem:[%s9358_s19 + $0x1150] sm:$0xff] }
 0x501   : > { %v3106_v62 = vadd.f32 %v2750_v44, %v13066_v42  ;;  %v3107_v56 = vadd.f32 %v2959_v22, %v13067_v60  ;;  %v8385_v60 = vld [vmem:[%s9358_s19 + $0x11e0] sm:$0xff] }
 0x503   : > { %v11255_v16 = vadd.f32 %v3563_v50, %v3106_v62  ;;  %v11257_v14 = vadd.f32 %v3772_v40, %v3107_v56 }
 0x504   : > { %v3566_v10 = vpop.f32.mrf.mxu0  ;;  %v3775_v34 = vpop.f32.mrf.mxu1 }
 0x505   : > { %8255 = vmatmul.msk.f32.gmra.mxu2 %vm285_vm1, %v8189_v54  ;;  %8320 = vmatmul.msk.f32.gmra.mxu3 %vm285_vm1, %v8189_v54 }
 0x507   : > { %8450 = vmatmul.msk.f32.gmra.mxu0 %vm285_vm1, %v8384_v38  ;;  %8515 = vmatmul.msk.f32.gmra.mxu1 %vm285_vm1, %v8384_v38  ;;  %v6463_v4 = vld.sshfl [vmem:[#allocation1] sm:$0xff pattern:$0x75316420]  ;;  %v6464_v41 = vld.sshfl [vmem:[#allocation1 + $0x8] sm:$0xff pattern:$0x75316420] }
 0x508   : > { %v2753_v40 = vpop.f32.mrf.mxu2  ;;  %v2962_v50 = vpop.f32.mrf.mxu3  ;;  %9167 = vmatpush.msk.msra.mxu0 %vm478_vm0, %v6463_v4  ;;  %9232 = vmatpush.msk.msra.mxu1 %vm478_vm0, %v6464_v41  ;;  %v13068_v38 = vld [vmem:[#allocation30_spill] sm:$0xff]  ;;  %v8712_v41 = vld [vmem:[%s9358_s19 + $0x10] sm:$0xff] }
 0x509   : > { %v3108_v44 = vadd.f32 %v2753_v40, %v10494_v7  ;;  %v3109_v22 = vadd.f32 %v2962_v50, %v10496_v30  ;;  %v8517_v50 = vld [vmem:[%s9358_s19 + $0x121] sm:$0xff] }
 0x50b   : > { %v11272_v42 = vadd.f32 %v3566_v10, %v3108_v44  ;;  %v11274_v62 = vadd.f32 %v3775_v34, %v3109_v22  ;;  %v13069_v34 = vld [vmem:[#allocation31_spill] sm:$0xff] }
 0x50c   : > { %v3569_v56 = vpop.f32.mrf.mxu0  ;;  %v3778_v54 = vpop.f32.mrf.mxu1 }
 0x50d   : > { %8256 = vmatmul.msk.f32.gmra.mxu2 %vm285_vm1, %v8190_v28  ;;  %8321 = vmatmul.msk.f32.gmra.mxu3 %vm285_vm1, %v8190_v28 }
 0x50f   : > { %8451 = vmatmul.msk.f32.gmra.mxu0 %vm285_vm1, %v8385_v60  ;;  %8516 = vmatmul.msk.f32.gmra.mxu1 %vm285_vm1, %v8385_v60 }
 0x510   : > { %v2756_v7 = vpop.f32.mrf.mxu2  ;;  %v2965_v30 = vpop.f32.mrf.mxu3 }
 0x511   : > { %v3110_v10 = vadd.f32 %v2756_v7, %v13068_v38  ;;  %v3111_v40 = vadd.f32 %v2965_v30, %v13069_v34  ;;  %v13072_v30 = vld [vmem:[#allocation32_spill] sm:$0xff] }
 0x513   : > { %v11286_v44 = vadd.f32 %v3569_v56, %v3110_v10  ;;  %v11288_v22 = vadd.f32 %v3778_v54, %v3111_v40  ;;  %v13073_v56 = vld [vmem:[#allocation33_spill] sm:$0xff]  ;;  %v8518_v10 = vld [vmem:[%s9358_s19 + $0x131] sm:$0xff] }
 0x514   : > { %v3572_v28 = vpop.f32.mrf.mxu0  ;;  %v3781_v4 = vpop.f32.mrf.mxu1 }
 0x515   : > { %13070 = vst [vmem:[#allocation28_spill] sm:$0xff] %v11286_v44  ;;  %8583 = vmatmul.msk.f32.vlgmr.msrb.gmra.mxu2 %vm285_vm1, %v8517_v50  ;;  %8648 = vmatmul.msk.f32.vlgmr.msrb.gmra.mxu3 %vm285_vm1, %v8517_v50  ;;  %v8713_v50 = vld [vmem:[%s9358_s19 + $0x20] sm:$0xff] }
 0x516   : > { %13071 = vst [vmem:[#allocation29_spill] sm:$0xff] %v11288_v22 }
 0x517   : > { %8778 = vmatmul.msk.f32.vlgmr.msrb.gmra.mxu0 %vm285_vm1, %v8712_v41  ;;  %8843 = vmatmul.msk.f32.vlgmr.msrb.gmra.mxu1 %vm285_vm1, %v8712_v41 }
 0x518   : > { %v2759_v60 = vpop.f32.mrf.mxu2  ;;  %v2968_v7 = vpop.f32.mrf.mxu3 }
 0x519   : > { %v3112_v38 = vadd.f32 %v2759_v60, %v13072_v30  ;;  %v3113_v54 = vadd.f32 %v2968_v7, %v13073_v56  ;;  %v13076_v7 = vld [vmem:[#allocation34_spill] sm:$0xff] }
 0x51b   : > { %v11298_v34 = vadd.f32 %v3572_v28, %v3112_v38  ;;  %v11300_v40 = vadd.f32 %v3781_v4, %v3113_v54  ;;  %v13077_v28 = vld [vmem:[#allocation35_spill] sm:$0xff]  ;;  %v8519_v38 = vld [vmem:[%s9358_s19 + $0x141] sm:$0xff] }
 0x51c   : > { %v3575_v22 = vpop.f32.mrf.mxu0  ;;  %v3784_v44 = vpop.f32.mrf.mxu1 }
 0x51d   : > { %13074 = vst [vmem:[#allocation30_spill] sm:$0xff] %v11298_v34  ;;  %8584 = vmatmul.msk.f32.gmra.mxu2 %vm285_vm1, %v8518_v10  ;;  %8649 = vmatmul.msk.f32.gmra.mxu3 %vm285_vm1, %v8518_v10  ;;  %v8714_v10 = vld [vmem:[%s9358_s19 + $0x30] sm:$0xff] }
 0x51e   : > { %13075 = vst [vmem:[#allocation31_spill] sm:$0xff] %v11300_v40 }
 0x51f   : > { %8779 = vmatmul.msk.f32.gmra.mxu0 %vm285_vm1, %v8713_v50  ;;  %8844 = vmatmul.msk.f32.gmra.mxu1 %vm285_vm1, %v8713_v50 }
 0x520   : > { %v2762_v41 = vpop.f32.mrf.mxu2  ;;  %v2971_v60 = vpop.f32.mrf.mxu3 }
 0x521   : > { %v3114_v30 = vadd.f32 %v2762_v41, %v13076_v7  ;;  %v3115_v4 = vadd.f32 %v2971_v60, %v13077_v28  ;;  %v13080_v60 = vld [vmem:[#allocation36_spill] sm:$0xff] }
 0x523   : > { %v11310_v56 = vadd.f32 %v3575_v22, %v3114_v30  ;;  %v11312_v54 = vadd.f32 %v3784_v44, %v3115_v4  ;;  %v13081_v22 = vld [vmem:[#allocation37_spill] sm:$0xff]  ;;  %v8520_v30 = vld [vmem:[%s9358_s19 + $0x151] sm:$0xff] }
 0x524   : > { %v3578_v40 = vpop.f32.mrf.mxu0  ;;  %v3787_v34 = vpop.f32.mrf.mxu1 }
 0x525   : > { %13078 = vst [vmem:[#allocation32_spill] sm:$0xff] %v11310_v56  ;;  %8585 = vmatmul.msk.f32.gmra.mxu2 %vm285_vm1, %v8519_v38  ;;  %8650 = vmatmul.msk.f32.gmra.mxu3 %vm285_vm1, %v8519_v38  ;;  %v8715_v38 = vld [vmem:[%s9358_s19 + $0x40] sm:$0xff] }
 0x526   : > { %13079 = vst [vmem:[#allocation33_spill] sm:$0xff] %v11312_v54 }
 0x527   : > { %8780 = vmatmul.msk.f32.gmra.mxu0 %vm285_vm1, %v8714_v10  ;;  %8845 = vmatmul.msk.f32.gmra.mxu1 %vm285_vm1, %v8714_v10 }
 0x528   : > { %v2765_v50 = vpop.f32.mrf.mxu2  ;;  %v2974_v41 = vpop.f32.mrf.mxu3 }
 0x529   : > { %v3116_v7 = vadd.f32 %v2765_v50, %v13080_v60  ;;  %v3117_v44 = vadd.f32 %v2974_v41, %v13081_v22  ;;  %v13084_v41 = vld [vmem:[#allocation38_spill] sm:$0xff] }
 0x52b   : > { %v11322_v28 = vadd.f32 %v3578_v40, %v3116_v7  ;;  %v11324_v4 = vadd.f32 %v3787_v34, %v3117_v44  ;;  %v13085_v40 = vld [vmem:[#allocation39_spill] sm:$0xff]  ;;  %v8521_v7 = vld [vmem:[%s9358_s19 + $0x161] sm:$0xff] }
 0x52c   : > { %v3581_v54 = vpop.f32.mrf.mxu0  ;;  %v3790_v56 = vpop.f32.mrf.mxu1 }
 0x52d   : > { %13082 = vst [vmem:[#allocation34_spill] sm:$0xff] %v11322_v28  ;;  %8586 = vmatmul.msk.f32.gmra.mxu2 %vm285_vm1, %v8520_v30  ;;  %8651 = vmatmul.msk.f32.gmra.mxu3 %vm285_vm1, %v8520_v30  ;;  %v8716_v30 = vld [vmem:[%s9358_s19 + $0x50] sm:$0xff] }
 0x52e   : > { %13083 = vst [vmem:[#allocation35_spill] sm:$0xff] %v11324_v4 }
 0x52f   : > { %8781 = vmatmul.msk.f32.gmra.mxu0 %vm285_vm1, %v8715_v38  ;;  %8846 = vmatmul.msk.f32.gmra.mxu1 %vm285_vm1, %v8715_v38 }
 0x530   : > { %v2768_v10 = vpop.f32.mrf.mxu2  ;;  %v2977_v50 = vpop.f32.mrf.mxu3 }
 0x531   : > { %v3118_v60 = vadd.f32 %v2768_v10, %v13084_v41  ;;  %v3119_v34 = vadd.f32 %v2977_v50, %v13085_v40  ;;  %v13088_v50 = vld [vmem:[#allocation40_spill] sm:$0xff] }
 0x533   : > { %v11334_v22 = vadd.f32 %v3581_v54, %v3118_v60  ;;  %v11336_v44 = vadd.f32 %v3790_v56, %v3119_v34  ;;  %v13089_v54 = vld [vmem:[#allocation41_spill] sm:$0xff]  ;;  %v8522_v60 = vld [vmem:[%s9358_s19 + $0x171] sm:$0xff] }
 0x534   : > { %v3584_v4 = vpop.f32.mrf.mxu0  ;;  %v3793_v28 = vpop.f32.mrf.mxu1 }
 0x535   : > { %13086 = vst [vmem:[#allocation36_spill] sm:$0xff] %v11334_v22  ;;  %8587 = vmatmul.msk.f32.gmra.mxu2 %vm285_vm1, %v8521_v7  ;;  %8652 = vmatmul.msk.f32.gmra.mxu3 %vm285_vm1, %v8521_v7  ;;  %v8717_v7 = vld [vmem:[%s9358_s19 + $0x60] sm:$0xff] }
 0x536   : > { %13087 = vst [vmem:[#allocation37_spill] sm:$0xff] %v11336_v44 }
 0x537   : > { %8782 = vmatmul.msk.f32.gmra.mxu0 %vm285_vm1, %v8716_v30  ;;  %8847 = vmatmul.msk.f32.gmra.mxu1 %vm285_vm1, %v8716_v30 }
 0x538   : > { %v2771_v38 = vpop.f32.mrf.mxu2  ;;  %v2980_v10 = vpop.f32.mrf.mxu3 }
 0x539   : > { %v3120_v41 = vadd.f32 %v2771_v38, %v13088_v50  ;;  %v3121_v56 = vadd.f32 %v2980_v10, %v13089_v54  ;;  %v13092_v10 = vld [vmem:[#allocation42_spill] sm:$0xff] }
 0x53b   : > { %v11346_v40 = vadd.f32 %v3584_v4, %v3120_v41  ;;  %v11348_v34 = vadd.f32 %v3793_v28, %v3121_v56  ;;  %v13093_v4 = vld [vmem:[#allocation43_spill] sm:$0xff]  ;;  %v8523_v41 = vld [vmem:[%s9358_s19 + $0x181] sm:$0xff] }
 0x53c   : > { %v3587_v44 = vpop.f32.mrf.mxu0  ;;  %v3796_v22 = vpop.f32.mrf.mxu1 }
 0x53d   : > { %13090 = vst [vmem:[#allocation38_spill] sm:$0xff] %v11346_v40  ;;  %8588 = vmatmul.msk.f32.gmra.mxu2 %vm285_vm1, %v8522_v60  ;;  %8653 = vmatmul.msk.f32.gmra.mxu3 %vm285_vm1, %v8522_v60  ;;  %v8718_v60 = vld [vmem:[%s9358_s19 + $0x70] sm:$0xff] }
 0x53e   : > { %13091 = vst [vmem:[#allocation39_spill] sm:$0xff] %v11348_v34 }
 0x53f   : > { %8783 = vmatmul.msk.f32.gmra.mxu0 %vm285_vm1, %v8717_v7  ;;  %8848 = vmatmul.msk.f32.gmra.mxu1 %vm285_vm1, %v8717_v7 }
 0x540   : > { %v2774_v30 = vpop.f32.mrf.mxu2  ;;  %v2983_v38 = vpop.f32.mrf.mxu3 }
 0x541   : > { %v3122_v50 = vadd.f32 %v2774_v30, %v13092_v10  ;;  %v3123_v28 = vadd.f32 %v2983_v38, %v13093_v4  ;;  %v13096_v38 = vld [vmem:[#allocation44_spill] sm:$0xff] }
 0x543   : > { %v11358_v54 = vadd.f32 %v3587_v44, %v3122_v50  ;;  %v11360_v56 = vadd.f32 %v3796_v22, %v3123_v28  ;;  %v13097_v44 = vld [vmem:[#allocation45_spill] sm:$0xff]  ;;  %v8524_v50 = vld [vmem:[%s9358_s19 + $0x191] sm:$0xff] }
 0x544   : > { %v3590_v34 = vpop.f32.mrf.mxu0  ;;  %v3799_v40 = vpop.f32.mrf.mxu1 }
 0x545   : > { %13094 = vst [vmem:[#allocation40_spill] sm:$0xff] %v11358_v54  ;;  %8589 = vmatmul.msk.f32.gmra.mxu2 %vm285_vm1, %v8523_v41  ;;  %8654 = vmatmul.msk.f32.gmra.mxu3 %vm285_vm1, %v8523_v41  ;;  %v8719_v41 = vld [vmem:[%s9358_s19 + $0x80] sm:$0xff] }
 0x546   : > { %13095 = vst [vmem:[#allocation41_spill] sm:$0xff] %v11360_v56 }
 0x547   : > { %8784 = vmatmul.msk.f32.gmra.mxu0 %vm285_vm1, %v8718_v60  ;;  %8849 = vmatmul.msk.f32.gmra.mxu1 %vm285_vm1, %v8718_v60 }
 0x548   : > { %v2777_v7 = vpop.f32.mrf.mxu2  ;;  %v2986_v30 = vpop.f32.mrf.mxu3 }
 0x549   : > { %v3124_v10 = vadd.f32 %v2777_v7, %v13096_v38  ;;  %v3125_v22 = vadd.f32 %v2986_v30, %v13097_v44  ;;  %v13100_v30 = vld [vmem:[#allocation46_spill] sm:$0xff] }
 0x54b   : > { %v11370_v4 = vadd.f32 %v3590_v34, %v3124_v10  ;;  %v11372_v28 = vadd.f32 %v3799_v40, %v3125_v22  ;;  %v13101_v34 = vld [vmem:[#allocation47_spill] sm:$0xff]  ;;  %v8525_v10 = vld [vmem:[%s9358_s19 + $0x361] sm:$0xff] }
 0x54c   : > { %v3593_v56 = vpop.f32.mrf.mxu0  ;;  %v3802_v54 = vpop.f32.mrf.mxu1 }
 0x54d   : > { %13098 = vst [vmem:[#allocation42_spill] sm:$0xff] %v11370_v4  ;;  %8590 = vmatmul.msk.f32.gmra.mxu2 %vm285_vm1, %v8524_v50  ;;  %8655 = vmatmul.msk.f32.gmra.mxu3 %vm285_vm1, %v8524_v50  ;;  %v8720_v50 = vld [vmem:[%s9358_s19 + $0x250] sm:$0xff] }
 0x54e   : > { %13099 = vst [vmem:[#allocation43_spill] sm:$0xff] %v11372_v28 }
 0x54f   : > { %8785 = vmatmul.msk.f32.gmra.mxu0 %vm285_vm1, %v8719_v41  ;;  %8850 = vmatmul.msk.f32.gmra.mxu1 %vm285_vm1, %v8719_v41 }
 0x550   : > { %v2780_v60 = vpop.f32.mrf.mxu2  ;;  %v2989_v7 = vpop.f32.mrf.mxu3 }
 0x551   : > { %v3126_v38 = vadd.f32 %v2780_v60, %v13100_v30  ;;  %v3127_v40 = vadd.f32 %v2989_v7, %v13101_v34  ;;  %v13104_v7 = vld [vmem:[#allocation48_spill] sm:$0xff] }
 0x553   : > { %v11382_v44 = vadd.f32 %v3593_v56, %v3126_v38  ;;  %v11384_v22 = vadd.f32 %v3802_v54, %v3127_v40  ;;  %v13105_v56 = vld [vmem:[#allocation49_spill] sm:$0xff]  ;;  %v8526_v38 = vld [vmem:[%s9358_s19 + $0x371] sm:$0xff] }
 0x554   : > { %v3596_v28 = vpop.f32.mrf.mxu0  ;;  %v3805_v4 = vpop.f32.mrf.mxu1 }
 0x555   : > { %13102 = vst [vmem:[#allocation44_spill] sm:$0xff] %v11382_v44  ;;  %8591 = vmatmul.msk.f32.gmra.mxu2 %vm285_vm1, %v8525_v10  ;;  %8656 = vmatmul.msk.f32.gmra.mxu3 %vm285_vm1, %v8525_v10  ;;  %v8721_v10 = vld [vmem:[%s9358_s19 + $0x260] sm:$0xff] }
 0x556   : > { %13103 = vst [vmem:[#allocation45_spill] sm:$0xff] %v11384_v22 }
 0x557   : > { %8786 = vmatmul.msk.f32.gmra.mxu0 %vm285_vm1, %v8720_v50  ;;  %8851 = vmatmul.msk.f32.gmra.mxu1 %vm285_vm1, %v8720_v50 }
 0x558   : > { %v2783_v41 = vpop.f32.mrf.mxu2  ;;  %v2992_v60 = vpop.f32.mrf.mxu3 }
 0x559   : > { %v3128_v30 = vadd.f32 %v2783_v41, %v13104_v7  ;;  %v3129_v54 = vadd.f32 %v2992_v60, %v13105_v56  ;;  %v13108_v60 = vld [vmem:[#allocation50_spill] sm:$0xff] }
 0x55b   : > { %v11394_v34 = vadd.f32 %v3596_v28, %v3128_v30  ;;  %v11396_v40 = vadd.f32 %v3805_v4, %v3129_v54  ;;  %v13109_v28 = vld [vmem:[#allocation51_spill] sm:$0xff]  ;;  %v8527_v30 = vld [vmem:[%s9358_s19 + $0x381] sm:$0xff] }
 0x55c   : > { %v3599_v22 = vpop.f32.mrf.mxu0  ;;  %v3808_v44 = vpop.f32.mrf.mxu1 }
 0x55d   : > { %13106 = vst [vmem:[#allocation46_spill] sm:$0xff] %v11394_v34  ;;  %8592 = vmatmul.msk.f32.gmra.mxu2 %vm285_vm1, %v8526_v38  ;;  %8657 = vmatmul.msk.f32.gmra.mxu3 %vm285_vm1, %v8526_v38  ;;  %v8722_v38 = vld [vmem:[%s9358_s19 + $0x270] sm:$0xff] }
 0x55e   : > { %13107 = vst [vmem:[#allocation47_spill] sm:$0xff] %v11396_v40 }
 0x55f   : > { %8787 = vmatmul.msk.f32.gmra.mxu0 %vm285_vm1, %v8721_v10  ;;  %8852 = vmatmul.msk.f32.gmra.mxu1 %vm285_vm1, %v8721_v10 }
 0x560   : > { %v2786_v50 = vpop.f32.mrf.mxu2  ;;  %v2995_v41 = vpop.f32.mrf.mxu3 }
 0x561   : > { %v3130_v7 = vadd.f32 %v2786_v50, %v13108_v60  ;;  %v3131_v4 = vadd.f32 %v2995_v41, %v13109_v28  ;;  %v13112_v41 = vld [vmem:[#allocation53_spill] sm:$0xff] }
 0x563   : > { %v11406_v56 = vadd.f32 %v3599_v22, %v3130_v7  ;;  %v11408_v54 = vadd.f32 %v3808_v44, %v3131_v4  ;;  %v13113_v22 = vld [vmem:[#allocation54_spill] sm:$0xff]  ;;  %v8528_v7 = vld [vmem:[%s9358_s19 + $0x391] sm:$0xff] }
 0x564   : > { %v3602_v40 = vpop.f32.mrf.mxu0  ;;  %v3811_v34 = vpop.f32.mrf.mxu1 }
 0x565   : > { %13110 = vst [vmem:[#allocation48_spill] sm:$0xff] %v11406_v56  ;;  %8593 = vmatmul.msk.f32.gmra.mxu2 %vm285_vm1, %v8527_v30  ;;  %8658 = vmatmul.msk.f32.gmra.mxu3 %vm285_vm1, %v8527_v30  ;;  %v8723_v30 = vld [vmem:[%s9358_s19 + $0x280] sm:$0xff] }
 0x566   : > { %13111 = vst [vmem:[#allocation49_spill] sm:$0xff] %v11408_v54 }
 0x567   : > { %8788 = vmatmul.msk.f32.gmra.mxu0 %vm285_vm1, %v8722_v38  ;;  %8853 = vmatmul.msk.f32.gmra.mxu1 %vm285_vm1, %v8722_v38 }
 0x568   : > { %v2789_v10 = vpop.f32.mrf.mxu2  ;;  %v2998_v50 = vpop.f32.mrf.mxu3 }
 0x569   : > { %v3132_v60 = vadd.f32 %v2789_v10, %v13112_v41  ;;  %v3133_v44 = vadd.f32 %v2998_v50, %v13113_v22  ;;  %v13116_v50 = vld [vmem:[#allocation57_spill] sm:$0xff] }
 0x56b   : > { %v11418_v28 = vadd.f32 %v3602_v40, %v3132_v60  ;;  %v11420_v4 = vadd.f32 %v3811_v34, %v3133_v44  ;;  %v13117_v40 = vld [vmem:[#allocation58_spill] sm:$0xff] }
 0x56c   : > { %v3605_v54 = vpop.f32.mrf.mxu0  ;;  %v3814_v56 = vpop.f32.mrf.mxu1  ;;  %v8529_v60 = vld [vmem:[%s9358_s19 + $0x3a1] sm:$0xff] }
 0x56d   : > { %13114 = vst [vmem:[#allocation50_spill] sm:$0xff] %v11418_v28  ;;  %8594 = vmatmul.msk.f32.gmra.mxu2 %vm285_vm1, %v8528_v7  ;;  %8659 = vmatmul.msk.f32.gmra.mxu3 %vm285_vm1, %v8528_v7  ;;  %v8724_v7 = vld [vmem:[%s9358_s19 + $0x290] sm:$0xff] }
 0x56e   : > { %13115 = vst [vmem:[#allocation51_spill] sm:$0xff] %v11420_v4 }
 0x56f   : > { %8789 = vmatmul.msk.f32.gmra.mxu0 %vm285_vm1, %v8723_v30  ;;  %8854 = vmatmul.msk.f32.gmra.mxu1 %vm285_vm1, %v8723_v30 }
 0x570   : > { %v2792_v38 = vpop.f32.mrf.mxu2  ;;  %v3001_v10 = vpop.f32.mrf.mxu3 }
 0x571   : > { %v3134_v41 = vadd.f32 %v2792_v38, %v13116_v50  ;;  %v3135_v34 = vadd.f32 %v3001_v10, %v13117_v40  ;;  %v13120_v10 = vld [vmem:[#allocation61_spill] sm:$0xff] }
 0x573   : > { %v11430_v22 = vadd.f32 %v3605_v54, %v3134_v41  ;;  %v11432_v44 = vadd.f32 %v3814_v56, %v3135_v34  ;;  %v13121_v54 = vld [vmem:[#allocation62_spill] sm:$0xff]  ;;  %v8530_v41 = vld [vmem:[%s9358_s19 + $0x3b1] sm:$0xff] }
 0x574   : > { %v3608_v4 = vpop.f32.mrf.mxu0  ;;  %v3817_v28 = vpop.f32.mrf.mxu1 }
 0x575   : > { %13118 = vst [vmem:[#allocation53_spill] sm:$0xff] %v11430_v22  ;;  %8595 = vmatmul.msk.f32.gmra.mxu2 %vm285_vm1, %v8529_v60  ;;  %8660 = vmatmul.msk.f32.gmra.mxu3 %vm285_vm1, %v8529_v60  ;;  %v8725_v60 = vld [vmem:[%s9358_s19 + $0x2a0] sm:$0xff] }
 0x576   : > { %13119 = vst [vmem:[#allocation54_spill] sm:$0xff] %v11432_v44 }
 0x577   : > { %8790 = vmatmul.msk.f32.gmra.mxu0 %vm285_vm1, %v8724_v7  ;;  %8855 = vmatmul.msk.f32.gmra.mxu1 %vm285_vm1, %v8724_v7 }
 0x578   : > { %v2795_v30 = vpop.f32.mrf.mxu2  ;;  %v3004_v38 = vpop.f32.mrf.mxu3 }
 0x579   : > { %v3136_v50 = vadd.f32 %v2795_v30, %v13120_v10  ;;  %v3137_v56 = vadd.f32 %v3004_v38, %v13121_v54  ;;  %v13124_v38 = vld [vmem:[#allocation65_spill] sm:$0xff] }
 0x57b   : > { %v11442_v40 = vadd.f32 %v3608_v4, %v3136_v50  ;;  %v11444_v34 = vadd.f32 %v3817_v28, %v3137_v56  ;;  %v13125_v4 = vld [vmem:[#allocation66_spill] sm:$0xff] }
 0x57c   : > { %v3611_v44 = vpop.f32.mrf.mxu0  ;;  %v3820_v22 = vpop.f32.mrf.mxu1  ;;  %v8531_v50 = vld [vmem:[%s9358_s19 + $0x3c1] sm:$0xff] }
 0x57d   : > { %13122 = vst [vmem:[#allocation57_spill] sm:$0xff] %v11442_v40  ;;  %8596 = vmatmul.msk.f32.gmra.mxu2 %vm285_vm1, %v8530_v41  ;;  %8661 = vmatmul.msk.f32.gmra.mxu3 %vm285_vm1, %v8530_v41  ;;  %v8726_v41 = vld [vmem:[%s9358_s19 + $0x2b0] sm:$0xff] }
 0x57e   : > { %13123 = vst [vmem:[#allocation58_spill] sm:$0xff] %v11444_v34 }
 0x57f   : > { %8791 = vmatmul.msk.f32.gmra.mxu0 %vm285_vm1, %v8725_v60  ;;  %8856 = vmatmul.msk.f32.gmra.mxu1 %vm285_vm1, %v8725_v60 }
 0x580   : > { %v2798_v7 = vpop.f32.mrf.mxu2  ;;  %v3007_v30 = vpop.f32.mrf.mxu3 }
 0x581   : > { %v3138_v10 = vadd.f32 %v2798_v7, %v13124_v38  ;;  %v3139_v28 = vadd.f32 %v3007_v30, %v13125_v4  ;;  %v13128_v30 = vld [vmem:[#allocation69_spill] sm:$0xff] }
 0x583   : > { %v11454_v54 = vadd.f32 %v3611_v44, %v3138_v10  ;;  %v11456_v56 = vadd.f32 %v3820_v22, %v3139_v28  ;;  %v13129_v44 = vld [vmem:[#allocation70_spill] sm:$0xff]  ;;  %v8532_v10 = vld [vmem:[%s9358_s19 + $0x3d1] sm:$0xff] }
 0x584   : > { %v3614_v34 = vpop.f32.mrf.mxu0  ;;  %v3823_v40 = vpop.f32.mrf.mxu1 }
 0x585   : > { %13126 = vst [vmem:[#allocation61_spill] sm:$0xff] %v11454_v54  ;;  %8597 = vmatmul.msk.f32.gmra.mxu2 %vm285_vm1, %v8531_v50  ;;  %8662 = vmatmul.msk.f32.gmra.mxu3 %vm285_vm1, %v8531_v50  ;;  %v8727_v50 = vld [vmem:[%s9358_s19 + $0x2c0] sm:$0xff] }
 0x586   : > { %13127 = vst [vmem:[#allocation62_spill] sm:$0xff] %v11456_v56 }
 0x587   : > { %8792 = vmatmul.msk.f32.gmra.mxu0 %vm285_vm1, %v8726_v41  ;;  %8857 = vmatmul.msk.f32.gmra.mxu1 %vm285_vm1, %v8726_v41 }
 0x588   : > { %v2801_v60 = vpop.f32.mrf.mxu2  ;;  %v3010_v7 = vpop.f32.mrf.mxu3 }
 0x589   : > { %v3140_v38 = vadd.f32 %v2801_v60, %v13128_v30  ;;  %v3141_v22 = vadd.f32 %v3010_v7, %v13129_v44 }
 0x58b   : > { %v11466_v4 = vadd.f32 %v3614_v34, %v3140_v38  ;;  %v11468_v28 = vadd.f32 %v3823_v40, %v3141_v22  ;;  %v8533_v34 = vld [vmem:[%s9358_s19 + $0x5a1] sm:$0xff] }
 0x58c   : > { %v3617_v56 = vpop.f32.mrf.mxu0  ;;  %v3826_v54 = vpop.f32.mrf.mxu1 }
 0x58d   : > { %8598 = vmatmul.msk.f32.gmra.mxu2 %vm285_vm1, %v8532_v10  ;;  %8663 = vmatmul.msk.f32.gmra.mxu3 %vm285_vm1, %v8532_v10  ;;  %v8728_v10 = vld [vmem:[%s9358_s19 + $0x490] sm:$0xff] }
 0x58f   : > { %8793 = vmatmul.msk.f32.gmra.mxu0 %vm285_vm1, %v8727_v50  ;;  %8858 = vmatmul.msk.f32.gmra.mxu1 %vm285_vm1, %v8727_v50 }
 0x590   : > { %v2804_v41 = vpop.f32.mrf.mxu2  ;;  %v3013_v60 = vpop.f32.mrf.mxu3 }
 0x591   : > { %v3142_v7 = vadd.f32 %v2804_v41, %v10700_v24  ;;  %v3143_v40 = vadd.f32 %v3013_v60, %v10702_v48 }
 0x593   : > { %v11478_v30 = vadd.f32 %v3617_v56, %v3142_v7  ;;  %v11480_v38 = vadd.f32 %v3826_v54, %v3143_v40  ;;  %v8534_v56 = vld [vmem:[%s9358_s19 + $0x5b1] sm:$0xff] }
 0x594   : > { %v5053_v44 = vpop.f32.mrf.mxu0  ;;  %v5262_v22 = vpop.f32.mrf.mxu1 }
 0x595   : > { %8599 = vmatmul.msk.f32.gmra.mxu2 %vm285_vm1, %v8533_v34  ;;  %8664 = vmatmul.msk.f32.gmra.mxu3 %vm285_vm1, %v8533_v34  ;;  %v8729_v34 = vld [vmem:[%s9358_s19 + $0x4a0] sm:$0xff] }
 0x597   : > { %8794 = vmatmul.msk.f32.gmra.mxu0 %vm285_vm1, %v8728_v10  ;;  %8859 = vmatmul.msk.f32.gmra.mxu1 %vm285_vm1, %v8728_v10 }
 0x598   : > { %v4240_v24 = vpop.f32.mrf.mxu2  ;;  %v4449_v50 = vpop.f32.mrf.mxu3 }
 0x599   : > { %v4641_v48 = vadd.f32 %v4240_v24, %v10712_v8  ;;  %v4642_v54 = vadd.f32 %v4449_v50, %v10714_v31 }
 0x59b   : > { %v11490_v41 = vadd.f32 %v5053_v44, %v4641_v48  ;;  %v11492_v60 = vadd.f32 %v5262_v22, %v4642_v54  ;;  %v8535_v22 = vld [vmem:[%s9358_s19 + $0x5c1] sm:$0xff] }
 0x59c   : > { %v5056_v7 = vpop.f32.mrf.mxu0  ;;  %v5265_v40 = vpop.f32.mrf.mxu1 }
 0x59d   : > { %8600 = vmatmul.msk.f32.gmra.mxu2 %vm285_vm1, %v8534_v56  ;;  %8665 = vmatmul.msk.f32.gmra.mxu3 %vm285_vm1, %v8534_v56  ;;  %v8730_v56 = vld [vmem:[%s9358_s19 + $0x4b0] sm:$0xff] }
 0x59f   : > { %8795 = vmatmul.msk.f32.gmra.mxu0 %vm285_vm1, %v8729_v34  ;;  %8860 = vmatmul.msk.f32.gmra.mxu1 %vm285_vm1, %v8729_v34 }
 0x5a0   : > { %v4243_v8 = vpop.f32.mrf.mxu2  ;;  %v4452_v10 = vpop.f32.mrf.mxu3 }
 0x5a1   : > { %v4643_v31 = vadd.f32 %v4243_v8, %v10724_v25  ;;  %v4644_v44 = vadd.f32 %v4452_v10, %v10726_v13 }
 0x5a3   : > { %v11502_v24 = vadd.f32 %v5056_v7, %v4643_v31  ;;  %v11504_v50 = vadd.f32 %v5265_v40, %v4644_v44  ;;  %v8536_v40 = vld [vmem:[%s9358_s19 + $0x5d1] sm:$0xff] }
 0x5a4   : > { %v5059_v48 = vpop.f32.mrf.mxu0  ;;  %v5268_v54 = vpop.f32.mrf.mxu1 }
 0x5a5   : > { %8601 = vmatmul.msk.f32.gmra.mxu2 %vm285_vm1, %v8535_v22  ;;  %8666 = vmatmul.msk.f32.gmra.mxu3 %vm285_vm1, %v8535_v22  ;;  %v8731_v22 = vld [vmem:[%s9358_s19 + $0x4c0] sm:$0xff] }
 0x5a7   : > { %8796 = vmatmul.msk.f32.gmra.mxu0 %vm285_vm1, %v8730_v56  ;;  %8861 = vmatmul.msk.f32.gmra.mxu1 %vm285_vm1, %v8730_v56 }
 0x5a8   : > { %v4246_v25 = vpop.f32.mrf.mxu2  ;;  %v4455_v34 = vpop.f32.mrf.mxu3 }
 0x5a9   : > { %v4645_v13 = vadd.f32 %v4246_v25, %v10736_v6  ;;  %v4646_v7 = vadd.f32 %v4455_v34, %v10738_v19 }
 0x5ab   : > { %v11514_v8 = vadd.f32 %v5059_v48, %v4645_v13  ;;  %v11516_v10 = vadd.f32 %v5268_v54, %v4646_v7  ;;  %v8537_v54 = vld [vmem:[%s9358_s19 + $0x5e1] sm:$0xff] }
 0x5ac   : > { %v5062_v31 = vpop.f32.mrf.mxu0  ;;  %v5271_v44 = vpop.f32.mrf.mxu1 }
 0x5ad   : > { %8602 = vmatmul.msk.f32.gmra.mxu2 %vm285_vm1, %v8536_v40  ;;  %8667 = vmatmul.msk.f32.gmra.mxu3 %vm285_vm1, %v8536_v40  ;;  %v8732_v40 = vld [vmem:[%s9358_s19 + $0x4d0] sm:$0xff] }
 0x5af   : > { %8797 = vmatmul.msk.f32.gmra.mxu0 %vm285_vm1, %v8731_v22  ;;  %8862 = vmatmul.msk.f32.gmra.mxu1 %vm285_vm1, %v8731_v22 }
 0x5b0   : > { %v4249_v6 = vpop.f32.mrf.mxu2  ;;  %v4458_v56 = vpop.f32.mrf.mxu3 }
 0x5b1   : > { %v4647_v19 = vadd.f32 %v4249_v6, %v10748_v47  ;;  %v4648_v48 = vadd.f32 %v4458_v56, %v10750_v23 }
 0x5b3   : > { %v11526_v25 = vadd.f32 %v5062_v31, %v4647_v19  ;;  %v11528_v34 = vadd.f32 %v5271_v44, %v4648_v48  ;;  %v8538_v44 = vld [vmem:[%s9358_s19 + $0x5f1] sm:$0xff] }
 0x5b4   : > { %v5065_v13 = vpop.f32.mrf.mxu0  ;;  %v5274_v7 = vpop.f32.mrf.mxu1 }
 0x5b5   : > { %8603 = vmatmul.msk.f32.gmra.mxu2 %vm285_vm1, %v8537_v54  ;;  %8668 = vmatmul.msk.f32.gmra.mxu3 %vm285_vm1, %v8537_v54  ;;  %v8733_v54 = vld [vmem:[%s9358_s19 + $0x4e0] sm:$0xff] }
 0x5b7   : > { %8798 = vmatmul.msk.f32.gmra.mxu0 %vm285_vm1, %v8732_v40  ;;  %8863 = vmatmul.msk.f32.gmra.mxu1 %vm285_vm1, %v8732_v40 }
 0x5b8   : > { %v4252_v47 = vpop.f32.mrf.mxu2  ;;  %v4461_v22 = vpop.f32.mrf.mxu3 }
 0x5b9   : > { %v4649_v23 = vadd.f32 %v4252_v47, %v10760_v43  ;;  %v4650_v31 = vadd.f32 %v4461_v22, %v10762_v18 }
 0x5bb   : > { %v11538_v6 = vadd.f32 %v5065_v13, %v4649_v23  ;;  %v11540_v56 = vadd.f32 %v5274_v7, %v4650_v31  ;;  %v8539_v7 = vld [vmem:[%s9358_s19 + $0x601] sm:$0xff] }
 0x5bc   : > { %v5068_v19 = vpop.f32.mrf.mxu0  ;;  %v5277_v48 = vpop.f32.mrf.mxu1 }
 0x5bd   : > { %8604 = vmatmul.msk.f32.gmra.mxu2 %vm285_vm1, %v8538_v44  ;;  %8669 = vmatmul.msk.f32.gmra.mxu3 %vm285_vm1, %v8538_v44  ;;  %v8734_v44 = vld [vmem:[%s9358_s19 + $0x4f0] sm:$0xff] }
 0x5bf   : > { %8799 = vmatmul.msk.f32.gmra.mxu0 %vm285_vm1, %v8733_v54  ;;  %8864 = vmatmul.msk.f32.gmra.mxu1 %vm285_vm1, %v8733_v54 }
 0x5c0   : > { %v4255_v43 = vpop.f32.mrf.mxu2  ;;  %v4464_v40 = vpop.f32.mrf.mxu3 }
 0x5c1   : > { %v4651_v18 = vadd.f32 %v4255_v43, %v10772_v49  ;;  %v4652_v13 = vadd.f32 %v4464_v40, %v10774_v35 }
 0x5c3   : > { %v11550_v47 = vadd.f32 %v5068_v19, %v4651_v18  ;;  %v11552_v22 = vadd.f32 %v5277_v48, %v4652_v13  ;;  %v8540_v48 = vld [vmem:[%s9358_s19 + $0x611] sm:$0xff] }
 0x5c4   : > { %v5071_v23 = vpop.f32.mrf.mxu0  ;;  %v5280_v31 = vpop.f32.mrf.mxu1 }
 0x5c5   : > { %8605 = vmatmul.msk.f32.gmra.mxu2 %vm285_vm1, %v8539_v7  ;;  %8670 = vmatmul.msk.f32.gmra.mxu3 %vm285_vm1, %v8539_v7  ;;  %v8735_v7 = vld [vmem:[%s9358_s19 + $0x500] sm:$0xff] }
 0x5c7   : > { %8800 = vmatmul.msk.f32.gmra.mxu0 %vm285_vm1, %v8734_v44  ;;  %8865 = vmatmul.msk.f32.gmra.mxu1 %vm285_vm1, %v8734_v44 }
 0x5c8   : > { %v4258_v49 = vpop.f32.mrf.mxu2  ;;  %v4467_v54 = vpop.f32.mrf.mxu3 }
 0x5c9   : > { %v4653_v35 = vadd.f32 %v4258_v49, %v10784_v55  ;;  %v4654_v19 = vadd.f32 %v4467_v54, %v10786_v45 }
 0x5cb   : > { %v11562_v43 = vadd.f32 %v5071_v23, %v4653_v35  ;;  %v11564_v40 = vadd.f32 %v5280_v31, %v4654_v19  ;;  %v8541_v31 = vld [vmem:[%s9358_s19 + $0x7e1] sm:$0xff] }
 0x5cc   : > { %v5074_v18 = vpop.f32.mrf.mxu0  ;;  %v5283_v13 = vpop.f32.mrf.mxu1 }
 0x5cd   : > { %8606 = vmatmul.msk.f32.gmra.mxu2 %vm285_vm1, %v8540_v48  ;;  %8671 = vmatmul.msk.f32.gmra.mxu3 %vm285_vm1, %v8540_v48  ;;  %v8736_v48 = vld [vmem:[%s9358_s19 + $0x6d0] sm:$0xff] }
 0x5cf   : > { %8801 = vmatmul.msk.f32.gmra.mxu0 %vm285_vm1, %v8735_v7  ;;  %8866 = vmatmul.msk.f32.gmra.mxu1 %vm285_vm1, %v8735_v7 }
 0x5d0   : > { %v4261_v55 = vpop.f32.mrf.mxu2  ;;  %v4470_v44 = vpop.f32.mrf.mxu3 }
 0x5d1   : > { %v4655_v45 = vadd.f32 %v4261_v55, %v10796_v61  ;;  %v4656_v23 = vadd.f32 %v4470_v44, %v10798_v63 }
 0x5d3   : > { %v11574_v49 = vadd.f32 %v5074_v18, %v4655_v45  ;;  %v11576_v54 = vadd.f32 %v5283_v13, %v4656_v23  ;;  %v8542_v13 = vld [vmem:[%s9358_s19 + $0x7f1] sm:$0xff] }
 0x5d4   : > { %v5077_v35 = vpop.f32.mrf.mxu0  ;;  %v5286_v19 = vpop.f32.mrf.mxu1 }
 0x5d5   : > { %8607 = vmatmul.msk.f32.gmra.mxu2 %vm285_vm1, %v8541_v31  ;;  %8672 = vmatmul.msk.f32.gmra.mxu3 %vm285_vm1, %v8541_v31  ;;  %v8737_v31 = vld [vmem:[%s9358_s19 + $0x6e0] sm:$0xff] }
 0x5d7   : > { %8802 = vmatmul.msk.f32.gmra.mxu0 %vm285_vm1, %v8736_v48  ;;  %8867 = vmatmul.msk.f32.gmra.mxu1 %vm285_vm1, %v8736_v48 }
 0x5d8   : > { %v4264_v61 = vpop.f32.mrf.mxu2  ;;  %v4473_v7 = vpop.f32.mrf.mxu3 }
 0x5d9   : > { %v4657_v63 = vadd.f32 %v4264_v61, %v10808_v3  ;;  %v4658_v18 = vadd.f32 %v4473_v7, %v10810_v36 }
 0x5db   : > { %v11586_v55 = vadd.f32 %v5077_v35, %v4657_v63  ;;  %v11588_v44 = vadd.f32 %v5286_v19, %v4658_v18  ;;  %v8543_v19 = vld [vmem:[%s9358_s19 + $0x801] sm:$0xff] }
 0x5dc   : > { %v5080_v45 = vpop.f32.mrf.mxu0  ;;  %v5289_v23 = vpop.f32.mrf.mxu1 }
 0x5dd   : > { %8608 = vmatmul.msk.f32.gmra.mxu2 %vm285_vm1, %v8542_v13  ;;  %8673 = vmatmul.msk.f32.gmra.mxu3 %vm285_vm1, %v8542_v13  ;;  %v8738_v13 = vld [vmem:[%s9358_s19 + $0x6f0] sm:$0xff] }
 0x5df   : > { %8803 = vmatmul.msk.f32.gmra.mxu0 %vm285_vm1, %v8737_v31  ;;  %8868 = vmatmul.msk.f32.gmra.mxu1 %vm285_vm1, %v8737_v31 }
 0x5e0   : > { %v4267_v3 = vpop.f32.mrf.mxu2  ;;  %v4476_v48 = vpop.f32.mrf.mxu3 }
 0x5e1   : > { %v4659_v36 = vadd.f32 %v4267_v3, %v10820_v9  ;;  %v4660_v35 = vadd.f32 %v4476_v48, %v10822_v37 }
 0x5e3   : > { %v11598_v61 = vadd.f32 %v5080_v45, %v4659_v36  ;;  %v11600_v7 = vadd.f32 %v5289_v23, %v4660_v35  ;;  %v8544_v23 = vld [vmem:[%s9358_s19 + $0x811] sm:$0xff] }
 0x5e4   : > { %v5083_v63 = vpop.f32.mrf.mxu0  ;;  %v5292_v18 = vpop.f32.mrf.mxu1 }
 0x5e5   : > { %8609 = vmatmul.msk.f32.gmra.mxu2 %vm285_vm1, %v8543_v19  ;;  %8674 = vmatmul.msk.f32.gmra.mxu3 %vm285_vm1, %v8543_v19  ;;  %v8739_v19 = vld [vmem:[%s9358_s19 + $0x700] sm:$0xff] }
 0x5e7   : > { %8804 = vmatmul.msk.f32.gmra.mxu0 %vm285_vm1, %v8738_v13  ;;  %8869 = vmatmul.msk.f32.gmra.mxu1 %vm285_vm1, %v8738_v13 }
 0x5e8   : > { %v4270_v9 = vpop.f32.mrf.mxu2  ;;  %v4479_v31 = vpop.f32.mrf.mxu3 }
 0x5e9   : > { %v4661_v37 = vadd.f32 %v4270_v9, %v10832_v15  ;;  %v4662_v45 = vadd.f32 %v4479_v31, %v10834_v17 }
 0x5eb   : > { %v11610_v3 = vadd.f32 %v5083_v63, %v4661_v37  ;;  %v11612_v48 = vadd.f32 %v5292_v18, %v4662_v45  ;;  %v8545_v18 = vld [vmem:[%s9358_s19 + $0x821] sm:$0xff] }
 0x5ec   : > { %v5086_v36 = vpop.f32.mrf.mxu0  ;;  %v5295_v35 = vpop.f32.mrf.mxu1 }
 0x5ed   : > { %8610 = vmatmul.msk.f32.gmra.mxu2 %vm285_vm1, %v8544_v23  ;;  %8675 = vmatmul.msk.f32.gmra.mxu3 %vm285_vm1, %v8544_v23  ;;  %v8740_v23 = vld [vmem:[%s9358_s19 + $0x710] sm:$0xff] }
 0x5ef   : > { %8805 = vmatmul.msk.f32.gmra.mxu0 %vm285_vm1, %v8739_v19  ;;  %8870 = vmatmul.msk.f32.gmra.mxu1 %vm285_vm1, %v8739_v19 }
 0x5f0   : > { %v4273_v15 = vpop.f32.mrf.mxu2  ;;  %v4482_v13 = vpop.f32.mrf.mxu3 }
 0x5f1   : > { %v4663_v17 = vadd.f32 %v4273_v15, %v10844_v21  ;;  %v4664_v63 = vadd.f32 %v4482_v13, %v10846_v59 }
 0x5f3   : > { %v11622_v9 = vadd.f32 %v5086_v36, %v4663_v17  ;;  %v11624_v31 = vadd.f32 %v5295_v35, %v4664_v63  ;;  %v8546_v35 = vld [vmem:[%s9358_s19 + $0x831] sm:$0xff] }
 0x5f4   : > { %v5089_v37 = vpop.f32.mrf.mxu0  ;;  %v5298_v45 = vpop.f32.mrf.mxu1 }
 0x5f5   : > { %8611 = vmatmul.msk.f32.gmra.mxu2 %vm285_vm1, %v8545_v18  ;;  %8676 = vmatmul.msk.f32.gmra.mxu3 %vm285_vm1, %v8545_v18  ;;  %v8741_v18 = vld [vmem:[%s9358_s19 + $0x720] sm:$0xff] }
 0x5f7   : > { %8806 = vmatmul.msk.f32.gmra.mxu0 %vm285_vm1, %v8740_v23  ;;  %8871 = vmatmul.msk.f32.gmra.mxu1 %vm285_vm1, %v8740_v23 }
 0x5f8   : > { %v4276_v21 = vpop.f32.mrf.mxu2  ;;  %v4485_v19 = vpop.f32.mrf.mxu3 }
 0x5f9   : > { %v4665_v59 = vadd.f32 %v4276_v21, %v10856_v27  ;;  %v4666_v36 = vadd.f32 %v4485_v19, %v10858_v57 }
 0x5fb   : > { %v11634_v15 = vadd.f32 %v5089_v37, %v4665_v59  ;;  %v11636_v13 = vadd.f32 %v5298_v45, %v4666_v36  ;;  %v8547_v45 = vld [vmem:[%s9358_s19 + $0x841] sm:$0xff] }
 0x5fc   : > { %v5092_v17 = vpop.f32.mrf.mxu0  ;;  %v5301_v63 = vpop.f32.mrf.mxu1 }
 0x5fd   : > { %8612 = vmatmul.msk.f32.gmra.mxu2 %vm285_vm1, %v8546_v35  ;;  %8677 = vmatmul.msk.f32.gmra.mxu3 %vm285_vm1, %v8546_v35  ;;  %v8742_v35 = vld [vmem:[%s9358_s19 + $0x730] sm:$0xff] }
 0x5ff   : > { %8807 = vmatmul.msk.f32.gmra.mxu0 %vm285_vm1, %v8741_v18  ;;  %8872 = vmatmul.msk.f32.gmra.mxu1 %vm285_vm1, %v8741_v18 }
 0x600   : > { %v4279_v27 = vpop.f32.mrf.mxu2  ;;  %v4488_v23 = vpop.f32.mrf.mxu3 }
 0x601   : > { %v4667_v57 = vadd.f32 %v4279_v27, %v10868_v33  ;;  %v4668_v37 = vadd.f32 %v4488_v23, %v10870_v53 }
 0x603   : > { %v11646_v21 = vadd.f32 %v5092_v17, %v4667_v57  ;;  %v11648_v19 = vadd.f32 %v5301_v63, %v4668_v37  ;;  %v8548_v63 = vld [vmem:[%s9358_s19 + $0x851] sm:$0xff] }
 0x604   : > { %v5095_v59 = vpop.f32.mrf.mxu0  ;;  %v5304_v36 = vpop.f32.mrf.mxu1 }
 0x605   : > { %8613 = vmatmul.msk.f32.gmra.mxu2 %vm285_vm1, %v8547_v45  ;;  %8678 = vmatmul.msk.f32.gmra.mxu3 %vm285_vm1, %v8547_v45  ;;  %v8743_v45 = vld [vmem:[%s9358_s19 + $0x740] sm:$0xff] }
 0x607   : > { %8808 = vmatmul.msk.f32.gmra.mxu0 %vm285_vm1, %v8742_v35  ;;  %8873 = vmatmul.msk.f32.gmra.mxu1 %vm285_vm1, %v8742_v35 }
 0x608   : > { %v4282_v33 = vpop.f32.mrf.mxu2  ;;  %v4491_v18 = vpop.f32.mrf.mxu3 }
 0x609   : > { %v4669_v53 = vadd.f32 %v4282_v33, %v10880_v39  ;;  %v4670_v17 = vadd.f32 %v4491_v18, %v10882_v26 }
 0x60b   : > { %v11658_v27 = vadd.f32 %v5095_v59, %v4669_v53  ;;  %v11660_v23 = vadd.f32 %v5304_v36, %v4670_v17  ;;  %v8549_v36 = vld [vmem:[%s9358_s19 + $0xa21] sm:$0xff] }
 0x60c   : > { %v5098_v57 = vpop.f32.mrf.mxu0  ;;  %v5307_v37 = vpop.f32.mrf.mxu1 }
 0x60d   : > { %8614 = vmatmul.msk.f32.gmra.mxu2 %vm285_vm1, %v8548_v63  ;;  %8679 = vmatmul.msk.f32.gmra.mxu3 %vm285_vm1, %v8548_v63  ;;  %v8744_v63 = vld [vmem:[%s9358_s19 + $0x910] sm:$0xff] }
 0x60f   : > { %8809 = vmatmul.msk.f32.gmra.mxu0 %vm285_vm1, %v8743_v45  ;;  %8874 = vmatmul.msk.f32.gmra.mxu1 %vm285_vm1, %v8743_v45 }
 0x610   : > { %v4285_v39 = vpop.f32.mrf.mxu2  ;;  %v4494_v35 = vpop.f32.mrf.mxu3 }
 0x611   : > { %v4671_v26 = vadd.f32 %v4285_v39, %v10892_v51  ;;  %v4672_v59 = vadd.f32 %v4494_v35, %v10894_v0 }
 0x613   : > { %v11670_v33 = vadd.f32 %v5098_v57, %v4671_v26  ;;  %v11672_v18 = vadd.f32 %v5307_v37, %v4672_v59  ;;  %v8550_v37 = vld [vmem:[%s9358_s19 + $0xa31] sm:$0xff] }
 0x614   : > { %v5101_v53 = vpop.f32.mrf.mxu0  ;;  %v5310_v17 = vpop.f32.mrf.mxu1 }
 0x615   : > { %8615 = vmatmul.msk.f32.gmra.mxu2 %vm285_vm1, %v8549_v36  ;;  %8680 = vmatmul.msk.f32.gmra.mxu3 %vm285_vm1, %v8549_v36  ;;  %v8745_v36 = vld [vmem:[%s9358_s19 + $0x920] sm:$0xff] }
 0x617   : > { %8810 = vmatmul.msk.f32.gmra.mxu0 %vm285_vm1, %v8744_v63  ;;  %8875 = vmatmul.msk.f32.gmra.mxu1 %vm285_vm1, %v8744_v63 }
 0x618   : > { %v4288_v51 = vpop.f32.mrf.mxu2  ;;  %v4497_v45 = vpop.f32.mrf.mxu3 }
 0x619   : > { %v4673_v0 = vadd.f32 %v4288_v51, %v10904_v5  ;;  %v4674_v57 = vadd.f32 %v4497_v45, %v10906_v46 }
 0x61b   : > { %v11682_v39 = vadd.f32 %v5101_v53, %v4673_v0  ;;  %v11684_v35 = vadd.f32 %v5310_v17, %v4674_v57  ;;  %v8551_v17 = vld [vmem:[%s9358_s19 + $0xa41] sm:$0xff] }
 0x61c   : > { %v5104_v26 = vpop.f32.mrf.mxu0  ;;  %v5313_v59 = vpop.f32.mrf.mxu1 }
 0x61d   : > { %8616 = vmatmul.msk.f32.gmra.mxu2 %vm285_vm1, %v8550_v37  ;;  %8681 = vmatmul.msk.f32.gmra.mxu3 %vm285_vm1, %v8550_v37  ;;  %v8746_v37 = vld [vmem:[%s9358_s19 + $0x930] sm:$0xff] }
 0x61f   : > { %8811 = vmatmul.msk.f32.gmra.mxu0 %vm285_vm1, %v8745_v36  ;;  %8876 = vmatmul.msk.f32.gmra.mxu1 %vm285_vm1, %v8745_v36 }
 0x620   : > { %v4291_v5 = vpop.f32.mrf.mxu2  ;;  %v4500_v63 = vpop.f32.mrf.mxu3 }
 0x621   : > { %v4675_v46 = vadd.f32 %v4291_v5, %v10916_v32  ;;  %v4676_v53 = vadd.f32 %v4500_v63, %v10918_v12 }
 0x623   : > { %v11694_v51 = vadd.f32 %v5104_v26, %v4675_v46  ;;  %v11696_v45 = vadd.f32 %v5313_v59, %v4676_v53  ;;  %v8552_v59 = vld [vmem:[%s9358_s19 + $0xa51] sm:$0xff] }
 0x624   : > { %v5107_v0 = vpop.f32.mrf.mxu0  ;;  %v5316_v57 = vpop.f32.mrf.mxu1 }
 0x625   : > { %8617 = vmatmul.msk.f32.gmra.mxu2 %vm285_vm1, %v8551_v17  ;;  %8682 = vmatmul.msk.f32.gmra.mxu3 %vm285_vm1, %v8551_v17  ;;  %v8747_v17 = vld [vmem:[%s9358_s19 + $0x940] sm:$0xff] }
 0x627   : > { %8812 = vmatmul.msk.f32.gmra.mxu0 %vm285_vm1, %v8746_v37  ;;  %8877 = vmatmul.msk.f32.gmra.mxu1 %vm285_vm1, %v8746_v37 }
 0x628   : > { %v4294_v32 = vpop.f32.mrf.mxu2  ;;  %v4503_v36 = vpop.f32.mrf.mxu3 }
 0x629   : > { %v4677_v12 = vadd.f32 %v4294_v32, %v10928_v20  ;;  %v4678_v26 = vadd.f32 %v4503_v36, %v10930_v58 }
 0x62b   : > { %v11706_v5 = vadd.f32 %v5107_v0, %v4677_v12  ;;  %v11708_v63 = vadd.f32 %v5316_v57, %v4678_v26  ;;  %v8553_v57 = vld [vmem:[%s9358_s19 + $0xa61] sm:$0xff] }
 0x62c   : > { %v5110_v46 = vpop.f32.mrf.mxu0  ;;  %v5319_v53 = vpop.f32.mrf.mxu1 }
 0x62d   : > { %8618 = vmatmul.msk.f32.gmra.mxu2 %vm285_vm1, %v8552_v59  ;;  %8683 = vmatmul.msk.f32.gmra.mxu3 %vm285_vm1, %v8552_v59  ;;  %v8748_v59 = vld [vmem:[%s9358_s19 + $0x950] sm:$0xff] }
 0x62f   : > { %8813 = vmatmul.msk.f32.gmra.mxu0 %vm285_vm1, %v8747_v17  ;;  %8878 = vmatmul.msk.f32.gmra.mxu1 %vm285_vm1, %v8747_v17 }
 0x630   : > { %v4297_v20 = vpop.f32.mrf.mxu2  ;;  %v4506_v37 = vpop.f32.mrf.mxu3 }
 0x631   : > { %v4679_v58 = vadd.f32 %v4297_v20, %v10940_v2  ;;  %v4680_v0 = vadd.f32 %v4506_v37, %v10942_v52 }
 0x633   : > { %v11718_v32 = vadd.f32 %v5110_v46, %v4679_v58  ;;  %v11720_v36 = vadd.f32 %v5319_v53, %v4680_v0  ;;  %v8554_v53 = vld [vmem:[%s9358_s19 + $0xa71] sm:$0xff] }
 0x634   : > { %v5113_v12 = vpop.f32.mrf.mxu0  ;;  %v5322_v26 = vpop.f32.mrf.mxu1 }
 0x635   : > { %8619 = vmatmul.msk.f32.gmra.mxu2 %vm285_vm1, %v8553_v57  ;;  %8684 = vmatmul.msk.f32.gmra.mxu3 %vm285_vm1, %v8553_v57  ;;  %v8749_v57 = vld [vmem:[%s9358_s19 + $0x960] sm:$0xff] }
 0x637   : > { %8814 = vmatmul.msk.f32.gmra.mxu0 %vm285_vm1, %v8748_v59  ;;  %8879 = vmatmul.msk.f32.gmra.mxu1 %vm285_vm1, %v8748_v59 }
 0x638   : > { %v4300_v2 = vpop.f32.mrf.mxu2  ;;  %v4509_v17 = vpop.f32.mrf.mxu3 }
 0x639   : > { %v4681_v52 = vadd.f32 %v4300_v2, %v10952_v29  ;;  %v4682_v46 = vadd.f32 %v4509_v17, %v10954_v1  ;;  %v8555_v2 = vld [vmem:[%s9358_s19 + $0xa81] sm:$0xff] }
 0x63b   : > { %v11730_v20 = vadd.f32 %v5113_v12, %v4681_v52  ;;  %v11732_v37 = vadd.f32 %v5322_v26, %v4682_v46  ;;  %v13131_v12 = vld [vmem:[#allocation73_spill] sm:$0xff] }
 0x63c   : > { %v5116_v58 = vpop.f32.mrf.mxu0  ;;  %v5325_v0 = vpop.f32.mrf.mxu1 }
 0x63d   : > { %13130 = vst [vmem:[#allocation65_spill] sm:$0xff] %v11732_v37  ;;  %8620 = vmatmul.msk.f32.gmra.mxu2 %vm285_vm1, %v8554_v53  ;;  %8685 = vmatmul.msk.f32.gmra.mxu3 %vm285_vm1, %v8554_v53  ;;  %v8750_v53 = vld [vmem:[%s9358_s19 + $0x970] sm:$0xff] }
 0x63f   : > { %8815 = vmatmul.msk.f32.gmra.mxu0 %vm285_vm1, %v8749_v57  ;;  %8880 = vmatmul.msk.f32.gmra.mxu1 %vm285_vm1, %v8749_v57 }
 0x640   : > { %v4303_v29 = vpop.f32.mrf.mxu2  ;;  %v4512_v59 = vpop.f32.mrf.mxu3 }
 0x641   : > { %v4683_v1 = vadd.f32 %v4303_v29, %v10964_v11  ;;  %v4684_v26 = vadd.f32 %v4512_v59, %v13131_v12  ;;  %v13134_v29 = vld [vmem:[#allocation74_spill] sm:$0xff] }
 0x643   : > { %v11742_v17 = vadd.f32 %v5116_v58, %v4683_v1  ;;  %v11744_v52 = vadd.f32 %v5325_v0, %v4684_v26  ;;  %v13135_v58 = vld [vmem:[#allocation77_spill] sm:$0xff]  ;;  %v8556_v1 = vld [vmem:[%s9358_s19 + $0xa91] sm:$0xff] }
 0x644   : > { %v5119_v46 = vpop.f32.mrf.mxu0  ;;  %v5328_v37 = vpop.f32.mrf.mxu1 }
 0x645   : > { %13132 = vst [vmem:[#allocation66_spill] sm:$0xff] %v11742_v17  ;;  %8621 = vmatmul.msk.f32.gmra.mxu2 %vm285_vm1, %v8555_v2  ;;  %8686 = vmatmul.msk.f32.gmra.mxu3 %vm285_vm1, %v8555_v2  ;;  %v8751_v2 = vld [vmem:[%s9358_s19 + $0x980] sm:$0xff] }
 0x646   : > { %13133 = vst [vmem:[#allocation69_spill] sm:$0xff] %v11744_v52 }
 0x647   : > { %8816 = vmatmul.msk.f32.gmra.mxu0 %vm285_vm1, %v8750_v53  ;;  %8881 = vmatmul.msk.f32.gmra.mxu1 %vm285_vm1, %v8750_v53 }
 0x648   : > { %v4306_v11 = vpop.f32.mrf.mxu2  ;;  %v4515_v57 = vpop.f32.mrf.mxu3 }
 0x649   : > { %v4685_v59 = vadd.f32 %v4306_v11, %v13134_v29  ;;  %v4686_v0 = vadd.f32 %v4515_v57, %v13135_v58  ;;  %v13138_v57 = vld [vmem:[#allocation78_spill] sm:$0xff] }
 0x64b   : > { %v11754_v12 = vadd.f32 %v5119_v46, %v4685_v59  ;;  %v11756_v26 = vadd.f32 %v5328_v37, %v4686_v0  ;;  %v13139_v46 = vld [vmem:[#allocation79_spill] sm:$0xff]  ;;  %v8557_v59 = vld [vmem:[%s9358_s19 + $0xc61] sm:$0xff] }
 0x64c   : > { %v5122_v52 = vpop.f32.mrf.mxu0  ;;  %v5331_v17 = vpop.f32.mrf.mxu1 }
 0x64d   : > { %13136 = vst [vmem:[#allocation70_spill] sm:$0xff] %v11754_v12  ;;  %8622 = vmatmul.msk.f32.gmra.mxu2 %vm285_vm1, %v8556_v1  ;;  %8687 = vmatmul.msk.f32.gmra.mxu3 %vm285_vm1, %v8556_v1  ;;  %v8752_v1 = vld [vmem:[%s9358_s19 + $0xb50] sm:$0xff] }
 0x64e   : > { %13137 = vst [vmem:[#allocation73_spill] sm:$0xff] %v11756_v26 }
 0x64f   : > { %8817 = vmatmul.msk.f32.gmra.mxu0 %vm285_vm1, %v8751_v2  ;;  %8882 = vmatmul.msk.f32.gmra.mxu1 %vm285_vm1, %v8751_v2 }
 0x650   : > { %v4309_v53 = vpop.f32.mrf.mxu2  ;;  %v4518_v11 = vpop.f32.mrf.mxu3 }
 0x651   : > { %v4687_v29 = vadd.f32 %v4309_v53, %v13138_v57  ;;  %v4688_v37 = vadd.f32 %v4518_v11, %v13139_v46  ;;  %v13142_v11 = vld [vmem:[#allocation80_spill] sm:$0xff] }
 0x653   : > { %v11766_v58 = vadd.f32 %v5122_v52, %v4687_v29  ;;  %v11768_v0 = vadd.f32 %v5331_v17, %v4688_v37  ;;  %v13143_v52 = vld [vmem:[#allocation81_spill] sm:$0xff]  ;;  %v8558_v29 = vld [vmem:[%s9358_s19 + $0xc71] sm:$0xff] }
 0x654   : > { %v5125_v26 = vpop.f32.mrf.mxu0  ;;  %v5334_v12 = vpop.f32.mrf.mxu1 }
 0x655   : > { %13140 = vst [vmem:[#allocation74_spill] sm:$0xff] %v11766_v58  ;;  %8623 = vmatmul.msk.f32.gmra.mxu2 %vm285_vm1, %v8557_v59  ;;  %8688 = vmatmul.msk.f32.gmra.mxu3 %vm285_vm1, %v8557_v59  ;;  %v8753_v59 = vld [vmem:[%s9358_s19 + $0xb60] sm:$0xff] }
 0x656   : > { %13141 = vst [vmem:[#allocation77_spill] sm:$0xff] %v11768_v0 }
 0x657   : > { %8818 = vmatmul.msk.f32.gmra.mxu0 %vm285_vm1, %v8752_v1  ;;  %8883 = vmatmul.msk.f32.gmra.mxu1 %vm285_vm1, %v8752_v1 }
 0x658   : > { %v4312_v2 = vpop.f32.mrf.mxu2  ;;  %v4521_v53 = vpop.f32.mrf.mxu3 }
 0x659   : > { %v4689_v57 = vadd.f32 %v4312_v2, %v13142_v11  ;;  %v4690_v17 = vadd.f32 %v4521_v53, %v13143_v52  ;;  %v13146_v53 = vld [vmem:[#allocation52_spill] sm:$0xff] }
 0x65b   : > { %v11778_v46 = vadd.f32 %v5125_v26, %v4689_v57  ;;  %v11780_v37 = vadd.f32 %v5334_v12, %v4690_v17  ;;  %v13147_v26 = vld [vmem:[#allocation82_spill] sm:$0xff] }
 0x65c   : > { %v5128_v0 = vpop.f32.mrf.mxu0  ;;  %v5337_v58 = vpop.f32.mrf.mxu1  ;;  %v8559_v57 = vld [vmem:[%s9358_s19 + $0xc81] sm:$0xff] }
 0x65d   : > { %13144 = vst [vmem:[#allocation78_spill] sm:$0xff] %v11778_v46  ;;  %8624 = vmatmul.msk.f32.gmra.mxu2 %vm285_vm1, %v8558_v29  ;;  %8689 = vmatmul.msk.f32.gmra.mxu3 %vm285_vm1, %v8558_v29  ;;  %v8754_v29 = vld [vmem:[%s9358_s19 + $0xb70] sm:$0xff] }
 0x65e   : > { %13145 = vst [vmem:[#allocation79_spill] sm:$0xff] %v11780_v37 }
 0x65f   : > { %8819 = vmatmul.msk.f32.gmra.mxu0 %vm285_vm1, %v8753_v59  ;;  %8884 = vmatmul.msk.f32.gmra.mxu1 %vm285_vm1, %v8753_v59 }
 0x660   : > { %v4315_v1 = vpop.f32.mrf.mxu2  ;;  %v4524_v2 = vpop.f32.mrf.mxu3 }
 0x661   : > { %v4691_v11 = vadd.f32 %v4315_v1, %v13146_v53  ;;  %v4692_v12 = vadd.f32 %v4524_v2, %v13147_v26  ;;  %v13150_v2 = vld [vmem:[#allocation55_spill] sm:$0xff] }
 0x663   : > { %v11790_v52 = vadd.f32 %v5128_v0, %v4691_v11  ;;  %v11792_v17 = vadd.f32 %v5337_v58, %v4692_v12  ;;  %v13151_v0 = vld [vmem:[#allocation56_spill] sm:$0xff] }
 0x664   : > { %v5131_v37 = vpop.f32.mrf.mxu0  ;;  %v5340_v46 = vpop.f32.mrf.mxu1  ;;  %v8560_v11 = vld [vmem:[%s9358_s19 + $0xc91] sm:$0xff] }
 0x665   : > { %13148 = vst [vmem:[#allocation80_spill] sm:$0xff] %v11790_v52  ;;  %8625 = vmatmul.msk.f32.gmra.mxu2 %vm285_vm1, %v8559_v57  ;;  %8690 = vmatmul.msk.f32.gmra.mxu3 %vm285_vm1, %v8559_v57  ;;  %v8755_v57 = vld [vmem:[%s9358_s19 + $0xb80] sm:$0xff] }
 0x666   : > { %13149 = vst [vmem:[#allocation81_spill] sm:$0xff] %v11792_v17 }
 0x667   : > { %8820 = vmatmul.msk.f32.gmra.mxu0 %vm285_vm1, %v8754_v29  ;;  %8885 = vmatmul.msk.f32.gmra.mxu1 %vm285_vm1, %v8754_v29 }
 0x668   : > { %v4318_v59 = vpop.f32.mrf.mxu2  ;;  %v4527_v1 = vpop.f32.mrf.mxu3 }
 0x669   : > { %v4693_v53 = vadd.f32 %v4318_v59, %v13150_v2  ;;  %v4694_v58 = vadd.f32 %v4527_v1, %v13151_v0  ;;  %v13154_v1 = vld [vmem:[#allocation59_spill] sm:$0xff] }
 0x66b   : > { %v11802_v26 = vadd.f32 %v5131_v37, %v4693_v53  ;;  %v11804_v12 = vadd.f32 %v5340_v46, %v4694_v58  ;;  %v13155_v37 = vld [vmem:[#allocation60_spill] sm:$0xff]  ;;  %v8561_v53 = vld [vmem:[%s9358_s19 + $0xca1] sm:$0xff] }
 0x66c   : > { %v5134_v17 = vpop.f32.mrf.mxu0  ;;  %v5343_v52 = vpop.f32.mrf.mxu1 }
 0x66d   : > { %13152 = vst [vmem:[#allocation52_spill] sm:$0xff] %v11802_v26  ;;  %8626 = vmatmul.msk.f32.gmra.mxu2 %vm285_vm1, %v8560_v11  ;;  %8691 = vmatmul.msk.f32.gmra.mxu3 %vm285_vm1, %v8560_v11  ;;  %v8756_v11 = vld [vmem:[%s9358_s19 + $0xb90] sm:$0xff] }
 0x66e   : > { %13153 = vst [vmem:[#allocation82_spill] sm:$0xff] %v11804_v12 }
 0x66f   : > { %8821 = vmatmul.msk.f32.gmra.mxu0 %vm285_vm1, %v8755_v57  ;;  %8886 = vmatmul.msk.f32.gmra.mxu1 %vm285_vm1, %v8755_v57 }
 0x670   : > { %v4321_v29 = vpop.f32.mrf.mxu2  ;;  %v4530_v59 = vpop.f32.mrf.mxu3 }
 0x671   : > { %v4695_v2 = vadd.f32 %v4321_v29, %v13154_v1  ;;  %v4696_v46 = vadd.f32 %v4530_v59, %v13155_v37  ;;  %v13158_v59 = vld [vmem:[#allocation63_spill] sm:$0xff] }
 0x673   : > { %v11814_v0 = vadd.f32 %v5134_v17, %v4695_v2  ;;  %v11816_v58 = vadd.f32 %v5343_v52, %v4696_v46  ;;  %v13159_v17 = vld [vmem:[#allocation64_spill] sm:$0xff] }
 0x674   : > { %v5137_v12 = vpop.f32.mrf.mxu0  ;;  %v5346_v26 = vpop.f32.mrf.mxu1  ;;  %v8562_v2 = vld [vmem:[%s9358_s19 + $0xcb1] sm:$0xff] }
 0x675   : > { %13156 = vst [vmem:[#allocation55_spill] sm:$0xff] %v11814_v0  ;;  %8627 = vmatmul.msk.f32.gmra.mxu2 %vm285_vm1, %v8561_v53  ;;  %8692 = vmatmul.msk.f32.gmra.mxu3 %vm285_vm1, %v8561_v53  ;;  %v8757_v53 = vld [vmem:[%s9358_s19 + $0xba0] sm:$0xff] }
 0x676   : > { %13157 = vst [vmem:[#allocation56_spill] sm:$0xff] %v11816_v58 }
 0x677   : > { %8822 = vmatmul.msk.f32.gmra.mxu0 %vm285_vm1, %v8756_v11  ;;  %8887 = vmatmul.msk.f32.gmra.mxu1 %vm285_vm1, %v8756_v11 }
 0x678   : > { %v4324_v57 = vpop.f32.mrf.mxu2  ;;  %v4533_v29 = vpop.f32.mrf.mxu3 }
 0x679   : > { %v4697_v1 = vadd.f32 %v4324_v57, %v13158_v59  ;;  %v4698_v52 = vadd.f32 %v4533_v29, %v13159_v17  ;;  %v13162_v29 = vld [vmem:[#allocation67_spill] sm:$0xff] }
 0x67b   : > { %v11826_v37 = vadd.f32 %v5137_v12, %v4697_v1  ;;  %v11828_v46 = vadd.f32 %v5346_v26, %v4698_v52  ;;  %v13163_v12 = vld [vmem:[#allocation68_spill] sm:$0xff]  ;;  %v8563_v1 = vld [vmem:[%s9358_s19 + $0xcc1] sm:$0xff] }
 0x67c   : > { %v5140_v58 = vpop.f32.mrf.mxu0  ;;  %v5349_v0 = vpop.f32.mrf.mxu1 }
 0x67d   : > { %13160 = vst [vmem:[#allocation59_spill] sm:$0xff] %v11826_v37  ;;  %8628 = vmatmul.msk.f32.gmra.mxu2 %vm285_vm1, %v8562_v2  ;;  %8693 = vmatmul.msk.f32.gmra.mxu3 %vm285_vm1, %v8562_v2  ;;  %v8758_v2 = vld [vmem:[%s9358_s19 + $0xbb0] sm:$0xff] }
 0x67e   : > { %13161 = vst [vmem:[#allocation60_spill] sm:$0xff] %v11828_v46 }
 0x67f   : > { %8823 = vmatmul.msk.f32.gmra.mxu0 %vm285_vm1, %v8757_v53  ;;  %8888 = vmatmul.msk.f32.gmra.mxu1 %vm285_vm1, %v8757_v53 }
 0x680   : > { %v4327_v11 = vpop.f32.mrf.mxu2  ;;  %v4536_v57 = vpop.f32.mrf.mxu3 }
 0x681   : > { %v4699_v59 = vadd.f32 %v4327_v11, %v13162_v29  ;;  %v4700_v26 = vadd.f32 %v4536_v57, %v13163_v12  ;;  %v13166_v57 = vld [vmem:[#allocation71_spill] sm:$0xff] }
 0x683   : > { %v11838_v17 = vadd.f32 %v5140_v58, %v4699_v59  ;;  %v11840_v52 = vadd.f32 %v5349_v0, %v4700_v26  ;;  %v13167_v58 = vld [vmem:[#allocation72_spill] sm:$0xff] }
 0x684   : > { %v5143_v46 = vpop.f32.mrf.mxu0  ;;  %v5352_v37 = vpop.f32.mrf.mxu1  ;;  %v8564_v59 = vld [vmem:[%s9358_s19 + $0xcd1] sm:$0xff] }
 0x685   : > { %13164 = vst [vmem:[#allocation63_spill] sm:$0xff] %v11838_v17  ;;  %8629 = vmatmul.msk.f32.gmra.mxu2 %vm285_vm1, %v8563_v1  ;;  %8694 = vmatmul.msk.f32.gmra.mxu3 %vm285_vm1, %v8563_v1  ;;  %v8759_v1 = vld [vmem:[%s9358_s19 + $0xbc0] sm:$0xff] }
 0x686   : > { %13165 = vst [vmem:[#allocation64_spill] sm:$0xff] %v11840_v52 }
 0x687   : > { %8824 = vmatmul.msk.f32.gmra.mxu0 %vm285_vm1, %v8758_v2  ;;  %8889 = vmatmul.msk.f32.gmra.mxu1 %vm285_vm1, %v8758_v2 }
 0x688   : > { %v4330_v53 = vpop.f32.mrf.mxu2  ;;  %v4539_v11 = vpop.f32.mrf.mxu3 }
 0x689   : > { %v4701_v29 = vadd.f32 %v4330_v53, %v13166_v57  ;;  %v4702_v0 = vadd.f32 %v4539_v11, %v13167_v58  ;;  %v13170_v11 = vld [vmem:[#allocation75_spill] sm:$0xff] }
 0x68b   : > { %v11850_v12 = vadd.f32 %v5143_v46, %v4701_v29  ;;  %v11852_v26 = vadd.f32 %v5352_v37, %v4702_v0  ;;  %v13171_v46 = vld [vmem:[#allocation76_spill] sm:$0xff]  ;;  %v8565_v29 = vld [vmem:[%s9358_s19 + $0xea1] sm:$0xff] }
 0x68c   : > { %v5146_v52 = vpop.f32.mrf.mxu0  ;;  %v5355_v17 = vpop.f32.mrf.mxu1 }
 0x68d   : > { %13168 = vst [vmem:[#allocation67_spill] sm:$0xff] %v11850_v12  ;;  %8630 = vmatmul.msk.f32.gmra.mxu2 %vm285_vm1, %v8564_v59  ;;  %8695 = vmatmul.msk.f32.gmra.mxu3 %vm285_vm1, %v8564_v59  ;;  %v8760_v59 = vld [vmem:[%s9358_s19 + $0xd90] sm:$0xff] }
 0x68e   : > { %13169 = vst [vmem:[#allocation68_spill] sm:$0xff] %v11852_v26 }
 0x68f   : > { %8825 = vmatmul.msk.f32.gmra.mxu0 %vm285_vm1, %v8759_v1  ;;  %8890 = vmatmul.msk.f32.gmra.mxu1 %vm285_vm1, %v8759_v1 }
 0x690   : > { %v4333_v2 = vpop.f32.mrf.mxu2  ;;  %v4542_v53 = vpop.f32.mrf.mxu3 }
 0x691   : > { %v4703_v57 = vadd.f32 %v4333_v2, %v13170_v11  ;;  %v4704_v37 = vadd.f32 %v4542_v53, %v13171_v46  ;;  %v13174_v53 = vld [vmem:[#allocation2_spill] sm:$0xff] }
 0x693   : > { %v11862_v58 = vadd.f32 %v5146_v52, %v4703_v57  ;;  %v11864_v0 = vadd.f32 %v5355_v17, %v4704_v37  ;;  %v13175_v52 = vld [vmem:[#allocation3_spill] sm:$0xff] }
 0x694   : > { %v5149_v26 = vpop.f32.mrf.mxu0  ;;  %v5358_v12 = vpop.f32.mrf.mxu1  ;;  %v8566_v57 = vld [vmem:[%s9358_s19 + $0xeb1] sm:$0xff] }
 0x695   : > { %13172 = vst [vmem:[#allocation71_spill] sm:$0xff] %v11862_v58  ;;  %8631 = vmatmul.msk.f32.gmra.mxu2 %vm285_vm1, %v8565_v29  ;;  %8696 = vmatmul.msk.f32.gmra.mxu3 %vm285_vm1, %v8565_v29  ;;  %v8761_v29 = vld [vmem:[%s9358_s19 + $0xda0] sm:$0xff] }
 0x696   : > { %13173 = vst [vmem:[#allocation72_spill] sm:$0xff] %v11864_v0 }
 0x697   : > { %8826 = vmatmul.msk.f32.gmra.mxu0 %vm285_vm1, %v8760_v59  ;;  %8891 = vmatmul.msk.f32.gmra.mxu1 %vm285_vm1, %v8760_v59 }
 0x698   : > { %v4336_v1 = vpop.f32.mrf.mxu2  ;;  %v4545_v2 = vpop.f32.mrf.mxu3 }
 0x699   : > { %v4705_v11 = vadd.f32 %v4336_v1, %v13174_v53  ;;  %v4706_v17 = vadd.f32 %v4545_v2, %v13175_v52  ;;  %v13178_v2 = vld [vmem:[#allocation4_spill] sm:$0xff] }
 0x69b   : > { %v11874_v46 = vadd.f32 %v5149_v26, %v4705_v11  ;;  %v11876_v37 = vadd.f32 %v5358_v12, %v4706_v17  ;;  %v13179_v26 = vld [vmem:[#allocation5_spill] sm:$0xff] }
 0x69c   : > { %v5152_v0 = vpop.f32.mrf.mxu0  ;;  %v5361_v58 = vpop.f32.mrf.mxu1  ;;  %v8567_v11 = vld [vmem:[%s9358_s19 + $0xec1] sm:$0xff] }
 0x69d   : > { %13176 = vst [vmem:[#allocation75_spill] sm:$0xff] %v11874_v46  ;;  %8632 = vmatmul.msk.f32.gmra.mxu2 %vm285_vm1, %v8566_v57  ;;  %8697 = vmatmul.msk.f32.gmra.mxu3 %vm285_vm1, %v8566_v57  ;;  %v8762_v57 = vld [vmem:[%s9358_s19 + $0xdb0] sm:$0xff] }
 0x69e   : > { %13177 = vst [vmem:[#allocation76_spill] sm:$0xff] %v11876_v37 }
 0x69f   : > { %8827 = vmatmul.msk.f32.gmra.mxu0 %vm285_vm1, %v8761_v29  ;;  %8892 = vmatmul.msk.f32.gmra.mxu1 %vm285_vm1, %v8761_v29 }
 0x6a0   : > { %v4339_v59 = vpop.f32.mrf.mxu2  ;;  %v4548_v1 = vpop.f32.mrf.mxu3 }
 0x6a1   : > { %v4707_v53 = vadd.f32 %v4339_v59, %v13178_v2  ;;  %v4708_v12 = vadd.f32 %v4548_v1, %v13179_v26  ;;  %v13182_v1 = vld [vmem:[#allocation6_spill] sm:$0xff] }
 0x6a3   : > { %v11886_v52 = vadd.f32 %v5152_v0, %v4707_v53  ;;  %v11888_v17 = vadd.f32 %v5361_v58, %v4708_v12  ;;  %v13183_v0 = vld [vmem:[#allocation7_spill] sm:$0xff] }
 0x6a4   : > { %v5155_v37 = vpop.f32.mrf.mxu0  ;;  %v5364_v46 = vpop.f32.mrf.mxu1  ;;  %v8568_v53 = vld [vmem:[%s9358_s19 + $0xed1] sm:$0xff] }
 0x6a5   : > { %13180 = vst [vmem:[#allocation2_spill] sm:$0xff] %v11886_v52  ;;  %8633 = vmatmul.msk.f32.gmra.mxu2 %vm285_vm1, %v8567_v11  ;;  %8698 = vmatmul.msk.f32.gmra.mxu3 %vm285_vm1, %v8567_v11  ;;  %v8763_v11 = vld [vmem:[%s9358_s19 + $0xdc0] sm:$0xff] }
 0x6a6   : > { %13181 = vst [vmem:[#allocation3_spill] sm:$0xff] %v11888_v17 }
 0x6a7   : > { %8828 = vmatmul.msk.f32.gmra.mxu0 %vm285_vm1, %v8762_v57  ;;  %8893 = vmatmul.msk.f32.gmra.mxu1 %vm285_vm1, %v8762_v57 }
 0x6a8   : > { %v4342_v29 = vpop.f32.mrf.mxu2  ;;  %v4551_v59 = vpop.f32.mrf.mxu3 }
 0x6a9   : > { %v4709_v2 = vadd.f32 %v4342_v29, %v13182_v1  ;;  %v4710_v58 = vadd.f32 %v4551_v59, %v13183_v0  ;;  %v13186_v59 = vld [vmem:[#allocation8_spill] sm:$0xff] }
 0x6ab   : > { %v11898_v26 = vadd.f32 %v5155_v37, %v4709_v2  ;;  %v11900_v12 = vadd.f32 %v5364_v46, %v4710_v58  ;;  %v13187_v37 = vld [vmem:[#allocation9_spill] sm:$0xff] }
 0x6ac   : > { %v5158_v17 = vpop.f32.mrf.mxu0  ;;  %v5367_v52 = vpop.f32.mrf.mxu1  ;;  %v8569_v2 = vld [vmem:[%s9358_s19 + $0xee1] sm:$0xff] }
 0x6ad   : > { %13184 = vst [vmem:[#allocation4_spill] sm:$0xff] %v11898_v26  ;;  %8634 = vmatmul.msk.f32.gmra.mxu2 %vm285_vm1, %v8568_v53  ;;  %8699 = vmatmul.msk.f32.gmra.mxu3 %vm285_vm1, %v8568_v53  ;;  %v8764_v53 = vld [vmem:[%s9358_s19 + $0xdd0] sm:$0xff] }
 0x6ae   : > { %13185 = vst [vmem:[#allocation5_spill] sm:$0xff] %v11900_v12 }
 0x6af   : > { %8829 = vmatmul.msk.f32.gmra.mxu0 %vm285_vm1, %v8763_v11  ;;  %8894 = vmatmul.msk.f32.gmra.mxu1 %vm285_vm1, %v8763_v11 }
 0x6b0   : > { %v4345_v57 = vpop.f32.mrf.mxu2  ;;  %v4554_v29 = vpop.f32.mrf.mxu3 }
 0x6b1   : > { %v4711_v1 = vadd.f32 %v4345_v57, %v13186_v59  ;;  %v4712_v46 = vadd.f32 %v4554_v29, %v13187_v37  ;;  %v13190_v29 = vld [vmem:[#allocation10_spill] sm:$0xff] }
 0x6b3   : > { %v11910_v0 = vadd.f32 %v5158_v17, %v4711_v1  ;;  %v11912_v58 = vadd.f32 %v5367_v52, %v4712_v46  ;;  %v13191_v17 = vld [vmem:[#allocation11_spill] sm:$0xff] }
 0x6b4   : > { %v5161_v12 = vpop.f32.mrf.mxu0  ;;  %v5370_v26 = vpop.f32.mrf.mxu1  ;;  %v8570_v1 = vld [vmem:[%s9358_s19 + $0xef1] sm:$0xff] }
 0x6b5   : > { %13188 = vst [vmem:[#allocation6_spill] sm:$0xff] %v11910_v0  ;;  %8635 = vmatmul.msk.f32.gmra.mxu2 %vm285_vm1, %v8569_v2  ;;  %8700 = vmatmul.msk.f32.gmra.mxu3 %vm285_vm1, %v8569_v2  ;;  %v8765_v2 = vld [vmem:[%s9358_s19 + $0xde0] sm:$0xff] }
 0x6b6   : > { %13189 = vst [vmem:[#allocation7_spill] sm:$0xff] %v11912_v58 }
 0x6b7   : > { %8830 = vmatmul.msk.f32.gmra.mxu0 %vm285_vm1, %v8764_v53  ;;  %8895 = vmatmul.msk.f32.gmra.mxu1 %vm285_vm1, %v8764_v53 }
 0x6b8   : > { %v4348_v11 = vpop.f32.mrf.mxu2  ;;  %v4557_v57 = vpop.f32.mrf.mxu3 }
 0x6b9   : > { %v4713_v59 = vadd.f32 %v4348_v11, %v13190_v29  ;;  %v4714_v52 = vadd.f32 %v4557_v57, %v13191_v17  ;;  %v13194_v57 = vld [vmem:[#allocation12_spill] sm:$0xff] }
 0x6bb   : > { %v11922_v37 = vadd.f32 %v5161_v12, %v4713_v59  ;;  %v11924_v46 = vadd.f32 %v5370_v26, %v4714_v52  ;;  %v13195_v12 = vld [vmem:[#allocation13_spill] sm:$0xff] }
 0x6bc   : > { %v5164_v58 = vpop.f32.mrf.mxu0  ;;  %v5373_v0 = vpop.f32.mrf.mxu1  ;;  %v8571_v59 = vld [vmem:[%s9358_s19 + $0xf01] sm:$0xff] }
 0x6bd   : > { %13192 = vst [vmem:[#allocation8_spill] sm:$0xff] %v11922_v37  ;;  %8636 = vmatmul.msk.f32.gmra.mxu2 %vm285_vm1, %v8570_v1  ;;  %8701 = vmatmul.msk.f32.gmra.mxu3 %vm285_vm1, %v8570_v1  ;;  %v8766_v1 = vld [vmem:[%s9358_s19 + $0xdf0] sm:$0xff] }
 0x6be   : > { %13193 = vst [vmem:[#allocation9_spill] sm:$0xff] %v11924_v46 }
 0x6bf   : > { %8831 = vmatmul.msk.f32.gmra.mxu0 %vm285_vm1, %v8765_v2  ;;  %8896 = vmatmul.msk.f32.gmra.mxu1 %vm285_vm1, %v8765_v2 }
 0x6c0   : > { %v4351_v53 = vpop.f32.mrf.mxu2  ;;  %v4560_v11 = vpop.f32.mrf.mxu3 }
 0x6c1   : > { %v4715_v29 = vadd.f32 %v4351_v53, %v13194_v57  ;;  %v4716_v26 = vadd.f32 %v4560_v11, %v13195_v12  ;;  %v13198_v11 = vld [vmem:[#allocation14_spill] sm:$0xff] }
 0x6c3   : > { %v11934_v17 = vadd.f32 %v5164_v58, %v4715_v29  ;;  %v11936_v52 = vadd.f32 %v5373_v0, %v4716_v26  ;;  %v13199_v58 = vld [vmem:[#allocation15_spill] sm:$0xff] }
 0x6c4   : > { %v5167_v46 = vpop.f32.mrf.mxu0  ;;  %v5376_v37 = vpop.f32.mrf.mxu1  ;;  %v8572_v29 = vld [vmem:[%s9358_s19 + $0xf11] sm:$0xff] }
 0x6c5   : > { %13196 = vst [vmem:[#allocation10_spill] sm:$0xff] %v11934_v17  ;;  %8637 = vmatmul.msk.f32.gmra.mxu2 %vm285_vm1, %v8571_v59  ;;  %8702 = vmatmul.msk.f32.gmra.mxu3 %vm285_vm1, %v8571_v59  ;;  %v8767_v59 = vld [vmem:[%s9358_s19 + $0xe00] sm:$0xff] }
 0x6c6   : > { %13197 = vst [vmem:[#allocation11_spill] sm:$0xff] %v11936_v52 }
 0x6c7   : > { %8832 = vmatmul.msk.f32.gmra.mxu0 %vm285_vm1, %v8766_v1  ;;  %8897 = vmatmul.msk.f32.gmra.mxu1 %vm285_vm1, %v8766_v1 }
 0x6c8   : > { %v4354_v2 = vpop.f32.mrf.mxu2  ;;  %v4563_v53 = vpop.f32.mrf.mxu3 }
 0x6c9   : > { %v4717_v57 = vadd.f32 %v4354_v2, %v13198_v11  ;;  %v4718_v0 = vadd.f32 %v4563_v53, %v13199_v58  ;;  %v13202_v53 = vld [vmem:[#allocation16_spill] sm:$0xff] }
 0x6cb   : > { %v11946_v12 = vadd.f32 %v5167_v46, %v4717_v57  ;;  %v11948_v26 = vadd.f32 %v5376_v37, %v4718_v0  ;;  %v13203_v46 = vld [vmem:[#allocation17_spill] sm:$0xff] }
 0x6cc   : > { %v5170_v52 = vpop.f32.mrf.mxu0  ;;  %v5379_v17 = vpop.f32.mrf.mxu1  ;;  %v8573_v57 = vld [vmem:[%s9358_s19 + $0x10e1] sm:$0xff] }
 0x6cd   : > { %13200 = vst [vmem:[#allocation12_spill] sm:$0xff] %v11946_v12  ;;  %8638 = vmatmul.msk.f32.gmra.mxu2 %vm285_vm1, %v8572_v29  ;;  %8703 = vmatmul.msk.f32.gmra.mxu3 %vm285_vm1, %v8572_v29  ;;  %v8768_v29 = vld [vmem:[%s9358_s19 + $0xfd0] sm:$0xff] }
 0x6ce   : > { %13201 = vst [vmem:[#allocation13_spill] sm:$0xff] %v11948_v26 }
 0x6cf   : > { %8833 = vmatmul.msk.f32.gmra.mxu0 %vm285_vm1, %v8767_v59  ;;  %8898 = vmatmul.msk.f32.gmra.mxu1 %vm285_vm1, %v8767_v59 }
 0x6d0   : > { %v4357_v1 = vpop.f32.mrf.mxu2  ;;  %v4566_v2 = vpop.f32.mrf.mxu3 }
 0x6d1   : > { %v4719_v11 = vadd.f32 %v4357_v1, %v13202_v53  ;;  %v4720_v37 = vadd.f32 %v4566_v2, %v13203_v46  ;;  %v13206_v2 = vld [vmem:[#allocation18_spill] sm:$0xff] }
 0x6d3   : > { %v11958_v58 = vadd.f32 %v5170_v52, %v4719_v11  ;;  %v11960_v0 = vadd.f32 %v5379_v17, %v4720_v37  ;;  %v13207_v52 = vld [vmem:[#allocation19_spill] sm:$0xff] }
 0x6d4   : > { %v5173_v26 = vpop.f32.mrf.mxu0  ;;  %v5382_v12 = vpop.f32.mrf.mxu1  ;;  %v8574_v11 = vld [vmem:[%s9358_s19 + $0x10f1] sm:$0xff] }
 0x6d5   : > { %13204 = vst [vmem:[#allocation14_spill] sm:$0xff] %v11958_v58  ;;  %8639 = vmatmul.msk.f32.gmra.mxu2 %vm285_vm1, %v8573_v57  ;;  %8704 = vmatmul.msk.f32.gmra.mxu3 %vm285_vm1, %v8573_v57  ;;  %v8769_v57 = vld [vmem:[%s9358_s19 + $0xfe0] sm:$0xff] }
 0x6d6   : > { %13205 = vst [vmem:[#allocation15_spill] sm:$0xff] %v11960_v0 }
 0x6d7   : > { %8834 = vmatmul.msk.f32.gmra.mxu0 %vm285_vm1, %v8768_v29  ;;  %8899 = vmatmul.msk.f32.gmra.mxu1 %vm285_vm1, %v8768_v29 }
 0x6d8   : > { %v4360_v59 = vpop.f32.mrf.mxu2  ;;  %v4569_v1 = vpop.f32.mrf.mxu3 }
 0x6d9   : > { %v4721_v53 = vadd.f32 %v4360_v59, %v13206_v2  ;;  %v4722_v17 = vadd.f32 %v4569_v1, %v13207_v52  ;;  %v13210_v1 = vld [vmem:[#allocation20_spill] sm:$0xff] }
 0x6db   : > { %v11970_v46 = vadd.f32 %v5173_v26, %v4721_v53  ;;  %v11972_v37 = vadd.f32 %v5382_v12, %v4722_v17  ;;  %v13211_v26 = vld [vmem:[#allocation21_spill] sm:$0xff] }
 0x6dc   : > { %v5176_v0 = vpop.f32.mrf.mxu0  ;;  %v5385_v58 = vpop.f32.mrf.mxu1  ;;  %v8575_v53 = vld [vmem:[%s9358_s19 + $0x1101] sm:$0xff] }
 0x6dd   : > { %13208 = vst [vmem:[#allocation16_spill] sm:$0xff] %v11970_v46  ;;  %8640 = vmatmul.msk.f32.gmra.mxu2 %vm285_vm1, %v8574_v11  ;;  %8705 = vmatmul.msk.f32.gmra.mxu3 %vm285_vm1, %v8574_v11  ;;  %v8770_v11 = vld [vmem:[%s9358_s19 + $0xff0] sm:$0xff] }
 0x6de   : > { %13209 = vst [vmem:[#allocation17_spill] sm:$0xff] %v11972_v37 }
 0x6df   : > { %8835 = vmatmul.msk.f32.gmra.mxu0 %vm285_vm1, %v8769_v57  ;;  %8900 = vmatmul.msk.f32.gmra.mxu1 %vm285_vm1, %v8769_v57 }
 0x6e0   : > { %v4363_v29 = vpop.f32.mrf.mxu2  ;;  %v4572_v59 = vpop.f32.mrf.mxu3 }
 0x6e1   : > { %v4723_v2 = vadd.f32 %v4363_v29, %v13210_v1  ;;  %v4724_v12 = vadd.f32 %v4572_v59, %v13211_v26  ;;  %v13214_v59 = vld [vmem:[#allocation22_spill] sm:$0xff] }
 0x6e3   : > { %v11982_v52 = vadd.f32 %v5176_v0, %v4723_v2  ;;  %v11984_v17 = vadd.f32 %v5385_v58, %v4724_v12  ;;  %v13215_v0 = vld [vmem:[#allocation23_spill] sm:$0xff] }
 0x6e4   : > { %v5179_v37 = vpop.f32.mrf.mxu0  ;;  %v5388_v46 = vpop.f32.mrf.mxu1  ;;  %v8576_v2 = vld [vmem:[%s9358_s19 + $0x1111] sm:$0xff] }
 0x6e5   : > { %13212 = vst [vmem:[#allocation18_spill] sm:$0xff] %v11982_v52  ;;  %8641 = vmatmul.msk.f32.gmra.mxu2 %vm285_vm1, %v8575_v53  ;;  %8706 = vmatmul.msk.f32.gmra.mxu3 %vm285_vm1, %v8575_v53  ;;  %v8771_v53 = vld [vmem:[%s9358_s19 + $0x1000] sm:$0xff] }
 0x6e6   : > { %13213 = vst [vmem:[#allocation19_spill] sm:$0xff] %v11984_v17 }
 0x6e7   : > { %8836 = vmatmul.msk.f32.gmra.mxu0 %vm285_vm1, %v8770_v11  ;;  %8901 = vmatmul.msk.f32.gmra.mxu1 %vm285_vm1, %v8770_v11 }
 0x6e8   : > { %v4366_v57 = vpop.f32.mrf.mxu2  ;;  %v4575_v29 = vpop.f32.mrf.mxu3 }
 0x6e9   : > { %v4725_v1 = vadd.f32 %v4366_v57, %v13214_v59  ;;  %v4726_v58 = vadd.f32 %v4575_v29, %v13215_v0  ;;  %v13218_v29 = vld [vmem:[#allocation24_spill] sm:$0xff] }
 0x6eb   : > { %v11994_v26 = vadd.f32 %v5179_v37, %v4725_v1  ;;  %v11996_v12 = vadd.f32 %v5388_v46, %v4726_v58  ;;  %v13219_v37 = vld [vmem:[#allocation25_spill] sm:$0xff] }
 0x6ec   : > { %v5182_v17 = vpop.f32.mrf.mxu0  ;;  %v5391_v52 = vpop.f32.mrf.mxu1  ;;  %v8577_v1 = vld [vmem:[%s9358_s19 + $0x1121] sm:$0xff] }
 0x6ed   : > { %13216 = vst [vmem:[#allocation20_spill] sm:$0xff] %v11994_v26  ;;  %8642 = vmatmul.msk.f32.gmra.mxu2 %vm285_vm1, %v8576_v2  ;;  %8707 = vmatmul.msk.f32.gmra.mxu3 %vm285_vm1, %v8576_v2  ;;  %v8772_v2 = vld [vmem:[%s9358_s19 + $0x1010] sm:$0xff] }
 0x6ee   : > { %13217 = vst [vmem:[#allocation21_spill] sm:$0xff] %v11996_v12 }
 0x6ef   : > { %8837 = vmatmul.msk.f32.gmra.mxu0 %vm285_vm1, %v8771_v53  ;;  %8902 = vmatmul.msk.f32.gmra.mxu1 %vm285_vm1, %v8771_v53 }
 0x6f0   : > { %v4369_v11 = vpop.f32.mrf.mxu2  ;;  %v4578_v57 = vpop.f32.mrf.mxu3 }
 0x6f1   : > { %v4727_v59 = vadd.f32 %v4369_v11, %v13218_v29  ;;  %v4728_v46 = vadd.f32 %v4578_v57, %v13219_v37  ;;  %v13222_v57 = vld [vmem:[#allocation26_spill] sm:$0xff] }
 0x6f3   : > { %v12006_v0 = vadd.f32 %v5182_v17, %v4727_v59  ;;  %v12008_v58 = vadd.f32 %v5391_v52, %v4728_v46  ;;  %v13223_v17 = vld [vmem:[#allocation27_spill] sm:$0xff] }
 0x6f4   : > { %v5185_v12 = vpop.f32.mrf.mxu0  ;;  %v5394_v26 = vpop.f32.mrf.mxu1  ;;  %v8578_v59 = vld [vmem:[%s9358_s19 + $0x1131] sm:$0xff] }
 0x6f5   : > { %13220 = vst [vmem:[#allocation22_spill] sm:$0xff] %v12006_v0  ;;  %8643 = vmatmul.msk.f32.gmra.mxu2 %vm285_vm1, %v8577_v1  ;;  %8708 = vmatmul.msk.f32.gmra.mxu3 %vm285_vm1, %v8577_v1  ;;  %v8773_v1 = vld [vmem:[%s9358_s19 + $0x1020] sm:$0xff] }
 0x6f6   : > { %13221 = vst [vmem:[#allocation23_spill] sm:$0xff] %v12008_v58 }
 0x6f7   : > { %8838 = vmatmul.msk.f32.gmra.mxu0 %vm285_vm1, %v8772_v2  ;;  %8903 = vmatmul.msk.f32.gmra.mxu1 %vm285_vm1, %v8772_v2 }
 0x6f8   : > { %v4372_v53 = vpop.f32.mrf.mxu2  ;;  %v4581_v11 = vpop.f32.mrf.mxu3 }
 0x6f9   : > { %v4729_v29 = vadd.f32 %v4372_v53, %v13222_v57  ;;  %v4730_v52 = vadd.f32 %v4581_v11, %v13223_v17 }
 0x6fb   : > { %v12018_v37 = vadd.f32 %v5185_v12, %v4729_v29  ;;  %v12020_v46 = vadd.f32 %v5394_v26, %v4730_v52  ;;  %v8579_v12 = vld [vmem:[%s9358_s19 + $0x1141] sm:$0xff] }
 0x6fc   : > { %v5188_v58 = vpop.f32.mrf.mxu0  ;;  %v5397_v0 = vpop.f32.mrf.mxu1 }
 0x6fd   : > { %8644 = vmatmul.msk.f32.gmra.mxu2 %vm285_vm1, %v8578_v59  ;;  %8709 = vmatmul.msk.f32.gmra.mxu3 %vm285_vm1, %v8578_v59  ;;  %v8774_v59 = vld [vmem:[%s9358_s19 + $0x1030] sm:$0xff] }
 0x6ff   : > { %8839 = vmatmul.msk.f32.gmra.mxu0 %vm285_vm1, %v8773_v1  ;;  %8904 = vmatmul.msk.f32.gmra.mxu1 %vm285_vm1, %v8773_v1 }
 0x700   : > { %v4375_v2 = vpop.f32.mrf.mxu2  ;;  %v4584_v53 = vpop.f32.mrf.mxu3 }
 0x701   : > { %v4731_v11 = vadd.f32 %v4375_v2, %v11255_v16  ;;  %v4732_v26 = vadd.f32 %v4584_v53, %v11257_v14 }
 0x703   : > { %v12030_v57 = vadd.f32 %v5188_v58, %v4731_v11  ;;  %v12032_v29 = vadd.f32 %v5397_v0, %v4732_v26  ;;  %v8580_v58 = vld [vmem:[%s9358_s19 + $0x1151] sm:$0xff] }
 0x704   : > { %v5191_v17 = vpop.f32.mrf.mxu0  ;;  %v5400_v52 = vpop.f32.mrf.mxu1 }
 0x705   : > { %8645 = vmatmul.msk.f32.gmra.mxu2 %vm285_vm1, %v8579_v12  ;;  %8710 = vmatmul.msk.f32.gmra.mxu3 %vm285_vm1, %v8579_v12  ;;  %v8775_v12 = vld [vmem:[%s9358_s19 + $0x1040] sm:$0xff] }
 0x707   : > { %8840 = vmatmul.msk.f32.gmra.mxu0 %vm285_vm1, %v8774_v59  ;;  %8905 = vmatmul.msk.f32.gmra.mxu1 %vm285_vm1, %v8774_v59 }
 0x708   : > { %v4378_v16 = vpop.f32.mrf.mxu2  ;;  %v4587_v1 = vpop.f32.mrf.mxu3 }
 0x709   : > { %v4733_v14 = vadd.f32 %v4378_v16, %v11272_v42  ;;  %v4734_v0 = vadd.f32 %v4587_v1, %v11274_v62  ;;  %v13226_v62 = vld [vmem:[#allocation28_spill] sm:$0xff]  ;;  %v8907_v1 = vld [vmem:[%s9358_s19 + $0xa0] sm:$0xff] }
 0x70b   : > { %v12042_v2 = vadd.f32 %v5191_v17, %v4733_v14  ;;  %v12044_v53 = vadd.f32 %v5400_v52, %v4734_v0  ;;  %v13227_v17 = vld [vmem:[#allocation29_spill] sm:$0xff] }
 0x70c   : > { %v5194_v11 = vpop.f32.mrf.mxu0  ;;  %v5403_v26 = vpop.f32.mrf.mxu1 }
 0x70d   : > { %13224 = vst [vmem:[#allocation24_spill] sm:$0xff] %v12042_v2  ;;  %8646 = vmatmul.msk.f32.gmra.mxu2 %vm285_vm1, %v8580_v58  ;;  %8711 = vmatmul.msk.f32.gmra.mxu3 %vm285_vm1, %v8580_v58  ;;  %v9102_v58 = vld [vmem:[%s9358_s19 + $0x11] sm:$0xff] }
 0x70e   : > { %13225 = vst [vmem:[#allocation25_spill] sm:$0xff] %v12044_v53 }
 0x70f   : > { %8841 = vmatmul.msk.f32.gmra.mxu0 %vm285_vm1, %v8775_v12  ;;  %8906 = vmatmul.msk.f32.gmra.mxu1 %vm285_vm1, %v8775_v12 }
 0x710   : > { %v4381_v42 = vpop.f32.mrf.mxu2  ;;  %v4590_v59 = vpop.f32.mrf.mxu3 }
 0x711   : > { %v4735_v16 = vadd.f32 %v4381_v42, %v13226_v62  ;;  %v4736_v52 = vadd.f32 %v4590_v59, %v13227_v17  ;;  %v13230_v59 = vld [vmem:[#allocation30_spill] sm:$0xff] }
 0x713   : > { %v12054_v14 = vadd.f32 %v5194_v11, %v4735_v16  ;;  %v12056_v0 = vadd.f32 %v5403_v26, %v4736_v52  ;;  %v13231_v11 = vld [vmem:[#allocation31_spill] sm:$0xff] }
 0x714   : > { %v5197_v53 = vpop.f32.mrf.mxu0  ;;  %v5406_v2 = vpop.f32.mrf.mxu1  ;;  %v8908_v16 = vld [vmem:[%s9358_s19 + $0xb0] sm:$0xff] }
 0x715   : > { %13228 = vst [vmem:[#allocation26_spill] sm:$0xff] %v12054_v14  ;;  %8973 = vmatmul.msk.f32.vlgmr.msra.gmra.mxu2 %vm285_vm1, %v8907_v1  ;;  %9038 = vmatmul.msk.f32.vlgmr.msra.gmra.mxu3 %vm285_vm1, %v8907_v1  ;;  %v9103_v1 = vld [vmem:[%s9358_s19 + $0x21] sm:$0xff] }
 0x716   : > { %13229 = vst [vmem:[#allocation27_spill] sm:$0xff] %v12056_v0 }
 0x717   : > { %9168 = vmatmul.msk.f32.vlgmr.msra.gmra.mxu0 %vm285_vm1, %v9102_v58  ;;  %9233 = vmatmul.msk.f32.vlgmr.msra.gmra.mxu1 %vm285_vm1, %v9102_v58 }
 0x718   : > { %v4384_v12 = vpop.f32.mrf.mxu2  ;;  %v4593_v42 = vpop.f32.mrf.mxu3 }
 0x719   : > { %v4737_v62 = vadd.f32 %v4384_v12, %v13230_v59  ;;  %v4738_v26 = vadd.f32 %v4593_v42, %v13231_v11  ;;  %v13234_v42 = vld [vmem:[#allocation32_spill] sm:$0xff] }
 0x71b   : > { %v12066_v17 = vadd.f32 %v5197_v53, %v4737_v62  ;;  %v12068_v52 = vadd.f32 %v5406_v2, %v4738_v26  ;;  %v13235_v53 = vld [vmem:[#allocation33_spill] sm:$0xff] }
 0x71c   : > { %v5200_v0 = vpop.f32.mrf.mxu0  ;;  %v5409_v14 = vpop.f32.mrf.mxu1  ;;  %v8909_v62 = vld [vmem:[%s9358_s19 + $0xc0] sm:$0xff] }
 0x71d   : > { %13232 = vst [vmem:[#allocation28_spill] sm:$0xff] %v12066_v17  ;;  %8974 = vmatmul.msk.f32.gmra.mxu2 %vm285_vm1, %v8908_v16  ;;  %9039 = vmatmul.msk.f32.gmra.mxu3 %vm285_vm1, %v8908_v16  ;;  %v9104_v16 = vld [vmem:[%s9358_s19 + $0x31] sm:$0xff] }
 0x71e   : > { %13233 = vst [vmem:[#allocation29_spill] sm:$0xff] %v12068_v52 }
 0x71f   : > { %9169 = vmatmul.msk.f32.gmra.mxu0 %vm285_vm1, %v9103_v1  ;;  %9234 = vmatmul.msk.f32.gmra.mxu1 %vm285_vm1, %v9103_v1 }
 0x720   : > { %v4387_v58 = vpop.f32.mrf.mxu2  ;;  %v4596_v12 = vpop.f32.mrf.mxu3 }
 0x721   : > { %v4739_v59 = vadd.f32 %v4387_v58, %v13234_v42  ;;  %v4740_v2 = vadd.f32 %v4596_v12, %v13235_v53  ;;  %v13238_v12 = vld [vmem:[#allocation34_spill] sm:$0xff] }
 0x723   : > { %v12078_v11 = vadd.f32 %v5200_v0, %v4739_v59  ;;  %v12080_v26 = vadd.f32 %v5409_v14, %v4740_v2  ;;  %v13239_v0 = vld [vmem:[#allocation35_spill] sm:$0xff] }
 0x724   : > { %v5203_v52 = vpop.f32.mrf.mxu0  ;;  %v5412_v17 = vpop.f32.mrf.mxu1  ;;  %v8910_v59 = vld [vmem:[%s9358_s19 + $0xd0] sm:$0xff] }
 0x725   : > { %13236 = vst [vmem:[#allocation30_spill] sm:$0xff] %v12078_v11  ;;  %8975 = vmatmul.msk.f32.gmra.mxu2 %vm285_vm1, %v8909_v62  ;;  %9040 = vmatmul.msk.f32.gmra.mxu3 %vm285_vm1, %v8909_v62  ;;  %v9105_v62 = vld [vmem:[%s9358_s19 + $0x41] sm:$0xff] }
 0x726   : > { %13237 = vst [vmem:[#allocation31_spill] sm:$0xff] %v12080_v26 }
 0x727   : > { %9170 = vmatmul.msk.f32.gmra.mxu0 %vm285_vm1, %v9104_v16  ;;  %9235 = vmatmul.msk.f32.gmra.mxu1 %vm285_vm1, %v9104_v16 }
 0x728   : > { %v4390_v1 = vpop.f32.mrf.mxu2  ;;  %v4599_v58 = vpop.f32.mrf.mxu3 }
 0x729   : > { %v4741_v42 = vadd.f32 %v4390_v1, %v13238_v12  ;;  %v4742_v14 = vadd.f32 %v4599_v58, %v13239_v0  ;;  %v13242_v58 = vld [vmem:[#allocation36_spill] sm:$0xff] }
 0x72b   : > { %v12090_v53 = vadd.f32 %v5203_v52, %v4741_v42  ;;  %v12092_v2 = vadd.f32 %v5412_v17, %v4742_v14  ;;  %v13243_v52 = vld [vmem:[#allocation37_spill] sm:$0xff] }
 0x72c   : > { %v5206_v26 = vpop.f32.mrf.mxu0  ;;  %v5415_v11 = vpop.f32.mrf.mxu1  ;;  %v8911_v42 = vld [vmem:[%s9358_s19 + $0xe0] sm:$0xff] }
 0x72d   : > { %13240 = vst [vmem:[#allocation32_spill] sm:$0xff] %v12090_v53  ;;  %8976 = vmatmul.msk.f32.gmra.mxu2 %vm285_vm1, %v8910_v59  ;;  %9041 = vmatmul.msk.f32.gmra.mxu3 %vm285_vm1, %v8910_v59  ;;  %v9106_v59 = vld [vmem:[%s9358_s19 + $0x51] sm:$0xff] }
 0x72e   : > { %13241 = vst [vmem:[#allocation33_spill] sm:$0xff] %v12092_v2 }
 0x72f   : > { %9171 = vmatmul.msk.f32.gmra.mxu0 %vm285_vm1, %v9105_v62  ;;  %9236 = vmatmul.msk.f32.gmra.mxu1 %vm285_vm1, %v9105_v62 }
 0x730   : > { %v4393_v16 = vpop.f32.mrf.mxu2  ;;  %v4602_v1 = vpop.f32.mrf.mxu3 }
 0x731   : > { %v4743_v12 = vadd.f32 %v4393_v16, %v13242_v58  ;;  %v4744_v17 = vadd.f32 %v4602_v1, %v13243_v52  ;;  %v13246_v1 = vld [vmem:[#allocation38_spill] sm:$0xff] }
 0x733   : > { %v12102_v0 = vadd.f32 %v5206_v26, %v4743_v12  ;;  %v12104_v14 = vadd.f32 %v5415_v11, %v4744_v17  ;;  %v13247_v26 = vld [vmem:[#allocation39_spill] sm:$0xff] }
 0x734   : > { %v5209_v2 = vpop.f32.mrf.mxu0  ;;  %v5418_v53 = vpop.f32.mrf.mxu1  ;;  %v8912_v12 = vld [vmem:[%s9358_s19 + $0xf0] sm:$0xff] }
 0x735   : > { %13244 = vst [vmem:[#allocation34_spill] sm:$0xff] %v12102_v0  ;;  %8977 = vmatmul.msk.f32.gmra.mxu2 %vm285_vm1, %v8911_v42  ;;  %9042 = vmatmul.msk.f32.gmra.mxu3 %vm285_vm1, %v8911_v42  ;;  %v9107_v42 = vld [vmem:[%s9358_s19 + $0x61] sm:$0xff] }
 0x736   : > { %13245 = vst [vmem:[#allocation35_spill] sm:$0xff] %v12104_v14 }
 0x737   : > { %9172 = vmatmul.msk.f32.gmra.mxu0 %vm285_vm1, %v9106_v59  ;;  %9237 = vmatmul.msk.f32.gmra.mxu1 %vm285_vm1, %v9106_v59 }
 0x738   : > { %v4396_v62 = vpop.f32.mrf.mxu2  ;;  %v4605_v16 = vpop.f32.mrf.mxu3 }
 0x739   : > { %v4745_v58 = vadd.f32 %v4396_v62, %v13246_v1  ;;  %v4746_v11 = vadd.f32 %v4605_v16, %v13247_v26  ;;  %v13250_v16 = vld [vmem:[#allocation40_spill] sm:$0xff] }
 0x73b   : > { %v12114_v52 = vadd.f32 %v5209_v2, %v4745_v58  ;;  %v12116_v17 = vadd.f32 %v5418_v53, %v4746_v11  ;;  %v13251_v2 = vld [vmem:[#allocation41_spill] sm:$0xff] }
 0x73c   : > { %v5212_v14 = vpop.f32.mrf.mxu0  ;;  %v5421_v0 = vpop.f32.mrf.mxu1  ;;  %v8913_v58 = vld [vmem:[%s9358_s19 + $0x100] sm:$0xff] }
 0x73d   : > { %13248 = vst [vmem:[#allocation36_spill] sm:$0xff] %v12114_v52  ;;  %8978 = vmatmul.msk.f32.gmra.mxu2 %vm285_vm1, %v8912_v12  ;;  %9043 = vmatmul.msk.f32.gmra.mxu3 %vm285_vm1, %v8912_v12  ;;  %v9108_v12 = vld [vmem:[%s9358_s19 + $0x71] sm:$0xff] }
 0x73e   : > { %13249 = vst [vmem:[#allocation37_spill] sm:$0xff] %v12116_v17 }
 0x73f   : > { %9173 = vmatmul.msk.f32.gmra.mxu0 %vm285_vm1, %v9107_v42  ;;  %9238 = vmatmul.msk.f32.gmra.mxu1 %vm285_vm1, %v9107_v42 }
 0x740   : > { %v4399_v59 = vpop.f32.mrf.mxu2  ;;  %v4608_v62 = vpop.f32.mrf.mxu3 }
 0x741   : > { %v4747_v1 = vadd.f32 %v4399_v59, %v13250_v16  ;;  %v4748_v53 = vadd.f32 %v4608_v62, %v13251_v2  ;;  %v13254_v62 = vld [vmem:[#allocation42_spill] sm:$0xff] }
 0x743   : > { %v12126_v26 = vadd.f32 %v5212_v14, %v4747_v1  ;;  %v12128_v11 = vadd.f32 %v5421_v0, %v4748_v53  ;;  %v13255_v14 = vld [vmem:[#allocation43_spill] sm:$0xff] }
 0x744   : > { %v5215_v17 = vpop.f32.mrf.mxu0  ;;  %v5424_v52 = vpop.f32.mrf.mxu1  ;;  %v8914_v1 = vld [vmem:[%s9358_s19 + $0x110] sm:$0xff] }
 0x745   : > { %13252 = vst [vmem:[#allocation38_spill] sm:$0xff] %v12126_v26  ;;  %8979 = vmatmul.msk.f32.gmra.mxu2 %vm285_vm1, %v8913_v58  ;;  %9044 = vmatmul.msk.f32.gmra.mxu3 %vm285_vm1, %v8913_v58  ;;  %v9109_v58 = vld [vmem:[%s9358_s19 + $0x81] sm:$0xff] }
 0x746   : > { %13253 = vst [vmem:[#allocation39_spill] sm:$0xff] %v12128_v11 }
 0x747   : > { %9174 = vmatmul.msk.f32.gmra.mxu0 %vm285_vm1, %v9108_v12  ;;  %9239 = vmatmul.msk.f32.gmra.mxu1 %vm285_vm1, %v9108_v12 }
 0x748   : > { %v4402_v42 = vpop.f32.mrf.mxu2  ;;  %v4611_v59 = vpop.f32.mrf.mxu3 }
 0x749   : > { %v4749_v16 = vadd.f32 %v4402_v42, %v13254_v62  ;;  %v4750_v0 = vadd.f32 %v4611_v59, %v13255_v14  ;;  %v13258_v59 = vld [vmem:[#allocation44_spill] sm:$0xff] }
 0x74b   : > { %v12138_v2 = vadd.f32 %v5215_v17, %v4749_v16  ;;  %v12140_v53 = vadd.f32 %v5424_v52, %v4750_v0  ;;  %v13259_v17 = vld [vmem:[#allocation45_spill] sm:$0xff] }
 0x74c   : > { %v5218_v11 = vpop.f32.mrf.mxu0  ;;  %v5427_v26 = vpop.f32.mrf.mxu1  ;;  %v8915_v16 = vld [vmem:[%s9358_s19 + $0x2e0] sm:$0xff] }
 0x74d   : > { %13256 = vst [vmem:[#allocation40_spill] sm:$0xff] %v12138_v2  ;;  %8980 = vmatmul.msk.f32.gmra.mxu2 %vm285_vm1, %v8914_v1  ;;  %9045 = vmatmul.msk.f32.gmra.mxu3 %vm285_vm1, %v8914_v1  ;;  %v9110_v1 = vld [vmem:[%s9358_s19 + $0x251] sm:$0xff] }
 0x74e   : > { %13257 = vst [vmem:[#allocation41_spill] sm:$0xff] %v12140_v53 }
 0x74f   : > { %9175 = vmatmul.msk.f32.gmra.mxu0 %vm285_vm1, %v9109_v58  ;;  %9240 = vmatmul.msk.f32.gmra.mxu1 %vm285_vm1, %v9109_v58 }
 0x750   : > { %v4405_v12 = vpop.f32.mrf.mxu2  ;;  %v4614_v42 = vpop.f32.mrf.mxu3 }
 0x751   : > { %v4751_v62 = vadd.f32 %v4405_v12, %v13258_v59  ;;  %v4752_v52 = vadd.f32 %v4614_v42, %v13259_v17  ;;  %v13262_v42 = vld [vmem:[#allocation46_spill] sm:$0xff] }
 0x753   : > { %v12150_v14 = vadd.f32 %v5218_v11, %v4751_v62  ;;  %v12152_v0 = vadd.f32 %v5427_v26, %v4752_v52  ;;  %v13263_v11 = vld [vmem:[#allocation47_spill] sm:$0xff] }
 0x754   : > { %v5221_v53 = vpop.f32.mrf.mxu0  ;;  %v5430_v2 = vpop.f32.mrf.mxu1  ;;  %v8916_v62 = vld [vmem:[%s9358_s19 + $0x2f0] sm:$0xff] }
 0x755   : > { %13260 = vst [vmem:[#allocation42_spill] sm:$0xff] %v12150_v14  ;;  %8981 = vmatmul.msk.f32.gmra.mxu2 %vm285_vm1, %v8915_v16  ;;  %9046 = vmatmul.msk.f32.gmra.mxu3 %vm285_vm1, %v8915_v16  ;;  %v9111_v16 = vld [vmem:[%s9358_s19 + $0x261] sm:$0xff] }
 0x756   : > { %13261 = vst [vmem:[#allocation43_spill] sm:$0xff] %v12152_v0 }
 0x757   : > { %9176 = vmatmul.msk.f32.gmra.mxu0 %vm285_vm1, %v9110_v1  ;;  %9241 = vmatmul.msk.f32.gmra.mxu1 %vm285_vm1, %v9110_v1 }
 0x758   : > { %v4408_v58 = vpop.f32.mrf.mxu2  ;;  %v4617_v12 = vpop.f32.mrf.mxu3 }
 0x759   : > { %v4753_v59 = vadd.f32 %v4408_v58, %v13262_v42  ;;  %v4754_v26 = vadd.f32 %v4617_v12, %v13263_v11  ;;  %v13266_v12 = vld [vmem:[#allocation48_spill] sm:$0xff] }
 0x75b   : > { %v12162_v17 = vadd.f32 %v5221_v53, %v4753_v59  ;;  %v12164_v52 = vadd.f32 %v5430_v2, %v4754_v26  ;;  %v13267_v53 = vld [vmem:[#allocation49_spill] sm:$0xff] }
 0x75c   : > { %v5224_v0 = vpop.f32.mrf.mxu0  ;;  %v5433_v14 = vpop.f32.mrf.mxu1  ;;  %v8917_v59 = vld [vmem:[%s9358_s19 + $0x300] sm:$0xff] }
 0x75d   : > { %13264 = vst [vmem:[#allocation44_spill] sm:$0xff] %v12162_v17  ;;  %8982 = vmatmul.msk.f32.gmra.mxu2 %vm285_vm1, %v8916_v62  ;;  %9047 = vmatmul.msk.f32.gmra.mxu3 %vm285_vm1, %v8916_v62  ;;  %v9112_v62 = vld [vmem:[%s9358_s19 + $0x271] sm:$0xff] }
 0x75e   : > { %13265 = vst [vmem:[#allocation45_spill] sm:$0xff] %v12164_v52 }
 0x75f   : > { %9177 = vmatmul.msk.f32.gmra.mxu0 %vm285_vm1, %v9111_v16  ;;  %9242 = vmatmul.msk.f32.gmra.mxu1 %vm285_vm1, %v9111_v16 }
 0x760   : > { %v4411_v1 = vpop.f32.mrf.mxu2  ;;  %v4620_v58 = vpop.f32.mrf.mxu3 }
 0x761   : > { %v4755_v42 = vadd.f32 %v4411_v1, %v13266_v12  ;;  %v4756_v2 = vadd.f32 %v4620_v58, %v13267_v53  ;;  %v13270_v58 = vld [vmem:[#allocation50_spill] sm:$0xff] }
 0x763   : > { %v12174_v11 = vadd.f32 %v5224_v0, %v4755_v42  ;;  %v12176_v26 = vadd.f32 %v5433_v14, %v4756_v2  ;;  %v13271_v0 = vld [vmem:[#allocation51_spill] sm:$0xff] }
 0x764   : > { %v5227_v52 = vpop.f32.mrf.mxu0  ;;  %v5436_v17 = vpop.f32.mrf.mxu1  ;;  %v8918_v42 = vld [vmem:[%s9358_s19 + $0x310] sm:$0xff] }
 0x765   : > { %13268 = vst [vmem:[#allocation46_spill] sm:$0xff] %v12174_v11  ;;  %8983 = vmatmul.msk.f32.gmra.mxu2 %vm285_vm1, %v8917_v59  ;;  %9048 = vmatmul.msk.f32.gmra.mxu3 %vm285_vm1, %v8917_v59  ;;  %v9113_v59 = vld [vmem:[%s9358_s19 + $0x281] sm:$0xff] }
 0x766   : > { %13269 = vst [vmem:[#allocation47_spill] sm:$0xff] %v12176_v26 }
 0x767   : > { %9178 = vmatmul.msk.f32.gmra.mxu0 %vm285_vm1, %v9112_v62  ;;  %9243 = vmatmul.msk.f32.gmra.mxu1 %vm285_vm1, %v9112_v62 }
 0x768   : > { %v4414_v16 = vpop.f32.mrf.mxu2  ;;  %v4623_v1 = vpop.f32.mrf.mxu3 }
 0x769   : > { %v4757_v12 = vadd.f32 %v4414_v16, %v13270_v58  ;;  %v4758_v14 = vadd.f32 %v4623_v1, %v13271_v0  ;;  %v13274_v1 = vld [vmem:[#allocation53_spill] sm:$0xff] }
 0x76b   : > { %v12186_v53 = vadd.f32 %v5227_v52, %v4757_v12  ;;  %v12188_v2 = vadd.f32 %v5436_v17, %v4758_v14  ;;  %v13275_v52 = vld [vmem:[#allocation54_spill] sm:$0xff]  ;;  %v8919_v12 = vld [vmem:[%s9358_s19 + $0x320] sm:$0xff] }
 0x76c   : > { %v5230_v26 = vpop.f32.mrf.mxu0  ;;  %v5439_v11 = vpop.f32.mrf.mxu1 }
 0x76d   : > { %13272 = vst [vmem:[#allocation48_spill] sm:$0xff] %v12186_v53  ;;  %8984 = vmatmul.msk.f32.gmra.mxu2 %vm285_vm1, %v8918_v42  ;;  %9049 = vmatmul.msk.f32.gmra.mxu3 %vm285_vm1, %v8918_v42  ;;  %v9114_v42 = vld [vmem:[%s9358_s19 + $0x291] sm:$0xff] }
 0x76e   : > { %13273 = vst [vmem:[#allocation49_spill] sm:$0xff] %v12188_v2 }
 0x76f   : > { %9179 = vmatmul.msk.f32.gmra.mxu0 %vm285_vm1, %v9113_v59  ;;  %9244 = vmatmul.msk.f32.gmra.mxu1 %vm285_vm1, %v9113_v59 }
 0x770   : > { %v4417_v62 = vpop.f32.mrf.mxu2  ;;  %v4626_v16 = vpop.f32.mrf.mxu3 }
 0x771   : > { %v4759_v58 = vadd.f32 %v4417_v62, %v13274_v1  ;;  %v4760_v17 = vadd.f32 %v4626_v16, %v13275_v52  ;;  %v13278_v16 = vld [vmem:[#allocation57_spill] sm:$0xff] }
 0x773   : > { %v12198_v0 = vadd.f32 %v5230_v26, %v4759_v58  ;;  %v12200_v14 = vadd.f32 %v5439_v11, %v4760_v17  ;;  %v13279_v26 = vld [vmem:[#allocation58_spill] sm:$0xff]  ;;  %v8920_v58 = vld [vmem:[%s9358_s19 + $0x330] sm:$0xff] }
 0x774   : > { %v5233_v2 = vpop.f32.mrf.mxu0  ;;  %v5442_v53 = vpop.f32.mrf.mxu1 }
 0x775   : > { %13276 = vst [vmem:[#allocation50_spill] sm:$0xff] %v12198_v0  ;;  %8985 = vmatmul.msk.f32.gmra.mxu2 %vm285_vm1, %v8919_v12  ;;  %9050 = vmatmul.msk.f32.gmra.mxu3 %vm285_vm1, %v8919_v12  ;;  %v9115_v12 = vld [vmem:[%s9358_s19 + $0x2a1] sm:$0xff] }
 0x776   : > { %13277 = vst [vmem:[#allocation51_spill] sm:$0xff] %v12200_v14 }
 0x777   : > { %9180 = vmatmul.msk.f32.gmra.mxu0 %vm285_vm1, %v9114_v42  ;;  %9245 = vmatmul.msk.f32.gmra.mxu1 %vm285_vm1, %v9114_v42 }
 0x778   : > { %v4420_v59 = vpop.f32.mrf.mxu2  ;;  %v4629_v62 = vpop.f32.mrf.mxu3 }
 0x779   : > { %v4761_v1 = vadd.f32 %v4420_v59, %v13278_v16  ;;  %v4762_v11 = vadd.f32 %v4629_v62, %v13279_v26  ;;  %v13282_v62 = vld [vmem:[#allocation61_spill] sm:$0xff] }
 0x77b   : > { %v12210_v52 = vadd.f32 %v5233_v2, %v4761_v1  ;;  %v12212_v17 = vadd.f32 %v5442_v53, %v4762_v11  ;;  %v13283_v2 = vld [vmem:[#allocation62_spill] sm:$0xff]  ;;  %v8921_v1 = vld [vmem:[%s9358_s19 + $0x340] sm:$0xff] }
 0x77c   : > { %v5236_v14 = vpop.f32.mrf.mxu0  ;;  %v5445_v0 = vpop.f32.mrf.mxu1 }
 0x77d   : > { %13280 = vst [vmem:[#allocation53_spill] sm:$0xff] %v12210_v52  ;;  %8986 = vmatmul.msk.f32.gmra.mxu2 %vm285_vm1, %v8920_v58  ;;  %9051 = vmatmul.msk.f32.gmra.mxu3 %vm285_vm1, %v8920_v58  ;;  %v9116_v58 = vld [vmem:[%s9358_s19 + $0x2b1] sm:$0xff] }
 0x77e   : > { %13281 = vst [vmem:[#allocation54_spill] sm:$0xff] %v12212_v17 }
 0x77f   : > { %9181 = vmatmul.msk.f32.gmra.mxu0 %vm285_vm1, %v9115_v12  ;;  %9246 = vmatmul.msk.f32.gmra.mxu1 %vm285_vm1, %v9115_v12 }
 0x780   : > { %v4423_v42 = vpop.f32.mrf.mxu2  ;;  %v4632_v59 = vpop.f32.mrf.mxu3 }
 0x781   : > { %v4763_v16 = vadd.f32 %v4423_v42, %v13282_v62  ;;  %v4764_v53 = vadd.f32 %v4632_v59, %v13283_v2 }
 0x783   : > { %v12222_v26 = vadd.f32 %v5236_v14, %v4763_v16  ;;  %v12224_v11 = vadd.f32 %v5445_v0, %v4764_v53  ;;  %v8922_v14 = vld [vmem:[%s9358_s19 + $0x350] sm:$0xff] }
 0x784   : > { %v5239_v17 = vpop.f32.mrf.mxu0  ;;  %v5448_v52 = vpop.f32.mrf.mxu1 }
 0x785   : > { %8987 = vmatmul.msk.f32.gmra.mxu2 %vm285_vm1, %v8921_v1  ;;  %9052 = vmatmul.msk.f32.gmra.mxu3 %vm285_vm1, %v8921_v1  ;;  %v9117_v1 = vld [vmem:[%s9358_s19 + $0x2c1] sm:$0xff] }
 0x787   : > { %9182 = vmatmul.msk.f32.gmra.mxu0 %vm285_vm1, %v9116_v58  ;;  %9247 = vmatmul.msk.f32.gmra.mxu1 %vm285_vm1, %v9116_v58 }
 0x788   : > { %v4426_v12 = vpop.f32.mrf.mxu2  ;;  %v4635_v42 = vpop.f32.mrf.mxu3 }
 0x789   : > { %v4765_v59 = vadd.f32 %v4426_v12, %v11466_v4  ;;  %v4766_v0 = vadd.f32 %v4635_v42, %v11468_v28 }
 0x78b   : > { %v12234_v62 = vadd.f32 %v5239_v17, %v4765_v59  ;;  %v12236_v16 = vadd.f32 %v5448_v52, %v4766_v0  ;;  %v8923_v17 = vld [vmem:[%s9358_s19 + $0x520] sm:$0xff] }
 0x78c   : > { %v5242_v2 = vpop.f32.mrf.mxu0  ;;  %v5451_v53 = vpop.f32.mrf.mxu1 }
 0x78d   : > { %13284 = vst [vmem:[#allocation57_spill] sm:$0xff] %v12234_v62  ;;  %8988 = vmatmul.msk.f32.gmra.mxu2 %vm285_vm1, %v8922_v14  ;;  %9053 = vmatmul.msk.f32.gmra.mxu3 %vm285_vm1, %v8922_v14  ;;  %v9118_v14 = vld [vmem:[%s9358_s19 + $0x491] sm:$0xff] }
 0x78e   : > { %13285 = vst [vmem:[#allocation58_spill] sm:$0xff] %v12236_v16 }
 0x78f   : > { %9183 = vmatmul.msk.f32.gmra.mxu0 %vm285_vm1, %v9117_v1  ;;  %9248 = vmatmul.msk.f32.gmra.mxu1 %vm285_vm1, %v9117_v1 }
 0x790   : > { %v4429_v4 = vpop.f32.mrf.mxu2  ;;  %v4638_v58 = vpop.f32.mrf.mxu3 }
 0x791   : > { %v4767_v28 = vadd.f32 %v4429_v4, %v11478_v30  ;;  %v4768_v52 = vadd.f32 %v4638_v58, %v11480_v38 }
 0x793   : > { %v12246_v12 = vadd.f32 %v5242_v2, %v4767_v28  ;;  %v12248_v42 = vadd.f32 %v5451_v53, %v4768_v52  ;;  %v8924_v53 = vld [vmem:[%s9358_s19 + $0x530] sm:$0xff] }
 0x794   : > { %v6678_v59 = vpop.f32.mrf.mxu0  ;;  %v6887_v0 = vpop.f32.mrf.mxu1 }
 0x795   : > { %13286 = vst [vmem:[#allocation61_spill] sm:$0xff] %v12246_v12  ;;  %8989 = vmatmul.msk.f32.gmra.mxu2 %vm285_vm1, %v8923_v17  ;;  %9054 = vmatmul.msk.f32.gmra.mxu3 %vm285_vm1, %v8923_v17 }
 0x796   : > { %13287 = vst [vmem:[#allocation62_spill] sm:$0xff] %v12248_v42  ;;  %v9119_v42 = vld [vmem:[%s9358_s19 + $0x4a1] sm:$0xff] }
 0x797   : > { %9184 = vmatmul.msk.f32.gmra.mxu0 %vm285_vm1, %v9118_v14  ;;  %9249 = vmatmul.msk.f32.gmra.mxu1 %vm285_vm1, %v9118_v14 }
 0x798   : > { %v5866_v30 = vpop.f32.mrf.mxu2  ;;  %v6075_v1 = vpop.f32.mrf.mxu3 }
 0x799   : > { %v6267_v38 = vadd.f32 %v5866_v30, %v11490_v41  ;;  %v6268_v2 = vadd.f32 %v6075_v1, %v11492_v60 }
 0x79b   : > { %v7079_v4 = vadd.f32 %v6678_v59, %v6267_v38  ;;  %v7080_v58 = vadd.f32 %v6887_v0, %v6268_v2  ;;  %v8925_v59 = vld [vmem:[%s9358_s19 + $0x540] sm:$0xff]  ;;  %v9120_v2 = vld [vmem:[%s9358_s19 + $0x4b1] sm:$0xff] }
 0x79c   : > { %v6681_v28 = vpop.f32.mrf.mxu0  ;;  %v6890_v52 = vpop.f32.mrf.mxu1 }
 0x79d   : > { %8990 = vmatmul.msk.f32.gmra.mxu2 %vm285_vm1, %v8924_v53  ;;  %9055 = vmatmul.msk.f32.gmra.mxu3 %vm285_vm1, %v8924_v53  ;;  %v7207_v12 = vmax.f32 %v7079_v4, 0.0  ;;  %v7208_v16 = vmax.f32 %v7080_v58, 0.0  ;;  %v8926_v58 = vld [vmem:[%s9358_s19 + $0x550] sm:$0xff] }
 0x79f   : > { %9185 = vmatmul.msk.f32.gmra.mxu0 %vm285_vm1, %v9119_v42  ;;  %9250 = vmatmul.msk.f32.gmra.mxu1 %vm285_vm1, %v9119_v42 }
 0x7a0   : > { %v5869_v17 = vpop.f32.mrf.mxu2  ;;  %v6078_v41 = vpop.f32.mrf.mxu3 }
 0x7a1   : > { %v6269_v14 = vadd.f32 %v5869_v17, %v11502_v24  ;;  %v6270_v60 = vadd.f32 %v6078_v41, %v11504_v50 }
 0x7a3   : > { %v7081_v0 = vadd.f32 %v6681_v28, %v6269_v14  ;;  %v7082_v30 = vadd.f32 %v6890_v52, %v6270_v60 }
 0x7a4   : > { %v6684_v1 = vpop.f32.mrf.mxu0  ;;  %v6893_v38 = vpop.f32.mrf.mxu1 }
 0x7a5   : > { %v7209_v53 = vmax.f32 %v7081_v0, 0.0  ;;  %v7210_v62 = vmax.f32 %v7082_v30, 0.0  ;;  %8991 = vmatmul.msk.f32.gmra.mxu2 %vm285_vm1, %v8925_v59  ;;  %9056 = vmatmul.msk.f32.gmra.mxu3 %vm285_vm1, %v8925_v59  ;;  %v9121_v0 = vld [vmem:[%s9358_s19 + $0x4c1] sm:$0xff] }
 0x7a7   : > { %v7335_v42 = vadd.f32 %v7209_v53, %v7207_v12  ;;  %v7348_v24 = vadd.f32 %v7210_v62, %v7208_v16  ;;  %9186 = vmatmul.msk.f32.gmra.mxu0 %vm285_vm1, %v9120_v2  ;;  %9251 = vmatmul.msk.f32.gmra.mxu1 %vm285_vm1, %v9120_v2 }
 0x7a8   : > { %v5872_v50 = vpop.f32.mrf.mxu2  ;;  %v6081_v28 = vpop.f32.mrf.mxu3 }
 0x7a9   : > { %v6271_v52 = vadd.f32 %v5872_v50, %v11514_v8  ;;  %v6272_v4 = vadd.f32 %v6081_v28, %v11516_v10 }
 0x7ab   : > { %v7083_v17 = vadd.f32 %v6684_v1, %v6271_v52  ;;  %v7084_v41 = vadd.f32 %v6893_v38, %v6272_v4  ;;  %v8927_v38 = vld [vmem:[%s9358_s19 + $0x560] sm:$0xff]  ;;  %v9122_v52 = vld [vmem:[%s9358_s19 + $0x4d1] sm:$0xff] }
 0x7ac   : > { %v6687_v14 = vpop.f32.mrf.mxu0  ;;  %v6896_v60 = vpop.f32.mrf.mxu1 }
 0x7ad   : > { %v7211_v59 = vmax.f32 %v7083_v17, 0.0  ;;  %v7212_v12 = vmax.f32 %v7084_v41, 0.0  ;;  %8992 = vmatmul.msk.f32.gmra.mxu2 %vm285_vm1, %v8926_v58  ;;  %9057 = vmatmul.msk.f32.gmra.mxu3 %vm285_vm1, %v8926_v58 }
 0x7af   : > { %v7336_v62 = vadd.f32 %v7335_v42, %v7211_v59  ;;  %v7349_v16 = vadd.f32 %v7348_v24, %v7212_v12  ;;  %9187 = vmatmul.msk.f32.gmra.mxu0 %vm285_vm1, %v9121_v0  ;;  %9252 = vmatmul.msk.f32.gmra.mxu1 %vm285_vm1, %v9121_v0 }
 0x7b0   : > { %v5875_v8 = vpop.f32.mrf.mxu2  ;;  %v6084_v10 = vpop.f32.mrf.mxu3 }
 0x7b1   : > { %v6273_v30 = vadd.f32 %v5875_v8, %v11526_v25  ;;  %v6274_v1 = vadd.f32 %v6084_v10, %v11528_v34  ;;  %v9123_v8 = vld [vmem:[%s9358_s19 + $0x4e1] sm:$0xff] }
 0x7b3   : > { %v7085_v2 = vadd.f32 %v6687_v14, %v6273_v30  ;;  %v7086_v53 = vadd.f32 %v6896_v60, %v6274_v1  ;;  %v8928_v14 = vld [vmem:[%s9358_s19 + $0x570] sm:$0xff] }
 0x7b4   : > { %v6690_v50 = vpop.f32.mrf.mxu0  ;;  %v6899_v28 = vpop.f32.mrf.mxu1 }
 0x7b5   : > { %v7213_v4 = vmax.f32 %v7085_v2, 0.0  ;;  %v7214_v42 = vmax.f32 %v7086_v53, 0.0  ;;  %8993 = vmatmul.msk.f32.gmra.mxu2 %vm285_vm1, %v8927_v38  ;;  %9058 = vmatmul.msk.f32.gmra.mxu3 %vm285_vm1, %v8927_v38  ;;  %v8929_v2 = vld [vmem:[%s9358_s19 + $0x580] sm:$0xff] }
 0x7b7   : > { %v7337_v24 = vadd.f32 %v7336_v62, %v7213_v4  ;;  %v7350_v58 = vadd.f32 %v7349_v16, %v7214_v42  ;;  %9188 = vmatmul.msk.f32.gmra.mxu0 %vm285_vm1, %v9122_v52  ;;  %9253 = vmatmul.msk.f32.gmra.mxu1 %vm285_vm1, %v9122_v52  ;;  %v9124_v4 = vld [vmem:[%s9358_s19 + $0x4f1] sm:$0xff] }
 0x7b8   : > { %v5878_v25 = vpop.f32.mrf.mxu2  ;;  %v6087_v34 = vpop.f32.mrf.mxu3 }
 0x7b9   : > { %v6275_v17 = vadd.f32 %v5878_v25, %v11538_v6  ;;  %v6276_v41 = vadd.f32 %v6087_v34, %v11540_v56 }
 0x7bb   : > { %v7087_v60 = vadd.f32 %v6690_v50, %v6275_v17  ;;  %v7088_v0 = vadd.f32 %v6899_v28, %v6276_v41  ;;  %v8930_v41 = vld [vmem:[%s9358_s19 + $0x590] sm:$0xff] }
 0x7bc   : > { %v6693_v59 = vpop.f32.mrf.mxu0  ;;  %v6902_v12 = vpop.f32.mrf.mxu1 }
 0x7bd   : > { %v7215_v10 = vmax.f32 %v7087_v60, 0.0  ;;  %v7216_v62 = vmax.f32 %v7088_v0, 0.0  ;;  %8994 = vmatmul.msk.f32.gmra.mxu2 %vm285_vm1, %v8928_v14  ;;  %9059 = vmatmul.msk.f32.gmra.mxu3 %vm285_vm1, %v8928_v14 }
 0x7bf   : > { %v7338_v16 = vadd.f32 %v7337_v24, %v7215_v10  ;;  %v7351_v30 = vadd.f32 %v7350_v58, %v7216_v62  ;;  %9189 = vmatmul.msk.f32.gmra.mxu0 %vm285_vm1, %v9123_v8  ;;  %9254 = vmatmul.msk.f32.gmra.mxu1 %vm285_vm1, %v9123_v8 }
 0x7c0   : > { %v5881_v6 = vpop.f32.mrf.mxu2  ;;  %v6090_v56 = vpop.f32.mrf.mxu3 }
 0x7c1   : > { %v6277_v1 = vadd.f32 %v5881_v6, %v11550_v47  ;;  %v6278_v38 = vadd.f32 %v6090_v56, %v11552_v22  ;;  %v8931_v56 = vld [vmem:[%s9358_s19 + $0x760] sm:$0xff] }
 0x7c3   : > { %v7089_v53 = vadd.f32 %v6693_v59, %v6277_v1  ;;  %v7090_v50 = vadd.f32 %v6902_v12, %v6278_v38  ;;  %v9125_v12 = vld [vmem:[%s9358_s19 + $0x501] sm:$0xff] }
 0x7c4   : > { %v6696_v28 = vpop.f32.mrf.mxu0  ;;  %v6905_v52 = vpop.f32.mrf.mxu1 }
 0x7c5   : > { %v7217_v42 = vmax.f32 %v7089_v53, 0.0  ;;  %v7218_v24 = vmax.f32 %v7090_v50, 0.0  ;;  %8995 = vmatmul.msk.f32.gmra.mxu2 %vm285_vm1, %v8929_v2  ;;  %9060 = vmatmul.msk.f32.gmra.mxu3 %vm285_vm1, %v8929_v2  ;;  %v9126_v50 = vld [vmem:[%s9358_s19 + $0x6d1] sm:$0xff] }
 0x7c7   : > { %v7339_v58 = vadd.f32 %v7338_v16, %v7217_v42  ;;  %v7352_v25 = vadd.f32 %v7351_v30, %v7218_v24  ;;  %9190 = vmatmul.msk.f32.gmra.mxu0 %vm285_vm1, %v9124_v4  ;;  %9255 = vmatmul.msk.f32.gmra.mxu1 %vm285_vm1, %v9124_v4 }
 0x7c8   : > { %v5884_v47 = vpop.f32.mrf.mxu2  ;;  %v6093_v22 = vpop.f32.mrf.mxu3 }
 0x7c9   : > { %v6279_v34 = vadd.f32 %v5884_v47, %v11562_v43  ;;  %v6280_v17 = vadd.f32 %v6093_v22, %v11564_v40 }
 0x7cb   : > { %v7091_v14 = vadd.f32 %v6696_v28, %v6279_v34  ;;  %v7092_v60 = vadd.f32 %v6905_v52, %v6280_v17 }
 0x7cc   : > { %v6699_v0 = vpop.f32.mrf.mxu0  ;;  %v6908_v59 = vpop.f32.mrf.mxu1 }
 0x7cd   : > { %v7219_v8 = vmax.f32 %v7091_v14, 0.0  ;;  %v7220_v10 = vmax.f32 %v7092_v60, 0.0  ;;  %8996 = vmatmul.msk.f32.gmra.mxu2 %vm285_vm1, %v8930_v41  ;;  %9061 = vmatmul.msk.f32.gmra.mxu3 %vm285_vm1, %v8930_v41  ;;  %v9127_v41 = vld [vmem:[%s9358_s19 + $0x6e1] sm:$0xff] }
 0x7cf   : > { %v7340_v62 = vadd.f32 %v7339_v58, %v7219_v8  ;;  %v7353_v16 = vadd.f32 %v7352_v25, %v7220_v10  ;;  %9191 = vmatmul.msk.f32.gmra.mxu0 %vm285_vm1, %v9125_v12  ;;  %9256 = vmatmul.msk.f32.gmra.mxu1 %vm285_vm1, %v9125_v12  ;;  %v8932_v25 = vld [vmem:[%s9358_s19 + $0x770] sm:$0xff] }
 0x7d0   : > { %v5887_v43 = vpop.f32.mrf.mxu2  ;;  %v6096_v40 = vpop.f32.mrf.mxu3 }
 0x7d1   : > { %v6281_v30 = vadd.f32 %v5887_v43, %v11574_v49  ;;  %v6282_v6 = vadd.f32 %v6096_v40, %v11576_v54 }
 0x7d3   : > { %v7093_v1 = vadd.f32 %v6699_v0, %v6281_v30  ;;  %v7094_v38 = vadd.f32 %v6908_v59, %v6282_v6  ;;  %v8933_v0 = vld [vmem:[%s9358_s19 + $0x780] sm:$0xff] }
 0x7d4   : > { %v6702_v2 = vpop.f32.mrf.mxu0  ;;  %v6911_v53 = vpop.f32.mrf.mxu1 }
 0x7d5   : > { %v7221_v28 = vmax.f32 %v7093_v1, 0.0  ;;  %v7222_v52 = vmax.f32 %v7094_v38, 0.0  ;;  %8997 = vmatmul.msk.f32.gmra.mxu2 %vm285_vm1, %v8931_v56  ;;  %9062 = vmatmul.msk.f32.gmra.mxu3 %vm285_vm1, %v8931_v56 }
 0x7d7   : > { %v12317_v4 = vadd.f32 %v7340_v62, %v7221_v28  ;;  %v12319_v42 = vadd.f32 %v7353_v16, %v7222_v52  ;;  %9192 = vmatmul.msk.f32.gmra.mxu0 %vm285_vm1, %v9126_v50  ;;  %9257 = vmatmul.msk.f32.gmra.mxu1 %vm285_vm1, %v9126_v50  ;;  %v9128_v62 = vld [vmem:[%s9358_s19 + $0x6f1] sm:$0xff] }
 0x7d8   : > { %v5890_v49 = vpop.f32.mrf.mxu2  ;;  %v6099_v54 = vpop.f32.mrf.mxu3 }
 0x7d9   : > { %v6283_v24 = vadd.f32 %v5890_v49, %v11586_v55  ;;  %v6284_v58 = vadd.f32 %v6099_v54, %v11588_v44  ;;  %v9129_v49 = vld [vmem:[%s9358_s19 + $0x701] sm:$0xff] }
 0x7db   : > { %v7095_v47 = vadd.f32 %v6702_v2, %v6283_v24  ;;  %v7096_v22 = vadd.f32 %v6911_v53, %v6284_v58  ;;  %v8934_v2 = vld [vmem:[%s9358_s19 + $0x790] sm:$0xff] }
 0x7dc   : > { %v6705_v34 = vpop.f32.mrf.mxu0  ;;  %v6914_v17 = vpop.f32.mrf.mxu1 }
 0x7dd   : > { %8998 = vmatmul.msk.f32.gmra.mxu2 %vm285_vm1, %v8932_v25  ;;  %9063 = vmatmul.msk.f32.gmra.mxu3 %vm285_vm1, %v8932_v25  ;;  %v7223_v16 = vmax.f32 %v7095_v47, 0.0  ;;  %v7224_v43 = vmax.f32 %v7096_v22, 0.0 }
 0x7df   : > { %9193 = vmatmul.msk.f32.gmra.mxu0 %vm285_vm1, %v9127_v41  ;;  %9258 = vmatmul.msk.f32.gmra.mxu1 %vm285_vm1, %v9127_v41 }
 0x7e0   : > { %v5893_v14 = vpop.f32.mrf.mxu2  ;;  %v6102_v55 = vpop.f32.mrf.mxu3 }
 0x7e1   : > { %v6285_v60 = vadd.f32 %v5893_v14, %v11598_v61  ;;  %v6286_v44 = vadd.f32 %v6102_v55, %v11600_v7 }
 0x7e3   : > { %v7097_v59 = vadd.f32 %v6705_v34, %v6285_v60  ;;  %v7098_v12 = vadd.f32 %v6914_v17, %v6286_v44  ;;  %v8935_v34 = vld [vmem:[%s9358_s19 + $0x7a0] sm:$0xff]  ;;  %v9130_v60 = vld [vmem:[%s9358_s19 + $0x711] sm:$0xff] }
 0x7e4   : > { %v6708_v8 = vpop.f32.mrf.mxu0  ;;  %v6917_v10 = vpop.f32.mrf.mxu1 }
 0x7e5   : > { %v7225_v40 = vmax.f32 %v7097_v59, 0.0  ;;  %v7226_v30 = vmax.f32 %v7098_v12, 0.0  ;;  %8999 = vmatmul.msk.f32.gmra.mxu2 %vm285_vm1, %v8933_v0  ;;  %9064 = vmatmul.msk.f32.gmra.mxu3 %vm285_vm1, %v8933_v0 }
 0x7e7   : > { %v7361_v6 = vadd.f32 %v7225_v40, %v7223_v16  ;;  %v7374_v61 = vadd.f32 %v7226_v30, %v7224_v43  ;;  %9194 = vmatmul.msk.f32.gmra.mxu0 %vm285_vm1, %v9128_v62  ;;  %9259 = vmatmul.msk.f32.gmra.mxu1 %vm285_vm1, %v9128_v62  ;;  %v8936_v62 = vld [vmem:[%s9358_s19 + $0x7b0] sm:$0xff] }
 0x7e8   : > { %v5896_v7 = vpop.f32.mrf.mxu2  ;;  %v6105_v56 = vpop.f32.mrf.mxu3 }
 0x7e9   : > { %v6287_v1 = vadd.f32 %v5896_v7, %v11610_v3  ;;  %v6288_v38 = vadd.f32 %v6105_v56, %v11612_v48 }
 0x7eb   : > { %v7099_v53 = vadd.f32 %v6708_v8, %v6287_v1  ;;  %v7100_v50 = vadd.f32 %v6917_v10, %v6288_v38 }
 0x7ec   : > { %v6711_v28 = vpop.f32.mrf.mxu0  ;;  %v6920_v52 = vpop.f32.mrf.mxu1 }
 0x7ed   : > { %v7227_v54 = vmax.f32 %v7099_v53, 0.0  ;;  %v7228_v24 = vmax.f32 %v7100_v50, 0.0  ;;  %9000 = vmatmul.msk.f32.gmra.mxu2 %vm285_vm1, %v8934_v2  ;;  %9065 = vmatmul.msk.f32.gmra.mxu3 %vm285_vm1, %v8934_v2  ;;  %v8937_v53 = vld [vmem:[%s9358_s19 + $0x7c0] sm:$0xff] }
 0x7ef   : > { %v7362_v58 = vadd.f32 %v7361_v6, %v7227_v54  ;;  %v7375_v25 = vadd.f32 %v7374_v61, %v7228_v24  ;;  %9195 = vmatmul.msk.f32.gmra.mxu0 %vm285_vm1, %v9129_v49  ;;  %9260 = vmatmul.msk.f32.gmra.mxu1 %vm285_vm1, %v9129_v49  ;;  %v9131_v6 = vld [vmem:[%s9358_s19 + $0x721] sm:$0xff]  ;;  %v9132_v54 = vld [vmem:[%s9358_s19 + $0x731] sm:$0xff]  ;;  %v9322_v24 = vmov 64.0  }
 0x7f0   : > { %v5899_v3 = vpop.f32.mrf.mxu2  ;;  %v6108_v48 = vpop.f32.mrf.mxu3  ;;  %9312 = vrcp.f32 %v9322_v24 }
 0x7f1   : > { %v6289_v47 = vadd.f32 %v5899_v3, %v11622_v9  ;;  %v6290_v22 = vadd.f32 %v6108_v48, %v11624_v31 }
 0x7f3   : > { %v7101_v17 = vadd.f32 %v6711_v28, %v6289_v47  ;;  %v7102_v41 = vadd.f32 %v6920_v52, %v6290_v22 }
 0x7f4   : > { %v6714_v14 = vpop.f32.mrf.mxu0  ;;  %v6923_v55 = vpop.f32.mrf.mxu1 }
 0x7f5   : > { %v7229_v44 = vmax.f32 %v7101_v17, 0.0  ;;  %v7230_v0 = vmax.f32 %v7102_v41, 0.0  ;;  %9001 = vmatmul.msk.f32.gmra.mxu2 %vm285_vm1, %v8935_v34  ;;  %9066 = vmatmul.msk.f32.gmra.mxu3 %vm285_vm1, %v8935_v34  ;;  %v7342_v34 = vrot.slane %v12317_v4, 4  ;;  %v8938_v17 = vld [vmem:[%s9358_s19 + $0x7d0] sm:$0xff] }
 0x7f6   : > { %v12375_v41 = vpop.eup %9312 }
 0x7f7   : > { %v7363_v59 = vadd.f32 %v7362_v58, %v7229_v44  ;;  %v7376_v12 = vadd.f32 %v7375_v25, %v7230_v0  ;;  %9196 = vmatmul.msk.f32.gmra.mxu0 %vm285_vm1, %v9130_v60  ;;  %9261 = vmatmul.msk.f32.gmra.mxu1 %vm285_vm1, %v9130_v60  ;;  %v7355_v60 = vrot.slane %v12319_v42, 4  ;;  %vm7548_vm2 = vweird.f32 %v12375_v41 }
 0x7f8   : > { %v5902_v9 = vpop.f32.mrf.mxu2  ;;  %v6111_v31 = vpop.f32.mrf.mxu3 }
 0x7f9   : > { %v6291_v8 = vadd.f32 %v5902_v9, %v11634_v15  ;;  %v6292_v10 = vadd.f32 %v6111_v31, %v11636_v13 }
 0x7fb   : > { %v7103_v16 = vadd.f32 %v6714_v14, %v6291_v8  ;;  %v7104_v43 = vadd.f32 %v6923_v55, %v6292_v10  ;;  %v7356_v10 = vadd.f32 %v7355_v60, %v12319_v42 }
 0x7fc   : > { %v6717_v40 = vpop.f32.mrf.mxu0  ;;  %v6926_v30 = vpop.f32.mrf.mxu1 }
 0x7fd   : > { %v7231_v61 = vmax.f32 %v7103_v16, 0.0  ;;  %v7232_v7 = vmax.f32 %v7104_v43, 0.0  ;;  %9002 = vmatmul.msk.f32.gmra.mxu2 %vm285_vm1, %v8936_v62  ;;  %9067 = vmatmul.msk.f32.gmra.mxu3 %vm285_vm1, %v8936_v62 }
 0x7ff   : > { %v7364_v56 = vadd.f32 %v7363_v59, %v7231_v61  ;;  %v7377_v1 = vadd.f32 %v7376_v12, %v7232_v7  ;;  %9197 = vmatmul.msk.f32.gmra.mxu0 %vm285_vm1, %v9131_v6  ;;  %9262 = vmatmul.msk.f32.gmra.mxu1 %vm285_vm1, %v9131_v6  ;;  %v9133_v59 = vld [vmem:[%s9358_s19 + $0x741] sm:$0xff] }
 0x800   : > { %v5905_v15 = vpop.f32.mrf.mxu2  ;;  %v6114_v13 = vpop.f32.mrf.mxu3 }
 0x801   : > { %v6293_v38 = vadd.f32 %v5905_v15, %v11646_v21  ;;  %v6294_v2 = vadd.f32 %v6114_v13, %v11648_v19  ;;  %v9134_v13 = vld [vmem:[%s9358_s19 + $0x911] sm:$0xff] }
 0x803   : > { %v7105_v50 = vadd.f32 %v6717_v40, %v6293_v38  ;;  %v7106_v28 = vadd.f32 %v6926_v30, %v6294_v2 }
 0x804   : > { %v6720_v52 = vpop.f32.mrf.mxu0  ;;  %v6929_v49 = vpop.f32.mrf.mxu1 }
 0x805   : > { %v7233_v58 = vmax.f32 %v7105_v50, 0.0  ;;  %v7234_v25 = vmax.f32 %v7106_v28, 0.0  ;;  %9003 = vmatmul.msk.f32.gmra.mxu2 %vm285_vm1, %v8937_v53  ;;  %9068 = vmatmul.msk.f32.gmra.mxu3 %vm285_vm1, %v8937_v53 }
 0x807   : > { %v7365_v3 = vadd.f32 %v7364_v56, %v7233_v58  ;;  %v7378_v21 = vadd.f32 %v7377_v1, %v7234_v25  ;;  %9198 = vmatmul.msk.f32.gmra.mxu0 %vm285_vm1, %v9132_v54  ;;  %9263 = vmatmul.msk.f32.gmra.mxu1 %vm285_vm1, %v9132_v54  ;;  %v7357_v56 = vrot.slane %v7356_v10, 2 }
 0x808   : > { %v5908_v19 = vpop.f32.mrf.mxu2  ;;  %v6117_v48 = vpop.f32.mrf.mxu3 }
 0x809   : > { %v6295_v47 = vadd.f32 %v5908_v19, %v11658_v27  ;;  %v6296_v22 = vadd.f32 %v6117_v48, %v11660_v23  ;;  %v7343_v27 = vadd.f32 %v7342_v34, %v12317_v4  ;;  %v7544_v23 = vmul.f32 64.0, %v12375_v41  ;;  %v8939_v4 = vld [vmem:[%s9358_s19 + $0x9a0] sm:$0xff] }
 0x80a   : > { %v7358_v50 = vadd.f32 %v7357_v56, %v7356_v10 }
 0x80b   : > { %v7107_v14 = vadd.f32 %v6720_v52, %v6295_v47  ;;  %v7108_v55 = vadd.f32 %v6929_v49, %v6296_v22  ;;  %v7344_v30 = vrot.slane %v7343_v27, 2  ;;  %v7545_v6 = vsub.f32 1.0, %v7544_v23 }
 0x80c   : > { %v6723_v44 = vpop.f32.mrf.mxu0  ;;  %v6932_v0 = vpop.f32.mrf.mxu1  ;;  %v7359_v34 = vrot.slane %v7358_v50, 1 }
 0x80d   : > { %v7235_v12 = vmax.f32 %v7107_v14, 0.0  ;;  %v7236_v9 = vmax.f32 %v7108_v55, 0.0  ;;  %9004 = vmatmul.msk.f32.gmra.mxu2 %vm285_vm1, %v8938_v17  ;;  %9069 = vmatmul.msk.f32.gmra.mxu3 %vm285_vm1, %v8938_v17  ;;  %v7345_v42 = vadd.f32 %v7344_v30, %v7343_v27  ;;  %v9135_v55 = vld [vmem:[%s9358_s19 + $0x921] sm:$0xff] }
 0x80f   : > { %v7366_v31 = vadd.f32 %v7365_v3, %v7235_v12  ;;  %v7379_v8 = vadd.f32 %v7378_v21, %v7236_v9  ;;  %9199 = vmatmul.msk.f32.gmra.mxu0 %vm285_vm1, %v9133_v59  ;;  %9264 = vmatmul.msk.f32.gmra.mxu1 %vm285_vm1, %v9133_v59  ;;  %v7346_v25 = vrot.slane %v7345_v42, 1  ;;  %v8940_v21 = vld [vmem:[%s9358_s19 + $0x9b0] sm:$0xff]  ;;  %v7360_v12 = vadd.f32 %v7359_v34, %v7358_v50  ;;  %v8943_v34 = vld [vmem:[%s9358_s19 + $0x9e0] sm:$0xff] }
 0x810   : > { %v5911_v62 = vpop.f32.mrf.mxu2  ;;  %v6120_v16 = vpop.f32.mrf.mxu3 }
 0x811   : > { %v6297_v43 = vadd.f32 %v5911_v62, %v11670_v33  ;;  %v6298_v40 = vadd.f32 %v6120_v16, %v11672_v18  ;;  %v7546_v33 = vmul.f32 %v12375_v41, %v7545_v6 }
 0x813   : > { %v7109_v61 = vadd.f32 %v6723_v44, %v6297_v43  ;;  %v7110_v7 = vadd.f32 %v6932_v0, %v6298_v40  ;;  %v7547_v3 = vadd.f32 %v12375_v41, %v7546_v33 }
 0x814   : > { %v6726_v1 = vpop.f32.mrf.mxu0  ;;  %v6935_v15 = vpop.f32.mrf.mxu1 }
 0x815   : > { %v7237_v38 = vmax.f32 %v7109_v61, 0.0  ;;  %v7238_v2 = vmax.f32 %v7110_v7, 0.0  ;;  %9005 = vmatmul.msk.f32.gmra.mxu2 %vm285_vm1, %v8939_v4  ;;  %9070 = vmatmul.msk.f32.gmra.mxu3 %vm285_vm1, %v8939_v4 }
 0x817   : > { %v7367_v18 = vadd.f32 %v7366_v31, %v7237_v38  ;;  %v7380_v53 = vadd.f32 %v7379_v8, %v7238_v2  ;;  %9200 = vmatmul.msk.f32.gmra.mxu0 %vm285_vm1, %v9134_v13  ;;  %9265 = vmatmul.msk.f32.gmra.mxu1 %vm285_vm1, %v9134_v13 }
 0x818   : > { %v5914_v28 = vpop.f32.mrf.mxu2  ;;  %v6123_v52 = vpop.f32.mrf.mxu3 }
 0x819   : > { %v7368_v49 = vrot.slane %v7367_v18, 4  ;;  %v7381_v54 = vrot.slane %v7380_v53, 4  ;;  %v6299_v24 = vadd.f32 %v5914_v28, %v11682_v39  ;;  %v6300_v58 = vadd.f32 %v6123_v52, %v11684_v35  ;;  %v8942_v52 = vld [vmem:[%s9358_s19 + $0x9d0] sm:$0xff] }
 0x81a   : > { %v7347_v39 = vadd.f32 %v7346_v25, %v7345_v42  ;;  %v12404_v35 = vsel %vm7548_vm2, %v12375_v41, %v7547_v3  ;;  %v8941_v41 = vld [vmem:[%s9358_s19 + $0x9c0] sm:$0xff] }
 0x81b   : > { %v7369_v19 = vadd.f32 %v7368_v49, %v7367_v18  ;;  %v7382_v48 = vadd.f32 %v7381_v54, %v7380_v53  ;;  %v7111_v47 = vadd.f32 %v6726_v1, %v6299_v24  ;;  %v7112_v22 = vadd.f32 %v6935_v15, %v6300_v58  ;;  %v9136_v1 = vld [vmem:[%s9358_s19 + $0x931] sm:$0xff]  ;;  %v9137_v25 = vld [vmem:[%s9358_s19 + $0x941] sm:$0xff] }
 0x81c   : > { %v6729_v17 = vpop.f32.mrf.mxu0  ;;  %v6938_v14 = vpop.f32.mrf.mxu1  ;;  %v7550_v62 = vmul.f32 %v12404_v35, %v7347_v39  ;;  %v7551_v6 = vmul.f32 %v12404_v35, %v7360_v12 }
 0x81d   : > { %v7370_v60 = vrot.slane %v7369_v19, 2  ;;  %v7383_v44 = vrot.slane %v7382_v48, 2  ;;  %9006 = vmatmul.msk.f32.gmra.mxu2 %vm285_vm1, %v8940_v21  ;;  %9071 = vmatmul.msk.f32.gmra.mxu3 %vm285_vm1, %v8940_v21  ;;  %v7239_v4 = vmax.f32 %v7111_v47, 0.0  ;;  %v7240_v61 = vmax.f32 %v7112_v22, 0.0 }
 0x81f   : > { %v7371_v0 = vadd.f32 %v7370_v60, %v7369_v19  ;;  %v7384_v59 = vadd.f32 %v7383_v44, %v7382_v48  ;;  %9201 = vmatmul.msk.f32.gmra.mxu0 %vm285_vm1, %v9135_v55  ;;  %9266 = vmatmul.msk.f32.gmra.mxu1 %vm285_vm1, %v9135_v55  ;;  %v9138_v44 = vld [vmem:[%s9358_s19 + $0x951] sm:$0xff] }
 0x820   : > { %v5917_v9 = vpop.f32.mrf.mxu2  ;;  %v6126_v27 = vpop.f32.mrf.mxu3 }
 0x821   : > { %v7372_v23 = vrot.slane %v7371_v0, 1  ;;  %v7385_v31 = vrot.slane %v7384_v59, 1  ;;  %v6301_v8 = vadd.f32 %v5917_v9, %v11694_v51  ;;  %v6302_v10 = vadd.f32 %v6126_v27, %v11696_v45  ;;  %v13288_v27 = vld [vmem:[#allocation65_spill] sm:$0xff] }
 0x823   : > { %v7373_v16 = vadd.f32 %v7372_v23, %v7371_v0  ;;  %v7386_v43 = vadd.f32 %v7385_v31, %v7384_v59  ;;  %v7113_v40 = vadd.f32 %v6729_v17, %v6301_v8  ;;  %v7114_v30 = vadd.f32 %v6938_v14, %v6302_v10  ;;  %v8944_v31 = vld [vmem:[%s9358_s19 + $0x9f0] sm:$0xff] }
 0x824   : > { %v6732_v7 = vpop.f32.mrf.mxu0  ;;  %v6941_v56 = vpop.f32.mrf.mxu1 }
 0x825   : > { %v7552_v15 = vmul.f32 %v12404_v35, %v7373_v16  ;;  %v7553_v51 = vmul.f32 %v12404_v35, %v7386_v43  ;;  %v7241_v45 = vmax.f32 %v7113_v40, 0.0  ;;  %v7242_v13 = vmax.f32 %v7114_v30, 0.0  ;;  %9007 = vmatmul.msk.f32.gmra.mxu2 %vm285_vm1, %v8941_v41  ;;  %9072 = vmatmul.msk.f32.gmra.mxu3 %vm285_vm1, %v8941_v41  ;;  %v9139_v16 = vld [vmem:[%s9358_s19 + $0x961] sm:$0xff] }
 0x827   : > { %v12418_v38 = vsel %vm7582_vm3, %v7552_v15, %v7550_v62  ;;  %v12420_v2 = vsel %vm7582_vm3, %v7553_v51, %v7551_v6  ;;  %v7387_v42 = vadd.f32 %v7241_v45, %v7239_v4  ;;  %v7400_v33 = vadd.f32 %v7242_v13, %v7240_v61  ;;  %9202 = vmatmul.msk.f32.gmra.mxu0 %vm285_vm1, %v9136_v1  ;;  %v13289_v61 = vld [vmem:[#allocation66_spill] sm:$0xff]  ;;  %v8945_v15 = vld [vmem:[%s9358_s19 + $0xa00] sm:$0xff] }
 0x828   : > { %v5920_v18 = vpop.f32.mrf.mxu2  ;;  %v6129_v53 = vpop.f32.mrf.mxu3  ;;  %9267 = vmatmul.msk.f32.gmra.mxu1 %vm285_vm1, %v9136_v1 }
 0x829   : > { %v6303_v50 = vadd.f32 %v5920_v18, %v11706_v5  ;;  %v6304_v28 = vadd.f32 %v6129_v53, %v11708_v63 }
 0x82b   : > { %v7115_v49 = vadd.f32 %v6732_v7, %v6303_v50  ;;  %v7116_v54 = vadd.f32 %v6941_v56, %v6304_v28  ;;  %v13290_v56 = vld [vmem:[#allocation69_spill] sm:$0xff] }
 0x82c   : > { %v6735_v24 = vpop.f32.mrf.mxu0  ;;  %v6944_v58 = vpop.f32.mrf.mxu1 }
 0x82d   : > { %v7243_v3 = vmax.f32 %v7115_v49, 0.0  ;;  %v7244_v21 = vmax.f32 %v7116_v54, 0.0  ;;  %9008 = vmatmul.msk.f32.gmra.mxu2 %vm285_vm1, %v8942_v52  ;;  %9073 = vmatmul.msk.f32.gmra.mxu3 %vm285_vm1, %v8942_v52  ;;  %v13291_v54 = vld [vmem:[#allocation70_spill] sm:$0xff] }
 0x82f   : > { %v7388_v19 = vadd.f32 %v7387_v42, %v7243_v3  ;;  %v7401_v48 = vadd.f32 %v7400_v33, %v7244_v21  ;;  %9203 = vmatmul.msk.f32.gmra.mxu0 %vm285_vm1, %v9137_v25  ;;  %v9140_v33 = vld [vmem:[%s9358_s19 + $0x971] sm:$0xff] }
 0x830   : > { %v5923_v5 = vpop.f32.mrf.mxu2  ;;  %v6132_v63 = vpop.f32.mrf.mxu3  ;;  %9268 = vmatmul.msk.f32.gmra.mxu1 %vm285_vm1, %v9137_v25  ;;  %v8946_v3 = vld [vmem:[%s9358_s19 + $0xa10] sm:$0xff] }
 0x831   : > { %v6305_v47 = vadd.f32 %v5923_v5, %v11718_v32  ;;  %v6306_v22 = vadd.f32 %v6132_v63, %v11720_v36  ;;  %v9141_v63 = vld [vmem:[%s9358_s19 + $0x981] sm:$0xff] }
 0x833   : > { %v7117_v17 = vadd.f32 %v6735_v24, %v6305_v47  ;;  %v7118_v14 = vadd.f32 %v6944_v58, %v6306_v22  ;;  %v13292_v58 = vld [vmem:[#allocation73_spill] sm:$0xff] }
 0x834   : > { %v6738_v55 = vpop.f32.mrf.mxu0  ;;  %v6947_v60 = vpop.f32.mrf.mxu1 }
 0x835   : > { %v7245_v39 = vmax.f32 %v7117_v17, 0.0  ;;  %v7246_v0 = vmax.f32 %v7118_v14, 0.0  ;;  %9009 = vmatmul.msk.f32.gmra.mxu2 %vm285_vm1, %v8943_v34  ;;  %9074 = vmatmul.msk.f32.gmra.mxu3 %vm285_vm1, %v8943_v34 }
 0x837   : > { %v7389_v59 = vadd.f32 %v7388_v19, %v7245_v39  ;;  %v7402_v12 = vadd.f32 %v7401_v48, %v7246_v0  ;;  %9204 = vmatmul.msk.f32.gmra.mxu0 %vm285_vm1, %v9138_v44  ;;  %v13294_v39 = vld [vmem:[#allocation77_spill] sm:$0xff] }
 0x838   : > { %v5926_v32 = vpop.f32.mrf.mxu2  ;;  %v6135_v36 = vpop.f32.mrf.mxu3  ;;  %9269 = vmatmul.msk.f32.gmra.mxu1 %vm285_vm1, %v9138_v44 }
 0x839   : > { %v6307_v9 = vadd.f32 %v5926_v32, %v11730_v20  ;;  %v6308_v23 = vadd.f32 %v6135_v36, %v13288_v27  ;;  %v9142_v27 = vld [vmem:[%s9358_s19 + $0xb51] sm:$0xff] }
 0x83b   : > { %v7119_v8 = vadd.f32 %v6738_v55, %v6307_v9  ;;  %v7120_v10 = vadd.f32 %v6947_v60, %v6308_v23  ;;  %v13293_v60 = vld [vmem:[#allocation74_spill] sm:$0xff] }
 0x83c   : > { %v6741_v62 = vpop.f32.mrf.mxu0  ;;  %v6950_v41 = vpop.f32.mrf.mxu1 }
 0x83d   : > { %v7247_v43 = vmax.f32 %v7119_v8, 0.0  ;;  %v7248_v40 = vmax.f32 %v7120_v10, 0.0  ;;  %9010 = vmatmul.msk.f32.gmra.mxu2 %vm285_vm1, %v8944_v31  ;;  %9075 = vmatmul.msk.f32.gmra.mxu3 %vm285_vm1, %v8944_v31 }
 0x83f   : > { %v7390_v30 = vadd.f32 %v7389_v59, %v7247_v43  ;;  %v7403_v6 = vadd.f32 %v7402_v12, %v7248_v40  ;;  %9205 = vmatmul.msk.f32.gmra.mxu0 %vm285_vm1, %v9139_v16  ;;  %v8947_v59 = vld [vmem:[%s9358_s19 + $0xbe0] sm:$0xff]  ;;  %v13295_v40 = vld [vmem:[#allocation78_spill] sm:$0xff] }
 0x840   : > { %v5929_v20 = vpop.f32.mrf.mxu2  ;;  %v6138_v4 = vpop.f32.mrf.mxu3  ;;  %9270 = vmatmul.msk.f32.gmra.mxu1 %vm285_vm1, %v9139_v16 }
 0x841   : > { %v6309_v7 = vadd.f32 %v5929_v20, %v13289_v61  ;;  %v6310_v1 = vadd.f32 %v6138_v4, %v13290_v56  ;;  %v8948_v4 = vld [vmem:[%s9358_s19 + $0xbf0] sm:$0xff] }
 0x843   : > { %v7121_v51 = vadd.f32 %v6741_v62, %v6309_v7  ;;  %v7122_v45 = vadd.f32 %v6950_v41, %v6310_v1 }
 0x844   : > { %v6744_v13 = vpop.f32.mrf.mxu0  ;;  %v6953_v42 = vpop.f32.mrf.mxu1 }
 0x845   : > { %v7249_v18 = vmax.f32 %v7121_v51, 0.0  ;;  %v7250_v53 = vmax.f32 %v7122_v45, 0.0  ;;  %9011 = vmatmul.msk.f32.gmra.mxu2 %vm285_vm1, %v8945_v15  ;;  %9076 = vmatmul.msk.f32.gmra.mxu3 %vm285_vm1, %v8945_v15  ;;  %v9143_v45 = vld [vmem:[%s9358_s19 + $0xb61] sm:$0xff] }
 0x847   : > { %v7391_v50 = vadd.f32 %v7390_v30, %v7249_v18  ;;  %v7404_v28 = vadd.f32 %v7403_v6, %v7250_v53  ;;  %9206 = vmatmul.msk.f32.gmra.mxu0 %vm285_vm1, %v9140_v33  ;;  %v13296_v6 = vld [vmem:[#allocation79_spill] sm:$0xff] }
 0x848   : > { %v5932_v52 = vpop.f32.mrf.mxu2  ;;  %v6141_v49 = vpop.f32.mrf.mxu3  ;;  %9271 = vmatmul.msk.f32.gmra.mxu1 %vm285_vm1, %v9140_v33 }
 0x849   : > { %v6311_v24 = vadd.f32 %v5932_v52, %v13291_v54  ;;  %v6312_v25 = vadd.f32 %v6141_v49, %v13292_v58  ;;  %v13297_v49 = vld [vmem:[#allocation80_spill] sm:$0xff] }
 0x84b   : > { %v7123_v21 = vadd.f32 %v6744_v13, %v6311_v24  ;;  %v7124_v19 = vadd.f32 %v6953_v42, %v6312_v25  ;;  %v13298_v24 = vld [vmem:[#allocation81_spill] sm:$0xff] }
 0x84c   : > { %v6747_v48 = vpop.f32.mrf.mxu0  ;;  %v6956_v5 = vpop.f32.mrf.mxu1  ;;  %v8949_v25 = vld [vmem:[%s9358_s19 + $0xc00] sm:$0xff] }
 0x84d   : > { %v7251_v47 = vmax.f32 %v7123_v21, 0.0  ;;  %v7252_v22 = vmax.f32 %v7124_v19, 0.0  ;;  %9012 = vmatmul.msk.f32.gmra.mxu2 %vm285_vm1, %v8946_v3  ;;  %9077 = vmatmul.msk.f32.gmra.mxu3 %vm285_vm1, %v8946_v3 }
 0x84f   : > { %v7392_v34 = vadd.f32 %v7391_v50, %v7251_v47  ;;  %v7405_v17 = vadd.f32 %v7404_v28, %v7252_v22  ;;  %9207 = vmatmul.msk.f32.gmra.mxu0 %vm285_vm1, %v9141_v63 }
 0x850   : > { %v5935_v14 = vpop.f32.mrf.mxu2  ;;  %v6144_v55 = vpop.f32.mrf.mxu3  ;;  %9272 = vmatmul.msk.f32.gmra.mxu1 %vm285_vm1, %v9141_v63 }
 0x851   : > { %v6313_v44 = vadd.f32 %v5935_v14, %v13293_v60  ;;  %v6314_v0 = vadd.f32 %v6144_v55, %v13294_v39 }
 0x853   : > { %v7125_v12 = vadd.f32 %v6747_v48, %v6313_v44  ;;  %v7126_v32 = vadd.f32 %v6956_v5, %v6314_v0 }
 0x854   : > { %v6750_v36 = vpop.f32.mrf.mxu0  ;;  %v6959_v9 = vpop.f32.mrf.mxu1 }
 0x855   : > { %v7253_v23 = vmax.f32 %v7125_v12, 0.0  ;;  %v7254_v31 = vmax.f32 %v7126_v32, 0.0  ;;  %9013 = vmatmul.msk.f32.gmra.mxu2 %vm285_vm1, %v8947_v59  ;;  %9078 = vmatmul.msk.f32.gmra.mxu3 %vm285_vm1, %v8947_v59 }
 0x857   : > { %v7393_v8 = vadd.f32 %v7392_v34, %v7253_v23  ;;  %v7406_v10 = vadd.f32 %v7405_v17, %v7254_v31  ;;  %9208 = vmatmul.msk.f32.gmra.mxu0 %vm285_vm1, %v9142_v27  ;;  %v9144_v34 = vld [vmem:[%s9358_s19 + $0xb71] sm:$0xff] }
 0x858   : > { %v5938_v62 = vpop.f32.mrf.mxu2  ;;  %v6147_v41 = vpop.f32.mrf.mxu3  ;;  %9273 = vmatmul.msk.f32.gmra.mxu1 %vm285_vm1, %v9142_v27  ;;  %v13300_v27 = vld [vmem:[#allocation82_spill] sm:$0xff]  ;;  %v8950_v31 = vld [vmem:[%s9358_s19 + $0xc10] sm:$0xff] }
 0x859   : > { %v7394_v16 = vrot.slane %v7393_v8, 4  ;;  %v7407_v43 = vrot.slane %v7406_v10, 4  ;;  %v6315_v30 = vadd.f32 %v5938_v62, %v13295_v40  ;;  %v6316_v20 = vadd.f32 %v6147_v41, %v13296_v6 }
 0x85b   : > { %v7395_v61 = vadd.f32 %v7394_v16, %v7393_v8  ;;  %v7408_v7 = vadd.f32 %v7407_v43, %v7406_v10  ;;  %v7127_v56 = vadd.f32 %v6750_v36, %v6315_v30  ;;  %v7128_v1 = vadd.f32 %v6959_v9, %v6316_v20  ;;  %v13299_v36 = vld [vmem:[#allocation52_spill] sm:$0xff]  ;;  %v13301_v20 = vld [vmem:[#allocation55_spill] sm:$0xff] }
 0x85c   : > { %v6753_v15 = vpop.f32.mrf.mxu0  ;;  %v6962_v51 = vpop.f32.mrf.mxu1 }
 0x85d   : > { %v7396_v13 = vrot.slane %v7395_v61, 2  ;;  %v7409_v42 = vrot.slane %v7408_v7, 2  ;;  %9014 = vmatmul.msk.f32.gmra.mxu2 %vm285_vm1, %v8948_v4  ;;  %9079 = vmatmul.msk.f32.gmra.mxu3 %vm285_vm1, %v8948_v4  ;;  %v7255_v5 = vmax.f32 %v7127_v56, 0.0  ;;  %v7256_v63 = vmax.f32 %v7128_v1, 0.0  ;;  %v8951_v56 = vld [vmem:[%s9358_s19 + $0xc20] sm:$0xff] }
 0x85f   : > { %v7397_v33 = vadd.f32 %v7396_v13, %v7395_v61  ;;  %v7410_v18 = vadd.f32 %v7409_v42, %v7408_v7  ;;  %9209 = vmatmul.msk.f32.gmra.mxu0 %vm285_vm1, %v9143_v45  ;;  %v13302_v61 = vld [vmem:[#allocation56_spill] sm:$0xff] }
 0x860   : > { %v5941_v53 = vpop.f32.mrf.mxu2  ;;  %v6150_v50 = vpop.f32.mrf.mxu3  ;;  %9274 = vmatmul.msk.f32.gmra.mxu1 %vm285_vm1, %v9143_v45  ;;  %v9146_v13 = vld [vmem:[%s9358_s19 + $0xb91] sm:$0xff] }
 0x861   : > { %v7398_v28 = vrot.slane %v7397_v33, 1  ;;  %v7411_v52 = vrot.slane %v7410_v18, 1  ;;  %v6317_v54 = vadd.f32 %v5941_v53, %v13297_v49  ;;  %v6318_v58 = vadd.f32 %v6150_v50, %v13298_v24 }
 0x863   : > { %v7399_v3 = vadd.f32 %v7398_v28, %v7397_v33  ;;  %v7412_v21 = vadd.f32 %v7411_v52, %v7410_v18  ;;  %v7129_v19 = vadd.f32 %v6753_v15, %v6317_v54  ;;  %v7130_v48 = vadd.f32 %v6962_v51, %v6318_v58  ;;  %v13303_v52 = vld [vmem:[#allocation59_spill] sm:$0xff]  ;;  %v13304_v54 = vld [vmem:[#allocation60_spill] sm:$0xff] }
 0x864   : > { %v6756_v47 = vpop.f32.mrf.mxu0  ;;  %v6965_v22 = vpop.f32.mrf.mxu1  ;;  %v8952_v58 = vld [vmem:[%s9358_s19 + $0xc30] sm:$0xff] }
 0x865   : > { %v7554_v17 = vmul.f32 %v12404_v35, %v7399_v3  ;;  %v7555_v14 = vmul.f32 %v12404_v35, %v7412_v21  ;;  %v7257_v55 = vmax.f32 %v7129_v19, 0.0  ;;  %v7258_v60 = vmax.f32 %v7130_v48, 0.0  ;;  %9015 = vmatmul.msk.f32.gmra.mxu2 %vm285_vm1, %v8949_v25  ;;  %9080 = vmatmul.msk.f32.gmra.mxu3 %vm285_vm1, %v8949_v25  ;;  %v9147_v48 = vld [vmem:[%s9358_s19 + $0xba1] sm:$0xff] }
 0x867   : > { %v12489_v44 = vsel %vm7584_vm4, %v7554_v17, %v12418_v38  ;;  %v12492_v39 = vsel %vm7584_vm4, %v7555_v14, %v12420_v2  ;;  %v7413_v0 = vadd.f32 %v7257_v55, %v7255_v5  ;;  %v7426_v59 = vadd.f32 %v7258_v60, %v7256_v63  ;;  %9210 = vmatmul.msk.f32.gmra.mxu0 %vm285_vm1, %v9144_v34  ;;  %v9145_v2 = vld [vmem:[%s9358_s19 + $0xb81] sm:$0xff]  ;;  %v13305_v14 = vld [vmem:[#allocation63_spill] sm:$0xff]  ;;  %v13306_v60 = vld [vmem:[#allocation64_spill] sm:$0xff] }
 0x868   : > { %v5944_v12 = vpop.f32.mrf.mxu2  ;;  %v6153_v32 = vpop.f32.mrf.mxu3  ;;  %9275 = vmatmul.msk.f32.gmra.mxu1 %vm285_vm1, %v9144_v34 }
 0x869   : > { %v6319_v9 = vadd.f32 %v5944_v12, %v13299_v36  ;;  %v6320_v23 = vadd.f32 %v6153_v32, %v13300_v27  ;;  %v9148_v27 = vld [vmem:[%s9358_s19 + $0xbb1] sm:$0xff] }
 0x86b   : > { %v7131_v8 = vadd.f32 %v6756_v47, %v6319_v9  ;;  %v7132_v10 = vadd.f32 %v6965_v22, %v6320_v23 }
 0x86c   : > { %v6759_v38 = vpop.f32.mrf.mxu0  ;;  %v6968_v62 = vpop.f32.mrf.mxu1 }
 0x86d   : > { %v7259_v41 = vmax.f32 %v7131_v8, 0.0  ;;  %v7260_v16 = vmax.f32 %v7132_v10, 0.0  ;;  %9016 = vmatmul.msk.f32.gmra.mxu2 %vm285_vm1, %v8950_v31  ;;  %9081 = vmatmul.msk.f32.gmra.mxu3 %vm285_vm1, %v8950_v31 }
 0x86f   : > { %v7414_v43 = vadd.f32 %v7413_v0, %v7259_v41  ;;  %v7427_v40 = vadd.f32 %v7426_v59, %v7260_v16  ;;  %9211 = vmatmul.msk.f32.gmra.mxu0 %vm285_vm1, %v9145_v2  ;;  %v8953_v59 = vld [vmem:[%s9358_s19 + $0xc40] sm:$0xff]  ;;  %v13308_v16 = vld [vmem:[#allocation68_spill] sm:$0xff] }
 0x870   : > { %v5947_v30 = vpop.f32.mrf.mxu2  ;;  %v6156_v6 = vpop.f32.mrf.mxu3  ;;  %9276 = vmatmul.msk.f32.gmra.mxu1 %vm285_vm1, %v9145_v2  ;;  %v13307_v2 = vld [vmem:[#allocation67_spill] sm:$0xff] }
 0x871   : > { %v6321_v4 = vadd.f32 %v5947_v30, %v13301_v20  ;;  %v6322_v7 = vadd.f32 %v6156_v6, %v13302_v61  ;;  %v9149_v61 = vld [vmem:[%s9358_s19 + $0xbc1] sm:$0xff] }
 0x873   : > { %v7133_v1 = vadd.f32 %v6759_v38, %v6321_v4  ;;  %v7134_v15 = vadd.f32 %v6968_v62, %v6322_v7 }
 0x874   : > { %v6762_v51 = vpop.f32.mrf.mxu0  ;;  %v6971_v45 = vpop.f32.mrf.mxu1 }
 0x875   : > { %v7261_v42 = vmax.f32 %v7133_v1, 0.0  ;;  %v7262_v33 = vmax.f32 %v7134_v15, 0.0  ;;  %9017 = vmatmul.msk.f32.gmra.mxu2 %vm285_vm1, %v8951_v56  ;;  %9082 = vmatmul.msk.f32.gmra.mxu3 %vm285_vm1, %v8951_v56 }
 0x877   : > { %v7415_v18 = vadd.f32 %v7414_v43, %v7261_v42  ;;  %v7428_v53 = vadd.f32 %v7427_v40, %v7262_v33  ;;  %9212 = vmatmul.msk.f32.gmra.mxu0 %vm285_vm1, %v9146_v13  ;;  %v8954_v40 = vld [vmem:[%s9358_s19 + $0xc50] sm:$0xff]  ;;  %v13310_v33 = vld [vmem:[#allocation72_spill] sm:$0xff] }
 0x878   : > { %v5950_v50 = vpop.f32.mrf.mxu2  ;;  %v6159_v28 = vpop.f32.mrf.mxu3  ;;  %9277 = vmatmul.msk.f32.gmra.mxu1 %vm285_vm1, %v9146_v13  ;;  %v13309_v13 = vld [vmem:[#allocation71_spill] sm:$0xff] }
 0x879   : > { %v6323_v49 = vadd.f32 %v5950_v50, %v13303_v52  ;;  %v6324_v24 = vadd.f32 %v6159_v28, %v13304_v54  ;;  %v9150_v54 = vld [vmem:[%s9358_s19 + $0xd91] sm:$0xff] }
 0x87b   : > { %v7135_v25 = vadd.f32 %v6762_v51, %v6323_v49  ;;  %v7136_v3 = vadd.f32 %v6971_v45, %v6324_v24 }
 0x87c   : > { %v6765_v21 = vpop.f32.mrf.mxu0  ;;  %v6974_v19 = vpop.f32.mrf.mxu1 }
 0x87d   : > { %v7263_v5 = vmax.f32 %v7135_v25, 0.0  ;;  %v7264_v63 = vmax.f32 %v7136_v3, 0.0  ;;  %9018 = vmatmul.msk.f32.gmra.mxu2 %vm285_vm1, %v8952_v58  ;;  %9083 = vmatmul.msk.f32.gmra.mxu3 %vm285_vm1, %v8952_v58 }
 0x87f   : > { %v7416_v47 = vadd.f32 %v7415_v18, %v7263_v5  ;;  %v7429_v22 = vadd.f32 %v7428_v53, %v7264_v63  ;;  %9213 = vmatmul.msk.f32.gmra.mxu0 %vm285_vm1, %v9147_v48  ;;  %v8955_v53 = vld [vmem:[%s9358_s19 + $0xe20] sm:$0xff]  ;;  %v13311_v63 = vld [vmem:[#allocation75_spill] sm:$0xff] }
 0x880   : > { %v5953_v34 = vpop.f32.mrf.mxu2  ;;  %v6162_v17 = vpop.f32.mrf.mxu3  ;;  %9278 = vmatmul.msk.f32.gmra.mxu1 %vm285_vm1, %v9147_v48 }
 0x881   : > { %v6325_v55 = vadd.f32 %v5953_v34, %v13305_v14  ;;  %v6326_v0 = vadd.f32 %v6162_v17, %v13306_v60  ;;  %v8956_v17 = vld [vmem:[%s9358_s19 + $0xe30] sm:$0xff] }
 0x883   : > { %v7137_v12 = vadd.f32 %v6765_v21, %v6325_v55  ;;  %v7138_v32 = vadd.f32 %v6974_v19, %v6326_v0 }
 0x884   : > { %v6768_v36 = vpop.f32.mrf.mxu0  ;;  %v6977_v9 = vpop.f32.mrf.mxu1 }
 0x885   : > { %v7265_v23 = vmax.f32 %v7137_v12, 0.0  ;;  %v7266_v31 = vmax.f32 %v7138_v32, 0.0  ;;  %9019 = vmatmul.msk.f32.gmra.mxu2 %vm285_vm1, %v8953_v59  ;;  %9084 = vmatmul.msk.f32.gmra.mxu3 %vm285_vm1, %v8953_v59  ;;  %v9151_v32 = vld [vmem:[%s9358_s19 + $0xda1] sm:$0xff] }
 0x887   : > { %v7417_v8 = vadd.f32 %v7416_v47, %v7265_v23  ;;  %v7430_v10 = vadd.f32 %v7429_v22, %v7266_v31  ;;  %9214 = vmatmul.msk.f32.gmra.mxu0 %vm285_vm1, %v9148_v27  ;;  %v13312_v22 = vld [vmem:[#allocation76_spill] sm:$0xff] }
 0x888   : > { %v5956_v38 = vpop.f32.mrf.mxu2  ;;  %v6165_v62 = vpop.f32.mrf.mxu3  ;;  %9279 = vmatmul.msk.f32.gmra.mxu1 %vm285_vm1, %v9148_v27 }
 0x889   : > { %v6327_v41 = vadd.f32 %v5956_v38, %v13307_v2  ;;  %v6328_v43 = vadd.f32 %v6165_v62, %v13308_v16  ;;  %v13313_v62 = vld [vmem:[#allocation2_spill] sm:$0xff] }
 0x88b   : > { %v7139_v30 = vadd.f32 %v6768_v36, %v6327_v41  ;;  %v7140_v6 = vadd.f32 %v6977_v9, %v6328_v43  ;;  %v13314_v41 = vld [vmem:[#allocation3_spill] sm:$0xff]  ;;  %v8957_v43 = vld [vmem:[%s9358_s19 + $0xe40] sm:$0xff] }
 0x88c   : > { %v6771_v20 = vpop.f32.mrf.mxu0  ;;  %v6980_v4 = vpop.f32.mrf.mxu1 }
 0x88d   : > { %v7267_v7 = vmax.f32 %v7139_v30, 0.0  ;;  %v7268_v56 = vmax.f32 %v7140_v6, 0.0  ;;  %9020 = vmatmul.msk.f32.gmra.mxu2 %vm285_vm1, %v8954_v40  ;;  %9085 = vmatmul.msk.f32.gmra.mxu3 %vm285_vm1, %v8954_v40 }
 0x88f   : > { %v7418_v1 = vadd.f32 %v7417_v8, %v7267_v7  ;;  %v7431_v15 = vadd.f32 %v7430_v10, %v7268_v56  ;;  %9215 = vmatmul.msk.f32.gmra.mxu0 %vm285_vm1, %v9149_v61  ;;  %v9152_v56 = vld [vmem:[%s9358_s19 + $0xdb1] sm:$0xff] }
 0x890   : > { %v5959_v51 = vpop.f32.mrf.mxu2  ;;  %v6168_v45 = vpop.f32.mrf.mxu3  ;;  %9280 = vmatmul.msk.f32.gmra.mxu1 %vm285_vm1, %v9149_v61 }
 0x891   : > { %v6329_v42 = vadd.f32 %v5959_v51, %v13309_v13  ;;  %v6330_v18 = vadd.f32 %v6168_v45, %v13310_v33 }
 0x893   : > { %v7141_v50 = vadd.f32 %v6771_v20, %v6329_v42  ;;  %v7142_v28 = vadd.f32 %v6980_v4, %v6330_v18 }
 0x894   : > { %v6774_v52 = vpop.f32.mrf.mxu0  ;;  %v6983_v49 = vpop.f32.mrf.mxu1 }
 0x895   : > { %v7269_v24 = vmax.f32 %v7141_v50, 0.0  ;;  %v7270_v58 = vmax.f32 %v7142_v28, 0.0  ;;  %9021 = vmatmul.msk.f32.gmra.mxu2 %vm285_vm1, %v8955_v53  ;;  %9086 = vmatmul.msk.f32.gmra.mxu3 %vm285_vm1, %v8955_v53 }
 0x897   : > { %v7419_v25 = vadd.f32 %v7418_v1, %v7269_v24  ;;  %v7432_v3 = vadd.f32 %v7431_v15, %v7270_v58  ;;  %9216 = vmatmul.msk.f32.gmra.mxu0 %vm285_vm1, %v9150_v54  ;;  %v8958_v58 = vld [vmem:[%s9358_s19 + $0xe50] sm:$0xff] }
 0x898   : > { %v5962_v21 = vpop.f32.mrf.mxu2  ;;  %v6171_v19 = vpop.f32.mrf.mxu3  ;;  %9281 = vmatmul.msk.f32.gmra.mxu1 %vm285_vm1, %v9150_v54  ;;  %v13316_v54 = vld [vmem:[#allocation5_spill] sm:$0xff] }
 0x899   : > { %v7420_v48 = vrot.slane %v7419_v25, 4  ;;  %v7433_v5 = vrot.slane %v7432_v3, 4  ;;  %v6331_v47 = vadd.f32 %v5962_v21, %v13311_v63  ;;  %v6332_v34 = vadd.f32 %v6171_v19, %v13312_v22  ;;  %v9153_v21 = vld [vmem:[%s9358_s19 + $0xdc1] sm:$0xff] }
 0x89b   : > { %v7421_v14 = vadd.f32 %v7420_v48, %v7419_v25  ;;  %v7434_v55 = vadd.f32 %v7433_v5, %v7432_v3  ;;  %v7143_v60 = vadd.f32 %v6774_v52, %v6331_v47  ;;  %v7144_v0 = vadd.f32 %v6983_v49, %v6332_v34  ;;  %v13315_v52 = vld [vmem:[#allocation4_spill] sm:$0xff]  ;;  %v13317_v34 = vld [vmem:[#allocation6_spill] sm:$0xff] }
 0x89c   : > { %v6777_v59 = vpop.f32.mrf.mxu0  ;;  %v6986_v12 = vpop.f32.mrf.mxu1 }
 0x89d   : > { %v7422_v36 = vrot.slane %v7421_v14, 2  ;;  %v7435_v9 = vrot.slane %v7434_v55, 2  ;;  %9022 = vmatmul.msk.f32.gmra.mxu2 %vm285_vm1, %v8956_v17  ;;  %9087 = vmatmul.msk.f32.gmra.mxu3 %vm285_vm1, %v8956_v17  ;;  %v7271_v4 = vmax.f32 %v7143_v60, 0.0  ;;  %v7272_v61 = vmax.f32 %v7144_v0, 0.0  ;;  %v8959_v60 = vld [vmem:[%s9358_s19 + $0xe60] sm:$0xff] }
 0x89f   : > { %v7423_v27 = vadd.f32 %v7422_v36, %v7421_v14  ;;  %v7436_v23 = vadd.f32 %v7435_v9, %v7434_v55  ;;  %9217 = vmatmul.msk.f32.gmra.mxu0 %vm285_vm1, %v9151_v32  ;;  %v13318_v14 = vld [vmem:[#allocation7_spill] sm:$0xff] }
 0x8a0   : > { %v5965_v31 = vpop.f32.mrf.mxu2  ;;  %v6174_v8 = vpop.f32.mrf.mxu3  ;;  %9282 = vmatmul.msk.f32.gmra.mxu1 %vm285_vm1, %v9151_v32  ;;  %v9154_v32 = vld [vmem:[%s9358_s19 + $0xdd1] sm:$0xff] }
 0x8a1   : > { %v7424_v10 = vrot.slane %v7423_v27, 1  ;;  %v7437_v38 = vrot.slane %v7436_v23, 1  ;;  %v6333_v2 = vadd.f32 %v5965_v31, %v13313_v62  ;;  %v6334_v16 = vadd.f32 %v6174_v8, %v13314_v41 }
 0x8a3   : > { %v7425_v40 = vadd.f32 %v7424_v10, %v7423_v27  ;;  %v7438_v30 = vadd.f32 %v7437_v38, %v7436_v23  ;;  %v7145_v6 = vadd.f32 %v6777_v59, %v6333_v2  ;;  %v7146_v20 = vadd.f32 %v6986_v12, %v6334_v16  ;;  %v13319_v38 = vld [vmem:[#allocation8_spill] sm:$0xff]  ;;  %v13320_v2 = vld [vmem:[#allocation9_spill] sm:$0xff]  ;;  %v8960_v16 = vld [vmem:[%s9358_s19 + $0xe70] sm:$0xff] }
 0x8a4   : > { %v6780_v7 = vpop.f32.mrf.mxu0 }
 0x8a5   : > { %v7556_v1 = vmul.f32 %v12404_v35, %v7425_v40  ;;  %v7557_v15 = vmul.f32 %v12404_v35, %v7438_v30  ;;  %v7273_v51 = vmax.f32 %v7145_v6, 0.0  ;;  %v7274_v45 = vmax.f32 %v7146_v20, 0.0  ;;  %9023 = vmatmul.msk.f32.gmra.mxu2 %vm285_vm1, %v8957_v43  ;;  %9088 = vmatmul.msk.f32.gmra.mxu3 %vm285_vm1, %v8957_v43  ;;  %v6989_v13 = vpop.f32.mrf.mxu1  ;;  %v9155_v6 = vld [vmem:[%s9358_s19 + $0xde1] sm:$0xff] }
 0x8a7   : > { %v12561_v42 = vsel %vm7586_vm5, %v7556_v1, %v12489_v44  ;;  %v12564_v33 = vsel %vm7586_vm5, %v7557_v15, %v12492_v39  ;;  %v7439_v18 = vadd.f32 %v7273_v51, %v7271_v4  ;;  %v7452_v53 = vadd.f32 %v7274_v45, %v7272_v61  ;;  %9218 = vmatmul.msk.f32.gmra.mxu0 %vm285_vm1, %v9152_v56  ;;  %v13321_v51 = vld [vmem:[#allocation10_spill] sm:$0xff] }
 0x8a8   : > { %v5968_v50 = vpop.f32.mrf.mxu2  ;;  %v6177_v28 = vpop.f32.mrf.mxu3  ;;  %9283 = vmatmul.msk.f32.gmra.mxu1 %vm285_vm1, %v9152_v56 }
 0x8a9   : > { %v6335_v49 = vadd.f32 %v5968_v50, %v13315_v52  ;;  %v6336_v24 = vadd.f32 %v6177_v28, %v13316_v54 }
 0x8ab   : > { %v7147_v25 = vadd.f32 %v6780_v7, %v6335_v49  ;;  %v7148_v3 = vadd.f32 %v6989_v13, %v6336_v24  ;;  %v13322_v13 = vld [vmem:[#allocation11_spill] sm:$0xff] }
 0x8ac   : > { %v6783_v44 = vpop.f32.mrf.mxu0  ;;  %v9156_v49 = vld [vmem:[%s9358_s19 + $0xdf1] sm:$0xff] }
 0x8ad   : > { %v7275_v39 = vmax.f32 %v7147_v25, 0.0  ;;  %v7276_v19 = vmax.f32 %v7148_v3, 0.0  ;;  %9024 = vmatmul.msk.f32.gmra.mxu2 %vm285_vm1, %v8958_v58  ;;  %9089 = vmatmul.msk.f32.gmra.mxu3 %vm285_vm1, %v8958_v58  ;;  %v6992_v48 = vpop.f32.mrf.mxu1 }
 0x8af   : > { %v7440_v5 = vadd.f32 %v7439_v18, %v7275_v39  ;;  %v7453_v63 = vadd.f32 %v7452_v53, %v7276_v19  ;;  %9219 = vmatmul.msk.f32.gmra.mxu0 %vm285_vm1, %v9153_v21  ;;  %v8961_v53 = vld [vmem:[%s9358_s19 + $0xe80] sm:$0xff]  ;;  %v13323_v39 = vld [vmem:[#allocation12_spill] sm:$0xff] }
 0x8b0   : > { %v5971_v47 = vpop.f32.mrf.mxu2  ;;  %v6180_v22 = vpop.f32.mrf.mxu3  ;;  %9284 = vmatmul.msk.f32.gmra.mxu1 %vm285_vm1, %v9153_v21 }
 0x8b1   : > { %v6337_v17 = vadd.f32 %v5971_v47, %v13317_v34  ;;  %v6338_v55 = vadd.f32 %v6180_v22, %v13318_v14 }
 0x8b3   : > { %v7149_v0 = vadd.f32 %v6783_v44, %v6337_v17  ;;  %v7150_v59 = vadd.f32 %v6992_v48, %v6338_v55  ;;  %v13324_v48 = vld [vmem:[#allocation13_spill] sm:$0xff] }
 0x8b4   : > { %v6786_v12 = vpop.f32.mrf.mxu0  ;;  %v9157_v17 = vld [vmem:[%s9358_s19 + $0xe01] sm:$0xff] }
 0x8b5   : > { %v7277_v36 = vmax.f32 %v7149_v0, 0.0  ;;  %v7278_v9 = vmax.f32 %v7150_v59, 0.0  ;;  %9025 = vmatmul.msk.f32.gmra.mxu2 %vm285_vm1, %v8959_v60  ;;  %9090 = vmatmul.msk.f32.gmra.mxu3 %vm285_vm1, %v8959_v60  ;;  %v6995_v27 = vpop.f32.mrf.mxu1 }
 0x8b7   : > { %v7441_v23 = vadd.f32 %v7440_v5, %v7277_v36  ;;  %v7454_v31 = vadd.f32 %v7453_v63, %v7278_v9  ;;  %9220 = vmatmul.msk.f32.gmra.mxu0 %vm285_vm1, %v9154_v32  ;;  %v8962_v63 = vld [vmem:[%s9358_s19 + $0xe90] sm:$0xff]  ;;  %v13325_v36 = vld [vmem:[#allocation14_spill] sm:$0xff] }
 0x8b8   : > { %v5974_v8 = vpop.f32.mrf.mxu2  ;;  %v6183_v10 = vpop.f32.mrf.mxu3  ;;  %9285 = vmatmul.msk.f32.gmra.mxu1 %vm285_vm1, %v9154_v32 }
 0x8b9   : > { %v6339_v62 = vadd.f32 %v5974_v8, %v13319_v38  ;;  %v6340_v41 = vadd.f32 %v6183_v10, %v13320_v2 }
 0x8bb   : > { %v7151_v43 = vadd.f32 %v6786_v12, %v6339_v62  ;;  %v7152_v40 = vadd.f32 %v6995_v27, %v6340_v41  ;;  %v13326_v27 = vld [vmem:[#allocation15_spill] sm:$0xff] }
 0x8bc   : > { %v6789_v30 = vpop.f32.mrf.mxu0  ;;  %v9158_v62 = vld [vmem:[%s9358_s19 + $0xfd1] sm:$0xff] }
 0x8bd   : > { %v7279_v20 = vmax.f32 %v7151_v43, 0.0  ;;  %v7280_v4 = vmax.f32 %v7152_v40, 0.0  ;;  %9026 = vmatmul.msk.f32.gmra.mxu2 %vm285_vm1, %v8960_v16  ;;  %9091 = vmatmul.msk.f32.gmra.mxu3 %vm285_vm1, %v8960_v16  ;;  %v6998_v61 = vpop.f32.mrf.mxu1 }
 0x8bf   : > { %v7442_v7 = vadd.f32 %v7441_v23, %v7279_v20  ;;  %v7455_v56 = vadd.f32 %v7454_v31, %v7280_v4  ;;  %9221 = vmatmul.msk.f32.gmra.mxu0 %vm285_vm1, %v9155_v6  ;;  %v8963_v31 = vld [vmem:[%s9358_s19 + $0x1060] sm:$0xff] }
 0x8c0   : > { %v5977_v1 = vpop.f32.mrf.mxu2  ;;  %v6186_v15 = vpop.f32.mrf.mxu3  ;;  %9286 = vmatmul.msk.f32.gmra.mxu1 %vm285_vm1, %v9155_v6 }
 0x8c1   : > { %v6341_v45 = vadd.f32 %v5977_v1, %v13321_v51  ;;  %v6342_v18 = vadd.f32 %v6186_v15, %v13322_v13  ;;  %v8964_v15 = vld [vmem:[%s9358_s19 + $0x1070] sm:$0xff] }
 0x8c3   : > { %v7153_v50 = vadd.f32 %v6789_v30, %v6341_v45  ;;  %v7154_v28 = vadd.f32 %v6998_v61, %v6342_v18  ;;  %v13327_v61 = vld [vmem:[#allocation16_spill] sm:$0xff] }
 0x8c4   : > { %v6792_v52 = vpop.f32.mrf.mxu0 }
 0x8c5   : > { %v7281_v54 = vmax.f32 %v7153_v50, 0.0  ;;  %v7282_v24 = vmax.f32 %v7154_v28, 0.0  ;;  %9027 = vmatmul.msk.f32.gmra.mxu2 %vm285_vm1, %v8961_v53  ;;  %9092 = vmatmul.msk.f32.gmra.mxu3 %vm285_vm1, %v8961_v53  ;;  %v7001_v58 = vpop.f32.mrf.mxu1  ;;  %v9159_v50 = vld [vmem:[%s9358_s19 + $0xfe1] sm:$0xff] }
 0x8c7   : > { %v7443_v25 = vadd.f32 %v7442_v7, %v7281_v54  ;;  %v7456_v3 = vadd.f32 %v7455_v56, %v7282_v24  ;;  %9222 = vmatmul.msk.f32.gmra.mxu0 %vm285_vm1, %v9156_v49  ;;  %v13328_v56 = vld [vmem:[#allocation17_spill] sm:$0xff] }
 0x8c8   : > { %v5980_v44 = vpop.f32.mrf.mxu2  ;;  %v6189_v21 = vpop.f32.mrf.mxu3  ;;  %9287 = vmatmul.msk.f32.gmra.mxu1 %vm285_vm1, %v9156_v49 }
 0x8c9   : > { %v6343_v19 = vadd.f32 %v5980_v44, %v13323_v39  ;;  %v6344_v5 = vadd.f32 %v6189_v21, %v13324_v48  ;;  %v13329_v21 = vld [vmem:[#allocation18_spill] sm:$0xff] }
 0x8cb   : > { %v7155_v47 = vadd.f32 %v6792_v52, %v6343_v19  ;;  %v7156_v22 = vadd.f32 %v7001_v58, %v6344_v5  ;;  %v13330_v19 = vld [vmem:[#allocation19_spill] sm:$0xff]  ;;  %v8965_v5 = vld [vmem:[%s9358_s19 + $0x1080] sm:$0xff] }
 0x8cc   : > { %v6795_v34 = vpop.f32.mrf.mxu0 }
 0x8cd   : > { %v7283_v14 = vmax.f32 %v7155_v47, 0.0  ;;  %v7284_v55 = vmax.f32 %v7156_v22, 0.0  ;;  %9028 = vmatmul.msk.f32.gmra.mxu2 %vm285_vm1, %v8962_v63  ;;  %9093 = vmatmul.msk.f32.gmra.mxu3 %vm285_vm1, %v8962_v63  ;;  %v7004_v60 = vpop.f32.mrf.mxu1 }
 0x8cf   : > { %v7444_v0 = vadd.f32 %v7443_v25, %v7283_v14  ;;  %v7457_v59 = vadd.f32 %v7456_v3, %v7284_v55  ;;  %9223 = vmatmul.msk.f32.gmra.mxu0 %vm285_vm1, %v9157_v17 }
 0x8d0   : > { %v5983_v12 = vpop.f32.mrf.mxu2  ;;  %v6192_v32 = vpop.f32.mrf.mxu3  ;;  %9288 = vmatmul.msk.f32.gmra.mxu1 %vm285_vm1, %v9157_v17 }
 0x8d1   : > { %v6345_v9 = vadd.f32 %v5983_v12, %v13325_v36  ;;  %v6346_v23 = vadd.f32 %v6192_v32, %v13326_v27 }
 0x8d3   : > { %v7157_v8 = vadd.f32 %v6795_v34, %v6345_v9  ;;  %v7158_v10 = vadd.f32 %v7004_v60, %v6346_v23  ;;  %v9160_v60 = vld [vmem:[%s9358_s19 + $0xff1] sm:$0xff] }
 0x8d4   : > { %v6798_v38 = vpop.f32.mrf.mxu0 }
 0x8d5   : > { %v7285_v2 = vmax.f32 %v7157_v8, 0.0  ;;  %v7286_v41 = vmax.f32 %v7158_v10, 0.0  ;;  %9029 = vmatmul.msk.f32.gmra.mxu2 %vm285_vm1, %v8963_v31  ;;  %9094 = vmatmul.msk.f32.gmra.mxu3 %vm285_vm1, %v8963_v31  ;;  %v7007_v16 = vpop.f32.mrf.mxu1 }
 0x8d7   : > { %v7445_v43 = vadd.f32 %v7444_v0, %v7285_v2  ;;  %v7458_v40 = vadd.f32 %v7457_v59, %v7286_v41  ;;  %9224 = vmatmul.msk.f32.gmra.mxu0 %vm285_vm1, %v9158_v62  ;;  %v13332_v2 = vld [vmem:[#allocation21_spill] sm:$0xff] }
 0x8d8   : > { %v5986_v30 = vpop.f32.mrf.mxu2  ;;  %v6195_v6 = vpop.f32.mrf.mxu3  ;;  %9289 = vmatmul.msk.f32.gmra.mxu1 %vm285_vm1, %v9158_v62 }
 0x8d9   : > { %v7446_v20 = vrot.slane %v7445_v43, 4  ;;  %v7459_v4 = vrot.slane %v7458_v40, 4  ;;  %v6347_v7 = vadd.f32 %v5986_v30, %v13327_v61  ;;  %v6348_v1 = vadd.f32 %v6195_v6, %v13328_v56  ;;  %v9161_v30 = vld [vmem:[%s9358_s19 + $0x1001] sm:$0xff] }
 0x8db   : > { %v7447_v51 = vadd.f32 %v7446_v20, %v7445_v43  ;;  %v7460_v45 = vadd.f32 %v7459_v4, %v7458_v40  ;;  %v7159_v13 = vadd.f32 %v6798_v38, %v6347_v7  ;;  %v7160_v18 = vadd.f32 %v7007_v16, %v6348_v1  ;;  %v13331_v38 = vld [vmem:[#allocation20_spill] sm:$0xff]  ;;  %v8966_v16 = vld [vmem:[%s9358_s19 + $0x1090] sm:$0xff]  ;;  %v13333_v1 = vld [vmem:[#allocation22_spill] sm:$0xff] }
 0x8dc   : > { %v6801_v53 = vpop.f32.mrf.mxu0 }
 0x8dd   : > { %v7448_v28 = vrot.slane %v7447_v51, 2  ;;  %v7461_v52 = vrot.slane %v7460_v45, 2  ;;  %9030 = vmatmul.msk.f32.gmra.mxu2 %vm285_vm1, %v8964_v15  ;;  %9095 = vmatmul.msk.f32.gmra.mxu3 %vm285_vm1, %v8964_v15  ;;  %v7010_v49 = vpop.f32.mrf.mxu1  ;;  %v7287_v17 = vmax.f32 %v7159_v13, 0.0  ;;  %v7288_v14 = vmax.f32 %v7160_v18, 0.0  ;;  %v8967_v13 = vld [vmem:[%s9358_s19 + $0x10a0] sm:$0xff] }
 0x8df   : > { %v7449_v54 = vadd.f32 %v7448_v28, %v7447_v51  ;;  %v7462_v24 = vadd.f32 %v7461_v52, %v7460_v45  ;;  %9225 = vmatmul.msk.f32.gmra.mxu0 %vm285_vm1, %v9159_v50  ;;  %v13334_v51 = vld [vmem:[#allocation23_spill] sm:$0xff] }
 0x8e0   : > { %v5989_v58 = vpop.f32.mrf.mxu2  ;;  %v6198_v25 = vpop.f32.mrf.mxu3  ;;  %9290 = vmatmul.msk.f32.gmra.mxu1 %vm285_vm1, %v9159_v50  ;;  %v9162_v28 = vld [vmem:[%s9358_s19 + $0x1011] sm:$0xff] }
 0x8e1   : > { %v7450_v3 = vrot.slane %v7449_v54, 1  ;;  %v7463_v44 = vrot.slane %v7462_v24, 1  ;;  %v6349_v39 = vadd.f32 %v5989_v58, %v13329_v21  ;;  %v6350_v48 = vadd.f32 %v6198_v25, %v13330_v19 }
 0x8e3   : > { %v7451_v63 = vadd.f32 %v7450_v3, %v7449_v54  ;;  %v7464_v47 = vadd.f32 %v7463_v44, %v7462_v24  ;;  %v7161_v22 = vadd.f32 %v6801_v53, %v6349_v39  ;;  %v7162_v34 = vadd.f32 %v7010_v49, %v6350_v48  ;;  %v8968_v39 = vld [vmem:[%s9358_s19 + $0x10b0] sm:$0xff] }
 0x8e4   : > { %v6804_v55 = vpop.f32.mrf.mxu0 }
 0x8e5   : > { %v7558_v0 = vmul.f32 %v12404_v35, %v7451_v63  ;;  %v7559_v59 = vmul.f32 %v12404_v35, %v7464_v47  ;;  %v7289_v12 = vmax.f32 %v7161_v22, 0.0  ;;  %v7290_v32 = vmax.f32 %v7162_v34, 0.0  ;;  %9031 = vmatmul.msk.f32.gmra.mxu2 %vm285_vm1, %v8965_v5  ;;  %9096 = vmatmul.msk.f32.gmra.mxu3 %vm285_vm1, %v8965_v5  ;;  %v7013_v36 = vpop.f32.mrf.mxu1  ;;  %v9163_v63 = vld [vmem:[%s9358_s19 + $0x1021] sm:$0xff] }
 0x8e7   : > { %v12633_v9 = vsel %vm7588_vm6, %v7558_v0, %v12561_v42  ;;  %v12636_v27 = vsel %vm7588_vm6, %v7559_v59, %v12564_v33  ;;  %v7465_v23 = vadd.f32 %v7289_v12, %v7287_v17  ;;  %v7478_v31 = vadd.f32 %v7290_v32, %v7288_v14  ;;  %9226 = vmatmul.msk.f32.gmra.mxu0 %vm285_vm1, %v9160_v60  ;;  %v8969_v0 = vld [vmem:[%s9358_s19 + $0x10c0] sm:$0xff] }
 0x8e8   : > { %v5992_v8 = vpop.f32.mrf.mxu2  ;;  %v6201_v10 = vpop.f32.mrf.mxu3  ;;  %9291 = vmatmul.msk.f32.gmra.mxu1 %vm285_vm1, %v9160_v60 }
 0x8e9   : > { %v6351_v62 = vadd.f32 %v5992_v8, %v13331_v38  ;;  %v6352_v41 = vadd.f32 %v6201_v10, %v13332_v2 }
 0x8eb   : > { %v7163_v43 = vadd.f32 %v6804_v55, %v6351_v62  ;;  %v7164_v40 = vadd.f32 %v7013_v36, %v6352_v41  ;;  %v9164_v36 = vld [vmem:[%s9358_s19 + $0x1031] sm:$0xff]  ;;  %v13336_v41 = vld [vmem:[#allocation25_spill] sm:$0xff] }
 0x8ec   : > { %v6807_v42 = vpop.f32.mrf.mxu0  ;;  %v13335_v62 = vld [vmem:[#allocation24_spill] sm:$0xff] }
 0x8ed   : > { %v7291_v33 = vmax.f32 %v7163_v43, 0.0  ;;  %v7292_v6 = vmax.f32 %v7164_v40, 0.0  ;;  %9032 = vmatmul.msk.f32.gmra.mxu2 %vm285_vm1, %v8966_v16  ;;  %9097 = vmatmul.msk.f32.gmra.mxu3 %vm285_vm1, %v8966_v16  ;;  %v7016_v20 = vpop.f32.mrf.mxu1  ;;  %v8970_v43 = vld [vmem:[%s9358_s19 + $0x10d0] sm:$0xff] }
 0x8ef   : > { %v7466_v4 = vadd.f32 %v7465_v23, %v7291_v33  ;;  %v7479_v61 = vadd.f32 %v7478_v31, %v7292_v6  ;;  %9227 = vmatmul.msk.f32.gmra.mxu0 %vm285_vm1, %v9161_v30  ;;  %v9165_v33 = vld [vmem:[%s9358_s19 + $0x1041] sm:$0xff] }
 0x8f0   : > { %v5995_v7 = vpop.f32.mrf.mxu2  ;;  %v6204_v56 = vpop.f32.mrf.mxu3  ;;  %9292 = vmatmul.msk.f32.gmra.mxu1 %vm285_vm1, %v9161_v30 }
 0x8f1   : > { %v6353_v15 = vadd.f32 %v5995_v7, %v13333_v1  ;;  %v6354_v45 = vadd.f32 %v6204_v56, %v13334_v51 }
 0x8f3   : > { %v7165_v18 = vadd.f32 %v6807_v42, %v6353_v15  ;;  %v7166_v53 = vadd.f32 %v7016_v20, %v6354_v45  ;;  %v13337_v15 = vld [vmem:[#allocation26_spill] sm:$0xff]  ;;  %v13338_v45 = vld [vmem:[#allocation27_spill] sm:$0xff] }
 0x8f4   : > { %v6810_v50 = vpop.f32.mrf.mxu0 }
 0x8f5   : > { %v7293_v52 = vmax.f32 %v7165_v18, 0.0  ;;  %v7294_v49 = vmax.f32 %v7166_v53, 0.0  ;;  %9033 = vmatmul.msk.f32.gmra.mxu2 %vm285_vm1, %v8967_v13  ;;  %9098 = vmatmul.msk.f32.gmra.mxu3 %vm285_vm1, %v8967_v13  ;;  %v7019_v54 = vpop.f32.mrf.mxu1 }
 0x8f7   : > { %v7467_v24 = vadd.f32 %v7466_v4, %v7293_v52  ;;  %v7480_v58 = vadd.f32 %v7479_v61, %v7294_v49  ;;  %9228 = vmatmul.msk.f32.gmra.mxu0 %vm285_vm1, %v9162_v28 }
 0x8f8   : > { %v5998_v25 = vpop.f32.mrf.mxu2  ;;  %v6207_v3 = vpop.f32.mrf.mxu3  ;;  %9293 = vmatmul.msk.f32.gmra.mxu1 %vm285_vm1, %v9162_v28 }
 0x8f9   : > { %v6355_v44 = vadd.f32 %v5998_v25, %v12018_v37  ;;  %v6356_v21 = vadd.f32 %v6207_v3, %v12020_v46 }
 0x8fb   : > { %v7167_v19 = vadd.f32 %v6810_v50, %v6355_v44  ;;  %v7168_v48 = vadd.f32 %v7019_v54, %v6356_v21  ;;  %v13339_v21 = vld [vmem:[#allocation28_spill] sm:$0xff] }
 0x8fc   : > { %v6813_v5 = vpop.f32.mrf.mxu0 }
 0x8fd   : > { %v7295_v47 = vmax.f32 %v7167_v19, 0.0  ;;  %v7296_v22 = vmax.f32 %v7168_v48, 0.0  ;;  %9034 = vmatmul.msk.f32.gmra.mxu2 %vm285_vm1, %v8968_v39  ;;  %9099 = vmatmul.msk.f32.gmra.mxu3 %vm285_vm1, %v8968_v39  ;;  %v7022_v34 = vpop.f32.mrf.mxu1  ;;  %v13340_v19 = vld [vmem:[#allocation29_spill] sm:$0xff] }
 0x8ff   : > { %v7468_v17 = vadd.f32 %v7467_v24, %v7295_v47  ;;  %v7481_v14 = vadd.f32 %v7480_v58, %v7296_v22  ;;  %9229 = vmatmul.msk.f32.gmra.mxu0 %vm285_vm1, %v9163_v63 }
 0x900   : > { %v6001_v37 = vpop.f32.mrf.mxu2  ;;  %v6210_v46 = vpop.f32.mrf.mxu3  ;;  %9294 = vmatmul.msk.f32.gmra.mxu1 %vm285_vm1, %v9163_v63 }
 0x901   : > { %v6357_v55 = vadd.f32 %v6001_v37, %v12030_v57  ;;  %v6358_v60 = vadd.f32 %v6210_v46, %v12032_v29 }
 0x903   : > { %v7169_v59 = vadd.f32 %v6813_v5, %v6357_v55  ;;  %v7170_v12 = vadd.f32 %v7022_v34, %v6358_v60 }
 0x904   : > { %v6816_v32 = vpop.f32.mrf.mxu0 }
 0x905   : > { %v7297_v23 = vmax.f32 %v7169_v59, 0.0  ;;  %v7298_v31 = vmax.f32 %v7170_v12, 0.0  ;;  %9035 = vmatmul.msk.f32.gmra.mxu2 %vm285_vm1, %v8969_v0  ;;  %9100 = vmatmul.msk.f32.gmra.mxu3 %vm285_vm1, %v8969_v0  ;;  %v7025_v8 = vpop.f32.mrf.mxu1 }
 0x907   : > { %v7469_v10 = vadd.f32 %v7468_v17, %v7297_v23  ;;  %v7482_v38 = vadd.f32 %v7481_v14, %v7298_v31  ;;  %9230 = vmatmul.msk.f32.gmra.mxu0 %vm285_vm1, %v9164_v36  ;;  %v13342_v23 = vld [vmem:[#allocation31_spill] sm:$0xff] }
 0x908   : > { %v6004_v57 = vpop.f32.mrf.mxu2  ;;  %v6213_v29 = vpop.f32.mrf.mxu3  ;;  %9295 = vmatmul.msk.f32.gmra.mxu1 %vm285_vm1, %v9164_v36 }
 0x909   : > { %v6359_v2 = vadd.f32 %v6004_v57, %v13335_v62  ;;  %v6360_v16 = vadd.f32 %v6213_v29, %v13336_v41 }
 0x90b   : > { %v7171_v40 = vadd.f32 %v6816_v32, %v6359_v2  ;;  %v7172_v42 = vadd.f32 %v7025_v8, %v6360_v16  ;;  %v13341_v32 = vld [vmem:[#allocation30_spill] sm:$0xff] }
 0x90c   : > { %v6819_v30 = vpop.f32.mrf.mxu0 }
 0x90d   : > { %v7299_v6 = vmax.f32 %v7171_v40, 0.0  ;;  %v7300_v20 = vmax.f32 %v7172_v42, 0.0  ;;  %9036 = vmatmul.msk.f32.gmra.mxu2 %vm285_vm1, %v8970_v43  ;;  %9101 = vmatmul.msk.f32.gmra.mxu3 %vm285_vm1, %v8970_v43  ;;  %v7028_v4 = vpop.f32.mrf.mxu1 }
 0x90f   : > { %v7470_v61 = vadd.f32 %v7469_v10, %v7299_v6  ;;  %v7483_v7 = vadd.f32 %v7482_v38, %v7300_v20  ;;  %9231 = vmatmul.msk.f32.gmra.mxu0 %vm285_vm1, %v9165_v33 }
 0x910   : > { %v6007_v56 = vpop.f32.mrf.mxu2  ;;  %v6216_v1 = vpop.f32.mrf.mxu3  ;;  %9296 = vmatmul.msk.f32.gmra.mxu1 %vm285_vm1, %v9165_v33 }
 0x911   : > { %v6361_v51 = vadd.f32 %v6007_v56, %v13337_v15  ;;  %v6362_v13 = vadd.f32 %v6216_v1, %v13338_v45  ;;  %v13344_v1 = vld [vmem:[#allocation33_spill] sm:$0xff] }
 0x913   : > { %v7173_v18 = vadd.f32 %v6819_v30, %v6361_v51  ;;  %v7174_v53 = vadd.f32 %v7028_v4, %v6362_v13 }
 0x914   : > { %v6822_v50 = vpop.f32.mrf.mxu0 }
 0x915   : > { %v7301_v28 = vmax.f32 %v7173_v18, 0.0  ;;  %v7302_v52 = vmax.f32 %v7174_v53, 0.0  ;;  %v7031_v49 = vpop.f32.mrf.mxu1 }
 0x917   : > { %v7471_v54 = vadd.f32 %v7470_v61, %v7301_v28  ;;  %v7484_v24 = vadd.f32 %v7483_v7, %v7302_v52  ;;  %v13343_v7 = vld [vmem:[#allocation32_spill] sm:$0xff] }
 0x918   : > { %v6010_v58 = vpop.f32.mrf.mxu2  ;;  %v6219_v25 = vpop.f32.mrf.mxu3 }
 0x919   : > { %v7472_v3 = vrot.slane %v7471_v54, 4  ;;  %v7485_v44 = vrot.slane %v7484_v24, 4  ;;  %v6363_v39 = vadd.f32 %v6010_v58, %v13339_v21  ;;  %v6364_v48 = vadd.f32 %v6219_v25, %v13340_v19 }
 0x91b   : > { %v7473_v5 = vadd.f32 %v7472_v3, %v7471_v54  ;;  %v7486_v63 = vadd.f32 %v7485_v44, %v7484_v24  ;;  %v7175_v47 = vadd.f32 %v6822_v50, %v6363_v39  ;;  %v7176_v22 = vadd.f32 %v7031_v49, %v6364_v48  ;;  %v13346_v24 = vld [vmem:[#allocation35_spill] sm:$0xff] }
 0x91c   : > { %v6825_v34 = vpop.f32.mrf.mxu0 }
 0x91d   : > { %v7474_v17 = vrot.slane %v7473_v5, 2  ;;  %v7487_v14 = vrot.slane %v7486_v63, 2  ;;  %v7034_v37 = vpop.f32.mrf.mxu1  ;;  %v7303_v29 = vmax.f32 %v7175_v47, 0.0  ;;  %v7304_v62 = vmax.f32 %v7176_v22, 0.0  ;;  %v13347_v22 = vld [vmem:[#allocation36_spill] sm:$0xff] }
 0x91f   : > { %v7475_v46 = vadd.f32 %v7474_v17, %v7473_v5  ;;  %v7488_v55 = vadd.f32 %v7487_v14, %v7486_v63  ;;  %v13348_v17 = vld [vmem:[#allocation37_spill] sm:$0xff] }
 0x920   : > { %v6013_v60 = vpop.f32.mrf.mxu2  ;;  %v6222_v0 = vpop.f32.mrf.mxu3 }
 0x921   : > { %v7476_v59 = vrot.slane %v7475_v46, 1  ;;  %v7489_v12 = vrot.slane %v7488_v55, 1  ;;  %v6365_v36 = vadd.f32 %v6013_v60, %v13341_v32  ;;  %v6366_v31 = vadd.f32 %v6222_v0, %v13342_v23 }
 0x923   : > { %v7477_v8 = vadd.f32 %v7476_v59, %v7475_v46  ;;  %v7490_v10 = vadd.f32 %v7489_v12, %v7488_v55  ;;  %v7177_v38 = vadd.f32 %v6825_v34, %v6365_v36  ;;  %v7178_v57 = vadd.f32 %v7034_v37, %v6366_v31  ;;  %v13349_v31 = vld [vmem:[#allocation38_spill] sm:$0xff] }
 0x924   : > { %v6828_v2 = vpop.f32.mrf.mxu0 }
 0x925   : > { %v7560_v41 = vmul.f32 %v12404_v35, %v7477_v8  ;;  %v7561_v16 = vmul.f32 %v12404_v35, %v7490_v10  ;;  %v7305_v43 = vmax.f32 %v7177_v38, 0.0  ;;  %v7306_v40 = vmax.f32 %v7178_v57, 0.0  ;;  %v7037_v42 = vpop.f32.mrf.mxu1  ;;  %v13350_v10 = vld [vmem:[#allocation39_spill] sm:$0xff] }
 0x927   : > { %v12689_v30 = vsel %vm7590_vm7, %v7560_v41, %v12633_v9  ;;  %v12692_v33 = vsel %vm7590_vm7, %v7561_v16, %v12636_v27  ;;  %v7491_v6 = vadd.f32 %v7305_v43, %v7303_v29  ;;  %v7504_v20 = vadd.f32 %v7306_v40, %v7304_v62  ;;  %v13345_v27 = vld [vmem:[#allocation34_spill] sm:$0xff] }
 0x928   : > { %v6016_v4 = vpop.f32.mrf.mxu2  ;;  %v6225_v61 = vpop.f32.mrf.mxu3 }
 0x929   : > { %v6367_v56 = vadd.f32 %v6016_v4, %v13343_v7  ;;  %v6368_v15 = vadd.f32 %v6225_v61, %v13344_v1  ;;  %v13352_v61 = vld [vmem:[#allocation41_spill] sm:$0xff] }
 0x92b   : > { %v7179_v51 = vadd.f32 %v6828_v2, %v6367_v56  ;;  %v7180_v45 = vadd.f32 %v7037_v42, %v6368_v15 }
 0x92c   : > { %v6831_v13 = vpop.f32.mrf.mxu0 }
 0x92d   : > { %v7307_v18 = vmax.f32 %v7179_v51, 0.0  ;;  %v7308_v53 = vmax.f32 %v7180_v45, 0.0  ;;  %v7040_v50 = vpop.f32.mrf.mxu1 }
 0x92f   : > { %v7492_v28 = vadd.f32 %v7491_v6, %v7307_v18  ;;  %v7505_v9 = vadd.f32 %v7504_v20, %v7308_v53  ;;  %v13351_v20 = vld [vmem:[#allocation40_spill] sm:$0xff] }
 0x930   : > { %v6019_v52 = vpop.f32.mrf.mxu2  ;;  %v6228_v49 = vpop.f32.mrf.mxu3 }
 0x931   : > { %v6369_v54 = vadd.f32 %v6019_v52, %v13345_v27  ;;  %v6370_v58 = vadd.f32 %v6228_v49, %v13346_v24  ;;  %v13354_v49 = vld [vmem:[#allocation43_spill] sm:$0xff] }
 0x933   : > { %v7181_v25 = vadd.f32 %v6831_v13, %v6369_v54  ;;  %v7182_v3 = vadd.f32 %v7040_v50, %v6370_v58 }
 0x934   : > { %v6834_v44 = vpop.f32.mrf.mxu0 }
 0x935   : > { %v7309_v21 = vmax.f32 %v7181_v25, 0.0  ;;  %v7310_v39 = vmax.f32 %v7182_v3, 0.0  ;;  %v7043_v19 = vpop.f32.mrf.mxu1 }
 0x937   : > { %v7493_v48 = vadd.f32 %v7492_v28, %v7309_v21  ;;  %v7506_v5 = vadd.f32 %v7505_v9, %v7310_v39  ;;  %v13353_v9 = vld [vmem:[#allocation42_spill] sm:$0xff] }
 0x938   : > { %v6022_v63 = vpop.f32.mrf.mxu2  ;;  %v6231_v47 = vpop.f32.mrf.mxu3 }
 0x939   : > { %v6371_v34 = vadd.f32 %v6022_v63, %v13347_v22  ;;  %v6372_v14 = vadd.f32 %v6231_v47, %v13348_v17 }
 0x93b   : > { %v7183_v37 = vadd.f32 %v6834_v44, %v6371_v34  ;;  %v7184_v46 = vadd.f32 %v7043_v19, %v6372_v14  ;;  %v13355_v34 = vld [vmem:[#allocation44_spill] sm:$0xff]  ;;  %v13356_v14 = vld [vmem:[#allocation45_spill] sm:$0xff] }
 0x93c   : > { %v6837_v55 = vpop.f32.mrf.mxu0 }
 0x93d   : > { %v7311_v60 = vmax.f32 %v7183_v37, 0.0  ;;  %v7312_v0 = vmax.f32 %v7184_v46, 0.0  ;;  %v7046_v59 = vpop.f32.mrf.mxu1 }
 0x93f   : > { %v7494_v12 = vadd.f32 %v7493_v48, %v7311_v60  ;;  %v7507_v32 = vadd.f32 %v7506_v5, %v7312_v0 }
 0x940   : > { %v6025_v36 = vpop.f32.mrf.mxu2  ;;  %v6234_v23 = vpop.f32.mrf.mxu3 }
 0x941   : > { %v6373_v8 = vadd.f32 %v6025_v36, %v13349_v31  ;;  %v6374_v38 = vadd.f32 %v6234_v23, %v13350_v10 }
 0x943   : > { %v7185_v57 = vadd.f32 %v6837_v55, %v6373_v8  ;;  %v7186_v29 = vadd.f32 %v7046_v59, %v6374_v38  ;;  %v13357_v38 = vld [vmem:[#allocation46_spill] sm:$0xff] }
 0x944   : > { %v6840_v62 = vpop.f32.mrf.mxu0 }
 0x945   : > { %v7313_v2 = vmax.f32 %v7185_v57, 0.0  ;;  %v7314_v41 = vmax.f32 %v7186_v29, 0.0  ;;  %v7049_v16 = vpop.f32.mrf.mxu1  ;;  %v13358_v29 = vld [vmem:[#allocation47_spill] sm:$0xff] }
 0x947   : > { %v7495_v43 = vadd.f32 %v7494_v12, %v7313_v2  ;;  %v7508_v40 = vadd.f32 %v7507_v32, %v7314_v41 }
 0x948   : > { %v6028_v42 = vpop.f32.mrf.mxu2  ;;  %v6237_v6 = vpop.f32.mrf.mxu3 }
 0x949   : > { %v6375_v4 = vadd.f32 %v6028_v42, %v13351_v20  ;;  %v6376_v7 = vadd.f32 %v6237_v6, %v13352_v61 }
 0x94b   : > { %v7187_v56 = vadd.f32 %v6840_v62, %v6375_v4  ;;  %v7188_v1 = vadd.f32 %v7049_v16, %v6376_v7 }
 0x94c   : > { %v6843_v15 = vpop.f32.mrf.mxu0 }
 0x94d   : > { %v7315_v51 = vmax.f32 %v7187_v56, 0.0  ;;  %v7316_v45 = vmax.f32 %v7188_v1, 0.0  ;;  %v7052_v13 = vpop.f32.mrf.mxu1 }
 0x94f   : > { %v7496_v18 = vadd.f32 %v7495_v43, %v7315_v51  ;;  %v7509_v53 = vadd.f32 %v7508_v40, %v7316_v45 }
 0x950   : > { %v6031_v50 = vpop.f32.mrf.mxu2  ;;  %v6240_v28 = vpop.f32.mrf.mxu3 }
 0x951   : > { %v6377_v52 = vadd.f32 %v6031_v50, %v13353_v9  ;;  %v6378_v27 = vadd.f32 %v6240_v28, %v13354_v49  ;;  %v13360_v28 = vld [vmem:[#allocation49_spill] sm:$0xff] }
 0x953   : > { %v7189_v54 = vadd.f32 %v6843_v15, %v6377_v52  ;;  %v7190_v24 = vadd.f32 %v7052_v13, %v6378_v27 }
 0x954   : > { %v6846_v58 = vpop.f32.mrf.mxu0 }
 0x955   : > { %v7317_v25 = vmax.f32 %v7189_v54, 0.0  ;;  %v7318_v3 = vmax.f32 %v7190_v24, 0.0  ;;  %v7055_v44 = vpop.f32.mrf.mxu1 }
 0x957   : > { %v7497_v21 = vadd.f32 %v7496_v18, %v7317_v25  ;;  %v7510_v39 = vadd.f32 %v7509_v53, %v7318_v3  ;;  %v13359_v53 = vld [vmem:[#allocation48_spill] sm:$0xff] }
 0x958   : > { %v6034_v19 = vpop.f32.mrf.mxu2  ;;  %v6243_v48 = vpop.f32.mrf.mxu3 }
 0x959   : > { %v7498_v5 = vrot.slane %v7497_v21, 4  ;;  %v7511_v63 = vrot.slane %v7510_v39, 4  ;;  %v6379_v17 = vadd.f32 %v6034_v19, %v13355_v34  ;;  %v6380_v37 = vadd.f32 %v6243_v48, %v13356_v14 }
 0x95b   : > { %v7499_v47 = vadd.f32 %v7498_v5, %v7497_v21  ;;  %v7512_v22 = vadd.f32 %v7511_v63, %v7510_v39  ;;  %v7191_v32 = vadd.f32 %v6846_v58, %v6379_v17  ;;  %v7192_v36 = vadd.f32 %v7055_v44, %v6380_v37  ;;  %v13362_v39 = vld [vmem:[#allocation51_spill] sm:$0xff] }
 0x95c   : > { %v6849_v46 = vpop.f32.mrf.mxu0 }
 0x95d   : > { %v7500_v55 = vrot.slane %v7499_v47, 2  ;;  %v7513_v60 = vrot.slane %v7512_v22, 2  ;;  %v7058_v0 = vpop.f32.mrf.mxu1  ;;  %v7319_v40 = vmax.f32 %v7191_v32, 0.0  ;;  %v7320_v42 = vmax.f32 %v7192_v36, 0.0 }
 0x95f   : > { %v7501_v59 = vadd.f32 %v7500_v55, %v7499_v47  ;;  %v7514_v12 = vadd.f32 %v7513_v60, %v7512_v22  ;;  %v13363_v55 = vld [vmem:[#allocation53_spill] sm:$0xff] }
 0x960   : > { %v6037_v23 = vpop.f32.mrf.mxu2  ;;  %v6246_v31 = vpop.f32.mrf.mxu3 }
 0x961   : > { %v7502_v8 = vrot.slane %v7501_v59, 1  ;;  %v7515_v10 = vrot.slane %v7514_v12, 1  ;;  %v6381_v57 = vadd.f32 %v6037_v23, %v13357_v38  ;;  %v6382_v62 = vadd.f32 %v6246_v31, %v13358_v29 }
 0x963   : > { %v7503_v2 = vadd.f32 %v7502_v8, %v7501_v59  ;;  %v7516_v41 = vadd.f32 %v7515_v10, %v7514_v12  ;;  %v7193_v16 = vadd.f32 %v6849_v46, %v6381_v57  ;;  %v7194_v43 = vadd.f32 %v7058_v0, %v6382_v62  ;;  %v13364_v0 = vld [vmem:[#allocation54_spill] sm:$0xff] }
 0x964   : > { %v6852_v6 = vpop.f32.mrf.mxu0 }
 0x965   : > { %v7562_v20 = vmul.f32 %v12404_v35, %v7503_v2  ;;  %v7563_v4 = vmul.f32 %v12404_v35, %v7516_v41  ;;  %v7321_v61 = vmax.f32 %v7193_v16, 0.0  ;;  %v7322_v7 = vmax.f32 %v7194_v43, 0.0  ;;  %v7061_v56 = vpop.f32.mrf.mxu1 }
 0x967   : > { %v12713_v1 = vsel %vm7592_vm8, %v7562_v20, %v12689_v30  ;;  %v12716_v15 = vsel %vm7592_vm8, %v7563_v4, %v12692_v33  ;;  %v7517_v51 = vadd.f32 %v7321_v61, %v7319_v40  ;;  %v7530_v45 = vadd.f32 %v7322_v7, %v7320_v42  ;;  %v13361_v33 = vld [vmem:[#allocation50_spill] sm:$0xff] }
 0x968   : > { %v6040_v13 = vpop.f32.mrf.mxu2  ;;  %v6249_v18 = vpop.f32.mrf.mxu3 }
 0x969   : > { %v6383_v50 = vadd.f32 %v6040_v13, %v13359_v53  ;;  %v6384_v9 = vadd.f32 %v6249_v18, %v13360_v28 }
 0x96b   : > { %v7195_v52 = vadd.f32 %v6852_v6, %v6383_v50  ;;  %v7196_v49 = vadd.f32 %v7061_v56, %v6384_v9  ;;  %v13365_v56 = vld [vmem:[#allocation57_spill] sm:$0xff] }
 0x96c   : > { %v6855_v27 = vpop.f32.mrf.mxu0 }
 0x96d   : > { %v7323_v54 = vmax.f32 %v7195_v52, 0.0  ;;  %v7324_v24 = vmax.f32 %v7196_v49, 0.0  ;;  %v7064_v58 = vpop.f32.mrf.mxu1 }
 0x96f   : > { %v7518_v25 = vadd.f32 %v7517_v51, %v7323_v54  ;;  %v7531_v30 = vadd.f32 %v7530_v45, %v7324_v24  ;;  %v13366_v45 = vld [vmem:[#allocation58_spill] sm:$0xff]  ;;  %v13367_v54 = vld [vmem:[#allocation61_spill] sm:$0xff] }
 0x970   : > { %v6043_v3 = vpop.f32.mrf.mxu2  ;;  %v6252_v44 = vpop.f32.mrf.mxu3 }
 0x971   : > { %v6385_v21 = vadd.f32 %v6043_v3, %v13361_v33  ;;  %v6386_v19 = vadd.f32 %v6252_v44, %v13362_v39 }
 0x973   : > { %v7197_v48 = vadd.f32 %v6855_v27, %v6385_v21  ;;  %v7198_v5 = vadd.f32 %v7064_v58, %v6386_v19  ;;  %v13368_v58 = vld [vmem:[#allocation62_spill] sm:$0xff] }
 0x974   : > { %v6858_v63 = vpop.f32.mrf.mxu0 }
 0x975   : > { %v7325_v47 = vmax.f32 %v7197_v48, 0.0  ;;  %v7326_v22 = vmax.f32 %v7198_v5, 0.0  ;;  %v7067_v34 = vpop.f32.mrf.mxu1 }
 0x977   : > { %v7519_v17 = vadd.f32 %v7518_v25, %v7325_v47  ;;  %v7532_v14 = vadd.f32 %v7531_v30, %v7326_v22 }
 0x978   : > { %v6046_v37 = vpop.f32.mrf.mxu2  ;;  %v6255_v46 = vpop.f32.mrf.mxu3 }
 0x979   : > { %v6387_v60 = vadd.f32 %v6046_v37, %v13363_v55  ;;  %v6388_v59 = vadd.f32 %v6255_v46, %v13364_v0 }
 0x97b   : > { %v7199_v12 = vadd.f32 %v6858_v63, %v6387_v60  ;;  %v7200_v32 = vadd.f32 %v7067_v34, %v6388_v59 }
 0x97c   : > { %v6861_v36 = vpop.f32.mrf.mxu0 }
 0x97d   : > { %v7327_v23 = vmax.f32 %v7199_v12, 0.0  ;;  %v7328_v31 = vmax.f32 %v7200_v32, 0.0  ;;  %v7070_v8 = vpop.f32.mrf.mxu1 }
 0x97f   : > { %v7520_v10 = vadd.f32 %v7519_v17, %v7327_v23  ;;  %v7533_v38 = vadd.f32 %v7532_v14, %v7328_v31 }
 0x980   : > { %v6049_v57 = vpop.f32.mrf.mxu2  ;;  %v6258_v29 = vpop.f32.mrf.mxu3 }
 0x981   : > { %v6389_v62 = vadd.f32 %v6049_v57, %v12222_v26  ;;  %v6390_v2 = vadd.f32 %v6258_v29, %v12224_v11 }
 0x983   : > { %v7201_v41 = vadd.f32 %v6861_v36, %v6389_v62  ;;  %v7202_v16 = vadd.f32 %v7070_v8, %v6390_v2 }
 0x984   : > { %v6864_v42 = vpop.f32.mrf.mxu0 }
 0x985   : > { %v7329_v43 = vmax.f32 %v7201_v41, 0.0  ;;  %v7330_v40 = vmax.f32 %v7202_v16, 0.0  ;;  %v7073_v6 = vpop.f32.mrf.mxu1 }
 0x987   : > { %v7521_v20 = vadd.f32 %v7520_v10, %v7329_v43  ;;  %v7534_v4 = vadd.f32 %v7533_v38, %v7330_v40 }
 0x988   : > { %v6052_v61 = vpop.f32.mrf.mxu2  ;;  %v6261_v7 = vpop.f32.mrf.mxu3 }
 0x989   : > { %v6391_v51 = vadd.f32 %v6052_v61, %v13365_v56  ;;  %v6392_v13 = vadd.f32 %v6261_v7, %v13366_v45 }
 0x98b   : > { %v7203_v18 = vadd.f32 %v6864_v42, %v6391_v51  ;;  %v7204_v53 = vadd.f32 %v7073_v6, %v6392_v13 }
 0x98c   : > { %v6867_v9 = vpop.f32.mrf.mxu0 }
 0x98d   : > { %v7331_v50 = vmax.f32 %v7203_v18, 0.0  ;;  %v7332_v26 = vmax.f32 %v7204_v53, 0.0  ;;  %v7076_v52 = vpop.f32.mrf.mxu1 }
 0x98f   : > { %v7522_v28 = vadd.f32 %v7521_v20, %v7331_v50  ;;  %v7535_v11 = vadd.f32 %v7534_v4, %v7332_v26 }
 0x990   : > { %v6055_v49 = vpop.f32.mrf.mxu2  ;;  %v6264_v27 = vpop.f32.mrf.mxu3 }
 0x991   : > { %v6393_v24 = vadd.f32 %v6055_v49, %v13367_v54  ;;  %v6394_v25 = vadd.f32 %v6264_v27, %v13368_v58 }
 0x993   : > { %v7205_v30 = vadd.f32 %v6867_v9, %v6393_v24  ;;  %v7206_v3 = vadd.f32 %v7076_v52, %v6394_v25 }
 0x995   : > { %v7333_v44 = vmax.f32 %v7205_v30, 0.0  ;;  %v7334_v33 = vmax.f32 %v7206_v3, 0.0 }
 0x997   : > { %v7523_v21 = vadd.f32 %v7522_v28, %v7333_v44  ;;  %v7536_v39 = vadd.f32 %v7535_v11, %v7334_v33 }
 0x999   : > { %v7524_v19 = vrot.slane %v7523_v21, 4  ;;  %v7537_v48 = vrot.slane %v7536_v39, 4 }
 0x99b   : > { %v7525_v5 = vadd.f32 %v7524_v19, %v7523_v21  ;;  %v7538_v63 = vadd.f32 %v7537_v48, %v7536_v39 }
 0x99d   : > { %v7526_v47 = vrot.slane %v7525_v5, 2  ;;  %v7539_v22 = vrot.slane %v7538_v63, 2 }
 0x99f   : > { %v7527_v34 = vadd.f32 %v7526_v47, %v7525_v5  ;;  %v7540_v17 = vadd.f32 %v7539_v22, %v7538_v63 }
 0x9a1   : > { %v7528_v14 = vrot.slane %v7527_v34, 1  ;;  %v7541_v37 = vrot.slane %v7540_v17, 1 }
 0x9a3   : > { %v7529_v46 = vadd.f32 %v7528_v14, %v7527_v34  ;;  %v7542_v55 = vadd.f32 %v7541_v37, %v7540_v17 }
 0x9a5   : > { %v7564_v60 = vmul.f32 %v12404_v35, %v7529_v46  ;;  %v7565_v0 = vmul.f32 %v12404_v35, %v7542_v55 }
 0x9a7   : > { %v7595_v59 = vsel %vm7594_vm9, %v7564_v60, %v12713_v1  ;;  %v7602_v12 = vsel %vm7594_vm9, %v7565_v0, %v12716_v15 }
 0x9a8   : > { %7605 = vst [vmem:[%s148_s11] sm:$0xff] %v7595_v59 }
 0x9a9   : > { %7606 = vst [vmem:[%s148_s11 + $0x8] sm:$0xff] %v7602_v12 }
 0x9aa PF: > { %s12_s9 = sadd.s32 1, %s9320_s9  }
 0x9ab   : > { %p9_p5 = scmp.ge.s32.totalorder %s12_s9, 4  }
 0x9ad   :  { %11 = sbr.rel (!%p9_p5) target bundleno = 1 (0x1), region = 71 }

</bundles_post_ra>
